<compile_context>
chip_gen: v7x
topology: tpu7x:2x2x1
jax: 0.10.0
libtpu: 0.0.40
codegen_flags: <defaults>
</compile_context>

<pallas_src>
import functools

import jax
import jax.numpy as jnp
from jax.experimental import pallas as pl
from jax.experimental.pallas import tpu as pltpu


# ------------------------------- fused kernel ------------------------------- #

def _zero_halo(pad_ref, nb, h, w):
    """Zero only the 1-pixel halo border of a (nb, h+2, w+2, C) scratch.

    The interior is fully overwritten every grid step, so the border strips are
    all that ever needs (re)zeroing. Done unconditionally each step instead of
    under `pl.when(program_id==0)` so it remains correct when the 'parallel'
    batch axis is split across TensorCores (v7x megacore), where a core may
    never execute grid step 0.
    """
    c = pad_ref.shape[-1]
    pad_ref[:, 0:1, :, :] = jnp.zeros((nb, 1, w + 2, c), pad_ref.dtype)
    pad_ref[:, h + 1:h + 2, :, :] = jnp.zeros((nb, 1, w + 2, c), pad_ref.dtype)
    pad_ref[:, :, 0:1, :] = jnp.zeros((nb, h + 2, 1, c), pad_ref.dtype)
    pad_ref[:, :, w + 1:w + 2, :] = jnp.zeros((nb, h + 2, 1, c), pad_ref.dtype)


def _basic_block_kernel(*refs, is_shortcut, nb, h, w):
    # inputs (per grid step, Nb batch elements):
    #   x_ref  : (Nb, H, W, Cin)      bf16  unpadded NHWC input tile
    #   w1_ref : (9, Cin, Cmid)       bf16  conv1 weight, tap-major, BN1 scale folded in
    #   b1_ref : (1, Cmid)            f32   folded BN1 bias
    #   w2_ref : (9, Cmid, Cout)      bf16  conv2 weight, BN2 scale folded in
    #   b2_ref : (1, Cout)            f32   folded BN2 bias
    #   [shortcut only] ws_ref (Cin, Cout) bf16 (scale folded), bs_ref (1, Cout) f32
    # output:
    #   o_ref  : (Nb, H*W, Cout)      f32
    # scratch (persists across grid steps):
    #   xpad   : (Nb, H+2, W+2, Cin)  bf16  zero-bordered halo buffer for conv1
    #   zpad   : (Nb, H+2, W+2, Cmid) bf16  zero-bordered halo buffer for conv2
    if is_shortcut:
        (x_ref, w1_ref, b1_ref, w2_ref, b2_ref, ws_ref, bs_ref,
         o_ref, xpad, zpad) = refs
    else:
        (x_ref, w1_ref, b1_ref, w2_ref, b2_ref, o_ref, xpad, zpad) = refs

    m = nb * h * w
    cin = x_ref.shape[-1]
    cmid = w1_ref.shape[-1]
    cout = o_ref.shape[-1]

    # Build the halo in VMEM: zero only the border strips, then stage the bf16
    # input tile. The padded activation never round-trips through HBM.
    _zero_halo(xpad, nb, h, w)
    _zero_halo(zpad, nb, h, w)
    xpad[:, 1:h + 1, 1:w + 1, :] = x_ref[...]

    # ---- conv_bn1 + ReLU (3x3, stride 1, pad 1); batch flattened into M dim ----
    # Taps are sliced from the bf16 scratch and fed to the MXU directly (no f32
    # upcast of the tile, no per-tap cast churn -- important on v5e's f32 VPU).
    # TODO(synk): at real ResNet widths, group taps (K = 3C or 9C) to fill the
    # 256-deep MXU on v6e/v7x; at Cin=4..8 the block is DMA/launch bound anyway.
    acc1 = jnp.zeros((m, cmid), jnp.float32)
    for k in range(9):
        ky, kx = k // 3, k % 3
        tap = xpad[:, ky:ky + h, kx:kx + w, :].reshape(m, cin)
        acc1 = acc1 + jnp.dot(tap, w1_ref[k],
                              preferred_element_type=jnp.float32)
    z = jnp.maximum(acc1 + b1_ref[...], 0.0)          # folded-BN bias + ReLU in f32

    # Stage z (bf16, one cast) with its halo for conv2 -- no HBM trip.
    zpad[:, 1:h + 1, 1:w + 1, :] = z.astype(jnp.bfloat16).reshape(nb, h, w, cmid)

    # ---- conv_bn2 (3x3, stride 1, pad 1) ----
    acc2 = jnp.zeros((m, cout), jnp.float32)
    for k in range(9):
        ky, kx = k // 3, k % 3
        tap = zpad[:, ky:ky + h, kx:kx + w, :].reshape(m, cmid)
        acc2 = acc2 + jnp.dot(tap, w2_ref[k],
                              preferred_element_type=jnp.float32)
    y = acc2 + b2_ref[...]

    # ---- shortcut (reuses the resident unpadded input tile) + add + ReLU ----
    xc = x_ref[...].reshape(m, cin)                    # bf16 center, no pad re-read
    if is_shortcut:
        sc = jnp.dot(xc, ws_ref[...],
                     preferred_element_type=jnp.float32) + bs_ref[...]
    else:
        sc = xc.astype(jnp.float32)                    # identity (Cin == Cout)

    o_ref[...] = jnp.maximum(y + sc, 0.0).reshape(nb, h * w, cout)


# ------------------------------ pallas_call wrapper -------------------------- #

def _pick_nb(n, h, w, cin, cmid, cout, budget_bytes=24 * 1024 * 1024):
    """Largest per-step batch tile that (a) keeps >=2 grid steps when N>=2 so
    both v7x TensorCores get work, and (b) fits a conservative VMEM budget
    sized for v7x's 64 MiB (v5e/v6e have 128 MiB and extra headroom)."""
    best = 1
    for nb in range(1, n + 1):
        if n % nb:
            continue
        if n >= 2 and n // nb < 2:
            continue
        per_step = (
            2 * nb * h * w * cin * 2                      # double-buffered bf16 input
            + 2 * nb * h * w * cout * 4                   # double-buffered f32 output
            + nb * (h + 2) * (w + 2) * (cin + cmid) * 2   # bf16 halo scratches
        )
        if per_step <= budget_bytes:
            best = nb
    return best


def basic_block_forward(x_nchw, p, *, stride=1, is_shortcut=False):
    # TODO(synk): stride > 1 (downsampling BasicBlocks) is not implemented in the
    # fused kernel; the module's default stride=1 path is covered.
    assert stride == 1, "fused kernel implements stride=1 only"

    n, cin, h, w = x_nchw.shape
    cmid = p["w1"].shape[-1]
    cout = p["w2"].shape[-1]
    if not is_shortcut:
        assert cin == cout, "identity shortcut needs Cin == Cout"

    # NCHW -> NHWC, bf16 over HBM. No jnp.pad: the halo is built in VMEM inside
    # the kernel, so the padded activation copy never hits HBM.
    x = jnp.transpose(x_nchw, (0, 2, 3, 1)).astype(jnp.bfloat16)

    nb = _pick_nb(n, h, w, cin, cmid, cout)

    def rep(shape):  # replicated (non-batched) operand
        nd = len(shape)
        return pl.BlockSpec(shape, lambda i, nd=nd: (0,) * nd)

    in_specs = [
        pl.BlockSpec((nb, h, w, cin), lambda i: (i, 0, 0, 0)),
        rep((9, cin, cmid)), rep((1, cmid)),
        rep((9, cmid, cout)), rep((1, cout)),
    ]
    args = [x, p["w1"], p["b1"], p["w2"], p["b2"]]
    if is_shortcut:
        in_specs += [rep((cin, cout)), rep((1, cout))]
        args += [p["ws"], p["bs"]]

    kernel = functools.partial(_basic_block_kernel,
                               is_shortcut=is_shortcut, nb=nb, h=h, w=w)
    out = pl.pallas_call(
        kernel,
        out_shape=jax.ShapeDtypeStruct((n, h * w, cout), jnp.float32),
        grid=(n // nb,),
        in_specs=in_specs,
        out_specs=pl.BlockSpec((nb, h * w, cout), lambda i: (i, 0, 0)),
        scratch_shapes=[
            pltpu.VMEM((nb, h + 2, w + 2, cin), jnp.bfloat16),
            pltpu.VMEM((nb, h + 2, w + 2, cmid), jnp.bfloat16),
        ],
        compiler_params=pltpu.CompilerParams(
            dimension_semantics=("parallel",),
            vmem_limit_bytes=32 * 1024 * 1024),
    )(*args)
    # TODO(synk): at toy Cout=8 the output store is lane-masked; at real ResNet
    # widths (Cout >= 128) the channel-last output becomes lane-dense for free.
    return jnp.transpose(out.reshape(n, h, w, cout), (0, 3, 1, 2))  # -> NCHW


# ------------------------ deterministic parameter init ----------------------- #
# Inference-mode BN folding: BN(conv(x, W)) == conv(x, W * scale) + bias with
# scale = gamma / sqrt(var + eps), bias = beta - mean * scale. The per-channel
# scale is folded into the bf16 conv weight so the kernel only adds the bias.

def init_params(key, cin, cmid, cout, *, is_shortcut, eps=1e-5):
    ks = jax.random.split(key, 16)

    def bn_fold(kg, kb, km, kv, c):
        gamma = 1.0 + 0.1 * jax.random.normal(kg, (c,), jnp.float32)
        beta = 0.1 * jax.random.normal(kb, (c,), jnp.float32)
        mean = 0.1 * jax.random.normal(km, (c,), jnp.float32)
        var = jnp.abs(jax.random.normal(kv, (c,), jnp.float32)) + 0.5
        scale = gamma / jnp.sqrt(var + eps)
        bias = beta - mean * scale
        return scale, bias.reshape(1, c)

    def conv3_w(k, ci, co, scale):
        # PyTorch layout (Cout, Cin, 3, 3); fold per-out-channel BN scale, then
        # tap-major (9, Cin, Cout) in bf16.
        wt = 0.1 * jax.random.normal(k, (co, ci, 3, 3), jnp.float32)
        wt = wt * scale[:, None, None, None]
        return jnp.transpose(wt, (2, 3, 1, 0)).reshape(9, ci, co).astype(jnp.bfloat16)

    def conv1_w(k, ci, co, scale):
        wt = 0.1 * jax.random.normal(k, (co, ci), jnp.float32) * scale[:, None]
        return jnp.transpose(wt, (1, 0)).astype(jnp.bfloat16)   # (Cin, Cout)

    s1, b1 = bn_fold(ks[1], ks[2], ks[3], ks[4], cmid)
    s2, b2 = bn_fold(ks[6], ks[7], ks[8], ks[9], cout)
    p = {"w1": conv3_w(ks[0], cin, cmid, s1), "b1": b1,
         "w2": conv3_w(ks[5], cmid, cout, s2), "b2": b2}
    if is_shortcut:
        ss, bs = bn_fold(ks[11], ks[12], ks[13], ks[14], cout)
        p["ws"] = conv1_w(ks[10], cin, cout, ss)
        p["bs"] = bs
    return p


# ------------------------------ pure-JAX reference --------------------------- #
# Matches the kernel's precision policy: bf16 conv operands (BN scale folded into
# the weights), f32 accumulation, f32 bias / ReLU / residual add.

def reference_forward(x_nchw, p, *, is_shortcut=False):
    x = jnp.transpose(x_nchw, (0, 2, 3, 1)).astype(jnp.float32)
    xb = x.astype(jnp.bfloat16)
    dn = ("NHWC", "HWIO", "NHWC")

    def conv(h_, w_hwio, pad):
        return jax.lax.conv_general_dilated(
            h_, w_hwio, (1, 1), ((pad, pad), (pad, pad)),
            dimension_numbers=dn, preferred_element_type=jnp.float32)

    w1 = p["w1"].reshape(3, 3, p["w1"].shape[1], p["w1"].shape[2])
    z = jax.nn.relu(conv(xb, w1, 1) + p["b1"])
    w2 = p["w2"].reshape(3, 3, p["w2"].shape[1], p["w2"].shape[2])
    y = conv(z.astype(jnp.bfloat16), w2, 1) + p["b2"]
    if is_shortcut:
        ws = p["ws"].reshape(1, 1, p["ws"].shape[0], p["ws"].shape[1])
        sc = conv(xb, ws, 0) + p["bs"]
    else:
        sc = xb.astype(jnp.float32)
    out = jax.nn.relu(y + sc)
    return jnp.transpose(out, (0, 3, 1, 2))


# ----------------------------------- main ------------------------------------ #

if __name__ == "__main__":
    # small shapes consistent with the module: batch=2, in_channel=4, channel=8,
    # out_channel=8, spatial=16x16
    N, CIN, CMID, COUT, H, W = 2, 4, 8, 8, 16, 16
    key = jax.random.PRNGKey(0)
    kx, kp1, kp2 = jax.random.split(key, 3)
    x = jax.random.normal(kx, (N, CIN, H, W), jnp.float32)

    # case 1: projection shortcut (is_shortcut=True)
    p1 = init_params(kp1, CIN, CMID, COUT, is_shortcut=True)
    y1 = basic_block_forward(x, p1, stride=1, is_shortcut=True)
    jax.block_until_ready(y1)
    r1 = reference_forward(x, p1, is_shortcut=True)
    assert y1.shape == (N, COUT, H, W)
    assert float(jnp.max(jnp.abs(y1 - r1))) < 1e-2

    # case 2: identity shortcut (is_shortcut=False, Cin == Cout)
    p2 = init_params(kp2, COUT, CMID, COUT, is_shortcut=False)
    x2 = jax.random.normal(kx, (N, COUT, H, W), jnp.float32)
    y2 = basic_block_forward(x2, p2, stride=1, is_shortcut=False)
    jax.block_until_ready(y2)
    r2 = reference_forward(x2, p2, is_shortcut=False)
    assert float(jnp.max(jnp.abs(y2 - r2))) < 1e-2

    # TODO(synk): training-mode BatchNorm (batch statistics) not implemented; the
    # kernel folds running stats into per-channel scale/bias (inference semantics).
    print("KERNEL_OK")
</pallas_src>

<mosaic_0001>
module attributes {stable_mosaic.version = 11 : i64} {
  func.func @_basic_block_kernel(%arg0: i32, %arg1: memref<1x16x16x4xbf16, #tpu.memory_space<vmem>>, %arg2: memref<9x4x8xbf16, #tpu.memory_space<vmem>>, %arg3: memref<1x8xf32, #tpu.memory_space<vmem>>, %arg4: memref<9x8x8xbf16, #tpu.memory_space<vmem>>, %arg5: memref<1x8xf32, #tpu.memory_space<vmem>>, %arg6: memref<4x8xbf16, #tpu.memory_space<vmem>>, %arg7: memref<1x8xf32, #tpu.memory_space<vmem>>, %arg8: memref<1x256x8xf32, #tpu.memory_space<vmem>>, %arg9: memref<1x18x18x4xbf16, #tpu.memory_space<vmem>>, %arg10: memref<1x18x18x8xbf16, #tpu.memory_space<vmem>>) attributes {dimension_semantics = [#tpu.dimension_semantics<parallel>], iteration_bounds = array<i64: 2>, scalar_prefetch = 0 : i64, scratch_operands = 2 : i64, tpu.core_type = #tpu.core_type<tc>, window_params = [{transform_indices = @transform_0, window_bounds = array<i64: 1, 16, 16, 4>}, {pipeline_mode = #tpu.pipeline_mode<synchronous>, transform_indices = @transform_1, window_bounds = array<i64: 9, 4, 8>}, {pipeline_mode = #tpu.pipeline_mode<synchronous>, transform_indices = @transform_2, window_bounds = array<i64: 1, 8>}, {pipeline_mode = #tpu.pipeline_mode<synchronous>, transform_indices = @transform_3, window_bounds = array<i64: 9, 8, 8>}, {pipeline_mode = #tpu.pipeline_mode<synchronous>, transform_indices = @transform_4, window_bounds = array<i64: 1, 8>}, {pipeline_mode = #tpu.pipeline_mode<synchronous>, transform_indices = @transform_5, window_bounds = array<i64: 4, 8>}, {pipeline_mode = #tpu.pipeline_mode<synchronous>, transform_indices = @transform_6, window_bounds = array<i64: 1, 8>}, {transform_indices = @transform_7, window_bounds = array<i64: 1, 256, 8>}]} {
    %cst = arith.constant 0.000000e+00 : bf16
    %0 = vector.broadcast %cst : bf16 to vector<1x1x18x4xbf16>
    %c0 = arith.constant 0 : index
    %c0_0 = arith.constant 0 : index
    %c0_1 = arith.constant 0 : index
    %c0_2 = arith.constant 0 : index
    %1 = vector.load %arg9[%c0, %c0_0, %c0_1, %c0_2] : memref<1x18x18x4xbf16, #tpu.memory_space<vmem>>, vector<1x1x18x4xbf16>
    tpu.vector_store %arg9[%c0, %c0_0, %c0_1, %c0_2], %0 {strides = array<i32>} : memref<1x18x18x4xbf16, #tpu.memory_space<vmem>>, vector<1x1x18x4xbf16>,
    %cst_3 = arith.constant 0.000000e+00 : bf16
    %2 = vector.broadcast %cst_3 : bf16 to vector<1x1x18x4xbf16>
    %c0_4 = arith.constant 0 : index
    %c17 = arith.constant 17 : index
    %c0_5 = arith.constant 0 : index
    %c0_6 = arith.constant 0 : index
    %3 = vector.load %arg9[%c0_4, %c17, %c0_5, %c0_6] : memref<1x18x18x4xbf16, #tpu.memory_space<vmem>>, vector<1x1x18x4xbf16>
    tpu.vector_store %arg9[%c0_4, %c17, %c0_5, %c0_6], %2 {strides = array<i32>} : memref<1x18x18x4xbf16, #tpu.memory_space<vmem>>, vector<1x1x18x4xbf16>,
    %cst_7 = arith.constant 0.000000e+00 : bf16
    %4 = vector.broadcast %cst_7 : bf16 to vector<1x18x1x4xbf16>
    %c0_8 = arith.constant 0 : index
    %c0_9 = arith.constant 0 : index
    %c0_10 = arith.constant 0 : index
    %c0_11 = arith.constant 0 : index
    %5 = vector.load %arg9[%c0_8, %c0_9, %c0_10, %c0_11] : memref<1x18x18x4xbf16, #tpu.memory_space<vmem>>, vector<1x18x1x4xbf16>
    tpu.vector_store %arg9[%c0_8, %c0_9, %c0_10, %c0_11], %4 {strides = array<i32>} : memref<1x18x18x4xbf16, #tpu.memory_space<vmem>>, vector<1x18x1x4xbf16>,
    %cst_12 = arith.constant 0.000000e+00 : bf16
    %6 = vector.broadcast %cst_12 : bf16 to vector<1x18x1x4xbf16>
    %c0_13 = arith.constant 0 : index
    %c0_14 = arith.constant 0 : index
    %c17_15 = arith.constant 17 : index
    %c0_16 = arith.constant 0 : index
    %7 = vector.load %arg9[%c0_13, %c0_14, %c17_15, %c0_16] : memref<1x18x18x4xbf16, #tpu.memory_space<vmem>>, vector<1x18x1x4xbf16>
    tpu.vector_store %arg9[%c0_13, %c0_14, %c17_15, %c0_16], %6 {strides = array<i32>} : memref<1x18x18x4xbf16, #tpu.memory_space<vmem>>, vector<1x18x1x4xbf16>,
    %cst_17 = arith.constant 0.000000e+00 : bf16
    %8 = vector.broadcast %cst_17 : bf16 to vector<1x1x18x8xbf16>
    %c0_18 = arith.constant 0 : index
    %c0_19 = arith.constant 0 : index
    %c0_20 = arith.constant 0 : index
    %c0_21 = arith.constant 0 : index
    %9 = vector.load %arg10[%c0_18, %c0_19, %c0_20, %c0_21] : memref<1x18x18x8xbf16, #tpu.memory_space<vmem>>, vector<1x1x18x8xbf16>
    tpu.vector_store %arg10[%c0_18, %c0_19, %c0_20, %c0_21], %8 {strides = array<i32>} : memref<1x18x18x8xbf16, #tpu.memory_space<vmem>>, vector<1x1x18x8xbf16>,
    %cst_22 = arith.constant 0.000000e+00 : bf16
    %10 = vector.broadcast %cst_22 : bf16 to vector<1x1x18x8xbf16>
    %c0_23 = arith.constant 0 : index
    %c17_24 = arith.constant 17 : index
    %c0_25 = arith.constant 0 : index
    %c0_26 = arith.constant 0 : index
    %11 = vector.load %arg10[%c0_23, %c17_24, %c0_25, %c0_26] : memref<1x18x18x8xbf16, #tpu.memory_space<vmem>>, vector<1x1x18x8xbf16>
    tpu.vector_store %arg10[%c0_23, %c17_24, %c0_25, %c0_26], %10 {strides = array<i32>} : memref<1x18x18x8xbf16, #tpu.memory_space<vmem>>, vector<1x1x18x8xbf16>,
    %cst_27 = arith.constant 0.000000e+00 : bf16
    %12 = vector.broadcast %cst_27 : bf16 to vector<1x18x1x8xbf16>
    %c0_28 = arith.constant 0 : index
    %c0_29 = arith.constant 0 : index
    %c0_30 = arith.constant 0 : index
    %c0_31 = arith.constant 0 : index
    %13 = vector.load %arg10[%c0_28, %c0_29, %c0_30, %c0_31] : memref<1x18x18x8xbf16, #tpu.memory_space<vmem>>, vector<1x18x1x8xbf16>
    tpu.vector_store %arg10[%c0_28, %c0_29, %c0_30, %c0_31], %12 {strides = array<i32>} : memref<1x18x18x8xbf16, #tpu.memory_space<vmem>>, vector<1x18x1x8xbf16>,
    %cst_32 = arith.constant 0.000000e+00 : bf16
    %14 = vector.broadcast %cst_32 : bf16 to vector<1x18x1x8xbf16>
    %c0_33 = arith.constant 0 : index
    %c0_34 = arith.constant 0 : index
    %c17_35 = arith.constant 17 : index
    %c0_36 = arith.constant 0 : index
    %15 = vector.load %arg10[%c0_33, %c0_34, %c17_35, %c0_36] : memref<1x18x18x8xbf16, #tpu.memory_space<vmem>>, vector<1x18x1x8xbf16>
    tpu.vector_store %arg10[%c0_33, %c0_34, %c17_35, %c0_36], %14 {strides = array<i32>} : memref<1x18x18x8xbf16, #tpu.memory_space<vmem>>, vector<1x18x1x8xbf16>,
    %c0_37 = arith.constant 0 : index
    %c0_38 = arith.constant 0 : index
    %c0_39 = arith.constant 0 : index
    %c0_40 = arith.constant 0 : index
    %16 = vector.load %arg1[%c0_37, %c0_38, %c0_39, %c0_40] : memref<1x16x16x4xbf16, #tpu.memory_space<vmem>>, vector<1x16x16x4xbf16>
    %c0_41 = arith.constant 0 : index
    %c1 = arith.constant 1 : index
    %c1_42 = arith.constant 1 : index
    %c0_43 = arith.constant 0 : index
    %17 = vector.load %arg9[%c0_41, %c1, %c1_42, %c0_43] : memref<1x18x18x4xbf16, #tpu.memory_space<vmem>>, vector<1x16x16x4xbf16>
    tpu.vector_store %arg9[%c0_41, %c1, %c1_42, %c0_43], %16 {strides = array<i32>} : memref<1x18x18x4xbf16, #tpu.memory_space<vmem>>, vector<1x16x16x4xbf16>,
    %cst_44 = arith.constant 0.000000e+00 : f32
    %18 = vector.broadcast %cst_44 : f32 to vector<256x8xf32>
    %c0_45 = arith.constant 0 : index
    %c0_46 = arith.constant 0 : index
    %c0_47 = arith.constant 0 : index
    %c0_48 = arith.constant 0 : index
    %19 = vector.load %arg9[%c0_45, %c0_46, %c0_47, %c0_48] : memref<1x18x18x4xbf16, #tpu.memory_space<vmem>>, vector<1x16x16x4xbf16>
    %20 = vector.shape_cast %19 : vector<1x16x16x4xbf16> to vector<256x4xbf16>
    %c0_49 = arith.constant 0 : index
    %c0_50 = arith.constant 0 : index
    %c0_51 = arith.constant 0 : index
    %21 = vector.load %arg2[%c0_49, %c0_50, %c0_51] : memref<9x4x8xbf16, #tpu.memory_space<vmem>>, vector<1x4x8xbf16>
    %22 = vector.shape_cast %21 : vector<1x4x8xbf16> to vector<4x8xbf16>
    %cst_52 = arith.constant dense<0.000000e+00> : vector<256x8xf32>
    %23 = tpu.matmul %20, %22, %cst_52 {dimension_numbers = #tpu.dot_dimension_numbers<[1], [0], [0], [1], [0, 0, 1, 1], [], []>} : vector<256x4xbf16>, vector<4x8xbf16>, vector<256x8xf32> -> vector<256x8xf32>
    %24 = arith.addf %18, %23 : vector<256x8xf32>
    %c0_53 = arith.constant 0 : index
    %c0_54 = arith.constant 0 : index
    %c1_55 = arith.constant 1 : index
    %c0_56 = arith.constant 0 : index
    %25 = vector.load %arg9[%c0_53, %c0_54, %c1_55, %c0_56] : memref<1x18x18x4xbf16, #tpu.memory_space<vmem>>, vector<1x16x16x4xbf16>
    %26 = vector.shape_cast %25 : vector<1x16x16x4xbf16> to vector<256x4xbf16>
    %c1_57 = arith.constant 1 : index
    %c0_58 = arith.constant 0 : index
    %c0_59 = arith.constant 0 : index
    %27 = vector.load %arg2[%c1_57, %c0_58, %c0_59] : memref<9x4x8xbf16, #tpu.memory_space<vmem>>, vector<1x4x8xbf16>
    %28 = vector.shape_cast %27 : vector<1x4x8xbf16> to vector<4x8xbf16>
    %cst_60 = arith.constant dense<0.000000e+00> : vector<256x8xf32>
    %29 = tpu.matmul %26, %28, %cst_60 {dimension_numbers = #tpu.dot_dimension_numbers<[1], [0], [0], [1], [0, 0, 1, 1], [], []>} : vector<256x4xbf16>, vector<4x8xbf16>, vector<256x8xf32> -> vector<256x8xf32>
    %30 = arith.addf %24, %29 : vector<256x8xf32>
    %c0_61 = arith.constant 0 : index
    %c0_62 = arith.constant 0 : index
    %c2 = arith.constant 2 : index
    %c0_63 = arith.constant 0 : index
    %31 = vector.load %arg9[%c0_61, %c0_62, %c2, %c0_63] : memref<1x18x18x4xbf16, #tpu.memory_space<vmem>>, vector<1x16x16x4xbf16>
    %32 = vector.shape_cast %31 : vector<1x16x16x4xbf16> to vector<256x4xbf16>
    %c2_64 = arith.constant 2 : index
    %c0_65 = arith.constant 0 : index
    %c0_66 = arith.constant 0 : index
    %33 = vector.load %arg2[%c2_64, %c0_65, %c0_66] : memref<9x4x8xbf16, #tpu.memory_space<vmem>>, vector<1x4x8xbf16>
    %34 = vector.shape_cast %33 : vector<1x4x8xbf16> to vector<4x8xbf16>
    %cst_67 = arith.constant dense<0.000000e+00> : vector<256x8xf32>
    %35 = tpu.matmul %32, %34, %cst_67 {dimension_numbers = #tpu.dot_dimension_numbers<[1], [0], [0], [1], [0, 0, 1, 1], [], []>} : vector<256x4xbf16>, vector<4x8xbf16>, vector<256x8xf32> -> vector<256x8xf32>
    %36 = arith.addf %30, %35 : vector<256x8xf32>
    %c0_68 = arith.constant 0 : index
    %c1_69 = arith.constant 1 : index
    %c0_70 = arith.constant 0 : index
    %c0_71 = arith.constant 0 : index
    %37 = vector.load %arg9[%c0_68, %c1_69, %c0_70, %c0_71] : memref<1x18x18x4xbf16, #tpu.memory_space<vmem>>, vector<1x16x16x4xbf16>
    %38 = vector.shape_cast %37 : vector<1x16x16x4xbf16> to vector<256x4xbf16>
    %c3 = arith.constant 3 : index
    %c0_72 = arith.constant 0 : index
    %c0_73 = arith.constant 0 : index
    %39 = vector.load %arg2[%c3, %c0_72, %c0_73] : memref<9x4x8xbf16, #tpu.memory_space<vmem>>, vector<1x4x8xbf16>
    %40 = vector.shape_cast %39 : vector<1x4x8xbf16> to vector<4x8xbf16>
    %cst_74 = arith.constant dense<0.000000e+00> : vector<256x8xf32>
    %41 = tpu.matmul %38, %40, %cst_74 {dimension_numbers = #tpu.dot_dimension_numbers<[1], [0], [0], [1], [0, 0, 1, 1], [], []>} : vector<256x4xbf16>, vector<4x8xbf16>, vector<256x8xf32> -> vector<256x8xf32>
    %42 = arith.addf %36, %41 : vector<256x8xf32>
    %c0_75 = arith.constant 0 : index
    %c1_76 = arith.constant 1 : index
    %c1_77 = arith.constant 1 : index
    %c0_78 = arith.constant 0 : index
    %43 = vector.load %arg9[%c0_75, %c1_76, %c1_77, %c0_78] : memref<1x18x18x4xbf16, #tpu.memory_space<vmem>>, vector<1x16x16x4xbf16>
    %44 = vector.shape_cast %43 : vector<1x16x16x4xbf16> to vector<256x4xbf16>
    %c4 = arith.constant 4 : index
    %c0_79 = arith.constant 0 : index
    %c0_80 = arith.constant 0 : index
    %45 = vector.load %arg2[%c4, %c0_79, %c0_80] : memref<9x4x8xbf16, #tpu.memory_space<vmem>>, vector<1x4x8xbf16>
    %46 = vector.shape_cast %45 : vector<1x4x8xbf16> to vector<4x8xbf16>
    %cst_81 = arith.constant dense<0.000000e+00> : vector<256x8xf32>
    %47 = tpu.matmul %44, %46, %cst_81 {dimension_numbers = #tpu.dot_dimension_numbers<[1], [0], [0], [1], [0, 0, 1, 1], [], []>} : vector<256x4xbf16>, vector<4x8xbf16>, vector<256x8xf32> -> vector<256x8xf32>
    %48 = arith.addf %42, %47 : vector<256x8xf32>
    %c0_82 = arith.constant 0 : index
    %c1_83 = arith.constant 1 : index
    %c2_84 = arith.constant 2 : index
    %c0_85 = arith.constant 0 : index
    %49 = vector.load %arg9[%c0_82, %c1_83, %c2_84, %c0_85] : memref<1x18x18x4xbf16, #tpu.memory_space<vmem>>, vector<1x16x16x4xbf16>
    %50 = vector.shape_cast %49 : vector<1x16x16x4xbf16> to vector<256x4xbf16>
    %c5 = arith.constant 5 : index
    %c0_86 = arith.constant 0 : index
    %c0_87 = arith.constant 0 : index
    %51 = vector.load %arg2[%c5, %c0_86, %c0_87] : memref<9x4x8xbf16, #tpu.memory_space<vmem>>, vector<1x4x8xbf16>
    %52 = vector.shape_cast %51 : vector<1x4x8xbf16> to vector<4x8xbf16>
    %cst_88 = arith.constant dense<0.000000e+00> : vector<256x8xf32>
    %53 = tpu.matmul %50, %52, %cst_88 {dimension_numbers = #tpu.dot_dimension_numbers<[1], [0], [0], [1], [0, 0, 1, 1], [], []>} : vector<256x4xbf16>, vector<4x8xbf16>, vector<256x8xf32> -> vector<256x8xf32>
    %54 = arith.addf %48, %53 : vector<256x8xf32>
    %c0_89 = arith.constant 0 : index
    %c2_90 = arith.constant 2 : index
    %c0_91 = arith.constant 0 : index
    %c0_92 = arith.constant 0 : index
    %55 = vector.load %arg9[%c0_89, %c2_90, %c0_91, %c0_92] : memref<1x18x18x4xbf16, #tpu.memory_space<vmem>>, vector<1x16x16x4xbf16>
    %56 = vector.shape_cast %55 : vector<1x16x16x4xbf16> to vector<256x4xbf16>
    %c6 = arith.constant 6 : index
    %c0_93 = arith.constant 0 : index
    %c0_94 = arith.constant 0 : index
    %57 = vector.load %arg2[%c6, %c0_93, %c0_94] : memref<9x4x8xbf16, #tpu.memory_space<vmem>>, vector<1x4x8xbf16>
    %58 = vector.shape_cast %57 : vector<1x4x8xbf16> to vector<4x8xbf16>
    %cst_95 = arith.constant dense<0.000000e+00> : vector<256x8xf32>
    %59 = tpu.matmul %56, %58, %cst_95 {dimension_numbers = #tpu.dot_dimension_numbers<[1], [0], [0], [1], [0, 0, 1, 1], [], []>} : vector<256x4xbf16>, vector<4x8xbf16>, vector<256x8xf32> -> vector<256x8xf32>
    %60 = arith.addf %54, %59 : vector<256x8xf32>
    %c0_96 = arith.constant 0 : index
    %c2_97 = arith.constant 2 : index
    %c1_98 = arith.constant 1 : index
    %c0_99 = arith.constant 0 : index
    %61 = vector.load %arg9[%c0_96, %c2_97, %c1_98, %c0_99] : memref<1x18x18x4xbf16, #tpu.memory_space<vmem>>, vector<1x16x16x4xbf16>
    %62 = vector.shape_cast %61 : vector<1x16x16x4xbf16> to vector<256x4xbf16>
    %c7 = arith.constant 7 : index
    %c0_100 = arith.constant 0 : index
    %c0_101 = arith.constant 0 : index
    %63 = vector.load %arg2[%c7, %c0_100, %c0_101] : memref<9x4x8xbf16, #tpu.memory_space<vmem>>, vector<1x4x8xbf16>
    %64 = vector.shape_cast %63 : vector<1x4x8xbf16> to vector<4x8xbf16>
    %cst_102 = arith.constant dense<0.000000e+00> : vector<256x8xf32>
    %65 = tpu.matmul %62, %64, %cst_102 {dimension_numbers = #tpu.dot_dimension_numbers<[1], [0], [0], [1], [0, 0, 1, 1], [], []>} : vector<256x4xbf16>, vector<4x8xbf16>, vector<256x8xf32> -> vector<256x8xf32>
    %66 = arith.addf %60, %65 : vector<256x8xf32>
    %c0_103 = arith.constant 0 : index
    %c2_104 = arith.constant 2 : index
    %c2_105 = arith.constant 2 : index
    %c0_106 = arith.constant 0 : index
    %67 = vector.load %arg9[%c0_103, %c2_104, %c2_105, %c0_106] : memref<1x18x18x4xbf16, #tpu.memory_space<vmem>>, vector<1x16x16x4xbf16>
    %68 = vector.shape_cast %67 : vector<1x16x16x4xbf16> to vector<256x4xbf16>
    %c8 = arith.constant 8 : index
    %c0_107 = arith.constant 0 : index
    %c0_108 = arith.constant 0 : index
    %69 = vector.load %arg2[%c8, %c0_107, %c0_108] : memref<9x4x8xbf16, #tpu.memory_space<vmem>>, vector<1x4x8xbf16>
    %70 = vector.shape_cast %69 : vector<1x4x8xbf16> to vector<4x8xbf16>
    %cst_109 = arith.constant dense<0.000000e+00> : vector<256x8xf32>
    %71 = tpu.matmul %68, %70, %cst_109 {dimension_numbers = #tpu.dot_dimension_numbers<[1], [0], [0], [1], [0, 0, 1, 1], [], []>} : vector<256x4xbf16>, vector<4x8xbf16>, vector<256x8xf32> -> vector<256x8xf32>
    %72 = arith.addf %66, %71 : vector<256x8xf32>
    %c0_110 = arith.constant 0 : index
    %c0_111 = arith.constant 0 : index
    %73 = vector.load %arg3[%c0_110, %c0_111] : memref<1x8xf32, #tpu.memory_space<vmem>>, vector<1x8xf32>
    %74 = vector.broadcast %73 : vector<1x8xf32> to vector<256x8xf32>
    %75 = arith.addf %72, %74 : vector<256x8xf32>
    %cst_112 = arith.constant 0.000000e+00 : f32
    %76 = vector.broadcast %cst_112 : f32 to vector<256x8xf32>
    %77 = arith.maximumf %75, %76 : vector<256x8xf32>
    %78 = arith.truncf %77 : vector<256x8xf32> to vector<256x8xbf16>
    %79 = vector.shape_cast %78 : vector<256x8xbf16> to vector<1x16x16x8xbf16>
    %c0_113 = arith.constant 0 : index
    %c1_114 = arith.constant 1 : index
    %c1_115 = arith.constant 1 : index
    %c0_116 = arith.constant 0 : index
    %80 = vector.load %arg10[%c0_113, %c1_114, %c1_115, %c0_116] : memref<1x18x18x8xbf16, #tpu.memory_space<vmem>>, vector<1x16x16x8xbf16>
    tpu.vector_store %arg10[%c0_113, %c1_114, %c1_115, %c0_116], %79 {strides = array<i32>} : memref<1x18x18x8xbf16, #tpu.memory_space<vmem>>, vector<1x16x16x8xbf16>,
    %cst_117 = arith.constant 0.000000e+00 : f32
    %81 = vector.broadcast %cst_117 : f32 to vector<256x8xf32>
    %c0_118 = arith.constant 0 : index
    %c0_119 = arith.constant 0 : index
    %c0_120 = arith.constant 0 : index
    %c0_121 = arith.constant 0 : index
    %82 = vector.load %arg10[%c0_118, %c0_119, %c0_120, %c0_121] : memref<1x18x18x8xbf16, #tpu.memory_space<vmem>>, vector<1x16x16x8xbf16>
    %83 = vector.shape_cast %82 : vector<1x16x16x8xbf16> to vector<256x8xbf16>
    %c0_122 = arith.constant 0 : index
    %c0_123 = arith.constant 0 : index
    %c0_124 = arith.constant 0 : index
    %84 = vector.load %arg4[%c0_122, %c0_123, %c0_124] : memref<9x8x8xbf16, #tpu.memory_space<vmem>>, vector<1x8x8xbf16>
    %85 = vector.shape_cast %84 : vector<1x8x8xbf16> to vector<8x8xbf16>
    %cst_125 = arith.constant dense<0.000000e+00> : vector<256x8xf32>
    %86 = tpu.matmul %83, %85, %cst_125 {dimension_numbers = #tpu.dot_dimension_numbers<[1], [0], [0], [1], [0, 0, 1, 1], [], []>} : vector<256x8xbf16>, vector<8x8xbf16>, vector<256x8xf32> -> vector<256x8xf32>
    %87 = arith.addf %81, %86 : vector<256x8xf32>
    %c0_126 = arith.constant 0 : index
    %c0_127 = arith.constant 0 : index
    %c1_128 = arith.constant 1 : index
    %c0_129 = arith.constant 0 : index
    %88 = vector.load %arg10[%c0_126, %c0_127, %c1_128, %c0_129] : memref<1x18x18x8xbf16, #tpu.memory_space<vmem>>, vector<1x16x16x8xbf16>
    %89 = vector.shape_cast %88 : vector<1x16x16x8xbf16> to vector<256x8xbf16>
    %c1_130 = arith.constant 1 : index
    %c0_131 = arith.constant 0 : index
    %c0_132 = arith.constant 0 : index
    %90 = vector.load %arg4[%c1_130, %c0_131, %c0_132] : memref<9x8x8xbf16, #tpu.memory_space<vmem>>, vector<1x8x8xbf16>
    %91 = vector.shape_cast %90 : vector<1x8x8xbf16> to vector<8x8xbf16>
    %cst_133 = arith.constant dense<0.000000e+00> : vector<256x8xf32>
    %92 = tpu.matmul %89, %91, %cst_133 {dimension_numbers = #tpu.dot_dimension_numbers<[1], [0], [0], [1], [0, 0, 1, 1], [], []>} : vector<256x8xbf16>, vector<8x8xbf16>, vector<256x8xf32> -> vector<256x8xf32>
    %93 = arith.addf %87, %92 : vector<256x8xf32>
    %c0_134 = arith.constant 0 : index
    %c0_135 = arith.constant 0 : index
    %c2_136 = arith.constant 2 : index
    %c0_137 = arith.constant 0 : index
    %94 = vector.load %arg10[%c0_134, %c0_135, %c2_136, %c0_137] : memref<1x18x18x8xbf16, #tpu.memory_space<vmem>>, vector<1x16x16x8xbf16>
    %95 = vector.shape_cast %94 : vector<1x16x16x8xbf16> to vector<256x8xbf16>
    %c2_138 = arith.constant 2 : index
    %c0_139 = arith.constant 0 : index
    %c0_140 = arith.constant 0 : index
    %96 = vector.load %arg4[%c2_138, %c0_139, %c0_140] : memref<9x8x8xbf16, #tpu.memory_space<vmem>>, vector<1x8x8xbf16>
    %97 = vector.shape_cast %96 : vector<1x8x8xbf16> to vector<8x8xbf16>
    %cst_141 = arith.constant dense<0.000000e+00> : vector<256x8xf32>
    %98 = tpu.matmul %95, %97, %cst_141 {dimension_numbers = #tpu.dot_dimension_numbers<[1], [0], [0], [1], [0, 0, 1, 1], [], []>} : vector<256x8xbf16>, vector<8x8xbf16>, vector<256x8xf32> -> vector<256x8xf32>
    %99 = arith.addf %93, %98 : vector<256x8xf32>
    %c0_142 = arith.constant 0 : index
    %c1_143 = arith.constant 1 : index
    %c0_144 = arith.constant 0 : index
    %c0_145 = arith.constant 0 : index
    %100 = vector.load %arg10[%c0_142, %c1_143, %c0_144, %c0_145] : memref<1x18x18x8xbf16, #tpu.memory_space<vmem>>, vector<1x16x16x8xbf16>
    %101 = vector.shape_cast %100 : vector<1x16x16x8xbf16> to vector<256x8xbf16>
    %c3_146 = arith.constant 3 : index
    %c0_147 = arith.constant 0 : index
    %c0_148 = arith.constant 0 : index
    %102 = vector.load %arg4[%c3_146, %c0_147, %c0_148] : memref<9x8x8xbf16, #tpu.memory_space<vmem>>, vector<1x8x8xbf16>
    %103 = vector.shape_cast %102 : vector<1x8x8xbf16> to vector<8x8xbf16>
    %cst_149 = arith.constant dense<0.000000e+00> : vector<256x8xf32>
    %104 = tpu.matmul %101, %103, %cst_149 {dimension_numbers = #tpu.dot_dimension_numbers<[1], [0], [0], [1], [0, 0, 1, 1], [], []>} : vector<256x8xbf16>, vector<8x8xbf16>, vector<256x8xf32> -> vector<256x8xf32>
    %105 = arith.addf %99, %104 : vector<256x8xf32>
    %c0_150 = arith.constant 0 : index
    %c1_151 = arith.constant 1 : index
    %c1_152 = arith.constant 1 : index
    %c0_153 = arith.constant 0 : index
    %106 = vector.load %arg10[%c0_150, %c1_151, %c1_152, %c0_153] : memref<1x18x18x8xbf16, #tpu.memory_space<vmem>>, vector<1x16x16x8xbf16>
    %107 = vector.shape_cast %106 : vector<1x16x16x8xbf16> to vector<256x8xbf16>
    %c4_154 = arith.constant 4 : index
    %c0_155 = arith.constant 0 : index
    %c0_156 = arith.constant 0 : index
    %108 = vector.load %arg4[%c4_154, %c0_155, %c0_156] : memref<9x8x8xbf16, #tpu.memory_space<vmem>>, vector<1x8x8xbf16>
    %109 = vector.shape_cast %108 : vector<1x8x8xbf16> to vector<8x8xbf16>
    %cst_157 = arith.constant dense<0.000000e+00> : vector<256x8xf32>
    %110 = tpu.matmul %107, %109, %cst_157 {dimension_numbers = #tpu.dot_dimension_numbers<[1], [0], [0], [1], [0, 0, 1, 1], [], []>} : vector<256x8xbf16>, vector<8x8xbf16>, vector<256x8xf32> -> vector<256x8xf32>
    %111 = arith.addf %105, %110 : vector<256x8xf32>
    %c0_158 = arith.constant 0 : index
    %c1_159 = arith.constant 1 : index
    %c2_160 = arith.constant 2 : index
    %c0_161 = arith.constant 0 : index
    %112 = vector.load %arg10[%c0_158, %c1_159, %c2_160, %c0_161] : memref<1x18x18x8xbf16, #tpu.memory_space<vmem>>, vector<1x16x16x8xbf16>
    %113 = vector.shape_cast %112 : vector<1x16x16x8xbf16> to vector<256x8xbf16>
    %c5_162 = arith.constant 5 : index
    %c0_163 = arith.constant 0 : index
    %c0_164 = arith.constant 0 : index
    %114 = vector.load %arg4[%c5_162, %c0_163, %c0_164] : memref<9x8x8xbf16, #tpu.memory_space<vmem>>, vector<1x8x8xbf16>
    %115 = vector.shape_cast %114 : vector<1x8x8xbf16> to vector<8x8xbf16>
    %cst_165 = arith.constant dense<0.000000e+00> : vector<256x8xf32>
    %116 = tpu.matmul %113, %115, %cst_165 {dimension_numbers = #tpu.dot_dimension_numbers<[1], [0], [0], [1], [0, 0, 1, 1], [], []>} : vector<256x8xbf16>, vector<8x8xbf16>, vector<256x8xf32> -> vector<256x8xf32>
    %117 = arith.addf %111, %116 : vector<256x8xf32>
    %c0_166 = arith.constant 0 : index
    %c2_167 = arith.constant 2 : index
    %c0_168 = arith.constant 0 : index
    %c0_169 = arith.constant 0 : index
    %118 = vector.load %arg10[%c0_166, %c2_167, %c0_168, %c0_169] : memref<1x18x18x8xbf16, #tpu.memory_space<vmem>>, vector<1x16x16x8xbf16>
    %119 = vector.shape_cast %118 : vector<1x16x16x8xbf16> to vector<256x8xbf16>
    %c6_170 = arith.constant 6 : index
    %c0_171 = arith.constant 0 : index
    %c0_172 = arith.constant 0 : index
    %120 = vector.load %arg4[%c6_170, %c0_171, %c0_172] : memref<9x8x8xbf16, #tpu.memory_space<vmem>>, vector<1x8x8xbf16>
    %121 = vector.shape_cast %120 : vector<1x8x8xbf16> to vector<8x8xbf16>
    %cst_173 = arith.constant dense<0.000000e+00> : vector<256x8xf32>
    %122 = tpu.matmul %119, %121, %cst_173 {dimension_numbers = #tpu.dot_dimension_numbers<[1], [0], [0], [1], [0, 0, 1, 1], [], []>} : vector<256x8xbf16>, vector<8x8xbf16>, vector<256x8xf32> -> vector<256x8xf32>
    %123 = arith.addf %117, %122 : vector<256x8xf32>
    %c0_174 = arith.constant 0 : index
    %c2_175 = arith.constant 2 : index
    %c1_176 = arith.constant 1 : index
    %c0_177 = arith.constant 0 : index
    %124 = vector.load %arg10[%c0_174, %c2_175, %c1_176, %c0_177] : memref<1x18x18x8xbf16, #tpu.memory_space<vmem>>, vector<1x16x16x8xbf16>
    %125 = vector.shape_cast %124 : vector<1x16x16x8xbf16> to vector<256x8xbf16>
    %c7_178 = arith.constant 7 : index
    %c0_179 = arith.constant 0 : index
    %c0_180 = arith.constant 0 : index
    %126 = vector.load %arg4[%c7_178, %c0_179, %c0_180] : memref<9x8x8xbf16, #tpu.memory_space<vmem>>, vector<1x8x8xbf16>
    %127 = vector.shape_cast %126 : vector<1x8x8xbf16> to vector<8x8xbf16>
    %cst_181 = arith.constant dense<0.000000e+00> : vector<256x8xf32>
    %128 = tpu.matmul %125, %127, %cst_181 {dimension_numbers = #tpu.dot_dimension_numbers<[1], [0], [0], [1], [0, 0, 1, 1], [], []>} : vector<256x8xbf16>, vector<8x8xbf16>, vector<256x8xf32> -> vector<256x8xf32>
    %129 = arith.addf %123, %128 : vector<256x8xf32>
    %c0_182 = arith.constant 0 : index
    %c2_183 = arith.constant 2 : index
    %c2_184 = arith.constant 2 : index
    %c0_185 = arith.constant 0 : index
    %130 = vector.load %arg10[%c0_182, %c2_183, %c2_184, %c0_185] : memref<1x18x18x8xbf16, #tpu.memory_space<vmem>>, vector<1x16x16x8xbf16>
    %131 = vector.shape_cast %130 : vector<1x16x16x8xbf16> to vector<256x8xbf16>
    %c8_186 = arith.constant 8 : index
    %c0_187 = arith.constant 0 : index
    %c0_188 = arith.constant 0 : index
    %132 = vector.load %arg4[%c8_186, %c0_187, %c0_188] : memref<9x8x8xbf16, #tpu.memory_space<vmem>>, vector<1x8x8xbf16>
    %133 = vector.shape_cast %132 : vector<1x8x8xbf16> to vector<8x8xbf16>
    %cst_189 = arith.constant dense<0.000000e+00> : vector<256x8xf32>
    %134 = tpu.matmul %131, %133, %cst_189 {dimension_numbers = #tpu.dot_dimension_numbers<[1], [0], [0], [1], [0, 0, 1, 1], [], []>} : vector<256x8xbf16>, vector<8x8xbf16>, vector<256x8xf32> -> vector<256x8xf32>
    %135 = arith.addf %129, %134 : vector<256x8xf32>
    %c0_190 = arith.constant 0 : index
    %c0_191 = arith.constant 0 : index
    %136 = vector.load %arg5[%c0_190, %c0_191] : memref<1x8xf32, #tpu.memory_space<vmem>>, vector<1x8xf32>
    %137 = vector.broadcast %136 : vector<1x8xf32> to vector<256x8xf32>
    %138 = arith.addf %135, %137 : vector<256x8xf32>
    %c0_192 = arith.constant 0 : index
    %c0_193 = arith.constant 0 : index
    %c0_194 = arith.constant 0 : index
    %c0_195 = arith.constant 0 : index
    %139 = vector.load %arg1[%c0_192, %c0_193, %c0_194, %c0_195] : memref<1x16x16x4xbf16, #tpu.memory_space<vmem>>, vector<1x16x16x4xbf16>
    %140 = vector.shape_cast %139 : vector<1x16x16x4xbf16> to vector<256x4xbf16>
    %c0_196 = arith.constant 0 : index
    %c0_197 = arith.constant 0 : index
    %141 = vector.load %arg6[%c0_196, %c0_197] : memref<4x8xbf16, #tpu.memory_space<vmem>>, vector<4x8xbf16>
    %cst_198 = arith.constant dense<0.000000e+00> : vector<256x8xf32>
    %142 = tpu.matmul %140, %141, %cst_198 {dimension_numbers = #tpu.dot_dimension_numbers<[1], [0], [0], [1], [0, 0, 1, 1], [], []>} : vector<256x4xbf16>, vector<4x8xbf16>, vector<256x8xf32> -> vector<256x8xf32>
    %c0_199 = arith.constant 0 : index
    %c0_200 = arith.constant 0 : index
    %143 = vector.load %arg7[%c0_199, %c0_200] : memref<1x8xf32, #tpu.memory_space<vmem>>, vector<1x8xf32>
    %144 = vector.broadcast %143 : vector<1x8xf32> to vector<256x8xf32>
    %145 = arith.addf %142, %144 : vector<256x8xf32>
    %146 = arith.addf %138, %145 : vector<256x8xf32>
    %cst_201 = arith.constant 0.000000e+00 : f32
    %147 = vector.broadcast %cst_201 : f32 to vector<256x8xf32>
    %148 = arith.maximumf %146, %147 : vector<256x8xf32>
    %149 = vector.shape_cast %148 : vector<256x8xf32> to vector<1x256x8xf32>
    %c0_202 = arith.constant 0 : index
    %c0_203 = arith.constant 0 : index
    %c0_204 = arith.constant 0 : index
    %150 = vector.load %arg8[%c0_202, %c0_203, %c0_204] : memref<1x256x8xf32, #tpu.memory_space<vmem>>, vector<1x256x8xf32>
    tpu.vector_store %arg8[%c0_202, %c0_203, %c0_204], %149 {strides = array<i32>} : memref<1x256x8xf32, #tpu.memory_space<vmem>>, vector<1x256x8xf32>,
    return
  }
  func.func @transform_0(%arg0: i32) -> (i32, i32, i32, i32) {
    %c0_i32 = arith.constant 0 : i32
    %c0_i32_0 = arith.constant 0 : i32
    %c0_i32_1 = arith.constant 0 : i32
    %c0_i32_2 = arith.constant 0 : i32
    return %arg0, %c0_i32, %c0_i32_0, %c0_i32_1 : i32, i32, i32, i32
  }
  func.func @transform_1(%arg0: i32) -> (i32, i32, i32) {
    %c0_i32 = arith.constant 0 : i32
    %c0_i32_0 = arith.constant 0 : i32
    %c0_i32_1 = arith.constant 0 : i32
    %c0_i32_2 = arith.constant 0 : i32
    return %c0_i32, %c0_i32_0, %c0_i32_1 : i32, i32, i32
  }
  func.func @transform_2(%arg0: i32) -> (i32, i32) {
    %c0_i32 = arith.constant 0 : i32
    %c0_i32_0 = arith.constant 0 : i32
    %c0_i32_1 = arith.constant 0 : i32
    return %c0_i32, %c0_i32_0 : i32, i32
  }
  func.func @transform_3(%arg0: i32) -> (i32, i32, i32) {
    %c0_i32 = arith.constant 0 : i32
    %c0_i32_0 = arith.constant 0 : i32
    %c0_i32_1 = arith.constant 0 : i32
    %c0_i32_2 = arith.constant 0 : i32
    return %c0_i32, %c0_i32_0, %c0_i32_1 : i32, i32, i32
  }
  func.func @transform_4(%arg0: i32) -> (i32, i32) {
    %c0_i32 = arith.constant 0 : i32
    %c0_i32_0 = arith.constant 0 : i32
    %c0_i32_1 = arith.constant 0 : i32
    return %c0_i32, %c0_i32_0 : i32, i32
  }
  func.func @transform_5(%arg0: i32) -> (i32, i32) {
    %c0_i32 = arith.constant 0 : i32
    %c0_i32_0 = arith.constant 0 : i32
    %c0_i32_1 = arith.constant 0 : i32
    return %c0_i32, %c0_i32_0 : i32, i32
  }
  func.func @transform_6(%arg0: i32) -> (i32, i32) {
    %c0_i32 = arith.constant 0 : i32
    %c0_i32_0 = arith.constant 0 : i32
    %c0_i32_1 = arith.constant 0 : i32
    return %c0_i32, %c0_i32_0 : i32, i32
  }
  func.func @transform_7(%arg0: i32) -> (i32, i32, i32) {
    %c0_i32 = arith.constant 0 : i32
    %c0_i32_0 = arith.constant 0 : i32
    %c0_i32_1 = arith.constant 0 : i32
    return %arg0, %c0_i32, %c0_i32_0 : i32, i32, i32
  }
}

</mosaic_0001>

<bundles_post_ra>
// kernel: tpu_custom_call.1
= control target key start
LH: loop header
LB: loop body
LE: loop exit
PB: predicated region body
PF: predicated region fallthrough
CT: control target
= control target key end

     0   :  { %s13817_s24 = smov 0   ;;  %s17683_s0 = inlined_call_operand.vmem [shape: bf16[2,16,16,4], index: 0, kind: input, shape index: {}]   ;;  %s17684_s1 = inlined_call_operand.vmem [shape: bf16[9,4,8], index: 1, kind: input, shape index: {}]   ;;  %s17685_s2 = inlined_call_operand.vmem [shape: f32[1,8], index: 2, kind: input, shape index: {}]   ;;  %s17686_s3 = inlined_call_operand.vmem [shape: bf16[9,8,8], index: 3, kind: input, shape index: {}]   ;;  %s17687_s4 = inlined_call_operand.vmem [shape: f32[1,8], index: 4, kind: input, shape index: {}]   ;;  %s17688_s5 = inlined_call_operand.vmem [shape: bf16[4,8], index: 5, kind: input, shape index: {}]   ;;  %s17689_s6 = inlined_call_operand.vmem [shape: f32[1,8], index: 6, kind: input, shape index: {}]   ;;  %s17690_s7 = inlined_call_operand.vmem [shape: f32[2,256,8], index: 7, kind: output, shape index: {}]  }
   0x1 LB: > { %s11225_s25 = sadd.s32 4294967295, %s13774_s24   ;;  %p11229_p0 = scmp.ge.s32.totalorder %s13774_s24, 1  ;;  %s13774_s24 = sphi %s13817_s24, %s17_s24  }
   0x2   : > { %p237_p1 = scmp.lt.s32.totalorder %s13774_s24, 3 }
   0x4   : > { %p238_p2 = pnand %p11229_p0, %p237_p1 }
   0x6   : > { %241 = sbr.rel (%p238_p2) target bundleno = 1791 (0x6ff), region = 48 }
   0xd   : > { %v11234_v0 = vld [vmem:[%s17684_s1 + $0x2] sm:$0x3]  ;;  %vm1526_vm0 = vcmask 1041408   ;;  %vm280_vm1 = vcmask 27648   ;;  %vm283_vm2 = vcmask 24576   ;;  %v17691_v2 = vmov 0  }
   0xe   : > { %13604 = vmatprep.subr.msk.bf16.mxu0 %vm1526_vm0, %v11234_v0  ;;  %v1528_v1 = vsel %vm1526_vm0, %v11234_v0, 0  ;;  %281 = vst.msk [vmem:[#allocation2] sm:$0xf] %vm280_vm1, %v17691_v2  ;;  %282 = vst.msk [vmem:[#allocation2 + $0x4] sm:$0xf] %vm280_vm1, %v17691_v2  ;;  %vm402_vm5 = vcmask 60416  }
   0xf   : > { %284 = vst.msk [vmem:[#allocation2 + $0x8] sm:$0x1] %vm283_vm2, %v17691_v2  ;;  %vm290_vm3 = vsmask.f32 256  ;;  %vm346_vm4 = vsmask.f32 7938  ;;  %12349 = vmatpush3.bf16.msra.mxu0 %v1528_v1 }
  0x10   : > { %286 = vst.msk [vmem:[#allocation2 + $0xcc] sm:$0xf] %vm280_vm1, %v17691_v2  ;;  %287 = vst.msk [vmem:[#allocation2 + $0xd0] sm:$0xf] %vm280_vm1, %v17691_v2  ;;  %p269_p3 = scmp.lt.s32.totalorder %s11225_s25, 1  ;;  %v17800_v4 = vmov 0 }
  0x11   : > { %288 = vst.msk [vmem:[#allocation2 + $0xd4] sm:$0x1] %vm283_vm2, %v17691_v2  ;;  %vm13844_vm6 = vmand %vm283_vm2, %vm290_vm3  ;;  %v13867_v5 = vld [vmem:[%s17684_s1] sm:$0x3]  ;;  %v295_v6 = vld [vmem:[#allocation2 + $0xc] sm:$0x1] }
  0x12   : > { %403 = vst.msk [vmem:[#allocation3] sm:$0xf] %vm402_vm5, %v17691_v2  ;;  %404 = vst.msk [vmem:[#allocation3 + $0x4] sm:$0xf] %vm402_vm5, %v17691_v2  ;;  %13605 = vmatprep.subr.msk.bf16.mxu0 %vm1526_vm0, %v13867_v5  ;;  %s18097_s25 = smov (!%p269_p3, %s11225_s25), 1  ;;  %v296_v7 = vsel %vm13844_vm6, 0, %v295_v6 }
  0x13   : > { %408 = vst.msk [vmem:[#allocation3 + $0xcc] sm:$0xf] %vm402_vm5, %v17691_v2  ;;  %409 = vst.msk [vmem:[#allocation3 + $0xd0] sm:$0xf] %vm402_vm5, %v17691_v2  ;;  %v351_v8 = vld [vmem:[#allocation2 + $0x14] sm:$0x1] }
  0x14   : > { %vm13860_vm7 = vmand %vm283_vm2, %vm346_vm4  ;;  %297 = vst [vmem:[#allocation2 + $0xc] sm:$0x1] %v296_v7  ;;  %v298_v10 = vld [vmem:[#allocation2 + $0x18] sm:$0x1]  ;;  %v354_v11 = vld [vmem:[#allocation2 + $0x20] sm:$0x1] }
  0x15   : > { %v17801_v4 = vsel %vm13860_vm7, 4294967295, %v17800_v4  ;;  %v352_v9 = vsel %vm13860_vm7, 0, %v351_v8  ;;  %s11991_s30 = sshll.u32 %s18097_s25, 7  ;;  %v299_v12 = vsel %vm13844_vm6, 0, %v298_v10  ;;  %v355_v13 = vsel %vm13860_vm7, 0, %v354_v11  ;;  %vm13903_vm10 = vmand %vm280_vm1, %vm346_vm4 }
  0x16   : > { %17802 = vst [vmem:[#allocation4_spill] sm:$0xff] %v17801_v4  ;;  %353 = vst [vmem:[#allocation2 + $0x14] sm:$0x1] %v352_v9  ;;  %v301_v14 = vld [vmem:[#allocation2 + $0x24] sm:$0x1]  ;;  %s13887_s10 = scalar_lea.vmem %s17683_s0, %s11991_s30  ;;  %v17805_v44 = vmov 0 }
  0x17   : > { %vm554_vm8 = vsmask.f32 4368  ;;  %300 = vst [vmem:[#allocation2 + $0x18] sm:$0x1] %v299_v12  ;;  %356 = vst [vmem:[#allocation2 + $0x20] sm:$0x1] %v355_v13 }
  0x18   : > { %v302_v15 = vsel %vm13844_vm6, 0, %v301_v14  ;;  %v292_v16 = vld [vmem:[#allocation2] sm:$0x1]  ;;  %v348_v17 = vld [vmem:[#allocation2 + $0x8] sm:$0x1]  ;;  %vm13912_vm11 = vmor %vm290_vm3, %vm554_vm8  ;;  %vm1477_vm14 = vcmask 31744  }
  0x19   : > { %v992_v18 = vld [vmem:[#allocation2 + $0x4] sm:$0xf]  ;;  %303 = vst [vmem:[#allocation2 + $0x24] sm:$0x1] %v302_v15  ;;  %v357_v19 = vld [vmem:[#allocation2 + $0x2c] sm:$0x1] }
  0x1a   : > { %v293_v20 = vsel %vm13844_vm6, 0, %v292_v16  ;;  %v349_v21 = vsel %vm13860_vm7, 0, %v348_v17  ;;  %vm1040_vm9 = vsmask.f32 3328  ;;  %v1053_v22 = vshll.u32 %v992_v18, 16 }
  0x1b   : > { %v1057_v23 = vshrl.u32 %v992_v18, 16  ;;  %v522_v24 = vld [vmem:[%s13887_s10] sm:$0xf]  ;;  %294 = vst [vmem:[#allocation2] sm:$0x1] %v293_v20  ;;  %v358_v43 = vsel %vm13860_vm7, 0, %v357_v19 }
  0x1c   : > { %350 = vst [vmem:[#allocation2 + $0x8] sm:$0x1] %v349_v21  ;;  %v523_v25 = vld [vmem:[%s13887_s10 + $0x4] sm:$0xf]  ;;  %v557_v26 = vshrl.u32 %v522_v24, 16  ;;  %v560_v27 = vshll.u32 %v522_v24, 16 }
  0x1d   : > { %v524_v28 = vld [vmem:[%s13887_s10 + $0x8] sm:$0xf]  ;;  %v13898_v29 = vrot.slane %v1053_v22, 5  ;;  %v1059_v30 = vrot.slane %v1057_v23, 4  ;;  %v565_v31 = vshrl.u32 %v523_v25, 16  ;;  %v568_v32 = vshll.u32 %v523_v25, 16 }
  0x1e   : > { %v525_v33 = vld [vmem:[%s13887_s10 + $0xc] sm:$0xf]  ;;  %v559_v34 = vrot.slane %v557_v26, 7  ;;  %v574_v35 = vshrl.u32 %v524_v28, 16  ;;  %v577_v36 = vshll.u32 %v524_v28, 16  ;;  %v17806_v44 = vsel %vm13912_vm11, 4294967295, %v17805_v44 }
  0x1f   : > { %v582_v37 = vshrl.u32 %v525_v33, 16  ;;  %v1060_v39 = vor.u32 %v1059_v30, %v13898_v29  ;;  %v567_v40 = vrot.slane %v565_v31, 7  ;;  %v879_v41 = vld [vmem:[#allocation2 + $0xc] sm:$0xf]  ;;  %v585_v42 = vshll.u32 %v525_v33, 16  ;;  %17807 = vst [vmem:[#allocation5_spill] sm:$0xff] %v17806_v44 }
  0x20   : > { %v562_v45 = vor.u32 %v560_v27, %v559_v34  ;;  %v563_v46 = vrot.slane %v559_v34, 4  ;;  %v883_v47 = vld [vmem:[#allocation2 + $0x14] sm:$0x1]  ;;  %v576_v48 = vrot.slane %v574_v35, 7  ;;  %359 = vst [vmem:[#allocation2 + $0x2c] sm:$0x1] %v358_v43 }
  0x21   : > { %v584_v49 = vrot.slane %v582_v37, 7  ;;  %vm1041_vm12 = vsmask.f32 7440  ;;  %v570_v50 = vor.u32 %v568_v32, %v567_v40  ;;  %v572_v51 = vrot.slane %v567_v40, 4  ;;  %v526_v52 = vld [vmem:[%s13887_s10 + $0x10] sm:$0xf] }
  0x22   : > { %v880_v53 = vsel %vm13903_vm10, %v562_v45, %v879_v41  ;;  %v579_v54 = vor.u32 %v577_v36, %v576_v48  ;;  %v580_v55 = vrot.slane %v576_v48, 4  ;;  %v886_v57 = vld [vmem:[#allocation2 + $0x18] sm:$0xf]  ;;  %v890_v58 = vld [vmem:[#allocation2 + $0x20] sm:$0x1]  ;;  %v591_v1 = vshrl.u32 %v526_v52, 16  ;;  %vm13935_vm13 = vmor %vm1040_vm9, %vm1041_vm12 }
  0x23   : > { %v587_v56 = vor.u32 %v585_v42, %v584_v49  ;;  %v304_v59 = vld [vmem:[#allocation2 + $0x30] sm:$0x1]  ;;  %v991_v60 = vld [vmem:[#allocation2] sm:$0xf]  ;;  %v1024_v61 = vld [vmem:[#allocation2 + $0x8] sm:$0x1]  ;;  %v571_v62 = vsel %vm13912_vm11, %v563_v46, %v570_v50  ;;  %v884_v63 = vsel %vm13844_vm6, %v572_v51, %v883_v47 }
  0x24   : > { %881 = vst [vmem:[#allocation2 + $0xc] sm:$0xf] %v880_v53  ;;  %v589_v0 = vrot.slane %v584_v49, 4  ;;  %v1044_v6 = vshrl.u32 %v991_v60, 16  ;;  %v1047_v7 = vshll.u32 %v991_v60, 16  ;;  %v1061_v8 = vrot.slane %v1060_v39, 4 }
  0x25   : > { %v1063_v9 = vshll.u32 %v1024_v61, 16  ;;  %882 = vst.msk [vmem:[#allocation2 + $0x10] sm:$0xf] %vm280_vm1, %v571_v62  ;;  %885 = vst [vmem:[#allocation2 + $0x14] sm:$0x1] %v884_v63  ;;  %v588_v11 = vsel %vm13912_vm11, %v580_v55, %v587_v56  ;;  %v887_v12 = vsel %vm13903_vm10, %v579_v54, %v886_v57  ;;  %v13931_v14 = vrot.slane %v591_v1, 7 }
  0x26   : > { %v527_v10 = vld [vmem:[%s13887_s10 + $0x14] sm:$0xf]  ;;  %v891_v13 = vsel %vm13844_vm6, %v589_v0, %v890_v58  ;;  %v893_v15 = vld [vmem:[#allocation2 + $0x24] sm:$0xf]  ;;  %v360_v16 = vld [vmem:[#allocation2 + $0x38] sm:$0x1] }
  0x27   : > { %v1046_v18 = vrot.slane %v1044_v6, 4  ;;  %v1049_v19 = vrot.slane %v1047_v7, 5  ;;  %v1065_v20 = vrot.slane %v1063_v9, 5  ;;  %888 = vst [vmem:[#allocation2 + $0x18] sm:$0xf] %v887_v12  ;;  %v594_v21 = vshll.u32 %v526_v52, 16 }
  0x28   : > { %889 = vst.msk [vmem:[#allocation2 + $0x1c] sm:$0xf] %vm280_vm1, %v588_v11  ;;  %892 = vst [vmem:[#allocation2 + $0x20] sm:$0x1] %v891_v13  ;;  %v13941_v22 = vld [vmem:[%s13887_s10 + $0x18] sm:$0xf] }
  0x29   : > { %v599_v23 = vshrl.u32 %v527_v10, 16  ;;  %v602_v24 = vshll.u32 %v527_v10, 16  ;;  %v305_v25 = vsel %vm13844_vm6, 0, %v304_v59  ;;  %v307_v26 = vld [vmem:[#allocation2 + $0x3c] sm:$0x1]  ;;  %v1050_v27 = vor.u32 %v1049_v19, %v1046_v18 }
  0x2a   : > { %v13947_v28 = vsel %vm1526_vm0, %v13867_v5, 0  ;;  %v596_v30 = vor.u32 %v594_v21, %v13931_v14  ;;  %306 = vst [vmem:[#allocation2 + $0x30] sm:$0x1] %v305_v25  ;;  %v361_v31 = vsel %vm13860_vm7, 0, %v360_v16  ;;  %v1066_v32 = vsel %vm13935_vm13, %v1061_v8, %v1065_v20  ;;  %v13956_v35 = vld [vmem:[%s13887_s10 + $0x1c] sm:$0xf] }
  0x2b   : > { %v597_v33 = vrot.slane %v13931_v14, 4  ;;  %v601_v34 = vrot.slane %v599_v23, 7  ;;  %362 = vst [vmem:[#allocation2 + $0x38] sm:$0x1] %v361_v31  ;;  %v608_v36 = vshrl.u32 %v13941_v22, 16  ;;  %v1051_v37 = vrot.slane %v1050_v27, 4 }
  0x2c   : > { %v13959_v5 = vld [vmem:[#allocation2 + $0xc] sm:$0xf]  ;;  %v894_v39 = vsel %vm13903_vm10, %v596_v30, %v893_v15  ;;  %v611_v40 = vshll.u32 %v13941_v22, 16  ;;  %v308_v41 = vsel %vm13844_vm6, 0, %v307_v26  ;;  %v13966_v42 = vld [vmem:[#allocation2 + $0x10] sm:$0xf] }
  0x2d   : > { %v1025_v43 = vld [vmem:[#allocation2 + $0x14] sm:$0x1]  ;;  %v1068_v45 = vshrl.u32 %v13959_v5, 16  ;;  %v1071_v46 = vshll.u32 %v13959_v5, 16  ;;  %v604_v47 = vor.u32 %v602_v24, %v601_v34  ;;  %895 = vst [vmem:[#allocation2 + $0x24] sm:$0xf] %v894_v39  ;;  %v1056_v48 = vsel %vm13935_vm13, %v1051_v37, %v13898_v29 }
  0x2e   : > { %309 = vst [vmem:[#allocation2 + $0x3c] sm:$0x1] %v308_v41  ;;  %v1077_v49 = vshll.u32 %v13966_v42, 16  ;;  %v1081_v50 = vshrl.u32 %v13966_v42, 16  ;;  %v1087_v51 = vshll.u32 %v1025_v43, 16  ;;  %v11235_v52 = vcombine.low %v1056_v48, %v1066_v32 }
  0x2f   : > { %v1070_v53 = vrot.slane %v1068_v45, 4  ;;  %v1073_v54 = vrot.slane %v1071_v46, 5  ;;  %v995_v55 = vld [vmem:[#allocation2 + $0x18] sm:$0xf]  ;;  %v616_v56 = vshrl.u32 %v13956_v35, 16  ;;  %v619_v61 = vshll.u32 %v13956_v35, 16 }
  0x30   : > { %v1079_v57 = vrot.slane %v1077_v49, 5  ;;  %v1083_v58 = vrot.slane %v1081_v50, 4  ;;  %v1089_v59 = vrot.slane %v1087_v51, 5  ;;  %v996_v60 = vld [vmem:[#allocation2 + $0x1c] sm:$0xf]  ;;  %12350 = vmatprep.mubr.msk.bf16.mxu0 %vm1477_vm14, %v11235_v52  ;;  %v1092_v63 = vshrl.u32 %v995_v55, 16 }
  0x31   : > { %v1074_v29 = vor.u32 %v1073_v54, %v1070_v53  ;;  %v1026_v62 = vld [vmem:[#allocation2 + $0x20] sm:$0x1]  ;;  %v1095_v0 = vshll.u32 %v995_v55, 16  ;;  %v1101_v1 = vshll.u32 %v996_v60, 16  ;;  %v1105_v7 = vshrl.u32 %v996_v60, 16 }
  0x32   : > { %v1084_v6 = vor.u32 %v1083_v58, %v1079_v57  ;;  %v1111_v8 = vshll.u32 %v1026_v62, 16  ;;  %v605_v9 = vsel %vm13912_vm11, %v597_v33, %v604_v47  ;;  %v1094_v11 = vrot.slane %v1092_v63, 4  ;;  %v897_v14 = vld [vmem:[#allocation2 + $0x2c] sm:$0x1]  ;;  %v363_v31 = vld [vmem:[#allocation2 + $0x44] sm:$0x1] }
  0x33   : > { %v1075_v10 = vrot.slane %v1074_v29, 4  ;;  %v1097_v12 = vrot.slane %v1095_v0, 5  ;;  %v1103_v13 = vrot.slane %v1101_v1, 5  ;;  %896 = vst.msk [vmem:[#allocation2 + $0x28] sm:$0xf] %vm280_vm1, %v605_v9  ;;  %v1107_v16 = vrot.slane %v1105_v7, 4 }
  0x34   : > { %v1085_v15 = vrot.slane %v1084_v6, 4  ;;  %v1113_v18 = vrot.slane %v1111_v8, 5  ;;  %v606_v19 = vrot.slane %v601_v34, 4  ;;  %v997_v20 = vld [vmem:[#allocation2 + $0x24] sm:$0xf]  ;;  %v610_v30 = vrot.slane %v608_v36, 7 }
  0x35   : > { %v1080_v21 = vsel %vm13935_vm13, %v1075_v10, %v1079_v57  ;;  %v1098_v22 = vor.u32 %v1097_v12, %v1094_v11  ;;  %v1116_v23 = vshrl.u32 %v997_v20, 16  ;;  %v1119_v24 = vshll.u32 %v997_v20, 16  ;;  %v530_v32 = vld [vmem:[%s13887_s10 + $0x20] sm:$0xf]  ;;  %v900_v39 = vld [vmem:[#allocation2 + $0x30] sm:$0xf] }
  0x36   : > { %v1090_v25 = vsel %vm13935_vm13, %v1085_v15, %v1089_v59  ;;  %v1108_v26 = vor.u32 %v1107_v16, %v1103_v13  ;;  %v898_v27 = vsel %vm13844_vm6, %v606_v19, %v897_v14  ;;  %v613_v43 = vor.u32 %v611_v40, %v610_v30  ;;  %v904_v36 = vld [vmem:[#allocation2 + $0x38] sm:$0x1]  ;;  %v531_v50 = vld [vmem:[%s13887_s10 + $0x24] sm:$0xf]  ;;  %v366_v29 = vld [vmem:[#allocation2 + $0x50] sm:$0x1] }
  0x37   : > { %v11236_v33 = vcombine.low %v1080_v21, %v1090_v25  ;;  %v1099_v34 = vrot.slane %v1098_v22, 4  ;;  %899 = vst [vmem:[#allocation2 + $0x2c] sm:$0x1] %v898_v27  ;;  %v1118_v35 = vrot.slane %v1116_v23, 4  ;;  %v1121_v37 = vrot.slane %v1119_v24, 5 }
  0x38   : > { %v1109_v41 = vrot.slane %v1108_v26, 4  ;;  %v614_v45 = vrot.slane %v610_v30, 4  ;;  %v618_v46 = vrot.slane %v616_v56, 7  ;;  %v364_v49 = vsel %vm13860_vm7, 0, %v363_v31  ;;  %v310_v56 = vld [vmem:[#allocation2 + $0x48] sm:$0x1] }
  0x39   : > { %12351 = vmatmul.mubr.msk.bf16.vlgmr.msra.gmra.mrb[0].mxu0 %vm1477_vm14, %v11236_v33  ;;  %v1104_v47 = vsel %vm13935_vm13, %v1099_v34, %v1103_v13  ;;  %v1122_v48 = vor.u32 %v1121_v37, %v1118_v35  ;;  %v625_v51 = vshrl.u32 %v530_v32, 16  ;;  %v901_v55 = vsel %vm13903_vm10, %v613_v43, %v900_v39  ;;  %365 = vst [vmem:[#allocation2 + $0x44] sm:$0x1] %v364_v49  ;;  %v907_v0 = vld [vmem:[#allocation2 + $0x3c] sm:$0xf] }
  0x3a   : > { %12383 = vmatpush3.bf16.msra.mxu0 %v13947_v28  ;;  %v1114_v52 = vsel %vm13935_vm13, %v1109_v41, %v1113_v18  ;;  %v998_v40 = vld [vmem:[#allocation2 + $0x28] sm:$0xf]  ;;  %v621_v53 = vor.u32 %v619_v61, %v618_v46  ;;  %v623_v54 = vrot.slane %v618_v46, 4  ;;  %902 = vst [vmem:[#allocation2 + $0x30] sm:$0xf] %v901_v55  ;;  %v628_v63 = vshll.u32 %v530_v32, 16 }
  0x3b   : > { %v11237_v57 = vcombine.low %v1104_v47, %v1114_v52  ;;  %v1123_v58 = vrot.slane %v1122_v48, 4  ;;  %v1125_v59 = vshll.u32 %v998_v40, 16  ;;  %v1129_v60 = vshrl.u32 %v998_v40, 16  ;;  %v532_v1 = vld [vmem:[%s13887_s10 + $0x28] sm:$0xf] }
  0x3c   : > { %v622_v28 = vsel %vm13912_vm11, %v614_v45, %v621_v53  ;;  %v905_v61 = vsel %vm13844_vm6, %v623_v54, %v904_v36  ;;  %v627_v62 = vrot.slane %v625_v51, 7  ;;  %v633_v8 = vshrl.u32 %v531_v50, 16  ;;  %v533_v10 = vld [vmem:[%s13887_s10 + $0x2c] sm:$0xf]  ;;  %v313_v21 = vld [vmem:[#allocation2 + $0x54] sm:$0x1] }
  0x3d   : > { %12354 = vmatprep.mubr.msk.bf16.mxu0 %vm1477_vm14, %v11237_v57  ;;  %v1127_v6 = vrot.slane %v1125_v59, 5  ;;  %v1131_v7 = vrot.slane %v1129_v60, 4  ;;  %903 = vst.msk [vmem:[#allocation2 + $0x34] sm:$0xf] %vm280_vm1, %v622_v28  ;;  %906 = vst [vmem:[#allocation2 + $0x38] sm:$0x1] %v905_v61 }
  0x3e   : > { %v636_v9 = vshll.u32 %v531_v50, 16  ;;  %v1027_v11 = vld [vmem:[#allocation2 + $0x2c] sm:$0x1]  ;;  %v630_v12 = vor.u32 %v628_v63, %v627_v62  ;;  %v631_v13 = vrot.slane %v627_v62, 4  ;;  %v311_v14 = vsel %vm13844_vm6, 0, %v310_v56 }
  0x3f   : > { %v367_v15 = vsel %vm13860_vm7, 0, %v366_v29  ;;  %v1128_v16 = vsel %vm13935_vm13, %v1123_v58, %v1127_v6  ;;  %v1132_v18 = vor.u32 %v1131_v7, %v1127_v6  ;;  %v1135_v19 = vshll.u32 %v1027_v11, 16  ;;  %312 = vst [vmem:[#allocation2 + $0x48] sm:$0x1] %v311_v14  ;;  %v369_v55 = vld [vmem:[#allocation2 + $0x5c] sm:$0x1] }
  0x40   : > { %v635_v20 = vrot.slane %v633_v8, 7  ;;  %368 = vst [vmem:[#allocation2 + $0x50] sm:$0x1] %v367_v15  ;;  %v908_v22 = vsel %vm13903_vm10, %v630_v12, %v907_v0  ;;  %v642_v23 = vshrl.u32 %v532_v1, 16  ;;  %v645_v24 = vshll.u32 %v532_v1, 16 }
  0x41   : > { %v650_v25 = vshrl.u32 %v533_v10, 16  ;;  %v1133_v26 = vrot.slane %v1132_v18, 4  ;;  %v1137_v27 = vrot.slane %v1135_v19, 5  ;;  %909 = vst [vmem:[#allocation2 + $0x3c] sm:$0xf] %v908_v22  ;;  %v653_v37 = vshll.u32 %v533_v10, 16 }
  0x42   : > { %v638_v30 = vor.u32 %v636_v9, %v635_v20  ;;  %v640_v31 = vrot.slane %v635_v20, 4  ;;  %v911_v32 = vld [vmem:[#allocation2 + $0x44] sm:$0x1]  ;;  %v999_v33 = vld [vmem:[#allocation2 + $0x30] sm:$0xf]  ;;  %v644_v34 = vrot.slane %v642_v23, 7  ;;  %v11268_v29 = vcombine.low %v13959_v5, %v13966_v42 }
  0x43   : > { %v652_v35 = vrot.slane %v650_v25, 7  ;;  %v314_v39 = vsel %vm13844_vm6, 0, %v313_v21  ;;  %v1138_v41 = vsel %vm13935_vm13, %v1133_v26, %v1137_v27  ;;  %v1140_v43 = vshrl.u32 %v999_v33, 16  ;;  %v534_v0 = vld [vmem:[%s13887_s10 + $0x30] sm:$0xf] }
  0x44   : > { %v1143_v45 = vshll.u32 %v999_v33, 16  ;;  %v639_v46 = vsel %vm13912_vm11, %v631_v13, %v638_v30  ;;  %315 = vst [vmem:[#allocation2 + $0x54] sm:$0x1] %v314_v39  ;;  %v11238_v47 = vcombine.low %v1128_v16, %v1138_v41  ;;  %v1000_v48 = vld [vmem:[#allocation2 + $0x34] sm:$0xf]  ;;  %v912_v49 = vsel %vm13844_vm6, %v640_v31, %v911_v32 }
  0x45   : > { %v1028_v36 = vld [vmem:[#allocation2 + $0x38] sm:$0x1]  ;;  %910 = vst.msk [vmem:[#allocation2 + $0x40] sm:$0xf] %vm280_vm1, %v639_v46  ;;  %v647_v50 = vor.u32 %v645_v24, %v644_v34  ;;  %v648_v51 = vrot.slane %v644_v34, 4  ;;  %v1142_v52 = vrot.slane %v1140_v43, 4  ;;  %v655_v57 = vor.u32 %v653_v37, %v652_v35 }
  0x46   : > { %v1145_v40 = vrot.slane %v1143_v45, 5  ;;  %v1149_v53 = vshll.u32 %v1000_v48, 16  ;;  %v1153_v54 = vshrl.u32 %v1000_v48, 16  ;;  %913 = vst [vmem:[#allocation2 + $0x44] sm:$0x1] %v912_v49  ;;  %12355 = vmatmul.mubr.msk.bf16.gmra.mrb[4].mxu0 %vm1477_vm14, %v11238_v47  ;;  %v1159_v56 = vshll.u32 %v1028_v36, 16 }
  0x47   : > { %v657_v58 = vrot.slane %v652_v35, 4  ;;  %v914_v59 = vld [vmem:[#allocation2 + $0x48] sm:$0xf]  ;;  %v918_v60 = vld [vmem:[#allocation2 + $0x50] sm:$0x1]  ;;  %v656_v8 = vsel %vm13912_vm11, %v648_v51, %v655_v57  ;;  %v370_v10 = vsel %vm13860_vm7, 0, %v369_v55 }
  0x48   : > { %v1146_v28 = vor.u32 %v1145_v40, %v1142_v52  ;;  %v1151_v61 = vrot.slane %v1149_v53, 5  ;;  %v1155_v62 = vrot.slane %v1153_v54, 4  ;;  %v915_v63 = vsel %vm13903_vm10, %v647_v50, %v914_v59  ;;  %v535_v1 = vld [vmem:[%s13887_s10 + $0x34] sm:$0xf]  ;;  %v1001_v7 = vld [vmem:[#allocation2 + $0x3c] sm:$0xf] }
  0x49   : > { %v1161_v6 = vrot.slane %v1159_v56, 5  ;;  %916 = vst [vmem:[#allocation2 + $0x48] sm:$0xf] %v915_v63  ;;  %v919_v9 = vsel %vm13844_vm6, %v657_v58, %v918_v60  ;;  %v1164_v13 = vshrl.u32 %v1001_v7, 16  ;;  %v1167_v14 = vshll.u32 %v1001_v7, 16 }
  0x4a   : > { %v1147_v11 = vrot.slane %v1146_v28, 4  ;;  %v1156_v12 = vor.u32 %v1155_v62, %v1151_v61  ;;  %917 = vst.msk [vmem:[#allocation2 + $0x4c] sm:$0xf] %vm280_vm1, %v656_v8  ;;  %920 = vst [vmem:[#allocation2 + $0x50] sm:$0x1] %v919_v9  ;;  %v659_v15 = vshrl.u32 %v534_v0, 16 }
  0x4b   : > { %371 = vst [vmem:[#allocation2 + $0x5c] sm:$0x1] %v370_v10  ;;  %v662_v16 = vshll.u32 %v534_v0, 16  ;;  %v667_v18 = vshrl.u32 %v535_v1, 16  ;;  %v670_v19 = vshll.u32 %v535_v1, 16  ;;  %v1166_v24 = vrot.slane %v1164_v13, 4 }
  0x4c   : > { %v316_v20 = vld [vmem:[#allocation2 + $0x60] sm:$0x1]  ;;  %v1152_v21 = vsel %vm13935_vm13, %v1147_v11, %v1151_v61  ;;  %v1157_v22 = vrot.slane %v1156_v12, 4  ;;  %v1169_v25 = vrot.slane %v1167_v14, 5  ;;  %v661_v31 = vrot.slane %v659_v15, 7 }
  0x4d   : > { %v1002_v23 = vld [vmem:[#allocation2 + $0x40] sm:$0xf]  ;;  %v1029_v26 = vld [vmem:[#allocation2 + $0x44] sm:$0x1]  ;;  %v669_v32 = vrot.slane %v667_v18, 7  ;;  %v317_v39 = vsel %vm13844_vm6, 0, %v316_v20 }
  0x4e   : > { %v1173_v27 = vshll.u32 %v1002_v23, 16  ;;  %v1177_v30 = vshrl.u32 %v1002_v23, 16  ;;  %v1162_v33 = vsel %vm13935_vm13, %v1157_v22, %v1161_v6  ;;  %v1170_v34 = vor.u32 %v1169_v25, %v1166_v24  ;;  %v921_v37 = vld [vmem:[#allocation2 + $0x54] sm:$0xf]  ;;  %318 = vst [vmem:[#allocation2 + $0x60] sm:$0x1] %v317_v39 }
  0x4f   : > { %v1183_v35 = vshll.u32 %v1029_v26, 16  ;;  %v11239_v41 = vcombine.low %v1152_v21, %v1162_v33  ;;  %v664_v46 = vor.u32 %v662_v16, %v661_v31  ;;  %v665_v49 = vrot.slane %v661_v31, 4  ;;  %v372_v51 = vld [vmem:[#allocation2 + $0x68] sm:$0x1]  ;;  %v536_v52 = vld [vmem:[%s13887_s10 + $0x38] sm:$0xf] }
  0x50   : > { %v1175_v43 = vrot.slane %v1173_v27, 5  ;;  %v1179_v45 = vrot.slane %v1177_v30, 4  ;;  %v1171_v47 = vrot.slane %v1170_v34, 4  ;;  %v1003_v36 = vld [vmem:[#allocation2 + $0x48] sm:$0xf]  ;;  %v672_v50 = vor.u32 %v670_v19, %v669_v32 }
  0x51   : > { %v1185_v48 = vrot.slane %v1183_v35, 5  ;;  %12358 = vmatprep.mubr.msk.bf16.mxu0 %vm1477_vm14, %v11239_v41  ;;  %v1004_v53 = vld [vmem:[#allocation2 + $0x4c] sm:$0xf]  ;;  %v1030_v54 = vld [vmem:[#allocation2 + $0x50] sm:$0x1]  ;;  %v1188_v55 = vshrl.u32 %v1003_v36, 16  ;;  %v922_v57 = vsel %vm13903_vm10, %v664_v46, %v921_v37 }
  0x52   : > { %v1180_v40 = vor.u32 %v1179_v45, %v1175_v43  ;;  %v1191_v56 = vshll.u32 %v1003_v36, 16  ;;  %v1176_v58 = vsel %vm13935_vm13, %v1171_v47, %v1175_v43  ;;  %v1197_v59 = vshll.u32 %v1004_v53, 16  ;;  %923 = vst [vmem:[#allocation2 + $0x54] sm:$0xf] %v922_v57  ;;  %v537_v61 = vld [vmem:[%s13887_s10 + $0x3c] sm:$0xf] }
  0x53   : > { %v1201_v60 = vshrl.u32 %v1004_v53, 16  ;;  %v1207_v28 = vshll.u32 %v1030_v54, 16  ;;  %v1190_v63 = vrot.slane %v1188_v55, 4  ;;  %v673_v1 = vsel %vm13912_vm11, %v665_v49, %v672_v50  ;;  %v925_v6 = vld [vmem:[#allocation2 + $0x5c] sm:$0x1] }
  0x54   : > { %v1181_v62 = vrot.slane %v1180_v40, 4  ;;  %v1193_v0 = vrot.slane %v1191_v56, 5  ;;  %v1199_v7 = vrot.slane %v1197_v59, 5  ;;  %v674_v10 = vrot.slane %v669_v32, 4  ;;  %924 = vst.msk [vmem:[#allocation2 + $0x58] sm:$0xf] %vm280_vm1, %v673_v1 }
  0x55   : > { %v1203_v8 = vrot.slane %v1201_v60, 4  ;;  %v1209_v9 = vrot.slane %v1207_v28, 5  ;;  %v319_v11 = vld [vmem:[#allocation2 + $0x6c] sm:$0x1]  ;;  %v373_v14 = vsel %vm13860_vm7, 0, %v372_v51  ;;  %v676_v15 = vshrl.u32 %v536_v52, 16 }
  0x56   : > { %v1186_v12 = vsel %vm13935_vm13, %v1181_v62, %v1185_v48  ;;  %v1194_v13 = vor.u32 %v1193_v0, %v1190_v63  ;;  %v375_v16 = vld [vmem:[#allocation2 + $0x74] sm:$0x1]  ;;  %v538_v18 = vld [vmem:[%s13887_s10 + $0x40] sm:$0xf]  ;;  %v926_v21 = vsel %vm13844_vm6, %v674_v10, %v925_v6  ;;  %374 = vst [vmem:[#allocation2 + $0x68] sm:$0x1] %v373_v14 }
  0x57   : > { %v11240_v19 = vcombine.low %v1176_v58, %v1186_v12  ;;  %v1204_v20 = vor.u32 %v1203_v8, %v1199_v7  ;;  %v679_v22 = vshll.u32 %v536_v52, 16  ;;  %927 = vst [vmem:[#allocation2 + $0x5c] sm:$0x1] %v926_v21  ;;  %v678_v24 = vrot.slane %v676_v15, 7  ;;  %v928_v30 = vld [vmem:[#allocation2 + $0x60] sm:$0xf] }
  0x58   : > { %v1195_v23 = vrot.slane %v1194_v13, 4  ;;  %v684_v25 = vshrl.u32 %v537_v61, 16  ;;  %v687_v26 = vshll.u32 %v537_v61, 16  ;;  %v320_v31 = vsel %vm13844_vm6, 0, %v319_v11  ;;  %v539_v47 = vld [vmem:[%s13887_s10 + $0x44] sm:$0xf] }
  0x59   : > { %12359 = vmatmul.mubr.msk.bf16.gmra.mrb[8].mxu0 %vm1477_vm14, %v11240_v19  ;;  %v1205_v27 = vrot.slane %v1204_v20, 4  ;;  %v376_v32 = vsel %vm13860_vm7, 0, %v375_v16  ;;  %v693_v33 = vshrl.u32 %v538_v18, 16  ;;  %v1005_v35 = vld [vmem:[#allocation2 + $0x54] sm:$0xf]  ;;  %v681_v37 = vor.u32 %v679_v22, %v678_v24 }
  0x5a   : > { %v1200_v34 = vsel %vm13935_vm13, %v1195_v23, %v1199_v7  ;;  %v682_v39 = vrot.slane %v678_v24, 4  ;;  %v686_v41 = vrot.slane %v684_v25, 7  ;;  %321 = vst [vmem:[#allocation2 + $0x6c] sm:$0x1] %v320_v31  ;;  %377 = vst [vmem:[#allocation2 + $0x74] sm:$0x1] %v376_v32 }
  0x5b   : > { %v1210_v43 = vsel %vm13935_vm13, %v1205_v27, %v1209_v9  ;;  %v1212_v45 = vshrl.u32 %v1005_v35, 16  ;;  %v1215_v46 = vshll.u32 %v1005_v35, 16  ;;  %v695_v48 = vrot.slane %v693_v33, 7  ;;  %v1006_v49 = vld [vmem:[#allocation2 + $0x58] sm:$0xf] }
  0x5c   : > { %v11241_v36 = vcombine.low %v1200_v34, %v1210_v43  ;;  %v689_v50 = vor.u32 %v687_v26, %v686_v41  ;;  %v691_v51 = vrot.slane %v686_v41, 4  ;;  %v929_v52 = vsel %vm13903_vm10, %v681_v37, %v928_v30  ;;  %v322_v56 = vld [vmem:[#allocation2 + $0x78] sm:$0x1]  ;;  %v378_v61 = vld [vmem:[#allocation2 + $0x80] sm:$0x1] }
  0x5d   : > { %v1214_v40 = vrot.slane %v1212_v45, 4  ;;  %v1217_v53 = vrot.slane %v1215_v46, 5  ;;  %v1221_v54 = vshll.u32 %v1006_v49, 16  ;;  %v1225_v55 = vshrl.u32 %v1006_v49, 16  ;;  %930 = vst [vmem:[#allocation2 + $0x60] sm:$0xf] %v929_v52 }
  0x5e   : > { %12362 = vmatprep.mubr.msk.bf16.mxu0 %vm1477_vm14, %v11241_v36  ;;  %v690_v57 = vsel %vm13912_vm11, %v682_v39, %v689_v50  ;;  %v932_v58 = vld [vmem:[#allocation2 + $0x68] sm:$0x1]  ;;  %v696_v59 = vshll.u32 %v538_v18, 16  ;;  %v699_v60 = vrot.slane %v695_v48, 4  ;;  %v701_v28 = vshrl.u32 %v539_v47, 16 }
  0x5f   : > { %v540_v62 = vld [vmem:[%s13887_s10 + $0x48] sm:$0xf]  ;;  %v1031_v63 = vld [vmem:[#allocation2 + $0x5c] sm:$0x1]  ;;  %v1218_v0 = vor.u32 %v1217_v53, %v1214_v40  ;;  %v1223_v1 = vrot.slane %v1221_v54, 5  ;;  %v1227_v6 = vrot.slane %v1225_v55, 4  ;;  %v933_v7 = vsel %vm13844_vm6, %v691_v51, %v932_v58 }
  0x60   : > { %931 = vst.msk [vmem:[#allocation2 + $0x64] sm:$0xf] %vm280_vm1, %v690_v57  ;;  %v541_v8 = vld [vmem:[%s13887_s10 + $0x4c] sm:$0xf]  ;;  %v1231_v9 = vshll.u32 %v1031_v63, 16  ;;  %v698_v10 = vor.u32 %v696_v59, %v695_v48  ;;  %v703_v11 = vrot.slane %v701_v28, 7 }
  0x61   : > { %934 = vst [vmem:[#allocation2 + $0x68] sm:$0x1] %v933_v7  ;;  %v704_v12 = vshll.u32 %v539_v47, 16  ;;  %v14084_v13 = vld [vmem:[%s17684_s1 + $0x4] sm:$0x3]  ;;  %v1219_v14 = vrot.slane %v1218_v0, 4  ;;  %v1228_v15 = vor.u32 %v1227_v6, %v1223_v1 }
  0x62   : > { %v935_v16 = vld [vmem:[#allocation2 + $0x6c] sm:$0xf]  ;;  %v939_v18 = vld [vmem:[#allocation2 + $0x74] sm:$0x1]  ;;  %v323_v19 = vsel %vm13844_vm6, 0, %v322_v56  ;;  %13606 = vmatprep.subr.msk.bf16.mxu0 %vm1526_vm0, %v14084_v13  ;;  %v1233_v21 = vrot.slane %v1231_v9, 5 }
  0x63   : > { %v325_v20 = vld [vmem:[#allocation2 + $0x84] sm:$0x1]  ;;  %v706_v22 = vor.u32 %v704_v12, %v703_v11  ;;  %v708_v23 = vrot.slane %v703_v11, 4  ;;  %v936_v24 = vsel %vm13903_vm10, %v698_v10, %v935_v16  ;;  %324 = vst [vmem:[#allocation2 + $0x78] sm:$0x1] %v323_v19  ;;  %v1224_v25 = vsel %vm13935_vm13, %v1219_v14, %v1223_v1 }
  0x64   : > { %v1229_v26 = vrot.slane %v1228_v15, 4  ;;  %937 = vst [vmem:[#allocation2 + $0x6c] sm:$0xf] %v936_v24  ;;  %v379_v27 = vsel %vm13860_vm7, 0, %v378_v61  ;;  %v710_v30 = vshrl.u32 %v540_v62, 16  ;;  %v713_v34 = vshll.u32 %v540_v62, 16 }
  0x65   : > { %v14096_v31 = vld [vmem:[#allocation2 + $0x60] sm:$0xf]  ;;  %v707_v32 = vsel %vm13912_vm11, %v699_v60, %v706_v22  ;;  %v940_v33 = vsel %vm13844_vm6, %v708_v23, %v939_v18  ;;  %380 = vst [vmem:[#allocation2 + $0x80] sm:$0x1] %v379_v27  ;;  %v718_v35 = vshrl.u32 %v541_v8, 16  ;;  %v721_v36 = vshll.u32 %v541_v8, 16 }
  0x66   : > { %v1234_v37 = vsel %vm13935_vm13, %v1229_v26, %v1233_v21  ;;  %v1236_v39 = vshrl.u32 %v14096_v31, 16  ;;  %v1239_v41 = vshll.u32 %v14096_v31, 16  ;;  %938 = vst.msk [vmem:[#allocation2 + $0x70] sm:$0xf] %vm280_vm1, %v707_v32  ;;  %941 = vst [vmem:[#allocation2 + $0x74] sm:$0x1] %v940_v33 }
  0x67   : > { %v712_v43 = vrot.slane %v710_v30, 7  ;;  %v381_v45 = vld [vmem:[#allocation2 + $0x8c] sm:$0x1]  ;;  %v11242_v46 = vcombine.low %v1224_v25, %v1234_v37  ;;  %v14107_v47 = vld [vmem:[#allocation2 + $0x64] sm:$0xf]  ;;  %v720_v48 = vrot.slane %v718_v35, 7 }
  0x68   : > { %v326_v49 = vsel %vm13844_vm6, 0, %v325_v20  ;;  %v1032_v50 = vld [vmem:[#allocation2 + $0x68] sm:$0x1]  ;;  %v1238_v51 = vrot.slane %v1236_v39, 4  ;;  %v1241_v52 = vrot.slane %v1239_v41, 5  ;;  %v1245_v40 = vshll.u32 %v14107_v47, 16 }
  0x69   : > { %v1249_v53 = vshrl.u32 %v14107_v47, 16  ;;  %327 = vst [vmem:[#allocation2 + $0x84] sm:$0x1] %v326_v49  ;;  %v542_v54 = vld [vmem:[%s13887_s10 + $0x50] sm:$0xf]  ;;  %12363 = vmatmul.mubr.msk.bf16.gmra.mrb[12].mxu0 %vm1477_vm14, %v11242_v46  ;;  %v1255_v55 = vshll.u32 %v1032_v50, 16  ;;  %v715_v56 = vor.u32 %v713_v34, %v712_v43  ;;  %v723_v58 = vor.u32 %v721_v36, %v720_v48 }
  0x6a   : > { %v716_v57 = vrot.slane %v712_v43, 4  ;;  %v1242_v59 = vor.u32 %v1241_v52, %v1238_v51  ;;  %v1247_v60 = vrot.slane %v1245_v40, 5  ;;  %v725_v61 = vrot.slane %v720_v48, 4  ;;  %v942_v62 = vld [vmem:[#allocation2 + $0x78] sm:$0xf] }
  0x6b   : > { %v1251_v28 = vrot.slane %v1249_v53, 4  ;;  %v1257_v63 = vrot.slane %v1255_v55, 5  ;;  %v14115_v0 = vld [vmem:[#allocation2 + $0x6c] sm:$0xf]  ;;  %v943_v6 = vsel %vm13903_vm10, %v715_v56, %v942_v62  ;;  %v382_v7 = vsel %vm13860_vm7, 0, %v381_v45 }
  0x6c   : > { %v724_v1 = vsel %vm13912_vm11, %v716_v57, %v723_v58  ;;  %v543_v8 = vld [vmem:[%s13887_s10 + $0x54] sm:$0xf]  ;;  %v1243_v9 = vrot.slane %v1242_v59, 4  ;;  %v1260_v11 = vshrl.u32 %v14115_v0, 16  ;;  %v1263_v12 = vshll.u32 %v14115_v0, 16 }
  0x6d   : > { %v1252_v10 = vor.u32 %v1251_v28, %v1247_v60  ;;  %944 = vst [vmem:[#allocation2 + $0x78] sm:$0xf] %v943_v6  ;;  %945 = vst.msk [vmem:[#allocation2 + $0x7c] sm:$0xf] %vm280_vm1, %v724_v1  ;;  %v946_v14 = vld [vmem:[#allocation2 + $0x80] sm:$0x1] }
  0x6e   : > { %383 = vst [vmem:[#allocation2 + $0x8c] sm:$0x1] %v382_v7  ;;  %v14127_v15 = vld [vmem:[#allocation2 + $0x70] sm:$0xf]  ;;  %v1033_v16 = vld [vmem:[#allocation2 + $0x74] sm:$0x1]  ;;  %v947_v18 = vsel %vm13844_vm6, %v725_v61, %v946_v14  ;;  %v1248_v21 = vsel %vm13935_vm13, %v1243_v9, %v1247_v60 }
  0x6f   : > { %v727_v19 = vshrl.u32 %v542_v54, 16  ;;  %v730_v20 = vshll.u32 %v542_v54, 16  ;;  %v1253_v22 = vrot.slane %v1252_v10, 4  ;;  %v1262_v23 = vrot.slane %v1260_v11, 4  ;;  %948 = vst [vmem:[#allocation2 + $0x80] sm:$0x1] %v947_v18 }
  0x70   : > { %v1265_v24 = vrot.slane %v1263_v12, 5  ;;  %v1269_v25 = vshll.u32 %v14127_v15, 16  ;;  %v1273_v26 = vshrl.u32 %v14127_v15, 16  ;;  %v1279_v27 = vshll.u32 %v1033_v16, 16  ;;  %v949_v36 = vld [vmem:[#allocation2 + $0x84] sm:$0xf] }
  0x71   : > { %v729_v30 = vrot.slane %v727_v19, 7  ;;  %v1258_v32 = vsel %vm13935_vm13, %v1253_v22, %v1257_v63  ;;  %v735_v34 = vshrl.u32 %v543_v8, 16  ;;  %v738_v41 = vshll.u32 %v543_v8, 16  ;;  %v328_v57 = vld [vmem:[#allocation2 + $0x90] sm:$0x1] }
  0x72   : > { %v1266_v33 = vor.u32 %v1265_v24, %v1262_v23  ;;  %v11243_v35 = vcombine.low %v1248_v21, %v1258_v32  ;;  %v1271_v37 = vrot.slane %v1269_v25, 5  ;;  %v1275_v39 = vrot.slane %v1273_v26, 4  ;;  %v384_v58 = vld [vmem:[#allocation2 + $0x98] sm:$0x1]  ;;  %v545_v1 = vld [vmem:[%s13887_s10 + $0x5c] sm:$0xf] }
  0x73   : > { %v1281_v45 = vrot.slane %v1279_v27, 5  ;;  %v733_v46 = vrot.slane %v729_v30, 4  ;;  %v737_v48 = vrot.slane %v735_v34, 7  ;;  %v732_v52 = vor.u32 %v730_v20, %v729_v30  ;;  %v544_v59 = vld [vmem:[%s13887_s10 + $0x58] sm:$0xf] }
  0x74   : > { %v1267_v43 = vrot.slane %v1266_v33, 4  ;;  %12366 = vmatprep.mubr.msk.bf16.mxu0 %vm1477_vm14, %v11243_v35  ;;  %v1276_v49 = vor.u32 %v1275_v39, %v1271_v37  ;;  %v14138_v50 = vld [vmem:[#allocation2 + $0x78] sm:$0xf]  ;;  %v14140_v51 = vld [vmem:[#allocation2 + $0x7c] sm:$0xf]  ;;  %v329_v26 = vsel %vm13844_vm6, 0, %v328_v57 }
  0x75   : > { %v953_v40 = vld [vmem:[#allocation2 + $0x8c] sm:$0x1]  ;;  %v1284_v54 = vshrl.u32 %v14138_v50, 16  ;;  %v1287_v55 = vshll.u32 %v14138_v50, 16  ;;  %v1293_v56 = vshll.u32 %v14140_v51, 16  ;;  %v1297_v61 = vshrl.u32 %v14140_v51, 16 }
  0x76   : > { %v1272_v53 = vsel %vm13935_vm13, %v1267_v43, %v1271_v37  ;;  %v1277_v60 = vrot.slane %v1276_v49, 4  ;;  %v14148_v28 = vld [vmem:[#allocation2 + $0x80] sm:$0x1]  ;;  %v740_v62 = vor.u32 %v738_v41, %v737_v48  ;;  %v742_v63 = vrot.slane %v737_v48, 4  ;;  %v331_v10 = vld [vmem:[#allocation2 + $0x9c] sm:$0x1] }
  0x77   : > { %v1286_v6 = vrot.slane %v1284_v54, 4  ;;  %v1289_v7 = vrot.slane %v1287_v55, 5  ;;  %v1295_v8 = vrot.slane %v1293_v56, 5  ;;  %v1303_v9 = vshll.u32 %v14148_v28, 16  ;;  %v387_v11 = vld [vmem:[#allocation2 + $0xa4] sm:$0x1] }
  0x78   : > { %v1282_v12 = vsel %vm13935_vm13, %v1277_v60, %v1281_v45  ;;  %v1299_v14 = vrot.slane %v1297_v61, 4  ;;  %v741_v16 = vsel %vm13912_vm11, %v733_v46, %v740_v62  ;;  %v950_v18 = vsel %vm13903_vm10, %v732_v52, %v949_v36  ;;  %v546_v19 = vld [vmem:[%s13887_s10 + $0x60] sm:$0xf]  ;;  %v547_v24 = vld [vmem:[%s13887_s10 + $0x64] sm:$0xf] }
  0x79   : > { %v11244_v20 = vcombine.low %v1272_v53, %v1282_v12  ;;  %v1290_v21 = vor.u32 %v1289_v7, %v1286_v6  ;;  %v1305_v22 = vrot.slane %v1303_v9, 5  ;;  %951 = vst [vmem:[#allocation2 + $0x84] sm:$0xf] %v950_v18  ;;  %952 = vst.msk [vmem:[#allocation2 + $0x88] sm:$0xf] %vm280_vm1, %v741_v16  ;;  %v954_v23 = vsel %vm13844_vm6, %v742_v63, %v953_v40 }
  0x7a   : > { %v1300_v25 = vor.u32 %v1299_v14, %v1295_v8  ;;  %955 = vst [vmem:[#allocation2 + $0x8c] sm:$0x1] %v954_v23  ;;  %v385_v27 = vsel %vm13860_vm7, 0, %v384_v58  ;;  %v744_v30 = vshrl.u32 %v544_v59, 16  ;;  %330 = vst [vmem:[#allocation2 + $0x90] sm:$0x1] %v329_v26 }
  0x7b   : > { %12367 = vmatmul.mubr.msk.bf16.gmra.mrb[16].mxu0 %vm1477_vm14, %v11244_v20  ;;  %v1291_v32 = vrot.slane %v1290_v21, 4  ;;  %386 = vst [vmem:[#allocation2 + $0x98] sm:$0x1] %v385_v27  ;;  %v747_v33 = vshll.u32 %v544_v59, 16  ;;  %v752_v34 = vshrl.u32 %v545_v1, 16  ;;  %v755_v35 = vshll.u32 %v545_v1, 16 }
  0x7c   : > { %v1301_v37 = vrot.slane %v1300_v25, 4  ;;  %v746_v39 = vrot.slane %v744_v30, 7  ;;  %v332_v41 = vsel %vm13844_vm6, 0, %v331_v10  ;;  %v388_v43 = vsel %vm13860_vm7, 0, %v387_v11  ;;  %v390_v9 = vld [vmem:[#allocation2 + $0xb0] sm:$0x1] }
  0x7d   : > { %v1296_v45 = vsel %vm13935_vm13, %v1291_v32, %v1295_v8  ;;  %v754_v46 = vrot.slane %v752_v34, 7  ;;  %333 = vst [vmem:[#allocation2 + $0x9c] sm:$0x1] %v332_v41  ;;  %389 = vst [vmem:[#allocation2 + $0xa4] sm:$0x1] %v388_v43  ;;  %v761_v48 = vshrl.u32 %v546_v19, 16 }
  0x7e   : > { %v1306_v36 = vsel %vm13935_vm13, %v1301_v37, %v1305_v22  ;;  %v750_v49 = vrot.slane %v746_v39, 4  ;;  %v764_v52 = vshll.u32 %v546_v19, 16  ;;  %v769_v40 = vshrl.u32 %v547_v24, 16  ;;  %v334_v8 = vld [vmem:[#allocation2 + $0xa8] sm:$0x1] }
  0x7f   : > { %v11245_v53 = vcombine.low %v1296_v45, %v1306_v36  ;;  %v757_v54 = vor.u32 %v755_v35, %v754_v46  ;;  %v759_v55 = vrot.slane %v754_v46, 4  ;;  %v763_v56 = vrot.slane %v761_v48, 7  ;;  %v548_v10 = vld [vmem:[%s13887_s10 + $0x68] sm:$0xf]  ;;  %v337_v25 = vld [vmem:[#allocation2 + $0xb4] sm:$0x1] }
  0x80   : > { %v14177_v57 = vld [vmem:[#allocation2 + $0x84] sm:$0xf]  ;;  %v14179_v58 = vld [vmem:[#allocation2 + $0x88] sm:$0xf]  ;;  %v749_v59 = vor.u32 %v747_v33, %v746_v39  ;;  %v771_v60 = vrot.slane %v769_v40, 7  ;;  %v772_v61 = vshll.u32 %v547_v24, 16 }
  0x81   : > { %12370 = vmatprep.mubr.msk.bf16.mxu0 %vm1477_vm14, %v11245_v53  ;;  %v14182_v62 = vld [vmem:[#allocation2 + $0x8c] sm:$0x1]  ;;  %v1308_v63 = vshrl.u32 %v14177_v57, 16  ;;  %v1311_v1 = vshll.u32 %v14177_v57, 16  ;;  %v1317_v6 = vshll.u32 %v14179_v58, 16  ;;  %v1321_v7 = vshrl.u32 %v14179_v58, 16 }
  0x82   : > { %v1327_v11 = vshll.u32 %v14182_v62, 16  ;;  %v758_v12 = vsel %vm13912_vm11, %v750_v49, %v757_v54  ;;  %v956_v14 = vld [vmem:[#allocation2 + $0x90] sm:$0xf]  ;;  %v960_v16 = vld [vmem:[#allocation2 + $0x98] sm:$0x1]  ;;  %v766_v18 = vor.u32 %v764_v52, %v763_v56  ;;  %v767_v19 = vrot.slane %v763_v56, 4 }
  0x83   : > { %v1310_v20 = vrot.slane %v1308_v63, 4  ;;  %v1313_v21 = vrot.slane %v1311_v1, 5  ;;  %v1319_v22 = vrot.slane %v1317_v6, 5  ;;  %v1323_v23 = vrot.slane %v1321_v7, 4  ;;  %959 = vst.msk [vmem:[#allocation2 + $0x94] sm:$0xf] %vm280_vm1, %v758_v12 }
  0x84   : > { %v549_v24 = vld [vmem:[%s13887_s10 + $0x6c] sm:$0xf]  ;;  %v1329_v26 = vrot.slane %v1327_v11, 5  ;;  %v957_v27 = vsel %vm13903_vm10, %v749_v59, %v956_v14  ;;  %v961_v30 = vsel %vm13844_vm6, %v759_v55, %v960_v16  ;;  %v774_v32 = vor.u32 %v772_v61, %v771_v60  ;;  %v963_v33 = vld [vmem:[#allocation2 + $0x9c] sm:$0xf] }
  0x85   : > { %v967_v34 = vld [vmem:[#allocation2 + $0xa4] sm:$0x1]  ;;  %v1314_v35 = vor.u32 %v1313_v21, %v1310_v20  ;;  %v1324_v37 = vor.u32 %v1323_v23, %v1319_v22  ;;  %958 = vst [vmem:[#allocation2 + $0x90] sm:$0xf] %v957_v27  ;;  %962 = vst [vmem:[#allocation2 + $0x98] sm:$0x1] %v961_v30  ;;  %v964_v41 = vsel %vm13903_vm10, %v766_v18, %v963_v33 }
  0x86   : > { %v776_v39 = vrot.slane %v771_v60, 4  ;;  %v393_v43 = vld [vmem:[#allocation2 + $0xbc] sm:$0x1]  ;;  %v775_v45 = vsel %vm13912_vm11, %v767_v19, %v774_v32  ;;  %965 = vst [vmem:[#allocation2 + $0x9c] sm:$0xf] %v964_v41  ;;  %v335_v46 = vsel %vm13844_vm6, 0, %v334_v8 }
  0x87   : > { %v391_v48 = vsel %vm13860_vm7, 0, %v390_v9  ;;  %v778_v36 = vshrl.u32 %v548_v10, 16  ;;  %v14207_v49 = vld [vmem:[%s13887_s10 + $0x70] sm:$0xf]  ;;  %v1315_v52 = vrot.slane %v1314_v35, 4  ;;  %v1325_v40 = vrot.slane %v1324_v37, 4 }
  0x88   : > { %966 = vst.msk [vmem:[#allocation2 + $0xa0] sm:$0xf] %vm280_vm1, %v775_v45  ;;  %v968_v53 = vsel %vm13844_vm6, %v776_v39, %v967_v34  ;;  %336 = vst [vmem:[#allocation2 + $0xa8] sm:$0x1] %v335_v46  ;;  %v781_v54 = vshll.u32 %v548_v10, 16  ;;  %v786_v59 = vshrl.u32 %v549_v24, 16 }
  0x89   : > { %392 = vst [vmem:[#allocation2 + $0xb0] sm:$0x1] %v391_v48  ;;  %v14213_v55 = vld [vmem:[%s13887_s10 + $0x74] sm:$0xf]  ;;  %969 = vst [vmem:[#allocation2 + $0xa4] sm:$0x1] %v968_v53  ;;  %v1320_v63 = vsel %vm13935_vm13, %v1315_v52, %v1319_v22  ;;  %v1330_v1 = vsel %vm13935_vm13, %v1325_v40, %v1329_v26 }
  0x8a   : > { %v780_v56 = vrot.slane %v778_v36, 7  ;;  %v789_v60 = vshll.u32 %v549_v24, 16  ;;  %v338_v61 = vsel %vm13844_vm6, 0, %v337_v25  ;;  %v394_v6 = vsel %vm13860_vm7, 0, %v393_v43  ;;  %v14224_v9 = vld [vmem:[#allocation2 + $0x94] sm:$0xf] }
  0x8b   : > { %339 = vst [vmem:[#allocation2 + $0xb4] sm:$0x1] %v338_v61  ;;  %v795_v7 = vshrl.u32 %v14207_v49, 16  ;;  %v11246_v8 = vcombine.low %v1320_v63, %v1330_v1  ;;  %v788_v12 = vrot.slane %v786_v59, 7  ;;  %395 = vst [vmem:[#allocation2 + $0xbc] sm:$0x1] %v394_v6  ;;  %v11276_v25 = vcombine.low %v14115_v0, %v14127_v15 }
  0x8c   : > { %v783_v10 = vor.u32 %v781_v54, %v780_v56  ;;  %v784_v11 = vrot.slane %v780_v56, 4  ;;  %v1341_v14 = vshll.u32 %v14224_v9, 16  ;;  %v1345_v16 = vshrl.u32 %v14224_v9, 16  ;;  %v14232_v20 = vld [vmem:[#allocation2 + $0x90] sm:$0xf] }
  0x8d   : > { %v14228_v18 = vrot.slane %v795_v7, 7  ;;  %v798_v19 = vshll.u32 %v14207_v49, 16  ;;  %12371 = vmatmul.mubr.msk.bf16.gmra.mrb[20].mxu0 %vm1477_vm14, %v11246_v8  ;;  %v14234_v21 = vld [vmem:[#allocation2 + $0x98] sm:$0x1]  ;;  %v791_v22 = vor.u32 %v789_v60, %v788_v12  ;;  %v793_v23 = vrot.slane %v788_v12, 4 }
  0x8e   : > { %v803_v24 = vshrl.u32 %v14213_v55, 16  ;;  %v1332_v26 = vshrl.u32 %v14232_v20, 16  ;;  %v1335_v27 = vshll.u32 %v14232_v20, 16  ;;  %v1343_v30 = vrot.slane %v1341_v14, 5  ;;  %v14241_v33 = vld [vmem:[#allocation2 + $0x9c] sm:$0xf] }
  0x8f   : > { %v1347_v32 = vrot.slane %v1345_v16, 4  ;;  %v1351_v34 = vshll.u32 %v14234_v21, 16  ;;  %v14244_v35 = vld [vmem:[#allocation2 + $0xa0] sm:$0xf]  ;;  %v1356_v37 = vshrl.u32 %v14241_v33, 16  ;;  %v1359_v39 = vshll.u32 %v14241_v33, 16 }
  0x90   : > { %v792_v41 = vsel %vm13912_vm11, %v784_v11, %v791_v22  ;;  %v1334_v43 = vrot.slane %v1332_v26, 4  ;;  %v1337_v45 = vrot.slane %v1335_v27, 5  ;;  %v14250_v48 = vld [vmem:[#allocation2 + $0xa4] sm:$0x1]  ;;  %v1365_v36 = vshll.u32 %v14244_v35, 16 }
  0x91   : > { %v1348_v46 = vor.u32 %v1347_v32, %v1343_v30  ;;  %973 = vst.msk [vmem:[#allocation2 + $0xac] sm:$0xf] %vm280_vm1, %v792_v41  ;;  %v1353_v49 = vrot.slane %v1351_v34, 5  ;;  %v1358_v52 = vrot.slane %v1356_v37, 4  ;;  %v1361_v40 = vrot.slane %v1359_v39, 5 }
  0x92   : > { %v1369_v53 = vshrl.u32 %v14244_v35, 16  ;;  %v970_v54 = vld [vmem:[#allocation2 + $0xa8] sm:$0xf]  ;;  %v1338_v56 = vor.u32 %v1337_v45, %v1334_v43  ;;  %v1367_v60 = vrot.slane %v1365_v36, 5  ;;  %v1375_v61 = vshll.u32 %v14250_v48, 16 }
  0x93   : > { %v1349_v59 = vrot.slane %v1348_v46, 4  ;;  %v974_v63 = vld [vmem:[#allocation2 + $0xb0] sm:$0x1]  ;;  %v1362_v1 = vor.u32 %v1361_v40, %v1358_v52  ;;  %v971_v7 = vsel %vm13903_vm10, %v783_v10, %v970_v54  ;;  %v977_v11 = vld [vmem:[#allocation2 + $0xb4] sm:$0xf]  ;;  %v800_v26 = vor.u32 %v798_v19, %v14228_v18 }
  0x94   : > { %v1371_v6 = vrot.slane %v1369_v53, 4  ;;  %v975_v8 = vsel %vm13844_vm6, %v793_v23, %v974_v63  ;;  %v14260_v12 = vld [vmem:[#allocation2 + $0x10] sm:$0xf]  ;;  %v1339_v16 = vrot.slane %v1338_v56, 4  ;;  %972 = vst [vmem:[#allocation2 + $0xa8] sm:$0xf] %v971_v7  ;;  %v11278_v54 = vcombine.low %v14177_v57, %v14179_v58 }
  0x95   : > { %v2043_v14 = vrot.slane %v14260_v12, 5  ;;  %v1354_v22 = vsel %vm13935_vm13, %v1349_v59, %v1353_v49  ;;  %976 = vst [vmem:[#allocation2 + $0xb0] sm:$0x1] %v975_v8  ;;  %v1363_v27 = vrot.slane %v1362_v1, 4  ;;  %v1377_v34 = vrot.slane %v1375_v61, 5 }
  0x96   : > { %v1372_v32 = vor.u32 %v1371_v6, %v1367_v60  ;;  %v805_v10 = vrot.slane %v803_v24, 7  ;;  %v1344_v23 = vsel %vm13935_vm13, %v1339_v16, %v1343_v30  ;;  %v801_v37 = vrot.slane %v14228_v18, 4  ;;  %v981_v43 = vld [vmem:[#allocation2 + $0xbc] sm:$0x1]  ;;  %v1984_v52 = vld [vmem:[#allocation2 + $0xc] sm:$0xe] }
  0x97   : > { %v806_v39 = vshll.u32 %v14213_v55, 16  ;;  %v978_v41 = vsel %vm13903_vm10, %v800_v26, %v977_v11  ;;  %v11247_v45 = vcombine.low %v1344_v23, %v1354_v22  ;;  %v1368_v46 = vsel %vm13935_vm13, %v1363_v27, %v1367_v60  ;;  %v13724_v26 = vld [vmem:[#allocation2 + $0x14] sm:$0x1] }
  0x98   : > { %v1373_v19 = vrot.slane %v1372_v32, 4  ;;  %v14274_v36 = vld [vmem:[#allocation2 + $0xac] sm:$0xf]  ;;  %v810_v49 = vrot.slane %v805_v10, 4  ;;  %979 = vst [vmem:[#allocation2 + $0xb4] sm:$0xf] %v978_v41  ;;  %v11277_v55 = vcombine.low %v14138_v50, %v14140_v51  ;;  %v11279_v56 = vcombine.low %v14232_v20, %v14224_v9 }
  0x99   : > { %v1389_v24 = vshll.u32 %v14274_v36, 16  ;;  %v1393_v30 = vshrl.u32 %v14274_v36, 16  ;;  %v808_v18 = vor.u32 %v806_v39, %v805_v10  ;;  %12374 = vmatprep.mubr.msk.bf16.mxu0 %vm1477_vm14, %v11247_v45  ;;  %v11280_v7 = vcombine.low %v14241_v33, %v14244_v35  ;;  %v13740_v33 = vld [vmem:[#allocation2 + $0x20] sm:$0x1] }
  0x9a   : > { %v1378_v40 = vsel %vm13935_vm13, %v1373_v19, %v1377_v34  ;;  %v982_v53 = vsel %vm13844_vm6, %v810_v49, %v981_v43  ;;  %vm2031_vm15 = vcmask 1042432   ;;  %vm2032_vm2 = vcmask 1046532  }
  0x9b   : > { %v11248_v59 = vcombine.low %v1368_v46, %v1378_v40  ;;  %v1391_v60 = vrot.slane %v1389_v24, 5  ;;  %v1395_v61 = vrot.slane %v1393_v30, 4  ;;  %v809_v63 = vsel %vm13912_vm11, %v801_v37, %v808_v18  ;;  %983 = vst [vmem:[#allocation2 + $0xbc] sm:$0x1] %v982_v53  ;;  %v14291_v1 = vld [vmem:[#allocation2 + $0xa8] sm:$0xf]  ;;  %vm14308_vm8 = vmor %vm2031_vm15, %vm2032_vm2 }
  0x9c   : > { %v14293_v6 = vld [vmem:[#allocation2 + $0xb0] sm:$0x1]  ;;  %980 = vst.msk [vmem:[#allocation2 + $0xb8] sm:$0xf] %vm280_vm1, %v809_v63  ;;  %v1380_v8 = vshrl.u32 %v14291_v1, 16  ;;  %v1383_v11 = vshll.u32 %v14291_v1, 16  ;;  %v11281_v32 = vcombine.low %v14291_v1, %v14274_v36 }
  0x9d   : > { %12375 = vmatmul.mubr.msk.bf16.gmra.mrb[24].mxu0 %vm1477_vm14, %v11248_v59  ;;  %v1396_v16 = vor.u32 %v1395_v61, %v1391_v60  ;;  %v1399_v22 = vshll.u32 %v14293_v6, 16  ;;  %v2046_v27 = vrot.slane %v13724_v26, 5  ;;  %v11300_v34 = vrot.slane %v1984_v52, 9  ;;  %v13647_v4 = vld [vmem:[#allocation2 + $0xa8] sm:$0xff]  }
  0x9e   : > { %v1382_v10 = vrot.slane %v1380_v8, 4  ;;  %v1385_v23 = vrot.slane %v1383_v11, 5  ;;  %v2045_v49 = vrot.slane %v2043_v14, 4  ;;  %vm6634_vm9 = vcmask 64512  }
  0x9f   : > { %v1397_v37 = vrot.slane %v1396_v16, 4  ;;  %v1401_v39 = vrot.slane %v1399_v22, 5  ;;  %v14304_v41 = vld [vmem:[#allocation2 + $0xb4] sm:$0xf]  ;;  %v14322_v52 = vsel %vm14308_vm8, %v11300_v34, %v2043_v14 }
  0xa0   : > { %v1404_v45 = vshrl.u32 %v14304_v41, 16  ;;  %v1407_v46 = vshll.u32 %v14304_v41, 16  ;;  %v1386_v19 = vor.u32 %v1385_v23, %v1382_v10  ;;  %v14331_v63 = vsel %vm14308_vm8, %v2045_v49, %v2046_v27 }
  0xa1   : > { %v1402_v53 = vsel %vm13935_vm13, %v1397_v37, %v1401_v39  ;;  %v11317_v22 = vcombine.low %v14322_v52, %v14331_v63  ;;  %v1988_v52 = vld [vmem:[#allocation2 + $0x3c] sm:$0xe] }
  0xa2   : > { %v14316_v24 = vld [vmem:[#allocation2 + $0xbc] sm:$0x1]  ;;  %v1406_v30 = vrot.slane %v1404_v45, 4  ;;  %v1409_v18 = vrot.slane %v1407_v46, 5  ;;  %v1387_v40 = vrot.slane %v1386_v19, 4 }
  0xa3   : > { %v14326_v59 = vld [vmem:[#allocation2 + $0xb8] sm:$0xf]  ;;  %v1423_v61 = vshll.u32 %v14316_v24, 16  ;;  %v14346_v19 = vld [vmem:[#allocation2 + $0x4] sm:$0xf] }
  0xa4   : > { %v1410_v8 = vor.u32 %v1409_v18, %v1406_v30  ;;  %v1413_v11 = vshll.u32 %v14326_v59, 16  ;;  %v1417_v12 = vshrl.u32 %v14326_v59, 16  ;;  %v11282_v14 = vcombine.low %v14304_v41, %v14326_v59  ;;  %v1993_v18 = vld [vmem:[#allocation2 + $0x78] sm:$0xe]  ;;  %v13741_v41 = vld [vmem:[#allocation2 + $0x2c] sm:$0x1] }
  0xa5   : > { %v1392_v16 = vsel %vm13935_vm13, %v1387_v40, %v1391_v60  ;;  %v1425_v37 = vrot.slane %v1423_v61, 5  ;;  %v13726_v60 = vld [vmem:[#allocation2] sm:$0xf]  ;;  %v1994_v40 = vld [vmem:[#allocation2 + $0x84] sm:$0xe]  ;;  %v2036_v50 = vrot.slane %v14346_v19, 5 }
  0xa6   : > { %v11249_v26 = vcombine.low %v1392_v16, %v1402_v53  ;;  %v1411_v34 = vrot.slane %v1410_v8, 4  ;;  %v1415_v10 = vrot.slane %v1413_v11, 5  ;;  %v1419_v23 = vrot.slane %v1417_v12, 4  ;;  %v1995_v53 = vld [vmem:[#allocation2 + $0x90] sm:$0xe] }
  0xa7   : > { %v11267_v49 = vcombine.low %v13726_v60, %v14346_v19  ;;  %v13727_v61 = vld [vmem:[#allocation2 + $0x18] sm:$0xf]  ;;  %v14351_v8 = vld [vmem:[#allocation2 + $0x1c] sm:$0xf]  ;;  %v14357_v12 = vld [vmem:[%s17684_s1 + $0x6] sm:$0x3] }
  0xa8   : > { %12378 = vmatprep.mubr.msk.bf16.mxu0 %vm1477_vm14, %v11249_v26  ;;  %v1420_v27 = vor.u32 %v1419_v23, %v1415_v10  ;;  %v1416_v39 = vsel %vm13935_vm13, %v1411_v34, %v1415_v10  ;;  %v11269_v11 = vcombine.low %v13727_v61, %v14351_v8  ;;  %v1996_v16 = vld [vmem:[#allocation2 + $0x9c] sm:$0xe]  ;;  %v2245_v26 = vsel %vm1526_vm0, %v14084_v13, 0  ;;  %v13731_v60 = vld [vmem:[#allocation2 + $0x30] sm:$0xf] }
  0xa9   : > { %v11309_v34 = vrot.slane %v1993_v18, 9  ;;  %v2106_v10 = vrot.slane %v14140_v51, 5  ;;  %v2109_v23 = vrot.slane %v14148_v28, 5  ;;  %v14371_v13 = vld [vmem:[#allocation2 + $0x34] sm:$0xf]  ;;  %v2116_v18 = vrot.slane %v14182_v62, 5 }
  0xaa   : > { %v1421_v45 = vrot.slane %v1420_v27, 4  ;;  %v13729_v27 = vld [vmem:[#allocation2 + $0x24] sm:$0xf]  ;;  %v2120_v61 = vrot.slane %v14224_v9, 5  ;;  %v2123_v62 = vrot.slane %v14234_v21, 5 }
  0xab   : > { %v14376_v28 = vsel %vm14308_vm8, %v11309_v34, %v2106_v10  ;;  %v1985_v19 = vld [vmem:[#allocation2 + $0x18] sm:$0xe] }
  0xac   : > { %v1426_v46 = vsel %vm13935_vm13, %v1421_v45, %v1425_v37  ;;  %v14363_v37 = vld [vmem:[#allocation2 + $0x28] sm:$0xf]  ;;  %v11310_v45 = vrot.slane %v1994_v40, 9 }
  0xad   : > { %v11250_v30 = vcombine.low %v1416_v39, %v1426_v46  ;;  %v11270_v39 = vcombine.low %v13729_v27, %v14363_v37  ;;  %v2113_v46 = vrot.slane %v14179_v58, 5  ;;  %v1997_v40 = vld [vmem:[#allocation2 + $0xa8] sm:$0xe]  ;;  %v1998_v27 = vld [vmem:[#allocation2 + $0xb4] sm:$0xe] }
  0xae   : > { %v13739_v58 = vld [vmem:[#allocation2 + $0x8] sm:$0x1] }
  0xaf   : > { %12379 = vmatmul.mubr.msk.bf16.gmra.mrb[28].mxu0 %vm1477_vm14, %v11250_v30  ;;  %v2108_v30 = vrot.slane %v2106_v10, 4  ;;  %v14382_v5 = vsel %vm14308_vm8, %v11310_v45, %v2113_v46  ;;  %v2115_v42 = vrot.slane %v2113_v46, 4  ;;  %v2122_v46 = vrot.slane %v2120_v61, 4 }
  0xb0   : > { %12384 = vmatprep.mubr.msk.bf16.mxu0 %vm1477_vm14, %v11267_v49  ;;  %v11271_v49 = vcombine.low %v13731_v60, %v14371_v13  ;;  %v2130_v60 = vrot.slane %v14250_v48, 5 }
  0xb1   : > { %v14389_v34 = vsel %vm14308_vm8, %v2108_v30, %v2109_v23  ;;  %v14412_v30 = vsel %vm14308_vm8, %v2122_v46, %v2123_v62 }
  0xb2   : > { %v11326_v10 = vcombine.low %v14376_v28, %v14389_v34 }
  0xb7   : > { %12385 = vmatmul.mubr.msk.bf16.vlgmr.msra.gmra.mrb[0].mxu0 %vm1477_vm14, %v11268_v29  ;;  %v11311_v29 = vrot.slane %v1995_v53, 9  ;;  %v14397_v53 = vsel %vm14308_vm8, %v2115_v42, %v2116_v18  ;;  %v11313_v18 = vrot.slane %v1997_v40, 9  ;;  %v2134_v42 = vrot.slane %v14274_v36, 5 }
  0xb8   : > { %12417 = vmatpush3.bf16.msra.mxu0 %v2245_v26  ;;  %12388 = vmatprep.mubr.msk.bf16.mxu0 %vm1477_vm14, %v11269_v11  ;;  %v11312_v26 = vrot.slane %v1996_v16, 9  ;;  %v2127_v11 = vrot.slane %v14244_v35, 5  ;;  %v11327_v23 = vcombine.low %v14382_v5, %v14397_v53  ;;  %v2053_v35 = vrot.slane %v13740_v33, 5  ;;  %v13634_v5 = vld [vmem:[#allocation2 + $0xc] sm:$0xff]   ;;  %v13635_v53 = vld [vmem:[#allocation2 + $0x18] sm:$0xff]  }
  0xb9   : > { %13607 = vmatprep.subr.msk.bf16.mxu0 %vm1526_vm0, %v14357_v12  ;;  %v14401_v45 = vsel %vm14308_vm8, %v11311_v29, %v2120_v61  ;;  %v2137_v29 = vrot.slane %v14293_v6, 5  ;;  %v14427_v40 = vsel %vm14308_vm8, %v11313_v18, %v2134_v42  ;;  %v2136_v62 = vrot.slane %v2134_v42, 4  ;;  %v14448_v42 = vld [vmem:[#allocation2 + $0x40] sm:$0xf] }
  0xba   : > { %v14407_v21 = vsel %vm14308_vm8, %v11312_v26, %v2127_v11  ;;  %v2129_v16 = vrot.slane %v2127_v11, 4  ;;  %v11328_v61 = vcombine.low %v14401_v45, %v14412_v30  ;;  %v11314_v26 = vrot.slane %v1998_v27, 9  ;;  %v14603_v30 = vld [vmem:[%s17684_s1 + $0xa] sm:$0x3] }
  0xbb   : > { %v2141_v11 = vrot.slane %v14326_v59, 5  ;;  %v2144_v6 = vrot.slane %v14316_v24, 5  ;;  %v14438_v27 = vsel %vm14308_vm8, %v2136_v62, %v2137_v29  ;;  %v13737_v62 = vld [vmem:[#allocation2 + $0x54] sm:$0xf]  ;;  %v11275_v24 = vcombine.low %v14096_v31, %v14107_v47  ;;  %v552_v31 = vld [vmem:[%s13887_s10 + $0x78] sm:$0xf] }
  0xbc   : > { %v14420_v2 = vsel %vm14308_vm8, %v2129_v16, %v2130_v60  ;;  %v11330_v60 = vcombine.low %v14427_v40, %v14438_v27  ;;  %v553_v47 = vld [vmem:[%s13887_s10 + $0x7c] sm:$0xf]  ;;  %v812_v0 = vshrl.u32 %v552_v31, 16  ;;  %v2057_v36 = vrot.slane %v14363_v37, 5  ;;  %v3527_v40 = vld [vmem:[#allocation2 + $0x30] sm:$0xe] }
  0xbd   : > { %v11329_v48 = vcombine.low %v14407_v21, %v14420_v2  ;;  %v14433_v46 = vsel %vm14308_vm8, %v11314_v26, %v2141_v11  ;;  %v2143_v16 = vrot.slane %v2141_v11, 4  ;;  %v14451_v11 = vld [vmem:[#allocation2 + $0x4c] sm:$0xf]  ;;  %v820_v15 = vshrl.u32 %v553_v47, 16 }
  0xbe   : > { %v814_v51 = vrot.slane %v812_v0, 7  ;;  %v11301_v0 = vrot.slane %v1985_v19, 9  ;;  %v2060_v59 = vrot.slane %v13741_v41, 5  ;;  %v2078_v63 = vrot.slane %v14451_v11, 5 }
  0xbf   : > { %12389 = vmatmul.mubr.msk.bf16.gmra.mrb[4].mxu0 %vm1477_vm14, %v11270_v39  ;;  %v14444_v18 = vsel %vm14308_vm8, %v2143_v16, %v2144_v6  ;;  %v13733_v39 = vld [vmem:[#allocation2 + $0x3c] sm:$0xf]  ;;  %v14456_v6 = vld [vmem:[#allocation2 + $0x58] sm:$0xf]  ;;  %v11417_v27 = vrot.slane %v3527_v40, 9 }
  0xc0   : > { %12392 = vmatprep.mubr.msk.bf16.mxu0 %vm1477_vm14, %v11271_v49  ;;  %v11272_v26 = vcombine.low %v13733_v39, %v14448_v42  ;;  %v13735_v49 = vld [vmem:[#allocation2 + $0x48] sm:$0xf]  ;;  %v11274_v16 = vcombine.low %v13737_v62, %v14456_v6  ;;  %v340_v39 = vld [vmem:[#allocation2 + $0xc0] sm:$0x1]  ;;  %v818_v62 = vrot.slane %v814_v51, 4  ;;  %v2080_v19 = vrot.slane %v2078_v63, 4 }
  0xc1   : > { %v11273_v29 = vcombine.low %v13735_v49, %v14451_v11  ;;  %v1983_v49 = vld [vmem:[#allocation2] sm:$0xe]  ;;  %v17812_v34 = vcombine.low %v14433_v46, %v14444_v18  ;;  %v14678_v40 = vld [vmem:[#allocation2 + $0x7c] sm:$0xf] }
  0xc7   : > { %12393 = vmatmul.mubr.msk.bf16.gmra.mrb[8].mxu0 %vm1477_vm14, %v11272_v26  ;;  %v341_v26 = vsel %vm13844_vm6, 0, %v340_v39  ;;  %v11299_v39 = vrot.slane %v1983_v49, 9 }
  0xc8   : > { %12396 = vmatprep.mubr.msk.bf16.mxu0 %vm1477_vm14, %v11273_v29  ;;  %342 = vst [vmem:[#allocation2 + $0xc0] sm:$0x1] %v341_v26  ;;  %v2038_v26 = vrot.slane %v2036_v50, 4 }
  0xcf   : > { %12397 = vmatmul.mubr.msk.bf16.gmra.mrb[12].mxu0 %vm1477_vm14, %v11274_v16  ;;  %v984_v16 = vld [vmem:[#allocation2 + $0xc0] sm:$0xf] }
  0xd0   : > { %12400 = vmatprep.mubr.msk.bf16.mxu0 %vm1477_vm14, %v11275_v24  ;;  %v823_v24 = vshll.u32 %v553_v47, 16 }
  0xd7   : > { %12401 = vmatmul.mubr.msk.bf16.gmra.mrb[16].mxu0 %vm1477_vm14, %v11276_v25  ;;  %v815_v25 = vshll.u32 %v552_v31, 16  ;;  %v2050_v31 = vrot.slane %v14351_v8, 5  ;;  %v2064_v8 = vrot.slane %v14371_v13, 5 }
  0xd8   : > { %12404 = vmatprep.mubr.msk.bf16.mxu0 %vm1477_vm14, %v11277_v55  ;;  %v14484_v55 = vrot.slane %v820_v15, 7 }
  0xd9   : > { %v817_v29 = vor.u32 %v815_v25, %v814_v51  ;;  %v2052_v15 = vrot.slane %v2050_v31, 4  ;;  %v2051_v1 = vsel %vm14308_vm8, %v11301_v0, %v2050_v31  ;;  %v2066_v37 = vrot.slane %v2064_v8, 4  ;;  %v13744_v31 = vld [vmem:[#allocation2 + $0x50] sm:$0x1] }
  0xda   : > { %v825_v57 = vor.u32 %v823_v24, %v14484_v55  ;;  %v2059_v24 = vrot.slane %v2057_v36, 4  ;;  %v827_v2 = vrot.slane %v14484_v55, 4  ;;  %v13637_v55 = vld [vmem:[#allocation2 + $0x30] sm:$0xff]  }
  0xdb   : > { %v985_v20 = vsel %vm13903_vm10, %v817_v29, %v984_v16  ;;  %v13742_v29 = vld [vmem:[#allocation2 + $0x38] sm:$0x1]  ;;  %vm15686_vm10 = vmand %vm402_vm5, %vm346_vm4 }
  0xdc   : > { %v826_v9 = vsel %vm13912_vm11, %v818_v62, %v825_v57  ;;  %986 = vst [vmem:[#allocation2 + $0xc0] sm:$0xf] %v985_v20  ;;  %v2067_v62 = vrot.slane %v13742_v29, 5  ;;  %v14521_v57 = vld [vmem:[%s17684_s1 + $0x8] sm:$0x3]  ;;  %v2061_v13 = vsel %vm14308_vm8, %v2059_v24, %v2060_v59 }
  0xdd   : > { %987 = vst.msk [vmem:[#allocation2 + $0xc4] sm:$0xf] %vm280_vm1, %v826_v9  ;;  %v11304_v9 = vrot.slane %v1988_v52, 9  ;;  %v13746_v24 = vld [vmem:[#allocation2 + $0x5c] sm:$0x1]  ;;  %v3329_v21 = vsel %vm1526_vm0, %v14521_v57, 0 }
  0xde   : > { %v2068_v16 = vsel %vm14308_vm8, %v2066_v37, %v2067_v62  ;;  %v2088_v41 = vrot.slane %v13746_v24, 5  ;;  %v13748_v62 = vld [vmem:[#allocation2 + $0x70] sm:$0xf]  ;;  %vm405_vm1 = vcmask 57344  }
  0xdf   : > { %12405 = vmatmul.mubr.msk.bf16.gmra.mrb[20].mxu0 %vm1477_vm14, %v11278_v54  ;;  %v2039_v54 = vrot.slane %v13739_v58, 5  ;;  %v2071_v58 = vrot.slane %v14448_v42, 5 }
  0xe0   : > { %12408 = vmatprep.mubr.msk.bf16.mxu0 %vm1477_vm14, %v11279_v56  ;;  %v2037_v56 = vsel %vm14308_vm8, %v11299_v39, %v2036_v50  ;;  %v1987_v50 = vld [vmem:[#allocation2 + $0x30] sm:$0xe] }
  0xe1   : > { %v2040_v38 = vsel %vm14308_vm8, %v2038_v26, %v2039_v54  ;;  %v11303_v49 = vrot.slane %v1987_v50, 9  ;;  %v2073_v20 = vrot.slane %v2071_v58, 4  ;;  %v2072_v11 = vsel %vm14308_vm8, %v11304_v9, %v2071_v58 }
  0xe2   : > { %v11316_v47 = vcombine.low %v2037_v56, %v2040_v38  ;;  %v13743_v56 = vld [vmem:[#allocation2 + $0x44] sm:$0x1] }
  0xe3   : > { %v2065_v54 = vsel %vm14308_vm8, %v11303_v49, %v2064_v8  ;;  %v2074_v38 = vrot.slane %v13743_v56, 5  ;;  %v13747_v49 = vld [vmem:[#allocation2 + $0x68] sm:$0x1] }
  0xe4   : > { %v11320_v26 = vcombine.low %v2065_v54, %v2068_v16  ;;  %v1992_v54 = vld [vmem:[#allocation2 + $0x6c] sm:$0xe] }
  0xe5   : > { %v2075_v0 = vsel %vm14308_vm8, %v2073_v20, %v2074_v38  ;;  %v396_v38 = vld [vmem:[#allocation2 + $0xc8] sm:$0x1] }
  0xe6   : > { %v11321_v8 = vcombine.low %v2072_v11, %v2075_v0  ;;  %v397_v28 = vsel %vm13860_vm7, 0, %v396_v38  ;;  %v14628_v11 = vld [vmem:[#allocation2 + $0x50] sm:$0x1]  ;;  %v3529_v0 = vld [vmem:[#allocation2 + $0x48] sm:$0xe] }
  0xe7   : > { %12409 = vmatmul.mubr.msk.bf16.gmra.mrb[24].mxu0 %vm1477_vm14, %v11280_v7  ;;  %v2054_v7 = vsel %vm14308_vm8, %v2052_v15, %v2053_v35  ;;  %v2085_v15 = vrot.slane %v14456_v6, 5  ;;  %v2095_v6 = vrot.slane %v13747_v49, 5  ;;  %398 = vst [vmem:[#allocation2 + $0xc8] sm:$0x1] %v397_v28  ;;  %v14648_v49 = vld [vmem:[#allocation2 + $0x64] sm:$0xf] }
  0xe8   : > { %12412 = vmatprep.mubr.msk.bf16.mxu0 %vm1477_vm14, %v11281_v32  ;;  %v1986_v32 = vld [vmem:[#allocation2 + $0x24] sm:$0xe]  ;;  %v11318_v51 = vcombine.low %v2051_v1, %v2054_v7 }
  0xe9   : > { %v11302_v25 = vrot.slane %v1986_v32, 9  ;;  %v13745_v1 = vld [vmem:[#allocation2 + $0x64] sm:$0xf]  ;;  %v1991_v32 = vld [vmem:[#allocation2 + $0x60] sm:$0xe] }
  0xea   : > { %v2092_v7 = vrot.slane %v13745_v1, 5  ;;  %v11307_v59 = vrot.slane %v1991_v32, 9  ;;  %v13639_v1 = vld [vmem:[#allocation2 + $0x48] sm:$0xff]  }
  0xef   : > { %12413 = vmatmul.mubr.msk.bf16.gmra.mrb[28].mxu0 %vm1477_vm14, %v11282_v14  ;;  %v2603_v14 = vsel %vm1526_vm0, %v14357_v12, 0  ;;  %v2058_v12 = vsel %vm14308_vm8, %v11302_v25, %v2057_v36  ;;  %v1990_v36 = vld [vmem:[#allocation2 + $0x54] sm:$0xe]  ;;  %v2087_v25 = vrot.slane %v2085_v15, 4 }
  0xf0   : > { %12418 = vmatprep.mubr.msk.bf16.mxu0 %vm1477_vm14, %v11316_v47  ;;  %v11319_v39 = vcombine.low %v2058_v12, %v2061_v13  ;;  %v2081_v47 = vrot.slane %v13744_v31, 5  ;;  %v2099_v12 = vrot.slane %v13748_v62, 5  ;;  %v2093_v13 = vsel %vm14308_vm8, %v11307_v59, %v2092_v7 }
  0xf1   : > { %v2089_v29 = vsel %vm14308_vm8, %v2087_v25, %v2088_v41 }
  0xf2   : > { %v2082_v35 = vsel %vm14308_vm8, %v2080_v19, %v2081_v47  ;;  %v14626_v47 = vld [vmem:[#allocation2 + $0x4c] sm:$0xf] }
  0xf7   : > { %12419 = vmatmul.mubr.msk.bf16.vlgmr.msra.gmra.mrb[0].mxu0 %vm1477_vm14, %v11317_v22  ;;  %v1989_v22 = vld [vmem:[#allocation2 + $0x48] sm:$0xe] }
  0xf8   : > { %12451 = vmatpush3.bf16.msra.mxu0 %v2603_v14  ;;  %12422 = vmatprep.mubr.msk.bf16.mxu0 %vm1477_vm14, %v11318_v51  ;;  %v11305_v42 = vrot.slane %v1989_v22, 9  ;;  %v11306_v51 = vrot.slane %v1990_v36, 9  ;;  %v2094_v14 = vrot.slane %v2092_v7, 4  ;;  %v2101_v22 = vrot.slane %v2099_v12, 4  ;;  %v2798_v7 = vld [vmem:[#allocation2 + $0xc] sm:$0xf] }
  0xf9   : > { %13608 = vmatprep.subr.msk.bf16.mxu0 %vm1526_vm0, %v14521_v57  ;;  %v2847_v24 = vshrl.u32 %v2798_v7, 16  ;;  %v2850_v41 = vshll.u32 %v2798_v7, 16  ;;  %v2807_v7 = vld [vmem:[#allocation2 + $0x30] sm:$0xf] }
  0xfa   : > { %v2079_v33 = vsel %vm14308_vm8, %v11305_v42, %v2078_v63  ;;  %v2086_v37 = vsel %vm14308_vm8, %v11306_v51, %v2085_v15  ;;  %v2096_v58 = vsel %vm14308_vm8, %v2094_v14, %v2095_v6  ;;  %v11308_v63 = vrot.slane %v1992_v54, 9  ;;  %v13638_v42 = vld [vmem:[#allocation2 + $0x3c] sm:$0xff]   ;;  %v14650_v6 = vld [vmem:[#allocation2 + $0x68] sm:$0x1] }
  0xfb   : > { %v11322_v50 = vcombine.low %v2079_v33, %v2082_v35  ;;  %v11323_v16 = vcombine.low %v2086_v37, %v2089_v29  ;;  %v11324_v52 = vcombine.low %v2093_v13, %v2096_v58  ;;  %v3625_v15 = vrot.slane %v14626_v47, 5  ;;  %v3531_v37 = vld [vmem:[#allocation2 + $0x60] sm:$0xe]  ;;  %v2801_v58 = vld [vmem:[#allocation2 + $0x18] sm:$0xf] }
  0xfc   : > { %v2100_v9 = vsel %vm14308_vm8, %v11308_v63, %v2099_v12  ;;  %v3628_v33 = vrot.slane %v14628_v11, 5  ;;  %v11419_v35 = vrot.slane %v3529_v0, 9  ;;  %v3639_v29 = vrot.slane %v14648_v49, 5  ;;  %v14655_v54 = vld [vmem:[#allocation2 + $0x1c] sm:$0xf] }
  0xfd   : > { %v3627_v36 = vrot.slane %v3625_v15, 4  ;;  %v3642_v62 = vrot.slane %v14650_v6, 5  ;;  %v11421_v12 = vrot.slane %v3531_v37, 9  ;;  %v2849_v13 = vrot.slane %v2847_v24, 4  ;;  %v14657_v63 = vld [vmem:[#allocation2 + $0x14] sm:$0x1] }
  0xfe   : > { %v14635_v32 = vsel %vm14308_vm8, %v11419_v35, %v3625_v15  ;;  %v2871_v38 = vshrl.u32 %v2801_v58, 16  ;;  %v2874_v28 = vshll.u32 %v2801_v58, 16  ;;  %v14685_v0 = vld [vmem:[#allocation2 + $0x28] sm:$0xf]  ;;  %v13643_v24 = vld [vmem:[#allocation2 + $0x78] sm:$0xff]  }
  0xff   : > { %12423 = vmatmul.mubr.msk.bf16.gmra.mrb[4].mxu0 %vm1477_vm14, %v11319_v39  ;;  %v13749_v39 = vld [vmem:[#allocation2 + $0x74] sm:$0x1]  ;;  %17815 = vst [vmem:[#allocation8_spill] sm:$0xff] %v14635_v32  ;;  %v14641_v51 = vsel %vm14308_vm8, %v3627_v36, %v3628_v33 }
 0x100   : > { %12426 = vmatprep.mubr.msk.bf16.mxu0 %vm1477_vm14, %v11320_v26  ;;  %v2102_v26 = vrot.slane %v13749_v39, 5  ;;  %17816 = vst [vmem:[#allocation9_spill] sm:$0xff] %v14641_v51 }
 0x102   : > { %v2103_v20 = vsel %vm14308_vm8, %v2101_v22, %v2102_v26  ;;  %v2852_v22 = vrot.slane %v2850_v41, 5 }
 0x103   : > { %v11325_v56 = vcombine.low %v2100_v9, %v2103_v20  ;;  %v14663_v9 = vsel %vm14308_vm8, %v11421_v12, %v3639_v29  ;;  %v13642_v20 = vld [vmem:[#allocation2 + $0x6c] sm:$0xff]   ;;  %v2904_v12 = vshll.u32 %v14685_v0, 16 }
 0x104   : > { %17817 = vst [vmem:[#allocation10_spill] sm:$0xff] %v14663_v9 }
 0x107   : > { %12427 = vmatmul.mubr.msk.bf16.gmra.mrb[8].mxu0 %vm1477_vm14, %v11321_v8  ;;  %v13640_v8 = vld [vmem:[#allocation2 + $0x54] sm:$0xff]  }
 0x108   : > { %12430 = vmatprep.mubr.msk.bf16.mxu0 %vm1477_vm14, %v11322_v50  ;;  %v14637_v50 = vld [vmem:[#allocation2 + $0x10] sm:$0xf] }
 0x109   : > { %v2856_v59 = vshll.u32 %v14637_v50, 16  ;;  %v2860_v14 = vshrl.u32 %v14637_v50, 16 }
 0x10b   : > { %v14659_v39 = vrot.slane %v2856_v59, 5  ;;  %v2862_v26 = vrot.slane %v2860_v14, 4 }
 0x10f   : > { %12431 = vmatmul.mubr.msk.bf16.gmra.mrb[12].mxu0 %vm1477_vm14, %v11323_v16  ;;  %v3641_v16 = vrot.slane %v3639_v29, 4  ;;  %v13644_v29 = vld [vmem:[#allocation2 + $0x84] sm:$0xff]  }
 0x110   : > { %12434 = vmatprep.mubr.msk.bf16.mxu0 %vm1477_vm14, %v11324_v52  ;;  %v13641_v52 = vld [vmem:[#allocation2 + $0x60] sm:$0xff]  }
 0x117   : > { %12435 = vmatmul.mubr.msk.bf16.gmra.mrb[16].mxu0 %vm1477_vm14, %v11325_v56  ;;  %v14667_v56 = vsel %vm14308_vm8, %v3641_v16, %v3642_v62 }
 0x118   : > { %12438 = vmatprep.mubr.msk.bf16.mxu0 %vm1477_vm14, %v11326_v10  ;;  %v988_v10 = vld [vmem:[#allocation2 + $0xc8] sm:$0x1]  ;;  %17818 = vst [vmem:[#allocation11_spill] sm:$0xff] %v14667_v56  ;;  %v14811_v56 = vld [vmem:[#allocation2 + $0xb8] sm:$0xf] }
 0x119   : > { %v989_v45 = vsel %vm13844_vm6, %v827_v2, %v988_v10  ;;  %v14672_v2 = vld [vmem:[#allocation2 + $0x20] sm:$0x1]  ;;  %v2880_v10 = vshll.u32 %v14655_v54, 16 }
 0x11a   : > { %990 = vst [vmem:[#allocation2 + $0xc8] sm:$0x1] %v989_v45  ;;  %v2853_v45 = vor.u32 %v2852_v22, %v2849_v13  ;;  %v2908_v13 = vshrl.u32 %v14685_v0, 16  ;;  %v2922_v22 = vshll.u32 %v2807_v7, 16 }
 0x11b   : > { %v14689_v36 = vrot.slane %v2880_v10, 5  ;;  %v14719_v10 = vld [vmem:[#allocation2 + $0x98] sm:$0x1] }
 0x11c   : > { %v14692_v41 = vrot.slane %v2853_v45, 4 }
 0x11f   : > { %12439 = vmatmul.mubr.msk.bf16.gmra.mrb[20].mxu0 %vm1477_vm14, %v11327_v23  ;;  %v13636_v23 = vld [vmem:[#allocation2 + $0x24] sm:$0xff]  }
 0x120   : > { %12442 = vmatprep.mubr.msk.bf16.mxu0 %vm1477_vm14, %v11328_v61  ;;  %v14606_v61 = vld [vmem:[#allocation2 + $0x34] sm:$0xf] }
 0x121   : > { %v3611_v46 = vrot.slane %v14606_v61, 5  ;;  %v2932_v25 = vshrl.u32 %v14606_v61, 16 }
 0x123   : > { %v3613_v18 = vrot.slane %v3611_v46, 4  ;;  %v14617_v57 = vsel %vm14308_vm8, %v11417_v27, %v3611_v46  ;;  %v14680_v46 = vld [vmem:[#allocation2 + $0x80] sm:$0x1]  ;;  %v3533_v27 = vld [vmem:[#allocation2 + $0x78] sm:$0xe] }
 0x124   : > { %17813 = vst [vmem:[#allocation6_spill] sm:$0xff] %v14617_v57  ;;  %v11423_v33 = vrot.slane %v3533_v27, 9 }
 0x127   : > { %12443 = vmatmul.mubr.msk.bf16.gmra.mrb[24].mxu0 %vm1477_vm14, %v11329_v48  ;;  %v14609_v48 = vld [vmem:[#allocation2 + $0x38] sm:$0x1] }
 0x128   : > { %12446 = vmatprep.mubr.msk.bf16.mxu0 %vm1477_vm14, %v11330_v60  ;;  %v3614_v60 = vrot.slane %v14609_v48, 5 }
 0x12a   : > { %v14621_v19 = vsel %vm14308_vm8, %v3613_v18, %v3614_v60  ;;  %v3653_v60 = vrot.slane %v14678_v40, 5  ;;  %v3656_v18 = vrot.slane %v14680_v46, 5 }
 0x12b   : > { %17814 = vst [vmem:[#allocation7_spill] sm:$0xff] %v14621_v19  ;;  %v14830_v19 = vld [vmem:[#allocation2 + $0x58] sm:$0xf] }
 0x12c   : > { %v14700_v37 = vsel %vm14308_vm8, %v11423_v33, %v3653_v60  ;;  %v14726_v33 = vrot.slane %v2904_v12, 5 }
 0x12d   : > { %17819 = vst [vmem:[#allocation12_spill] sm:$0xff] %v14700_v37 }
 0x12f   : > { %12447 = vmatmul.mubr.msk.bf16.gmra.mrb[28].mxu0 %vm1477_vm14, %v17812_v34  ;;  %v2866_v34 = vshll.u32 %v14657_v63, 16 }
 0x130   : > { %12452 = vmatprep.mubr.msk.bf16.mxu0 %vm1477_vm14, %v13634_v5 }
 0x131   : > { %v14687_v35 = vrot.slane %v2866_v34, 5 }
 0x137   : > { %12453 = vmatmul.mubr.msk.bf16.vlgmr.msra.gmra.mrb[0].mxu0 %vm1477_vm14, %v13635_v53  ;;  %v2804_v53 = vld [vmem:[#allocation2 + $0x24] sm:$0xf] }
 0x138   : > { %12485 = vmatpush3.bf16.msra.mxu0 %v3329_v21  ;;  %12456 = vmatprep.mubr.msk.bf16.mxu0 %vm1477_vm14, %v13636_v23  ;;  %v2863_v23 = vor.u32 %v2862_v26, %v14659_v39  ;;  %v2884_v21 = vshrl.u32 %v14655_v54, 16  ;;  %v2895_v15 = vshrl.u32 %v2804_v53, 16  ;;  %v2898_v62 = vshll.u32 %v2804_v53, 16  ;;  %v3534_v53 = vld [vmem:[#allocation2 + $0x84] sm:$0xe] }
 0x139   : > { %13609 = vmatprep.subr.msk.bf16.mxu0 %vm1526_vm0, %v14603_v30  ;;  %v11424_v27 = vrot.slane %v3534_v53, 9  ;;  %v2928_v53 = vshll.u32 %v14606_v61, 16  ;;  %v2859_v61 = vsel %vm13935_vm13, %v14692_v41, %v14659_v39 }
 0x13a   : > { %v14694_v59 = vrot.slane %v2863_v23, 4  ;;  %v14696_v14 = vrot.slane %v2884_v21, 4  ;;  %v14708_v16 = vrot.slane %v2895_v15, 4  ;;  %v2900_v21 = vrot.slane %v2898_v62, 5  ;;  %v14732_v62 = vld [vmem:[#allocation2 + $0x2c] sm:$0x1] }
 0x13b   : > { %v3670_v15 = vrot.slane %v14719_v10, 5 }
 0x13c   : > { %v2869_v39 = vsel %vm13935_vm13, %v14694_v59, %v14687_v35 }
 0x13f   : > { %12457 = vmatmul.mubr.msk.bf16.gmra.mrb[4].mxu0 %vm1477_vm14, %v13637_v55  ;;  %v2873_v55 = vrot.slane %v2871_v38, 4  ;;  %v14714_v38 = vld [vmem:[#allocation2 + $0x8c] sm:$0x1] }
 0x140   : > { %12460 = vmatprep.mubr.msk.bf16.mxu0 %vm1477_vm14, %v13638_v42  ;;  %v2876_v42 = vrot.slane %v2874_v28, 5  ;;  %v14716_v28 = vld [vmem:[#allocation2 + $0x94] sm:$0xf]  ;;  %v3663_v23 = vrot.slane %v14714_v38, 5 }
 0x142   : > { %v2877_v34 = vor.u32 %v2876_v42, %v2873_v55 }
 0x147   : > { %12461 = vmatmul.mubr.msk.bf16.gmra.mrb[8].mxu0 %vm1477_vm14, %v13639_v1  ;;  %v2890_v1 = vshll.u32 %v14672_v2, 16 }
 0x148   : > { %12464 = vmatprep.mubr.msk.bf16.mxu0 %vm1477_vm14, %v13640_v8  ;;  %v3655_v8 = vrot.slane %v3653_v60, 4  ;;  %v3535_v60 = vld [vmem:[#allocation2 + $0x90] sm:$0xe] }
 0x149   : > { %v11425_v42 = vrot.slane %v3535_v60, 9  ;;  %v2887_v60 = vor.u32 %v14696_v14, %v14689_v36  ;;  %v14773_v14 = vrot.slane %v2928_v53, 5 }
 0x14a   : > { %v14706_v58 = vsel %vm14308_vm8, %v3655_v8, %v3656_v18  ;;  %v3667_v18 = vrot.slane %v14716_v28, 5 }
 0x14b   : > { %17820 = vst [vmem:[#allocation13_spill] sm:$0xff] %v14706_v58  ;;  %v14782_v44 = vrot.slane %v2887_v60, 4 }
 0x14c   : > { %v3669_v5 = vrot.slane %v3667_v18, 4 }
 0x14f   : > { %12465 = vmatmul.mubr.msk.bf16.gmra.mrb[12].mxu0 %vm1477_vm14, %v13641_v52  ;;  %v2919_v52 = vshrl.u32 %v2807_v7, 16  ;;  %v2910_v7 = vrot.slane %v2908_v13, 4  ;;  %v14742_v13 = vsel %vm14308_vm8, %v11425_v42, %v3667_v18  ;;  %v2810_v18 = vld [vmem:[#allocation2 + $0x3c] sm:$0xf] }
 0x150   : > { %12468 = vmatprep.mubr.msk.bf16.mxu0 %vm1477_vm14, %v13642_v20  ;;  %v14712_v20 = vld [vmem:[#allocation2 + $0x88] sm:$0xf]  ;;  %17823 = vst [vmem:[#allocation16_spill] sm:$0xff] %v14742_v13 }
 0x151   : > { %v3660_v45 = vrot.slane %v14712_v20, 5  ;;  %v2921_v8 = vrot.slane %v2919_v52, 4  ;;  %v13646_v52 = vld [vmem:[#allocation2 + $0x9c] sm:$0xff]   ;;  %v2911_v42 = vor.u32 %v2910_v7, %v14726_v33  ;;  %v2946_v7 = vshll.u32 %v2810_v18, 16 }
 0x153   : > { %v3662_v55 = vrot.slane %v3660_v45, 4  ;;  %v14730_v26 = vsel %vm14308_vm8, %v11424_v27, %v3660_v45  ;;  %v14750_v27 = vsel %vm14308_vm8, %v3669_v5, %v3670_v15  ;;  %v2914_v5 = vshll.u32 %v14732_v62, 16  ;;  %v14766_v45 = vld [vmem:[#allocation2 + $0x40] sm:$0xf] }
 0x154   : > { %17821 = vst [vmem:[#allocation14_spill] sm:$0xff] %v14730_v26  ;;  %17824 = vst [vmem:[#allocation17_spill] sm:$0xff] %v14750_v27  ;;  %v2938_v15 = vshll.u32 %v14609_v48, 16  ;;  %v2943_v48 = vshrl.u32 %v2810_v18, 16  ;;  %v2952_v35 = vshll.u32 %v14766_v45, 16  ;;  %v2956_v59 = vshrl.u32 %v14766_v45, 16 }
 0x155   : > { %v14738_v12 = vsel %vm14308_vm8, %v3662_v55, %v3663_v23  ;;  %v14756_v23 = vrot.slane %v2877_v34, 4  ;;  %v2901_v55 = vor.u32 %v2900_v21, %v14708_v16  ;;  %17825 = vst [vmem:[#allocation18_spill] sm:$0xff] %v14766_v45  ;;  %v2934_v34 = vrot.slane %v2932_v25, 4  ;;  %v14775_v16 = vld [vmem:[#allocation2 + $0xac] sm:$0xf]  ;;  %v13648_v26 = vld [vmem:[#allocation2 + $0xb4] sm:$0xff]  }
 0x156   : > { %17822 = vst [vmem:[#allocation15_spill] sm:$0xff] %v14738_v12  ;;  %v14777_v21 = vld [vmem:[#allocation2 + $0xb0] sm:$0x1]  ;;  %v2813_v25 = vld [vmem:[#allocation2 + $0x48] sm:$0xf]  ;;  %v14788_v53 = vrot.slane %v2911_v42, 4 }
 0x157   : > { %12469 = vmatmul.mubr.msk.bf16.gmra.mrb[16].mxu0 %vm1477_vm14, %v13643_v24  ;;  %v2924_v24 = vrot.slane %v2922_v22, 5  ;;  %v14744_v22 = vrot.slane %v2890_v1, 5  ;;  %v3537_v1 = vld [vmem:[#allocation2 + $0xa8] sm:$0xe]  ;;  %v3684_v31 = vrot.slane %v14777_v21, 5  ;;  %v2935_v13 = vor.u32 %v2934_v34, %v14773_v14 }
 0x158   : > { %12472 = vmatprep.mubr.msk.bf16.mxu0 %vm1477_vm14, %v13644_v29  ;;  %v13645_v29 = vld [vmem:[#allocation2 + $0x90] sm:$0xff]   ;;  %v14795_v60 = vrot.slane %v2938_v15, 5  ;;  %v2967_v58 = vshrl.u32 %v2813_v25, 16  ;;  %v2958_v37 = vrot.slane %v2956_v59, 4  ;;  %v2970_v34 = vshll.u32 %v2813_v25, 16 }
 0x159   : > { %v2925_v41 = vor.u32 %v2924_v24, %v2921_v8  ;;  %v11427_v8 = vrot.slane %v3537_v1, 9  ;;  %v14786_v24 = vrot.slane %v2901_v55, 4  ;;  %v2945_v1 = vrot.slane %v2943_v48, 4  ;;  %v14815_v48 = vld [vmem:[#allocation2 + $0xc4] sm:$0xf] }
 0x15a   : > { %v2948_v55 = vrot.slane %v2946_v7, 5  ;;  %v11382_v7 = vcombine.low %v2859_v61, %v2869_v39  ;;  %v3538_v59 = vld [vmem:[#allocation2 + $0xb4] sm:$0xe]  ;;  %v3688_v25 = vrot.slane %v14811_v56, 5  ;;  %v2969_v51 = vrot.slane %v2967_v58, 4 }
 0x15b   : > { %v14792_v27 = vrot.slane %v2925_v41, 4  ;;  %v14807_v41 = vrot.slane %v2952_v35, 5  ;;  %v14822_v35 = vld [vmem:[#allocation2 + $0xc8] sm:$0x1]  ;;  %v11428_v15 = vrot.slane %v3538_v59, 9  ;;  %v2972_v32 = vrot.slane %v2970_v34, 5 }
 0x15c   : > { %v3698_v61 = vrot.slane %v14822_v35, 5  ;;  %v2949_v39 = vor.u32 %v2948_v55, %v2945_v1  ;;  %v13649_v59 = vld [vmem:[#allocation2 + $0xc0] sm:$0xff]   ;;  %v2976_v45 = vshll.u32 %v14626_v47, 16  ;;  %v2980_v55 = vshrl.u32 %v14626_v47, 16 }
 0x15d   : > { %v2959_v57 = vor.u32 %v2958_v37, %v14807_v41  ;;  %v2893_v47 = vsel %vm13935_vm13, %v14782_v44, %v14744_v22 }
 0x15e   : > { %v2950_v22 = vrot.slane %v2949_v39, 4 }
 0x15f   : > { %12473 = vmatmul.mubr.msk.bf16.gmra.mrb[20].mxu0 %vm1477_vm14, %v13645_v29  ;;  %v3681_v29 = vrot.slane %v14775_v16, 5 }
 0x160   : > { %12476 = vmatprep.mubr.msk.bf16.mxu0 %vm1477_vm14, %v13646_v52  ;;  %v14790_v52 = vrot.slane %v2914_v5, 5  ;;  %v14805_v5 = vld [vmem:[#allocation2 + $0x44] sm:$0x1] }
 0x161   : > { %v3683_v18 = vrot.slane %v3681_v29, 4  ;;  %v14799_v12 = vsel %vm14308_vm8, %v11427_v8, %v3681_v29  ;;  %v14813_v29 = vld [vmem:[#allocation2 + $0xbc] sm:$0x1] }
 0x162   : > { %17826 = vst [vmem:[#allocation19_spill] sm:$0xff] %v14799_v12  ;;  %v3691_v8 = vrot.slane %v14813_v29, 5  ;;  %v2962_v12 = vshll.u32 %v14805_v5, 16 }
 0x163   : > { %v14803_v42 = vsel %vm14308_vm8, %v3683_v18, %v3684_v31  ;;  %v2883_v31 = vsel %vm13935_vm13, %v14756_v23, %v14689_v36  ;;  %v2936_v18 = vrot.slane %v2935_v13, 4  ;;  %v2816_v36 = vld [vmem:[#allocation2 + $0x54] sm:$0xf]  ;;  %v3690_v23 = vrot.slane %v3688_v25, 4 }
 0x164   : > { %17827 = vst [vmem:[#allocation20_spill] sm:$0xff] %v14803_v42  ;;  %v3539_v42 = vld [vmem:[#allocation2 + $0xc0] sm:$0xe]  ;;  %v2994_v37 = vshll.u32 %v2816_v36, 16 }
 0x165   : > { %v11429_v9 = vrot.slane %v3539_v42, 9  ;;  %v14840_v1 = vsel %vm14308_vm8, %v3690_v23, %v3691_v8  ;;  %v2991_v42 = vshrl.u32 %v2816_v36, 16  ;;  %v3004_v8 = vshrl.u32 %v14830_v19, 16 }
 0x166   : > { %v2941_v44 = vsel %vm13935_vm13, %v2936_v18, %v14795_v60  ;;  %v2964_v36 = vrot.slane %v2962_v12, 5  ;;  %v14878_v23 = vrot.slane %v2976_v45, 5  ;;  %v11383_v12 = vcombine.low %v2883_v31, %v2893_v47  ;;  %v2825_v47 = vld [vmem:[#allocation2 + $0x78] sm:$0xf] }
 0x167   : > { %12477 = vmatmul.mubr.msk.bf16.gmra.mrb[24].mxu0 %vm1477_vm14, %v13647_v4  ;;  %v3695_v4 = vrot.slane %v14815_v48, 5  ;;  %v2993_v34 = vrot.slane %v2991_v42, 4 }
 0x168   : > { %12480 = vmatprep.mubr.msk.bf16.mxu0 %vm1477_vm14, %v13648_v26  ;;  %v14834_v26 = vsel %vm14308_vm8, %v11428_v15, %v3688_v25  ;;  %v3000_v25 = vshll.u32 %v14830_v19, 16 }
 0x169   : > { %v3697_v13 = vrot.slane %v3695_v4, 4  ;;  %v14844_v58 = vsel %vm14308_vm8, %v11429_v9, %v3695_v4  ;;  %v2907_v9 = vsel %vm13935_vm13, %v14786_v24, %v14726_v33  ;;  %v2917_v4 = vsel %vm13935_vm13, %v14788_v53, %v14790_v52  ;;  %v2819_v33 = vld [vmem:[#allocation2 + $0x60] sm:$0xf] }
 0x16a   : > { %v2960_v24 = vrot.slane %v2959_v57, 4  ;;  %v2982_v53 = vrot.slane %v2980_v55, 4  ;;  %v2986_v52 = vshll.u32 %v14628_v11, 16  ;;  %v3015_v60 = vshrl.u32 %v2819_v33, 16 }
 0x16b   : > { %v14851_v15 = vsel %vm14308_vm8, %v3697_v13, %v3698_v61  ;;  %v2931_v61 = vsel %vm13935_vm13, %v14792_v27, %v14773_v14  ;;  %v2973_v13 = vor.u32 %v2972_v32, %v2969_v51  ;;  %v2996_v27 = vrot.slane %v2994_v37, 5  ;;  %v2822_v37 = vld [vmem:[#allocation2 + $0x6c] sm:$0xf] }
 0x16c   : > { %17828 = vst [vmem:[#allocation21_spill] sm:$0xff] %v14851_v15  ;;  %v14881_v14 = vrot.slane %v3000_v25, 5  ;;  %v14883_v15 = vld [vmem:[#allocation2 + $0x5c] sm:$0x1]  ;;  %v3018_v18 = vshll.u32 %v2819_v33, 16  ;;  %v3024_v32 = vshll.u32 %v14648_v49, 16  ;;  %v11384_v45 = vcombine.low %v2907_v9, %v2917_v4 }
 0x16d   : > { %v3028_v51 = vshrl.u32 %v14648_v49, 16  ;;  %v3799_v57 = vsel %vm1526_vm0, %v14603_v30, 0  ;;  %v2955_v11 = vsel %vm13935_vm13, %v2950_v22, %v14807_v41  ;;  %v14892_v39 = vrot.slane %v2973_v13, 4  ;;  %v14897_v25 = vld [vmem:[#allocation2 + $0x70] sm:$0xf] }
 0x16e   : > { %v2983_v55 = vor.u32 %v2982_v53, %v14878_v23  ;;  %v14895_v42 = vrot.slane %v2986_v52, 5  ;;  %v2965_v49 = vsel %vm13935_vm13, %v2960_v24, %v2964_v36  ;;  %v2997_v31 = vor.u32 %v2996_v27, %v2993_v34 }
 0x16f   : > { %12481 = vmatmul.mubr.msk.bf16.gmra.mrb[28].mxu0 %vm1477_vm14, %v13649_v59  ;;  %v3006_v59 = vrot.slane %v3004_v8, 4  ;;  %v3010_v8 = vshll.u32 %v14883_v15, 16  ;;  %v3017_v9 = vrot.slane %v3015_v60, 4  ;;  %v3020_v41 = vrot.slane %v3018_v18, 5 }
 0x170   : > { %12486 = vmatprep.mubr.msk.bf16.mxu0 %vm1477_vm14, %v11382_v7  ;;  %v11385_v7 = vcombine.low %v2931_v61, %v2941_v44  ;;  %v14903_v4 = vrot.slane %v3024_v32, 5  ;;  %v3030_v61 = vrot.slane %v3028_v51, 4  ;;  %v14908_v44 = vld [vmem:[%s17684_s1 + $0xc] sm:$0x3]  ;;  %v3039_v22 = vshrl.u32 %v2822_v37, 16 }
 0x171   : > { %v3007_v30 = vor.u32 %v3006_v59, %v14881_v14  ;;  %v3042_v36 = vshll.u32 %v2822_v37, 16  ;;  %v3048_v34 = vshll.u32 %v14897_v25, 16  ;;  %v3052_v13 = vshrl.u32 %v14897_v25, 16 }
 0x172   : > { %v11386_v33 = vcombine.low %v2955_v11, %v2965_v49  ;;  %v2984_v24 = vrot.slane %v2983_v55, 4  ;;  %v3063_v53 = vshrl.u32 %v2825_v47, 16  ;;  %v3066_v52 = vshll.u32 %v2825_v47, 16 }
 0x173   : > { %v2998_v27 = vrot.slane %v2997_v31, 4  ;;  %v3012_v59 = vrot.slane %v3010_v8, 5  ;;  %v3072_v60 = vshll.u32 %v14678_v40, 16  ;;  %v3076_v18 = vshrl.u32 %v14678_v40, 16 }
 0x174   : > { %v3008_v32 = vrot.slane %v3007_v30, 4  ;;  %v3021_v51 = vor.u32 %v3020_v41, %v3017_v9  ;;  %v3041_v11 = vrot.slane %v3039_v22, 4  ;;  %v3044_v55 = vrot.slane %v3042_v36, 5  ;;  %v14929_v30 = vld [vmem:[#allocation2 + $0x74] sm:$0x1] }
 0x175   : > { %v14920_v37 = vrot.slane %v3048_v34, 5  ;;  %v3054_v49 = vrot.slane %v3052_v13, 4  ;;  %v2979_v40 = vsel %vm13935_vm13, %v14892_v39, %v14878_v23  ;;  %v2989_v31 = vsel %vm13935_vm13, %v2984_v24, %v14895_v42 }
 0x176   : > { %v3065_v8 = vrot.slane %v3063_v53, 4  ;;  %v3068_v47 = vrot.slane %v3066_v52, 5  ;;  %v3078_v9 = vrot.slane %v3076_v18, 4  ;;  %v3003_v22 = vsel %vm13935_vm13, %v2998_v27, %v14881_v14 }
 0x177   : > { %12487 = vmatmul.mubr.msk.bf16.vlgmr.msra.gmra.mrb[0].mxu0 %vm1477_vm14, %v11383_v12  ;;  %v3031_v12 = vor.u32 %v3030_v61, %v14903_v4  ;;  %v3013_v23 = vsel %vm13935_vm13, %v3008_v32, %v3012_v59  ;;  %v3022_v39 = vrot.slane %v3021_v51, 4  ;;  %v3045_v34 = vor.u32 %v3044_v55, %v3041_v11  ;;  %v2834_v11 = vld [vmem:[#allocation2 + $0x9c] sm:$0xf] }
 0x178   : > { %12519 = vmatpush3.bf16.msra.mxu0 %v3799_v57  ;;  %12490 = vmatprep.mubr.msk.bf16.mxu0 %vm1477_vm14, %v11384_v45  ;;  %v3034_v57 = vshll.u32 %v14650_v6, 16  ;;  %v2828_v45 = vld [vmem:[#allocation2 + $0x84] sm:$0xf]  ;;  %v14931_v6 = vrot.slane %v3072_v60, 5  ;;  %v3055_v13 = vor.u32 %v3054_v49, %v14920_v37  ;;  %v3058_v24 = vshll.u32 %v14929_v30, 16 }
 0x179   : > { %13610 = vmatprep.subr.msk.bf16.mxu0 %vm1526_vm0, %v14908_v44  ;;  %v3087_v41 = vshrl.u32 %v2828_v45, 16  ;;  %v3090_v61 = vshll.u32 %v2828_v45, 16  ;;  %v3032_v42 = vrot.slane %v3031_v12, 4  ;;  %v3082_v53 = vshll.u32 %v14680_v46, 16 }
 0x17a   : > { %v3036_v36 = vrot.slane %v3034_v57, 5  ;;  %v3096_v52 = vshll.u32 %v14712_v20, 16  ;;  %v3100_v14 = vshrl.u32 %v14712_v20, 16  ;;  %v3069_v27 = vor.u32 %v3068_v47, %v3065_v8  ;;  %v14953_v47 = vld [vmem:[#allocation2 + $0xa0] sm:$0xf] }
 0x17b   : > { %v3079_v59 = vor.u32 %v3078_v9, %v14931_v6  ;;  %v3089_v60 = vrot.slane %v3087_v41, 4  ;;  %v3092_v18 = vrot.slane %v3090_v61, 5  ;;  %v11387_v32 = vcombine.low %v2979_v40, %v2989_v31 }
 0x17c   : > { %v11388_v51 = vcombine.low %v3003_v22, %v3013_v23  ;;  %v3027_v12 = vsel %vm13935_vm13, %v3022_v39, %v14903_v4  ;;  %v3046_v46 = vrot.slane %v3045_v34, 4  ;;  %v3056_v57 = vrot.slane %v3055_v13, 4 }
 0x17d   : > { %v3060_v45 = vrot.slane %v3058_v24, 5  ;;  %v14951_v20 = vrot.slane %v3096_v52, 5  ;;  %v3102_v55 = vrot.slane %v3100_v14, 4  ;;  %v3070_v40 = vrot.slane %v3069_v27, 4 }
 0x17e   : > { %v3080_v31 = vrot.slane %v3079_v59, 4  ;;  %v3084_v9 = vrot.slane %v3082_v53, 5  ;;  %v3093_v41 = vor.u32 %v3092_v18, %v3089_v60  ;;  %v3120_v4 = vshll.u32 %v14716_v28, 16 }
 0x17f   : > { %12491 = vmatmul.mubr.msk.bf16.gmra.mrb[4].mxu0 %vm1477_vm14, %v11385_v7  ;;  %v2831_v7 = vld [vmem:[#allocation2 + $0x90] sm:$0xf]  ;;  %v3124_v61 = vshrl.u32 %v14716_v28, 16  ;;  %v3135_v22 = vshrl.u32 %v2834_v11, 16  ;;  %v3138_v23 = vshll.u32 %v2834_v11, 16  ;;  %v3051_v39 = vsel %vm13935_vm13, %v3046_v46, %v14920_v37 }
 0x180   : > { %12494 = vmatprep.mubr.msk.bf16.mxu0 %vm1477_vm14, %v11386_v33  ;;  %v3037_v33 = vsel %vm13935_vm13, %v3032_v42, %v3036_v36  ;;  %v3111_v49 = vshrl.u32 %v2831_v7, 16  ;;  %v3114_v8 = vshll.u32 %v2831_v7, 16  ;;  %v3061_v36 = vsel %vm13935_vm13, %v3056_v57, %v3060_v45  ;;  %v2837_v57 = vld [vmem:[#allocation2 + $0xa8] sm:$0xf] }
 0x181   : > { %v3144_v42 = vshll.u32 %v14953_v47, 16  ;;  %v3148_v34 = vshrl.u32 %v14953_v47, 16  ;;  %v3103_v13 = vor.u32 %v3102_v55, %v14951_v20  ;;  %v3106_v28 = vshll.u32 %v14714_v38, 16 }
 0x182   : > { %v3113_v24 = vrot.slane %v3111_v49, 4  ;;  %v3116_v53 = vrot.slane %v3114_v8, 5  ;;  %v3075_v52 = vsel %vm13935_vm13, %v3070_v40, %v14931_v6  ;;  %v3085_v37 = vsel %vm13935_vm13, %v3080_v31, %v3084_v9 }
 0x183   : > { %v3094_v14 = vrot.slane %v3093_v41, 4  ;;  %v14973_v27 = vrot.slane %v3120_v4, 5  ;;  %v3126_v59 = vrot.slane %v3124_v61, 4  ;;  %v3137_v60 = vrot.slane %v3135_v22, 4  ;;  %v2840_v41 = vld [vmem:[#allocation2 + $0xb4] sm:$0xf] }
 0x184   : > { %v3140_v18 = vrot.slane %v3138_v23, 5  ;;  %v11389_v7 = vcombine.low %v3027_v12, %v3037_v33  ;;  %v3146_v38 = vrot.slane %v3144_v42, 5  ;;  %v3150_v46 = vrot.slane %v3148_v34, 4 }
 0x185   : > { %v3104_v45 = vrot.slane %v3103_v13, 4  ;;  %v3108_v11 = vrot.slane %v3106_v28, 5  ;;  %v3117_v55 = vor.u32 %v3116_v53, %v3113_v24  ;;  %v3130_v6 = vshll.u32 %v14719_v10, 16 }
 0x186   : > { %v11391_v49 = vcombine.low %v3075_v52, %v3085_v37  ;;  %v3127_v8 = vor.u32 %v3126_v59, %v14973_v27  ;;  %v3141_v40 = vor.u32 %v3140_v18, %v3137_v60  ;;  %v3159_v9 = vshrl.u32 %v2837_v57, 16 }
 0x187   : > { %12495 = vmatmul.mubr.msk.bf16.gmra.mrb[8].mxu0 %vm1477_vm14, %v11387_v32  ;;  %v11390_v32 = vcombine.low %v3051_v39, %v3061_v36  ;;  %v3151_v12 = vor.u32 %v3150_v46, %v3146_v38  ;;  %v3162_v33 = vshll.u32 %v2837_v57, 16  ;;  %v3168_v4 = vshll.u32 %v14775_v16, 16  ;;  %v2843_v46 = vld [vmem:[#allocation2 + $0xc0] sm:$0xf] }
 0x188   : > { %12498 = vmatprep.mubr.msk.bf16.mxu0 %vm1477_vm14, %v11388_v51  ;;  %v14975_v51 = vld [vmem:[#allocation2 + $0xa4] sm:$0x1]  ;;  %v3172_v61 = vshrl.u32 %v14775_v16, 16  ;;  %v3099_v10 = vsel %vm13935_vm13, %v3094_v14, %v14951_v20  ;;  %v3109_v22 = vsel %vm13935_vm13, %v3104_v45, %v3108_v11  ;;  %v3118_v23 = vrot.slane %v3117_v55, 4 }
 0x189   : > { %v3154_v31 = vshll.u32 %v14975_v51, 16  ;;  %v3132_v39 = vrot.slane %v3130_v6, 5  ;;  %v3183_v36 = vshrl.u32 %v2840_v41, 16  ;;  %v3186_v42 = vshll.u32 %v2840_v41, 16 }
 0x18a   : > { %v3192_v34 = vshll.u32 %v14811_v56, 16  ;;  %v3196_v13 = vshrl.u32 %v14811_v56, 16  ;;  %v3128_v28 = vrot.slane %v3127_v8, 4  ;;  %v3142_v24 = vrot.slane %v3141_v40, 4 }
 0x18b   : > { %v3156_v16 = vrot.slane %v3154_v31, 5  ;;  %v3161_v53 = vrot.slane %v3159_v9, 4  ;;  %v3152_v52 = vrot.slane %v3151_v12, 4  ;;  %v3164_v37 = vrot.slane %v3162_v33, 5 }
 0x18c   : > { %v3170_v59 = vrot.slane %v3168_v4, 5  ;;  %v3174_v60 = vrot.slane %v3172_v61, 4  ;;  %v11392_v20 = vcombine.low %v3099_v10, %v3109_v22  ;;  %v3185_v14 = vrot.slane %v3183_v36, 4 }
 0x18d   : > { %v3188_v18 = vrot.slane %v3186_v42, 5  ;;  %v3123_v57 = vsel %vm13935_vm13, %v3118_v23, %v14973_v27  ;;  %v3133_v56 = vsel %vm13935_vm13, %v3128_v28, %v3132_v39  ;;  %v3178_v45 = vshll.u32 %v14777_v21, 16 }
 0x18e   : > { %v3147_v11 = vsel %vm13935_vm13, %v3142_v24, %v3146_v38  ;;  %v3157_v55 = vsel %vm13935_vm13, %v3152_v52, %v3156_v16  ;;  %v3165_v6 = vor.u32 %v3164_v37, %v3161_v53  ;;  %v3175_v8 = vor.u32 %v3174_v60, %v3170_v59  ;;  %v3524_v37 = vld [vmem:[#allocation2 + $0xc] sm:$0xe] }
 0x18f   : > { %12499 = vmatmul.mubr.msk.bf16.gmra.mrb[12].mxu0 %vm1477_vm14, %v11389_v7  ;;  %v3194_v7 = vrot.slane %v3192_v34, 5  ;;  %v3207_v40 = vshrl.u32 %v2843_v46, 16  ;;  %v3210_v31 = vshll.u32 %v2843_v46, 16  ;;  %v3216_v27 = vshll.u32 %v14815_v48, 16 }
 0x190   : > { %12502 = vmatprep.mubr.msk.bf16.mxu0 %vm1477_vm14, %v11390_v32  ;;  %v3198_v32 = vrot.slane %v3196_v13, 4  ;;  %v3220_v9 = vshrl.u32 %v14815_v48, 16  ;;  %v3189_v41 = vor.u32 %v3188_v18, %v3185_v14  ;;  %v11393_v12 = vcombine.low %v3123_v57, %v3133_v56 }
 0x191   : > { %v11394_v33 = vcombine.low %v3147_v11, %v3157_v55  ;;  %v3166_v38 = vrot.slane %v3165_v6, 4  ;;  %v3176_v4 = vrot.slane %v3175_v8, 4  ;;  %v3180_v61 = vrot.slane %v3178_v45, 5  ;;  %v3526_v6 = vld [vmem:[#allocation2 + $0x24] sm:$0xe] }
 0x192   : > { %v3199_v21 = vor.u32 %v3198_v32, %v3194_v7  ;;  %v3209_v10 = vrot.slane %v3207_v40, 4  ;;  %v3212_v22 = vrot.slane %v3210_v31, 5  ;;  %v3218_v23 = vrot.slane %v3216_v27, 5  ;;  %v343_v32 = vld [vmem:[#allocation2 + $0xcc] sm:$0x1] }
 0x193   : > { %v3222_v39 = vrot.slane %v3220_v9, 4  ;;  %v3190_v36 = vrot.slane %v3189_v41, 4  ;;  %v3171_v48 = vsel %vm13935_vm13, %v3166_v38, %v3170_v59  ;;  %v3226_v24 = vshll.u32 %v14822_v35, 16 }
 0x194   : > { %v3200_v42 = vrot.slane %v3199_v21, 4  ;;  %v3213_v13 = vor.u32 %v3212_v22, %v3209_v10  ;;  %v3590_v52 = vrot.slane %v14637_v50, 5  ;;  %v11414_v46 = vrot.slane %v3524_v37, 9 }
 0x195   : > { %v3223_v28 = vor.u32 %v3222_v39, %v3218_v23  ;;  %v3195_v16 = vsel %vm13935_vm13, %v3190_v36, %v3194_v7  ;;  %v3228_v18 = vrot.slane %v3226_v24, 5  ;;  %v3593_v56 = vrot.slane %v14657_v63, 5  ;;  %v3525_v63 = vld [vmem:[#allocation2 + $0x18] sm:$0xe]  ;;  %v11496_v36 = vld [vmem:[%s17684_s1 + $0xe] sm:$0x3] }
 0x196   : > { %v3592_v57 = vrot.slane %v3590_v52, 4  ;;  %v344_v35 = vsel %vm13844_vm6, 0, %v343_v32  ;;  %v3597_v45 = vrot.slane %v14655_v54, 5  ;;  %v3591_v11 = vsel %vm14308_vm8, %v11414_v46, %v3590_v52  ;;  %v17830_v24 = vld [vmem:[#allocation6_spill] sm:$0xff]  ;;  %v17834_v32 = vld [vmem:[#allocation9_spill] sm:$0xff]  ;;  %vm15349_vm6 = vmand %vm405_vm1, %vm290_vm3 }
 0x197   : > { %12503 = vmatmul.mubr.msk.bf16.gmra.mrb[16].mxu0 %vm1477_vm14, %v11391_v49  ;;  %v3202_v49 = vshll.u32 %v14813_v29, 16  ;;  %v3181_v29 = vsel %vm13935_vm13, %v3176_v4, %v3180_v61  ;;  %v3224_v14 = vrot.slane %v3223_v28, 4  ;;  %345 = vst [vmem:[#allocation2 + $0xcc] sm:$0x1] %v344_v35  ;;  %v3604_v55 = vrot.slane %v14685_v0, 5  ;;  %v17836_v35 = vld [vmem:[#allocation10_spill] sm:$0xff]  ;;  %vm15591_vm3 = vmand %vm405_vm1, %vm346_vm4 }
 0x198   : > { %12506 = vmatprep.mubr.msk.bf16.mxu0 %vm1477_vm14, %v11392_v20  ;;  %v11395_v60 = vcombine.low %v3171_v48, %v3181_v29  ;;  %v3214_v20 = vrot.slane %v3213_v13, 4  ;;  %v3594_v3 = vsel %vm14308_vm8, %v3592_v57, %v3593_v56  ;;  %v11415_v31 = vrot.slane %v3525_v63, 9  ;;  %v3528_v4 = vld [vmem:[#allocation2 + $0x3c] sm:$0xe] }
 0x199   : > { %v3204_v34 = vrot.slane %v3202_v49, 5  ;;  %v3229_v7 = vsel %vm13935_vm13, %v3224_v14, %v3228_v18  ;;  %v11431_v40 = vcombine.low %v3591_v11, %v3594_v3  ;;  %v3599_v27 = vrot.slane %v3597_v45, 4  ;;  %v17833_v18 = vld [vmem:[#allocation8_spill] sm:$0xff] }
 0x19a   : > { %v3219_v50 = vsel %vm13935_vm13, %v3214_v20, %v3218_v23  ;;  %v3600_v9 = vrot.slane %v14672_v2, 5  ;;  %v11416_v41 = vrot.slane %v3526_v6, 9  ;;  %v3606_v21 = vrot.slane %v3604_v55, 4  ;;  %v17840_v6 = vld [vmem:[#allocation13_spill] sm:$0xff] }
 0x19b   : > { %v3205_v53 = vsel %vm13935_vm13, %v3200_v42, %v3204_v34  ;;  %v11397_v8 = vcombine.low %v3219_v50, %v3229_v7  ;;  %v3607_v54 = vrot.slane %v14732_v62, 5  ;;  %v3598_v49 = vsel %vm14308_vm8, %v11415_v31, %v3597_v45  ;;  %v17837_v50 = vld [vmem:[#allocation11_spill] sm:$0xff]  ;;  %v3536_v45 = vld [vmem:[#allocation2 + $0x9c] sm:$0xe] }
 0x19c   : > { %v11396_v59 = vcombine.low %v3195_v16, %v3205_v53  ;;  %v3601_v0 = vsel %vm14308_vm8, %v3599_v27, %v3600_v9  ;;  %v4158_v10 = vsel %vm1526_vm0, %v14908_v44, 0  ;;  %v11418_v22 = vrot.slane %v3528_v4, 9  ;;  %v17831_v16 = vld [vmem:[#allocation7_spill] sm:$0xff] }
 0x19d   : > { %v3608_v2 = vsel %vm14308_vm8, %v3606_v21, %v3607_v54  ;;  %v11432_v62 = vcombine.low %v3598_v49, %v3601_v0  ;;  %v3621_v39 = vrot.slane %v14805_v5, 5  ;;  %v3632_v44 = vrot.slane %v14830_v19, 5  ;;  %v3530_v5 = vld [vmem:[#allocation2 + $0x54] sm:$0xe]  ;;  %v17843_v31 = vld [vmem:[#allocation15_spill] sm:$0xff]  ;;  %v17846_v54 = vld [vmem:[#allocation17_spill] sm:$0xff] }
 0x19e   : > { %v11420_v29 = vrot.slane %v3530_v5, 9  ;;  %v3635_v28 = vrot.slane %v14883_v15, 5  ;;  %v17832_v53 = vcombine.low %v17830_v24, %v17831_v16  ;;  %v3646_v37 = vrot.slane %v14897_v25, 5  ;;  %v17845_v21 = vld [vmem:[#allocation16_spill] sm:$0xff]  ;;  %v17848_v49 = vld [vmem:[#allocation19_spill] sm:$0xff] }
 0x19f   : > { %12507 = vmatmul.mubr.msk.bf16.gmra.mrb[20].mxu0 %vm1477_vm14, %v11393_v12  ;;  %v3605_v12 = vsel %vm14308_vm8, %v11416_v41, %v3604_v55  ;;  %v3634_v13 = vrot.slane %v3632_v44, 4  ;;  %v3649_v15 = vrot.slane %v14929_v30, 5  ;;  %v17835_v46 = vcombine.low %v17833_v18, %v17834_v32  ;;  %v17839_v55 = vld [vmem:[#allocation12_spill] sm:$0xff]  ;;  %v15147_v16 = vld [vmem:[#allocation2 + $0x58] sm:$0xf] }
 0x1a0   : > { %12510 = vmatprep.mubr.msk.bf16.mxu0 %vm1477_vm14, %v11394_v33  ;;  %v17829_v33 = vld [vmem:[#allocation18_spill] sm:$0xff]  ;;  %v11433_v61 = vcombine.low %v3605_v12, %v3608_v2  ;;  %v3633_v52 = vsel %vm14308_vm8, %v11420_v29, %v3632_v44  ;;  %v3648_v14 = vrot.slane %v3646_v37, 4  ;;  %v17838_v7 = vcombine.low %v17836_v35, %v17837_v50  ;;  %v17849_v0 = vld [vmem:[#allocation20_spill] sm:$0xff] }
 0x1a1   : > { %v3618_v38 = vrot.slane %v17829_v33, 5  ;;  %v3636_v19 = vsel %vm14308_vm8, %v3634_v13, %v3635_v28  ;;  %v3674_v30 = vrot.slane %v14953_v47, 5  ;;  %v11426_v11 = vrot.slane %v3536_v45, 9  ;;  %v399_v2 = vld [vmem:[#allocation2 + $0xd4] sm:$0x1]  ;;  %v13654_v13 = vld [vmem:[#allocation2 + $0x48] sm:$0xff]  }
 0x1a2   : > { %v3650_v56 = vsel %vm14308_vm8, %v3648_v14, %v3649_v15  ;;  %v3677_v63 = vrot.slane %v14975_v51, 5  ;;  %v17847_v51 = vcombine.low %v17845_v21, %v17846_v54  ;;  %v17850_v12 = vcombine.low %v17848_v49, %v17849_v0  ;;  %v13656_v15 = vld [vmem:[#allocation2 + $0x60] sm:$0xff]   ;;  %v4353_v45 = vld [vmem:[#allocation2 + $0x18] sm:$0xf]  ;;  %v15191_v21 = vld [vmem:[#allocation2 + $0x8c] sm:$0x1] }
 0x1a3   : > { %v3620_v23 = vrot.slane %v3618_v38, 4  ;;  %v3619_v42 = vsel %vm14308_vm8, %v11418_v22, %v3618_v38  ;;  %v3676_v3 = vrot.slane %v3674_v30, 4  ;;  %v3675_v9 = vsel %vm14308_vm8, %v11426_v11, %v3674_v30  ;;  %v13651_v22 = vld [vmem:[#allocation2 + $0x24] sm:$0xff]   ;;  %v13657_v30 = vld [vmem:[#allocation2 + $0x6c] sm:$0xff]  }
 0x1a4   : > { %v17851_v33 = vcombine.low %v14834_v26, %v14840_v1  ;;  %v400_v4 = vsel %vm13860_vm7, 0, %v399_v2  ;;  %v15124_v26 = vld [vmem:[%s17684_s1 + $0x10] sm:$0x3]  ;;  %v15127_v1 = vld [vmem:[#allocation2 + $0x40] sm:$0xf]  ;;  %vm6683_vm7 = vcmask 1043456  }
 0x1a5   : > { %v3622_v34 = vsel %vm14308_vm8, %v3620_v23, %v3621_v39  ;;  %v3678_v47 = vsel %vm14308_vm8, %v3676_v3, %v3677_v63  ;;  %401 = vst [vmem:[#allocation2 + $0xd4] sm:$0x1] %v400_v4  ;;  %v13652_v23 = vld [vmem:[#allocation2 + $0x30] sm:$0xff]   ;;  %v4884_v39 = vsel %vm1526_vm0, %v11496_v36, 0  ;;  %v13658_v3 = vld [vmem:[#allocation2 + $0x78] sm:$0xff]  }
 0x1a6   : > { %v11435_v48 = vcombine.low %v3619_v42, %v3622_v34  ;;  %v11443_v41 = vcombine.low %v3675_v9, %v3678_v47  ;;  %v15129_v42 = vld [vmem:[#allocation2 + $0x44] sm:$0x1]  ;;  %v5166_v34 = vrot.slane %v15127_v1, 5  ;;  %v15176_v63 = vld [vmem:[#allocation2 + $0x1c] sm:$0xf] }
 0x1a7   : > { %12511 = vmatmul.mubr.msk.bf16.gmra.mrb[24].mxu0 %vm1477_vm14, %v11395_v60  ;;  %v3532_v60 = vld [vmem:[#allocation2 + $0x6c] sm:$0xe]  ;;  %v5169_v44 = vrot.slane %v15129_v42, 5  ;;  %v4411_v9 = vshll.u32 %v15176_v63, 16  ;;  %v4415_v47 = vshrl.u32 %v15176_v63, 16 }
 0x1a8   : > { %12514 = vmatprep.mubr.msk.bf16.mxu0 %vm1477_vm14, %v11396_v59  ;;  %v11437_v59 = vcombine.low %v3633_v52, %v3636_v19  ;;  %v11422_v20 = vrot.slane %v3532_v60, 9  ;;  %v5168_v5 = vrot.slane %v5166_v34, 4  ;;  %v5084_v52 = vld [vmem:[#allocation2 + $0x54] sm:$0xe]  ;;  %v5180_v19 = vrot.slane %v15147_v16, 5 }
 0x1a9   : > { %v11534_v60 = vrot.slane %v5084_v52, 9  ;;  %v5088_v49 = vld [vmem:[#allocation2 + $0x84] sm:$0xe] }
 0x1aa   : > { %v3647_v57 = vsel %vm14308_vm8, %v11422_v20, %v3646_v37  ;;  %v15142_v28 = vsel %vm14308_vm8, %v5168_v5, %v5169_v44  ;;  %v13655_v20 = vld [vmem:[#allocation2 + $0x54] sm:$0xff]   ;;  %v11538_v38 = vrot.slane %v5088_v49, 9 }
 0x1ab   : > { %v11439_v25 = vcombine.low %v3647_v57, %v3650_v56  ;;  %v15156_v14 = vsel %vm14308_vm8, %v11534_v60, %v5180_v19  ;;  %v15167_v57 = vld [vmem:[#allocation2 + $0x74] sm:$0x1]  ;;  %v5086_v56 = vld [vmem:[#allocation2 + $0x6c] sm:$0xe]  ;;  %v4359_v60 = vld [vmem:[#allocation2 + $0x30] sm:$0xf] }
 0x1ac   : > { %v5197_v35 = vrot.slane %v15167_v57, 5  ;;  %v11536_v50 = vrot.slane %v5086_v56, 9  ;;  %v15221_v56 = vld [vmem:[#allocation2 + $0xa0] sm:$0xf] }
 0x1af   : > { %12515 = vmatmul.mubr.msk.bf16.gmra.mrb[28].mxu0 %vm1477_vm14, %v11397_v8  ;;  %v17841_v8 = vcombine.low %v17839_v55, %v17840_v6  ;;  %v4356_v6 = vld [vmem:[#allocation2 + $0x24] sm:$0xf] }
 0x1b0   : > { %12520 = vmatprep.mubr.msk.bf16.mxu0 %vm1477_vm14, %v11431_v40  ;;  %v17842_v40 = vld [vmem:[#allocation14_spill] sm:$0xff]  ;;  %v4426_v54 = vshrl.u32 %v4356_v6, 16 }
 0x1b1   : > { %v17844_v27 = vcombine.low %v17842_v40, %v17843_v31  ;;  %v4402_v40 = vshrl.u32 %v4353_v45, 16  ;;  %v4405_v31 = vshll.u32 %v4353_v45, 16 }
 0x1b2   : > { %v4428_v44 = vrot.slane %v4426_v54, 4 }
 0x1b3   : > { %v4404_v4 = vrot.slane %v4402_v40, 4  ;;  %v4453_v40 = vshll.u32 %v4359_v60, 16 }
 0x1b7   : > { %12521 = vmatmul.mubr.msk.bf16.vlgmr.msra.gmra.mrb[0].mxu0 %vm1477_vm14, %v11432_v62  ;;  %v13650_v62 = vld [vmem:[#allocation2 + $0x18] sm:$0xff]  }
 0x1b8   : > { %12553 = vmatpush3.bf16.msra.mxu0 %v4158_v10  ;;  %12524 = vmatprep.mubr.msk.bf16.mxu0 %vm1477_vm14, %v11433_v61  ;;  %v17853_v61 = vld [vmem:[#allocation21_spill] sm:$0xff] }
 0x1b9   : > { %13611 = vmatprep.subr.msk.bf16.mxu0 %vm1526_vm0, %v11496_v36  ;;  %v17854_v10 = vcombine.low %v14844_v58, %v17853_v61  ;;  %v5082_v58 = vld [vmem:[#allocation2 + $0x3c] sm:$0xe]  ;;  %v13659_v61 = vld [vmem:[#allocation2 + $0x84] sm:$0xff]  }
 0x1ba   : > { %v11532_v36 = vrot.slane %v5082_v58, 9 }
 0x1bc   : > { %v15138_v29 = vsel %vm14308_vm8, %v11532_v36, %v5166_v34  ;;  %v13660_v34 = vld [vmem:[#allocation2 + $0x90] sm:$0xff]  }
 0x1bf   : > { %12525 = vmatmul.mubr.msk.bf16.gmra.mrb[4].mxu0 %vm1477_vm14, %v17832_v53  ;;  %v15149_v53 = vld [vmem:[#allocation2 + $0x5c] sm:$0x1] }
 0x1c0   : > { %12528 = vmatprep.mubr.msk.bf16.mxu0 %vm1477_vm14, %v11435_v48  ;;  %v13653_v48 = vld [vmem:[#allocation2 + $0x3c] sm:$0xff]   ;;  %v5183_v37 = vrot.slane %v15149_v53, 5 }
 0x1c7   : > { %12529 = vmatmul.mubr.msk.bf16.gmra.mrb[8].mxu0 %vm1477_vm14, %v17835_v46  ;;  %v15165_v46 = vld [vmem:[#allocation2 + $0x70] sm:$0xf] }
 0x1c8   : > { %12532 = vmatprep.mubr.msk.bf16.mxu0 %vm1477_vm14, %v11437_v59  ;;  %v5182_v59 = vrot.slane %v5180_v19, 4 }
 0x1ca   : > { %v15160_v18 = vsel %vm14308_vm8, %v5182_v59, %v5183_v37 }
 0x1cf   : > { %12533 = vmatmul.mubr.msk.bf16.gmra.mrb[12].mxu0 %vm1477_vm14, %v17838_v7 }
 0x1d0   : > { %12536 = vmatprep.mubr.msk.bf16.mxu0 %vm1477_vm14, %v11439_v25  ;;  %v5194_v25 = vrot.slane %v15165_v46, 5 }
 0x1d2   : > { %v5196_v7 = vrot.slane %v5194_v25, 4  ;;  %v15174_v11 = vsel %vm14308_vm8, %v11536_v50, %v5194_v25  ;;  %v15223_v25 = vld [vmem:[#allocation2 + $0xa4] sm:$0x1] }
 0x1d3   : > { %v5225_v45 = vrot.slane %v15223_v25, 5 }
 0x1d4   : > { %v15180_v55 = vsel %vm14308_vm8, %v5196_v7, %v5197_v35  ;;  %v5090_v7 = vld [vmem:[#allocation2 + $0x9c] sm:$0xe] }
 0x1d5   : > { %17855 = vst [vmem:[#allocation18_spill] sm:$0xff] %v15180_v55 }
 0x1d7   : > { %12537 = vmatmul.mubr.msk.bf16.gmra.mrb[16].mxu0 %vm1477_vm14, %v17841_v8 }
 0x1d8   : > { %12540 = vmatprep.mubr.msk.bf16.mxu0 %vm1477_vm14, %v17844_v27  ;;  %v15184_v27 = vld [vmem:[#allocation2 + $0x28] sm:$0xf] }
 0x1d9   : > { %v4435_v2 = vshll.u32 %v15184_v27, 16 }
 0x1df   : > { %12541 = vmatmul.mubr.msk.bf16.gmra.mrb[20].mxu0 %vm1477_vm14, %v17847_v51  ;;  %v4429_v51 = vshll.u32 %v4356_v6, 16  ;;  %v4450_v6 = vshrl.u32 %v4359_v60, 16 }
 0x1e0   : > { %12544 = vmatprep.mubr.msk.bf16.mxu0 %vm1477_vm14, %v11443_v41  ;;  %v15189_v41 = vld [vmem:[#allocation2 + $0x88] sm:$0xf] }
 0x1e1   : > { %v5208_v0 = vrot.slane %v15189_v41, 5  ;;  %v4431_v36 = vrot.slane %v4429_v51, 5  ;;  %v13661_v51 = vld [vmem:[#allocation2 + $0x9c] sm:$0xff]  }
 0x1e3   : > { %v15204_v58 = vsel %vm14308_vm8, %v11538_v38, %v5208_v0  ;;  %v4432_v35 = vor.u32 %v4431_v36, %v4428_v44  ;;  %v15242_v36 = vld [vmem:[#allocation2 + $0x38] sm:$0x1] }
 0x1e4   : > { %17856 = vst [vmem:[#allocation6_spill] sm:$0xff] %v15204_v58 }
 0x1e7   : > { %12545 = vmatmul.mubr.msk.bf16.gmra.mrb[24].mxu0 %vm1477_vm14, %v17850_v12  ;;  %v5211_v12 = vrot.slane %v15191_v21, 5 }
 0x1e8   : > { %12548 = vmatprep.mubr.msk.bf16.mxu0 %vm1477_vm14, %v17851_v33  ;;  %v4439_v33 = vshrl.u32 %v15184_v27, 16 }
 0x1ea   : > { %v4441_v52 = vrot.slane %v4439_v33, 4  ;;  %v13662_v33 = vld [vmem:[#allocation2 + $0xa8] sm:$0xff]  }
 0x1ef   : > { %12549 = vmatmul.mubr.msk.bf16.gmra.mrb[28].mxu0 %vm1477_vm14, %v17854_v10  ;;  %v15198_v10 = vld [vmem:[#allocation2 + $0x20] sm:$0x1] }
 0x1f0   : > { %12554 = vmatprep.mubr.msk.bf16.mxu0 %vm1477_vm14, %v13650_v62  ;;  %v5210_v62 = vrot.slane %v5208_v0, 4  ;;  %v4421_v37 = vshll.u32 %v15198_v10, 16 }
 0x1f2   : > { %v15208_v5 = vsel %vm14308_vm8, %v5210_v62, %v5211_v12  ;;  %v4423_v0 = vrot.slane %v4421_v37, 5  ;;  %v4362_v12 = vld [vmem:[#allocation2 + $0x3c] sm:$0xf] }
 0x1f3   : > { %17857 = vst [vmem:[#allocation7_spill] sm:$0xff] %v15208_v5  ;;  %v4474_v60 = vshrl.u32 %v4362_v12, 16  ;;  %v4380_v5 = vld [vmem:[#allocation2 + $0x84] sm:$0xf] }
 0x1f7   : > { %12555 = vmatmul.mubr.msk.bf16.vlgmr.msra.gmra.mrb[0].mxu0 %vm1477_vm14, %v13651_v22  ;;  %v4407_v22 = vrot.slane %v4405_v31, 5  ;;  %v11540_v31 = vrot.slane %v5090_v7, 9  ;;  %v15251_v7 = vld [vmem:[#allocation2 + $0xbc] sm:$0x1] }
 0x1f8   : > { %12587 = vmatpush3.bf16.msra.mxu0 %v4884_v39  ;;  %12558 = vmatprep.mubr.msk.bf16.mxu0 %vm1477_vm14, %v13652_v23  ;;  %v15200_v23 = vrot.slane %v4411_v9, 5  ;;  %v4417_v39 = vrot.slane %v4415_v47, 4 }
 0x1f9   : > { %13612 = vmatprep.subr.msk.bf16.mxu0 %vm1526_vm0, %v15124_v26  ;;  %v4408_v59 = vor.u32 %v4407_v22, %v4404_v4  ;;  %v4433_v4 = vrot.slane %v4432_v35, 4  ;;  %v4487_v35 = vshrl.u32 %v15127_v1, 16 }
 0x1fb   : > { %v4409_v49 = vrot.slane %v4408_v59, 4  ;;  %v4477_v59 = vshll.u32 %v4362_v12, 16  ;;  %v15266_v12 = vld [vmem:[#allocation2 + $0x4c] sm:$0xf]  ;;  %v4489_v44 = vrot.slane %v4487_v35, 4 }
 0x1fc   : > { %v4368_v35 = vld [vmem:[#allocation2 + $0x54] sm:$0xf] }
 0x1ff   : > { %12559 = vmatmul.mubr.msk.bf16.gmra.mrb[4].mxu0 %vm1477_vm14, %v13653_v48  ;;  %v15210_v48 = vld [vmem:[#allocation2 + $0x2c] sm:$0x1] }
 0x200   : > { %12562 = vmatprep.mubr.msk.bf16.mxu0 %vm1477_vm14, %v13654_v13  ;;  %v15212_v13 = vrot.slane %v4435_v2, 5  ;;  %v4445_v50 = vshll.u32 %v15210_v48, 16 }
 0x202   : > { %v4447_v62 = vrot.slane %v4445_v50, 5  ;;  %v15249_v50 = vld [vmem:[#allocation2 + $0xb8] sm:$0xf] }
 0x207   : > { %12563 = vmatmul.mubr.msk.bf16.gmra.mrb[8].mxu0 %vm1477_vm14, %v13655_v20  ;;  %v4418_v20 = vor.u32 %v4417_v39, %v15200_v23  ;;  %v4452_v39 = vrot.slane %v4450_v6, 4  ;;  %v5092_v6 = vld [vmem:[#allocation2 + $0xb4] sm:$0xe] }
 0x208   : > { %12566 = vmatprep.mubr.msk.bf16.mxu0 %vm1477_vm14, %v13656_v15  ;;  %v15219_v15 = vld [vmem:[#allocation2 + $0x34] sm:$0xf] }
 0x209   : > { %v4459_v9 = vshll.u32 %v15219_v15, 16  ;;  %v4463_v47 = vshrl.u32 %v15219_v15, 16  ;;  %v4419_v38 = vrot.slane %v4418_v20, 4  ;;  %v4483_v20 = vshll.u32 %v15127_v1, 16 }
 0x20a   : > { %v4438_v1 = vsel %vm13935_vm13, %v4433_v4, %v15212_v13 }
 0x20b   : > { %v4465_v37 = vrot.slane %v4463_v47, 4  ;;  %v4469_v47 = vshll.u32 %v15242_v36, 16 }
 0x20f   : > { %12567 = vmatmul.mubr.msk.bf16.gmra.mrb[12].mxu0 %vm1477_vm14, %v13657_v30  ;;  %v5222_v30 = vrot.slane %v15221_v56, 5 }
 0x210   : > { %12570 = vmatprep.mubr.msk.bf16.mxu0 %vm1477_vm14, %v13658_v3  ;;  %v4442_v3 = vor.u32 %v4441_v52, %v15212_v13  ;;  %v15244_v52 = vrot.slane %v4459_v9, 5  ;;  %v13664_v13 = vld [vmem:[#allocation2 + $0xc0] sm:$0xff]  }
 0x211   : > { %v5224_v54 = vrot.slane %v5222_v30, 4  ;;  %v15234_v2 = vsel %vm14308_vm8, %v11540_v31, %v5222_v30  ;;  %v4414_v30 = vsel %vm13935_vm13, %v4409_v49, %v15200_v23  ;;  %v5239_v31 = vrot.slane %v15251_v7, 5 }
 0x212   : > { %17858 = vst [vmem:[#allocation8_spill] sm:$0xff] %v15234_v2  ;;  %v4443_v22 = vrot.slane %v4442_v3, 4  ;;  %v4365_v3 = vld [vmem:[#allocation2 + $0x48] sm:$0xf]  ;;  %v4476_v23 = vrot.slane %v4474_v60, 4  ;;  %v4479_v49 = vrot.slane %v4477_v59, 5 }
 0x213   : > { %v4498_v19 = vshrl.u32 %v4365_v3, 16  ;;  %v15282_v60 = vsel %vm1526_vm0, %v15124_v26, 0  ;;  %v4507_v59 = vshll.u32 %v15266_v12, 16 }
 0x217   : > { %12571 = vmatmul.mubr.msk.bf16.gmra.mrb[16].mxu0 %vm1477_vm14, %v13659_v61  ;;  %v15238_v61 = vsel %vm14308_vm8, %v5224_v54, %v5225_v45  ;;  %v4424_v45 = vsel %vm13935_vm13, %v4419_v38, %v4423_v0  ;;  %v11542_v54 = vrot.slane %v5092_v6, 9  ;;  %v15268_v38 = vrot.slane %v4483_v20, 5 }
 0x218   : > { %12574 = vmatprep.mubr.msk.bf16.mxu0 %vm1477_vm14, %v13660_v34  ;;  %17859 = vst [vmem:[#allocation9_spill] sm:$0xff] %v15238_v61  ;;  %v4455_v34 = vrot.slane %v4453_v40, 5  ;;  %v5236_v40 = vrot.slane %v15249_v50, 5  ;;  %v11497_v4 = vcombine.low %v4414_v30, %v4424_v45  ;;  %v4511_v20 = vshrl.u32 %v15266_v12, 16 }
 0x219   : > { %v4471_v6 = vrot.slane %v4469_v47, 5  ;;  %v4490_v26 = vor.u32 %v4489_v44, %v15268_v38  ;;  %v5094_v47 = vld [vmem:[#allocation2 + $0xcc] sm:$0xe]  ;;  %v4525_v44 = vshll.u32 %v4368_v35, 16 }
 0x21a   : > { %v4456_v9 = vor.u32 %v4455_v34, %v4452_v39  ;;  %v5238_v0 = vrot.slane %v5236_v40, 4  ;;  %v15272_v8 = vsel %vm14308_vm8, %v11542_v54, %v5236_v40  ;;  %v4448_v39 = vsel %vm13935_vm13, %v4443_v22, %v4447_v62  ;;  %v15293_v54 = vld [vmem:[#allocation2 + $0xd0] sm:$0xf] }
 0x21b   : > { %17860 = vst [vmem:[#allocation10_spill] sm:$0xff] %v15272_v8  ;;  %v4501_v34 = vshll.u32 %v4365_v3, 16  ;;  %v4480_v62 = vor.u32 %v4479_v49, %v4476_v23  ;;  %v4493_v22 = vshll.u32 %v15129_v42, 16  ;;  %v15290_v3 = vcombine.low %v4438_v1, %v4448_v39  ;;  %v15300_v49 = vld [vmem:[#allocation2 + $0x50] sm:$0x1] }
 0x21c   : > { %v4457_v45 = vrot.slane %v4456_v9, 4  ;;  %v4522_v9 = vshrl.u32 %v4368_v35, 16  ;;  %v5250_v23 = vrot.slane %v15293_v54, 5  ;;  %v15302_v1 = vrot.slane %v4507_v59, 5  ;;  %v15315_v35 = vld [vmem:[#allocation2 + $0x64] sm:$0xf] }
 0x21d   : > { %v4503_v30 = vrot.slane %v4501_v34, 5  ;;  %v15309_v34 = vrot.slane %v4493_v22, 5  ;;  %v4535_v59 = vshrl.u32 %v15147_v16, 16  ;;  %v15362_v8 = vld [vmem:[#allocation2 + $0x7c] sm:$0xf] }
 0x21e   : > { %v4462_v39 = vsel %vm13935_vm13, %v4457_v45, %v15244_v52  ;;  %v5252_v32 = vrot.slane %v5250_v23, 4 }
 0x21f   : > { %12575 = vmatmul.mubr.msk.bf16.gmra.mrb[20].mxu0 %vm1477_vm14, %v13661_v51  ;;  %v4466_v51 = vor.u32 %v4465_v37, %v15244_v52  ;;  %v15278_v37 = vsel %vm14308_vm8, %v5238_v0, %v5239_v31  ;;  %v4500_v31 = vrot.slane %v4498_v19, 4  ;;  %v15295_v0 = vld [vmem:[#allocation2 + $0xd4] sm:$0x1]  ;;  %v11544_v19 = vrot.slane %v5094_v47, 9 }
 0x220   : > { %12578 = vmatprep.mubr.msk.bf16.mxu0 %vm1477_vm14, %v13662_v33  ;;  %v13663_v33 = vld [vmem:[#allocation2 + $0xb4] sm:$0xff]   ;;  %17861 = vst [vmem:[#allocation11_spill] sm:$0xff] %v15278_v37  ;;  %v5253_v42 = vrot.slane %v15295_v0, 5  ;;  %v4531_v37 = vshll.u32 %v15147_v16, 16  ;;  %v15321_v52 = vrot.slane %v4490_v26, 4  ;;  %v4527_v16 = vrot.slane %v4525_v44, 5 }
 0x221   : > { %v4467_v40 = vrot.slane %v4466_v51, 4  ;;  %v4513_v51 = vrot.slane %v4511_v20, 4  ;;  %v4371_v20 = vld [vmem:[#allocation2 + $0x60] sm:$0xf]  ;;  %v15319_v47 = vsel %vm14308_vm8, %v11544_v19, %v5250_v23  ;;  %v4504_v45 = vor.u32 %v4503_v30, %v4500_v31 }
 0x222   : > { %17862 = vst [vmem:[#allocation12_spill] sm:$0xff] %v15319_v47  ;;  %v15326_v22 = vsel %vm14308_vm8, %v5252_v32, %v5253_v42  ;;  %v4546_v61 = vshrl.u32 %v4371_v20, 16  ;;  %v4549_v2 = vshll.u32 %v4371_v20, 16  ;;  %v4555_v23 = vshll.u32 %v15315_v35, 16  ;;  %v419_v42 = vld [vmem:[#allocation3 + $0x18] sm:$0x1] }
 0x223   : > { %v4472_v24 = vsel %vm13935_vm13, %v4467_v40, %v4471_v6  ;;  %17863 = vst [vmem:[#allocation13_spill] sm:$0xff] %v15326_v22  ;;  %v4514_v6 = vor.u32 %v4513_v51, %v15302_v1  ;;  %v4524_v40 = vrot.slane %v4522_v9, 4  ;;  %v4559_v26 = vshrl.u32 %v15315_v35, 16 }
 0x224   : > { %v11499_v30 = vcombine.low %v4462_v39, %v4472_v24  ;;  %v15334_v31 = vrot.slane %v4531_v37, 5  ;;  %v4537_v32 = vrot.slane %v4535_v59, 4  ;;  %v4496_v51 = vsel %vm13935_vm13, %v15321_v52, %v15309_v34  ;;  %v15345_v24 = vld [vmem:[#allocation2 + $0x68] sm:$0x1]  ;;  %v4374_v37 = vld [vmem:[#allocation2 + $0x6c] sm:$0xf] }
 0x225   : > { %v4505_v44 = vrot.slane %v4504_v45, 4  ;;  %v4528_v39 = vor.u32 %v4527_v16, %v4524_v40  ;;  %v4377_v34 = vld [vmem:[#allocation2 + $0x78] sm:$0xf]  ;;  %v420_v59 = vsel %vm15349_vm6, 0, %v419_v42  ;;  %v4548_v20 = vrot.slane %v4546_v61, 4 }
 0x226   : > { %v4551_v52 = vrot.slane %v4549_v2, 5  ;;  %v15360_v45 = vrot.slane %v4555_v23, 5  ;;  %421 = vst [vmem:[#allocation3 + $0x18] sm:$0x1] %v420_v59  ;;  %v4538_v22 = vor.u32 %v4537_v32, %v15334_v31  ;;  %v4573_v40 = vshll.u32 %v4374_v37, 16 }
 0x227   : > { %12579 = vmatmul.mubr.msk.bf16.gmra.mrb[24].mxu0 %vm1477_vm14, %v13663_v33  ;;  %v13665_v33 = vld [vmem:[#allocation2 + $0xcc] sm:$0xff]   ;;  %v4583_v16 = vshrl.u32 %v15165_v46, 16  ;;  %v4597_v42 = vshll.u32 %v4377_v34, 16  ;;  %v4510_v2 = vsel %vm13935_vm13, %v4505_v44, %v15302_v1  ;;  %v4529_v61 = vrot.slane %v4528_v39, 4 }
 0x228   : > { %12582 = vmatprep.mubr.msk.bf16.mxu0 %vm1477_vm14, %v13664_v13  ;;  %v15307_v13 = vrot.slane %v4480_v62, 4  ;;  %v4517_v62 = vshll.u32 %v15300_v49, 16  ;;  %v4603_v23 = vshll.u32 %v15362_v8, 16  ;;  %v4575_v1 = vrot.slane %v4573_v40, 5 }
 0x229   : > { %v4585_v39 = vrot.slane %v4583_v16, 4 }
 0x22a   : > { %v4486_v9 = vsel %vm13935_vm13, %v15307_v13, %v15268_v38  ;;  %v4519_v19 = vrot.slane %v4517_v62, 5  ;;  %v4515_v38 = vrot.slane %v4514_v6, 4  ;;  %v4541_v13 = vshll.u32 %v15149_v53, 16 }
 0x22b   : > { %v4561_v62 = vrot.slane %v4559_v26, 4  ;;  %v4570_v6 = vshrl.u32 %v4374_v37, 16  ;;  %v4579_v53 = vshll.u32 %v15165_v46, 16  ;;  %v4607_v26 = vshrl.u32 %v15362_v8, 16 }
 0x22c   : > { %v4520_v32 = vsel %vm13935_vm13, %v4515_v38, %v4519_v19  ;;  %v4543_v59 = vrot.slane %v4541_v13, 5  ;;  %v4552_v37 = vor.u32 %v4551_v52, %v4548_v20  ;;  %v4539_v46 = vrot.slane %v4538_v22, 4  ;;  %v15384_v22 = vld [vmem:[#allocation2 + $0x80] sm:$0x1] }
 0x22d   : > { %v4562_v47 = vor.u32 %v4561_v62, %v15360_v45  ;;  %v4572_v58 = vrot.slane %v4570_v6, 4  ;;  %v15380_v44 = vrot.slane %v4579_v53, 5  ;;  %v4599_v38 = vrot.slane %v4597_v42, 5  ;;  %v4383_v42 = vld [vmem:[#allocation2 + $0x90] sm:$0xf] }
 0x22e   : > { %v15382_v13 = vrot.slane %v4603_v23, 5  ;;  %v4609_v20 = vrot.slane %v4607_v26, 4  ;;  %v4618_v52 = vshrl.u32 %v4380_v5, 16  ;;  %v4621_v62 = vshll.u32 %v4380_v5, 16  ;;  %v15395_v23 = vld [vmem:[#allocation2 + $0x94] sm:$0xf] }
 0x22f   : > { %12583 = vmatmul.mubr.msk.bf16.gmra.mrb[28].mxu0 %vm1477_vm14, %v13665_v33  ;;  %v17864_v33 = vmov 0  ;;  %v4553_v55 = vrot.slane %v4552_v37, 4  ;;  %v11500_v6 = vcombine.low %v4486_v9, %v4496_v51  ;;  %v4544_v40 = vsel %vm13935_vm13, %v4539_v46, %v4543_v59 }
 0x230   : > { %12588 = vmatprep.mubr.msk.bf16.mxu0 %vm1477_vm14, %v11497_v4  ;;  %v17865_v33 = vsel %vm15349_vm6, 4294967295, %v17864_v33  ;;  %v17867_v4 = vmov 0   ;;  %v4576_v53 = vor.u32 %v4575_v1, %v4572_v58  ;;  %v4586_v5 = vor.u32 %v4585_v39, %v15380_v44 }
 0x231   : > { %17866 = vst [vmem:[#allocation14_spill] sm:$0xff] %v17865_v33  ;;  %406 = vst.msk [vmem:[#allocation3 + $0x8] sm:$0x1] %vm405_vm1, %v17867_v4  ;;  %v4594_v33 = vshrl.u32 %v4377_v34, 16  ;;  %v4613_v9 = vshll.u32 %v15384_v22, 16  ;;  %v4620_v51 = vrot.slane %v4618_v52, 4 }
 0x232   : > { %410 = vst.msk [vmem:[#allocation3 + $0xd4] sm:$0x1] %vm405_vm1, %v17867_v4  ;;  %v4565_v4 = vshll.u32 %v15345_v24, 16  ;;  %v4642_v26 = vshrl.u32 %v4383_v42, 16  ;;  %v4651_v59 = vshll.u32 %v15395_v23, 16  ;;  %v4655_v37 = vshrl.u32 %v15395_v23, 16 }
 0x233   : > { %v4596_v19 = vrot.slane %v4594_v33, 4  ;;  %v4534_v33 = vsel %vm13935_vm13, %v4529_v61, %v15334_v31  ;;  %v4558_v31 = vsel %vm13935_vm13, %v4553_v55, %v15360_v45  ;;  %v4577_v46 = vrot.slane %v4576_v53, 4 }
 0x234   : > { %v4567_v34 = vrot.slane %v4565_v4, 5  ;;  %v4627_v4 = vshll.u32 %v15189_v41, 16  ;;  %v4587_v1 = vrot.slane %v4586_v5, 4  ;;  %v11502_v52 = vcombine.low %v4534_v33, %v4544_v40  ;;  %v4389_v33 = vld [vmem:[#allocation2 + $0xa8] sm:$0xf] }
 0x235   : > { %v4600_v16 = vor.u32 %v4599_v38, %v4596_v19  ;;  %v4615_v19 = vrot.slane %v4613_v9, 5  ;;  %v4637_v38 = vshll.u32 %v15191_v21, 16  ;;  %v4582_v53 = vsel %vm13935_vm13, %v4577_v46, %v15380_v44  ;;  %v15421_v40 = vld [vmem:[#allocation2 + $0xac] sm:$0xf] }
 0x236   : > { %v15404_v61 = vrot.slane %v4627_v4, 5  ;;  %v15412_v4 = vld [vmem:[#allocation2 + $0x98] sm:$0x1] }
 0x237   : > { %12589 = vmatmul.mubr.msk.bf16.vlgmr.msra.gmra.mrb[0].mxu0 %vm1477_vm14, %v15290_v3  ;;  %v4563_v3 = vrot.slane %v4562_v47, 4  ;;  %v4589_v47 = vshll.u32 %v15167_v57, 16  ;;  %v4601_v55 = vrot.slane %v4600_v16, 4  ;;  %v4661_v44 = vshll.u32 %v15412_v4, 16 }
 0x238   : > { %12621 = vmatpush3.bf16.msra.mxu0 %v15282_v60  ;;  %12592 = vmatprep.mubr.msk.bf16.mxu0 %vm1477_vm14, %v11499_v30  ;;  %v4631_v60 = vshrl.u32 %v15189_v41, 16  ;;  %v11501_v30 = vcombine.low %v4510_v2, %v4520_v32  ;;  %v4610_v41 = vor.u32 %v4609_v20, %v15382_v13  ;;  %v4623_v2 = vrot.slane %v4621_v62, 5  ;;  %v4386_v20 = vld [vmem:[#allocation2 + $0x9c] sm:$0xf] }
 0x239   : > { %v4568_v58 = vsel %vm13935_vm13, %v4563_v3, %v4567_v34  ;;  %v4645_v32 = vshll.u32 %v4383_v42, 16  ;;  %v4591_v39 = vrot.slane %v4589_v47, 5  ;;  %v15414_v42 = vrot.slane %v4651_v59, 5 }
 0x23a   : > { %v4633_v57 = vrot.slane %v4631_v60, 4  ;;  %v4611_v45 = vrot.slane %v4610_v41, 4  ;;  %v4624_v34 = vor.u32 %v4623_v2, %v4620_v51  ;;  %v11503_v62 = vcombine.low %v4558_v31, %v4568_v58 }
 0x23b   : > { %v4644_v60 = vrot.slane %v4642_v26, 4  ;;  %v4592_v5 = vsel %vm13935_vm13, %v4587_v1, %v4591_v39  ;;  %v4666_v21 = vshrl.u32 %v4386_v20, 16  ;;  %v4669_v47 = vshll.u32 %v4386_v20, 16  ;;  %v15443_v20 = vld [vmem:[#allocation2 + $0xb0] sm:$0x1] }
 0x23c   : > { %v4634_v3 = vor.u32 %v4633_v57, %v15404_v61  ;;  %v4606_v16 = vsel %vm13935_vm13, %v4601_v55, %v15382_v13  ;;  %v4616_v41 = vsel %vm13935_vm13, %v4611_v45, %v4615_v19  ;;  %v4625_v9 = vrot.slane %v4624_v34, 4 }
 0x23d   : > { %v4639_v51 = vrot.slane %v4637_v38, 5  ;;  %v4675_v31 = vshll.u32 %v15221_v56, 16  ;;  %v4679_v58 = vshrl.u32 %v15221_v56, 16  ;;  %v4690_v57 = vshrl.u32 %v4389_v33, 16 }
 0x23e   : > { %v4635_v2 = vrot.slane %v4634_v3, 4  ;;  %v4693_v26 = vshll.u32 %v4389_v33, 16  ;;  %v4703_v13 = vshrl.u32 %v15421_v40, 16  ;;  %v4668_v46 = vrot.slane %v4666_v21, 4 }
 0x23f   : > { %12593 = vmatmul.mubr.msk.bf16.gmra.mrb[4].mxu0 %vm1477_vm14, %v11500_v6  ;;  %v4647_v6 = vrot.slane %v4645_v32, 5  ;;  %v4699_v32 = vshll.u32 %v15421_v40, 16  ;;  %v4671_v1 = vrot.slane %v4669_v47, 5  ;;  %v11504_v39 = vcombine.low %v4582_v53, %v4592_v5 }
 0x240   : > { %12596 = vmatprep.mubr.msk.bf16.mxu0 %vm1477_vm14, %v11501_v30  ;;  %v4657_v30 = vrot.slane %v4655_v37, 4  ;;  %v11505_v55 = vcombine.low %v4606_v16, %v4616_v41  ;;  %v4630_v56 = vsel %vm13935_vm13, %v4625_v9, %v15404_v61  ;;  %v4640_v45 = vsel %vm13935_vm13, %v4635_v2, %v4639_v51  ;;  %v4395_v9 = vld [vmem:[#allocation2 + $0xc0] sm:$0xf]  ;;  %v15448_v51 = vld [vmem:[#allocation2 + $0xc4] sm:$0xf] }
 0x241   : > { %v4648_v59 = vor.u32 %v4647_v6, %v4644_v60  ;;  %v4663_v19 = vrot.slane %v4661_v44, 5  ;;  %v15441_v34 = vrot.slane %v4675_v31, 5  ;;  %v4681_v38 = vrot.slane %v4679_v58, 4  ;;  %v4392_v6 = vld [vmem:[#allocation2 + $0xb4] sm:$0xf] }
 0x242   : > { %v4658_v37 = vor.u32 %v4657_v30, %v15414_v42  ;;  %v4701_v3 = vrot.slane %v4699_v32, 5  ;;  %v4705_v60 = vrot.slane %v4703_v13, 4  ;;  %v4672_v5 = vor.u32 %v4671_v1, %v4668_v46 }
 0x243   : > { %v4649_v30 = vrot.slane %v4648_v59, 4  ;;  %v4685_v21 = vshll.u32 %v15223_v25, 16  ;;  %v4709_v61 = vshll.u32 %v15443_v20, 16  ;;  %v11506_v47 = vcombine.low %v4630_v56, %v4640_v45 }
 0x244   : > { %v4659_v53 = vrot.slane %v4658_v37, 4  ;;  %v4682_v33 = vor.u32 %v4681_v38, %v15441_v34  ;;  %v4714_v16 = vshrl.u32 %v4392_v6, 16  ;;  %v4717_v41 = vshll.u32 %v4392_v6, 16 }
 0x245   : > { %v4706_v44 = vor.u32 %v4705_v60, %v4701_v3  ;;  %v4723_v31 = vshll.u32 %v15249_v50, 16  ;;  %v4727_v58 = vshrl.u32 %v15249_v50, 16  ;;  %v4654_v25 = vsel %vm13935_vm13, %v4649_v30, %v15414_v42  ;;  %v4398_v30 = vld [vmem:[#allocation2 + $0xcc] sm:$0xf] }
 0x246   : > { %v4687_v32 = vrot.slane %v4685_v21, 5  ;;  %v4738_v13 = vshrl.u32 %v4395_v9, 16  ;;  %v4741_v59 = vshll.u32 %v4395_v9, 16  ;;  %v4747_v37 = vshll.u32 %v15448_v51, 16 }
 0x247   : > { %12597 = vmatmul.mubr.msk.bf16.gmra.mrb[8].mxu0 %vm1477_vm14, %v11502_v52  ;;  %v4692_v52 = vrot.slane %v4690_v57, 4  ;;  %v4664_v57 = vsel %vm13935_vm13, %v4659_v53, %v4663_v19  ;;  %v4751_v46 = vshrl.u32 %v15448_v51, 16  ;;  %v4683_v1 = vrot.slane %v4682_v33, 4 }
 0x248   : > { %12600 = vmatprep.mubr.msk.bf16.mxu0 %vm1477_vm14, %v11503_v62  ;;  %v4695_v62 = vrot.slane %v4693_v26, 5  ;;  %v4673_v26 = vrot.slane %v4672_v5, 4  ;;  %v4716_v50 = vrot.slane %v4714_v16, 4  ;;  %v4719_v56 = vrot.slane %v4717_v41, 5 }
 0x249   : > { %v4707_v45 = vrot.slane %v4706_v44, 4  ;;  %v4725_v38 = vrot.slane %v4723_v31, 5  ;;  %v11507_v42 = vcombine.low %v4654_v25, %v4664_v57  ;;  %v4743_v60 = vrot.slane %v4741_v59, 5 }
 0x24a   : > { %v4696_v2 = vor.u32 %v4695_v62, %v4692_v52  ;;  %v4729_v52 = vrot.slane %v4727_v58, 4  ;;  %v4740_v62 = vrot.slane %v4738_v13, 4  ;;  %v4749_v19 = vrot.slane %v4747_v37, 5 }
 0x24b   : > { %v4753_v6 = vrot.slane %v4751_v46, 4  ;;  %v4678_v53 = vsel %vm13935_vm13, %v4673_v26, %v15441_v34  ;;  %v4688_v5 = vsel %vm13935_vm13, %v4683_v1, %v4687_v32  ;;  %v4720_v21 = vor.u32 %v4719_v56, %v4716_v50 }
 0x24c   : > { %v4730_v41 = vor.u32 %v4729_v52, %v4725_v38  ;;  %v4733_v9 = vshll.u32 %v15251_v7, 16  ;;  %v4762_v34 = vshrl.u32 %v4398_v30, 16  ;;  %v4771_v44 = vshll.u32 %v15293_v54, 16 }
 0x24d   : > { %v4775_v31 = vshrl.u32 %v15293_v54, 16  ;;  %v4744_v58 = vor.u32 %v4743_v60, %v4740_v62  ;;  %v4754_v25 = vor.u32 %v4753_v6, %v4749_v19  ;;  %v11508_v57 = vcombine.low %v4678_v53, %v4688_v5  ;;  %v5079_v6 = vld [vmem:[#allocation2 + $0x18] sm:$0xe] }
 0x24e   : > { %v4721_v26 = vrot.slane %v4720_v21, 4  ;;  %v4731_v32 = vrot.slane %v4730_v41, 4  ;;  %v4735_v13 = vrot.slane %v4733_v9, 5  ;;  %v4764_v59 = vrot.slane %v4762_v34, 4 }
 0x24f   : > { %12601 = vmatmul.mubr.msk.bf16.gmra.mrb[12].mxu0 %vm1477_vm14, %v11504_v39  ;;  %v4711_v39 = vrot.slane %v4709_v61, 5  ;;  %v15466_v61 = vld [vmem:[#allocation2 + $0xc8] sm:$0x1]  ;;  %v4773_v7 = vrot.slane %v4771_v44, 5  ;;  %v4777_v46 = vrot.slane %v4775_v31, 4  ;;  %v4745_v1 = vrot.slane %v4744_v58, 4 }
 0x250   : > { %12604 = vmatprep.mubr.msk.bf16.mxu0 %vm1477_vm14, %v11505_v55  ;;  %v4697_v55 = vrot.slane %v4696_v2, 4  ;;  %v4765_v2 = vshll.u32 %v4398_v30, 16  ;;  %v4726_v54 = vsel %vm13935_vm13, %v4721_v26, %v4725_v38  ;;  %v4736_v56 = vsel %vm13935_vm13, %v4731_v32, %v4735_v13  ;;  %v5081_v44 = vld [vmem:[#allocation2 + $0x30] sm:$0xe] }
 0x251   : > { %v4712_v16 = vsel %vm13935_vm13, %v4707_v45, %v4711_v39  ;;  %v4755_v39 = vrot.slane %v4754_v25, 4  ;;  %v4778_v45 = vor.u32 %v4777_v46, %v4773_v7  ;;  %v4781_v52 = vshll.u32 %v15295_v0, 16 }
 0x252   : > { %v4702_v33 = vsel %vm13935_vm13, %v4697_v55, %v4701_v3  ;;  %v4767_v37 = vrot.slane %v4765_v2, 5  ;;  %v5145_v60 = vrot.slane %v15176_v63, 5  ;;  %v11510_v30 = vcombine.low %v4726_v54, %v4736_v56  ;;  %v5080_v2 = vld [vmem:[#allocation2 + $0x24] sm:$0xe] }
 0x253   : > { %v11509_v3 = vcombine.low %v4702_v33, %v4712_v16  ;;  %v4779_v5 = vrot.slane %v4778_v45, 4  ;;  %v4783_v21 = vrot.slane %v4781_v52, 5  ;;  %v11529_v33 = vrot.slane %v5079_v6, 9  ;;  %v5087_v6 = vld [vmem:[#allocation2 + $0x78] sm:$0xe] }
 0x254   : > { %v4768_v55 = vor.u32 %v4767_v37, %v4764_v59  ;;  %v5147_v16 = vrot.slane %v5145_v60, 4  ;;  %v5148_v41 = vrot.slane %v15198_v10, 5  ;;  %v5159_v10 = vrot.slane %v15219_v15, 5  ;;  %v5083_v37 = vld [vmem:[#allocation2 + $0x48] sm:$0xe] }
 0x255   : > { %v4784_v63 = vsel %vm13935_vm13, %v4779_v5, %v4783_v21  ;;  %v5146_v9 = vsel %vm14308_vm8, %v11529_v33, %v5145_v60  ;;  %v11530_v25 = vrot.slane %v5080_v2, 9  ;;  %v5173_v59 = vrot.slane %v15266_v12, 5  ;;  %v5085_v12 = vld [vmem:[#allocation2 + $0x60] sm:$0xe]  ;;  %v5089_v21 = vld [vmem:[#allocation2 + $0x90] sm:$0xe] }
 0x256   : > { %v4769_v53 = vrot.slane %v4768_v55, 4  ;;  %v5149_v34 = vsel %vm14308_vm8, %v5147_v16, %v5148_v41  ;;  %v5161_v26 = vrot.slane %v5159_v10, 4  ;;  %v11533_v46 = vrot.slane %v5083_v37, 9 }
 0x257   : > { %12605 = vmatmul.mubr.msk.bf16.gmra.mrb[16].mxu0 %vm1477_vm14, %v11506_v47  ;;  %v4757_v47 = vshll.u32 %v15466_v61, 16  ;;  %v11546_v58 = vcombine.low %v5146_v9, %v5149_v34  ;;  %v5187_v56 = vrot.slane %v15315_v35, 5  ;;  %v11535_v45 = vrot.slane %v5085_v12, 9  ;;  %v471_v12 = vld [vmem:[#allocation3 + $0x14] sm:$0x1] }
 0x258   : > { %12608 = vmatprep.mubr.msk.bf16.mxu0 %vm1477_vm14, %v11507_v42  ;;  %v4750_v42 = vsel %vm13935_vm13, %v4745_v1, %v4749_v19  ;;  %v4774_v0 = vsel %vm13935_vm13, %v4769_v53, %v4773_v7  ;;  %v5152_v19 = vrot.slane %v15184_v27, 5  ;;  %v5162_v27 = vrot.slane %v15242_v36, 5 }
 0x259   : > { %v4759_v50 = vrot.slane %v4757_v47, 5  ;;  %v11512_v31 = vcombine.low %v4774_v0, %v4784_v63  ;;  %v5175_v1 = vrot.slane %v5173_v59, 4  ;;  %v5189_v52 = vrot.slane %v5187_v56, 4 }
 0x25a   : > { %v5154_v47 = vrot.slane %v5152_v19, 4  ;;  %v5153_v32 = vsel %vm14308_vm8, %v11530_v25, %v5152_v19  ;;  %v5201_v35 = vrot.slane %v15362_v8, 5  ;;  %v5215_v8 = vrot.slane %v15395_v23, 5  ;;  %v5091_v19 = vld [vmem:[#allocation2 + $0xa8] sm:$0xe] }
 0x25b   : > { %v4760_v62 = vsel %vm13935_vm13, %v4755_v39, %v4759_v50  ;;  %v5176_v39 = vrot.slane %v15300_v49, 5  ;;  %v5174_v50 = vsel %vm14308_vm8, %v11533_v46, %v5173_v59  ;;  %v17868_v49 = vcombine.low %v15138_v29, %v15142_v28  ;;  %v5093_v25 = vld [vmem:[#allocation2 + $0xc0] sm:$0xe]  ;;  %v17879_v59 = vld [vmem:[#allocation11_spill] sm:$0xff]  ;;  %v416_v46 = vld [vmem:[#allocation3 + $0xc] sm:$0x1] }
 0x25c   : > { %v11511_v38 = vcombine.low %v4750_v42, %v4760_v62  ;;  %v5190_v42 = vrot.slane %v15345_v24, 5  ;;  %v5188_v62 = vsel %vm14308_vm8, %v11535_v45, %v5187_v56  ;;  %v5203_v53 = vrot.slane %v5201_v35, 4  ;;  %v425_v45 = vld [vmem:[#allocation3 + $0x30] sm:$0x1] }
 0x25d   : > { %v5177_v54 = vsel %vm14308_vm8, %v5175_v1, %v5176_v39  ;;  %v5204_v24 = vrot.slane %v15384_v22, 5  ;;  %v17869_v29 = vcombine.low %v15156_v14, %v15160_v18  ;;  %v11539_v16 = vrot.slane %v5089_v21, 9  ;;  %v17870_v14 = vld [vmem:[#allocation18_spill] sm:$0xff]  ;;  %v483_v21 = vld [vmem:[#allocation3 + $0x44] sm:$0x1] }
 0x25e   : > { %v11550_v55 = vcombine.low %v5174_v50, %v5177_v54  ;;  %v5191_v60 = vsel %vm14308_vm8, %v5189_v52, %v5190_v42  ;;  %v5217_v41 = vrot.slane %v5215_v8, 4  ;;  %v5218_v22 = vrot.slane %v15412_v4, 5  ;;  %v474_v54 = vld [vmem:[#allocation3 + $0x20] sm:$0x1]  ;;  %v422_v42 = vld [vmem:[#allocation3 + $0x24] sm:$0x1] }
 0x25f   : > { %12609 = vmatmul.mubr.msk.bf16.gmra.mrb[20].mxu0 %vm1477_vm14, %v11508_v57  ;;  %v5155_v57 = vrot.slane %v15210_v48, 5  ;;  %v5163_v48 = vsel %vm14308_vm8, %v5161_v26, %v5162_v27  ;;  %v5205_v5 = vsel %vm14308_vm8, %v5203_v53, %v5204_v24  ;;  %v17871_v18 = vcombine.low %v15174_v11, %v17870_v14  ;;  %v17873_v11 = vld [vmem:[#allocation7_spill] sm:$0xff]  ;;  %v17875_v26 = vld [vmem:[#allocation8_spill] sm:$0xff]  ;;  %v17876_v27 = vld [vmem:[#allocation9_spill] sm:$0xff] }
 0x260   : > { %12612 = vmatprep.mubr.msk.bf16.mxu0 %vm1477_vm14, %v11509_v3  ;;  %v11531_v3 = vrot.slane %v5081_v44, 9  ;;  %v5216_v0 = vsel %vm14308_vm8, %v11539_v16, %v5215_v8  ;;  %v5219_v63 = vsel %vm14308_vm8, %v5217_v41, %v5218_v22  ;;  %v5229_v23 = vrot.slane %v15421_v40, 5  ;;  %v428_v24 = vld [vmem:[#allocation3 + $0x3c] sm:$0x1]  ;;  %v437_v22 = vld [vmem:[#allocation3 + $0x60] sm:$0x1] }
 0x261   : > { %v5156_v15 = vsel %vm14308_vm8, %v5154_v47, %v5155_v57  ;;  %v11556_v9 = vcombine.low %v5216_v0, %v5219_v63  ;;  %v11541_v34 = vrot.slane %v5091_v19, 9  ;;  %v5232_v4 = vrot.slane %v15443_v20, 5  ;;  %v434_v0 = vld [vmem:[#allocation3 + $0x54] sm:$0x1]  ;;  %v492_v19 = vld [vmem:[#allocation3 + $0x68] sm:$0x1] }
 0x262   : > { %v5160_v13 = vsel %vm14308_vm8, %v11531_v3, %v5159_v10  ;;  %v11547_v36 = vcombine.low %v5153_v32, %v5156_v15  ;;  %v5231_v2 = vrot.slane %v5229_v23, 4  ;;  %v17872_v10 = vld [vmem:[#allocation6_spill] sm:$0xff]  ;;  %v5243_v40 = vrot.slane %v15448_v51, 5 }
 0x263   : > { %v11548_v7 = vcombine.low %v5160_v13, %v5163_v48  ;;  %v17874_v44 = vcombine.low %v17872_v10, %v17873_v11  ;;  %v11543_v57 = vrot.slane %v5093_v25, 9  ;;  %v5246_v20 = vrot.slane %v15466_v61, 5  ;;  %v17878_v48 = vld [vmem:[#allocation10_spill] sm:$0xff]  ;;  %v17881_v61 = vld [vmem:[#allocation12_spill] sm:$0xff] }
 0x264   : > { %v5245_v3 = vrot.slane %v5243_v40, 4  ;;  %v17877_v32 = vcombine.low %v17875_v26, %v17876_v27  ;;  %v17880_v37 = vcombine.low %v17878_v48, %v17879_v59  ;;  %v417_v39 = vsel %vm15349_vm6, 0, %v416_v46  ;;  %v443_v27 = vld [vmem:[#allocation3 + $0x78] sm:$0x1] }
 0x265   : > { %v5244_v15 = vsel %vm14308_vm8, %v11543_v57, %v5243_v40  ;;  %v17885_v50 = vmov 0  ;;  %418 = vst [vmem:[#allocation3 + $0xc] sm:$0x1] %v417_v39  ;;  %v475_v56 = vsel %vm15591_vm3, 0, %v474_v54  ;;  %v426_v52 = vsel %vm15349_vm6, 0, %v425_v45 }
 0x266   : > { %v5247_v13 = vsel %vm14308_vm8, %v5245_v3, %v5246_v20  ;;  %v17886_v50 = vsel %vm15591_vm3, 4294967295, %v17885_v50  ;;  %476 = vst [vmem:[#allocation3 + $0x20] sm:$0x1] %v475_v56  ;;  %427 = vst [vmem:[#allocation3 + $0x30] sm:$0x1] %v426_v52  ;;  %v484_v16 = vsel %vm15591_vm3, 0, %v483_v21 }
 0x267   : > { %12613 = vmatmul.mubr.msk.bf16.gmra.mrb[24].mxu0 %vm1477_vm14, %v11510_v30  ;;  %v11552_v30 = vcombine.low %v5188_v62, %v5191_v60  ;;  %v11560_v51 = vcombine.low %v5244_v15, %v5247_v13  ;;  %17887 = vst [vmem:[#allocation15_spill] sm:$0xff] %v17886_v50  ;;  %v480_v62 = vld [vmem:[#allocation3 + $0x38] sm:$0x1]  ;;  %485 = vst [vmem:[#allocation3 + $0x44] sm:$0x1] %v484_v16 }
 0x268   : > { %12616 = vmatprep.mubr.msk.bf16.mxu0 %vm1477_vm14, %v11511_v38  ;;  %v11537_v38 = vrot.slane %v5087_v6, 9  ;;  %v481_v60 = vsel %vm15591_vm3, 0, %v480_v62  ;;  %v440_v15 = vld [vmem:[#allocation3 + $0x6c] sm:$0x1]  ;;  %v495_v54 = vld [vmem:[#allocation3 + $0x74] sm:$0x1] }
 0x269   : > { %482 = vst [vmem:[#allocation3 + $0x38] sm:$0x1] %v481_v60  ;;  %v441_v59 = vsel %vm15349_vm6, 0, %v440_v15  ;;  %v496_v56 = vsel %vm15591_vm3, 0, %v495_v54  ;;  %v446_v45 = vld [vmem:[#allocation3 + $0x84] sm:$0x1] }
 0x26a   : > { %v5202_v28 = vsel %vm14308_vm8, %v11537_v38, %v5201_v35  ;;  %v477_v35 = vld [vmem:[#allocation3 + $0x2c] sm:$0x1]  ;;  %v413_v38 = vld [vmem:[#allocation3] sm:$0x1]  ;;  %442 = vst [vmem:[#allocation3 + $0x6c] sm:$0x1] %v441_v59 }
 0x26b   : > { %v11554_v33 = vcombine.low %v5202_v28, %v5205_v5  ;;  %v478_v6 = vsel %vm15591_vm3, 0, %v477_v35  ;;  %v429_v28 = vsel %vm15349_vm6, 0, %v428_v24  ;;  %v486_v5 = vld [vmem:[#allocation3 + $0x50] sm:$0x1]  ;;  %497 = vst [vmem:[#allocation3 + $0x74] sm:$0x1] %v496_v56 }
 0x26c   : > { %479 = vst [vmem:[#allocation3 + $0x2c] sm:$0x1] %v478_v6  ;;  %430 = vst [vmem:[#allocation3 + $0x3c] sm:$0x1] %v429_v28  ;;  %v487_v8 = vsel %vm15591_vm3, 0, %v486_v5 }
 0x26d   : > { %488 = vst [vmem:[#allocation3 + $0x50] sm:$0x1] %v487_v8  ;;  %v504_v52 = vld [vmem:[#allocation3 + $0x98] sm:$0x1]  ;;  %v501_v62 = vld [vmem:[#allocation3 + $0x8c] sm:$0x1] }
 0x26e   : > { %v502_v60 = vsel %vm15591_vm3, 0, %v501_v62  ;;  %v455_v35 = vld [vmem:[#allocation3 + $0xa8] sm:$0x1]  ;;  %v461_v5 = vld [vmem:[#allocation3 + $0xc0] sm:$0x1] }
 0x26f   : > { %12617 = vmatmul.mubr.msk.bf16.gmra.mrb[28].mxu0 %vm1477_vm14, %v11512_v31  ;;  %v5230_v31 = vsel %vm14308_vm8, %v11541_v34, %v5229_v23  ;;  %v435_v23 = vsel %vm15349_vm6, 0, %v434_v0  ;;  %503 = vst [vmem:[#allocation3 + $0x8c] sm:$0x1] %v502_v60  ;;  %v456_v6 = vsel %vm15349_vm6, 0, %v455_v35  ;;  %v462_v8 = vsel %vm15349_vm6, 0, %v461_v5 }
 0x270   : > { %12622 = vmatprep.mubr.msk.bf16.mxu0 %vm1477_vm14, %v11546_v58  ;;  %v5233_v58 = vsel %vm14308_vm8, %v5231_v2, %v5232_v4  ;;  %436 = vst [vmem:[#allocation3 + $0x54] sm:$0x1] %v435_v23  ;;  %v493_v2 = vsel %vm15591_vm3, 0, %v492_v19  ;;  %v489_v4 = vld [vmem:[#allocation3 + $0x5c] sm:$0x1] }
 0x271   : > { %v11558_v47 = vcombine.low %v5230_v31, %v5233_v58  ;;  %494 = vst [vmem:[#allocation3 + $0x68] sm:$0x1] %v493_v2  ;;  %v490_v11 = vsel %vm15591_vm3, 0, %v489_v4  ;;  %457 = vst [vmem:[#allocation3 + $0xa8] sm:$0x1] %v456_v6 }
 0x272   : > { %491 = vst [vmem:[#allocation3 + $0x5c] sm:$0x1] %v490_v11  ;;  %463 = vst [vmem:[#allocation3 + $0xc0] sm:$0x1] %v462_v8  ;;  %v458_v21 = vld [vmem:[#allocation3 + $0xb4] sm:$0x1] }
 0x273   : > { %v516_v16 = vld [vmem:[#allocation3 + $0xc8] sm:$0x1]  ;;  %v6050_v60 = vld [vmem:[#allocation3 + $0x20] sm:$0x1] }
 0x274   : > { %v15677_v0 = vld [vmem:[%s17685_s2] ss:$0 sm:$0xff] }
 0x277   : > { %12623 = vmatmul.mubr.msk.bf16.vlgmr.msra.gmra.mrb[0].mxu0 %vm1477_vm14, %v11547_v36  ;;  %v17882_v36 = vld [vmem:[#allocation13_spill] sm:$0xff] }
 0x278   : > { %12626 = vmatprep.mubr.msk.bf16.mxu0 %vm1477_vm14, %v11548_v7  ;;  %v17883_v7 = vcombine.low %v17881_v61, %v17882_v36 }
 0x27f   : > { %12627 = vmatmul.mubr.msk.bf16.gmra.mrb[4].mxu0 %vm1477_vm14, %v17868_v49  ;;  %v423_v49 = vsel %vm15349_vm6, 0, %v422_v42  ;;  %v447_v42 = vsel %vm15349_vm6, 0, %v446_v45 }
 0x280   : > { %12630 = vmatprep.mubr.msk.bf16.mxu0 %vm1477_vm14, %v11550_v55  ;;  %v472_v55 = vsel %vm15591_vm3, 0, %v471_v12  ;;  %424 = vst [vmem:[#allocation3 + $0x24] sm:$0x1] %v423_v49  ;;  %v449_v12 = vld [vmem:[#allocation3 + $0x90] sm:$0x1]  ;;  %v505_v49 = vsel %vm15591_vm3, 0, %v504_v52 }
 0x281   : > { %473 = vst [vmem:[#allocation3 + $0x14] sm:$0x1] %v472_v55  ;;  %v450_v55 = vsel %vm15349_vm6, 0, %v449_v12  ;;  %448 = vst [vmem:[#allocation3 + $0x84] sm:$0x1] %v447_v42 }
 0x282   : > { %451 = vst [vmem:[#allocation3 + $0x90] sm:$0x1] %v450_v55  ;;  %506 = vst [vmem:[#allocation3 + $0x98] sm:$0x1] %v505_v49  ;;  %v6039_v55 = vld [vmem:[#allocation3 + $0xc] sm:$0xf] }
 0x287   : > { %12631 = vmatmul.mubr.msk.bf16.gmra.mrb[8].mxu0 %vm1477_vm14, %v17869_v29  ;;  %v414_v29 = vsel %vm15349_vm6, 0, %v413_v38  ;;  %v510_v38 = vld [vmem:[#allocation3 + $0xb0] sm:$0x1] }
 0x288   : > { %12634 = vmatprep.mubr.msk.bf16.mxu0 %vm1477_vm14, %v11552_v30  ;;  %v431_v30 = vld [vmem:[#allocation3 + $0x48] sm:$0x1]  ;;  %415 = vst [vmem:[#allocation3] sm:$0x1] %v414_v29  ;;  %v511_v24 = vsel %vm15591_vm3, 0, %v510_v38 }
 0x289   : > { %v432_v53 = vsel %vm15349_vm6, 0, %v431_v30  ;;  %v452_v30 = vld [vmem:[#allocation3 + $0x9c] sm:$0x1]  ;;  %512 = vst [vmem:[#allocation3 + $0xb0] sm:$0x1] %v511_v24 }
 0x28a   : > { %433 = vst [vmem:[#allocation3 + $0x48] sm:$0x1] %v432_v53  ;;  %v453_v53 = vsel %vm15349_vm6, 0, %v452_v30  ;;  %v507_v29 = vld [vmem:[#allocation3 + $0xa4] sm:$0x1] }
 0x28b   : > { %454 = vst [vmem:[#allocation3 + $0x9c] sm:$0x1] %v453_v53  ;;  %v508_v28 = vsel %vm15591_vm3, 0, %v507_v29  ;;  %v6043_v24 = vld [vmem:[#allocation3 + $0x14] sm:$0x1] }
 0x28c   : > { %509 = vst [vmem:[#allocation3 + $0xa4] sm:$0x1] %v508_v28 }
 0x28f   : > { %12635 = vmatmul.mubr.msk.bf16.gmra.mrb[12].mxu0 %vm1477_vm14, %v17871_v18  ;;  %v6151_v14 = vld [vmem:[#allocation3] sm:$0xf]  ;;  %v438_v18 = vsel %vm15349_vm6, 0, %v437_v22  ;;  %v513_v22 = vld [vmem:[#allocation3 + $0xbc] sm:$0x1] }
 0x290   : > { %12638 = vmatprep.mubr.msk.bf16.mxu0 %vm1477_vm14, %v11554_v33  ;;  %v468_v33 = vld [vmem:[#allocation3 + $0x8] sm:$0x1]  ;;  %v6201_v63 = vshrl.u32 %v6151_v14, 16  ;;  %439 = vst [vmem:[#allocation3 + $0x60] sm:$0x1] %v438_v18  ;;  %v6204_v34 = vshll.u32 %v6151_v14, 16 }
 0x291   : > { %v469_v41 = vsel %vm15591_vm3, 0, %v468_v33  ;;  %v459_v33 = vsel %vm15349_vm6, 0, %v458_v21  ;;  %v514_v14 = vsel %vm15591_vm3, 0, %v513_v22  ;;  %v6183_v18 = vld [vmem:[%s17686_s3] sm:$0xf] }
 0x292   : > { %470 = vst [vmem:[#allocation3 + $0x8] sm:$0x1] %v469_v41  ;;  %v6203_v10 = vrot.slane %v6201_v63, 4  ;;  %v6206_v40 = vrot.slane %v6204_v34, 5  ;;  %460 = vst [vmem:[#allocation3 + $0xb4] sm:$0x1] %v459_v33 }
 0x293   : > { %v517_v41 = vsel %vm15591_vm3, 0, %v516_v16  ;;  %515 = vst [vmem:[#allocation3 + $0xbc] sm:$0x1] %v514_v14 }
 0x294   : > { %v6207_v3 = vor.u32 %v6206_v40, %v6203_v10  ;;  %518 = vst [vmem:[#allocation3 + $0xc8] sm:$0x1] %v517_v41 }
 0x296   : > { %v6208_v13 = vrot.slane %v6207_v3, 4 }
 0x297   : > { %12639 = vmatmul.mubr.msk.bf16.gmra.mrb[16].mxu0 %vm1477_vm14, %v17874_v44  ;;  %v11611_v44 = vld [vmem:[%s17686_s3 + $0x4] sm:$0xf] }
 0x298   : > { %12642 = vmatprep.mubr.msk.bf16.mxu0 %vm1477_vm14, %v11556_v9  ;;  %v6152_v9 = vld [vmem:[#allocation3 + $0x4] sm:$0xf]  ;;  %13613 = vmatprep.subr.msk.bf16.mxu0 %vm6683_vm7, %v11611_v44  ;;  %v6685_v31 = vsel %vm6683_vm7, %v11611_v44, 0 }
 0x299   : > { %v6184_v58 = vld [vmem:[#allocation3 + $0x8] sm:$0x1]  ;;  %v6210_v25 = vshll.u32 %v6152_v9, 16  ;;  %13614 = vmatprep.subr.msk.bf16.mxu1 %vm6683_vm7, %v11611_v44  ;;  %12655 = vmatpush3.bf16.msra.mxu0 %v6685_v31 }
 0x29a   : > { %v6220_v57 = vshll.u32 %v6184_v58, 16  ;;  %12995 = vmatpush3.bf16.msra.mxu1 %v6685_v31 }
 0x29b   : > { %v6212_v20 = vrot.slane %v6210_v25, 5  ;;  %13615 = vmatprep.subr.msk.bf16.mxu1 %vm6683_vm7, %v6183_v18 }
 0x29c   : > { %v6222_v48 = vrot.slane %v6220_v57, 5 }
 0x29d   : > { %v6213_v36 = vsel %vm13935_vm13, %v6208_v13, %v6212_v20 }
 0x29f   : > { %12643 = vmatmul.mubr.msk.bf16.gmra.mrb[20].mxu0 %vm1477_vm14, %v17877_v32  ;;  %v444_v32 = vsel %vm15349_vm6, 0, %v443_v27 }
 0x2a0   : > { %12646 = vmatprep.mubr.msk.bf16.mxu0 %vm1477_vm14, %v11558_v47  ;;  %v6214_v47 = vshrl.u32 %v6152_v9, 16  ;;  %445 = vst [vmem:[#allocation3 + $0x78] sm:$0x1] %v444_v32 }
 0x2a2   : > { %v6216_v26 = vrot.slane %v6214_v47, 4 }
 0x2a7   : > { %12647 = vmatmul.mubr.msk.bf16.gmra.mrb[24].mxu0 %vm1477_vm14, %v17880_v37  ;;  %v498_v37 = vld [vmem:[#allocation3 + $0x80] sm:$0x1] }
 0x2a8   : > { %12650 = vmatprep.mubr.msk.bf16.mxu0 %vm1477_vm14, %v11560_v51  ;;  %v6217_v51 = vor.u32 %v6216_v26, %v6212_v20  ;;  %v499_v61 = vsel %vm15591_vm3, 0, %v498_v37 }
 0x2a9   : > { %500 = vst [vmem:[#allocation3 + $0x80] sm:$0x1] %v499_v61  ;;  %v6046_v61 = vld [vmem:[#allocation3 + $0x18] sm:$0xf] }
 0x2af   : > { %12651 = vmatmul.mubr.msk.bf16.gmra.mrb[28].mxu0 %vm1477_vm14, %v17883_v7  ;;  %v6218_v7 = vrot.slane %v6217_v51, 4 }
 0x2b1   : > { %v6223_v46 = vsel %vm13935_vm13, %v6218_v7, %v6222_v48 }
 0x2b2   : > { %v11612_v39 = vcombine.low %v6213_v36, %v6223_v46 }
 0x2b4   : > { %12656 = vmatprep.mubr.msk.bf16.mxu0 %vm6634_vm9, %v11612_v39 }
 0x34a   : > { %v12624_v63 = vpop.f32.mrb[0].mxu0 }
 0x34b   : > { %v5558_v23 = vadd.f32 %v12624_v63, %v15677_v0  ;;  %v5390_v19 = vpop.f32.mrb[1].mxu0 }
 0x34c   : > { %v5556_v9 = vadd.f32 %v15677_v0, %v5390_v19  ;;  %v12625_v34 = vpop.f32.mrb[2].mxu0 }
 0x34d   : > { %v5590_v2 = vmax.f32 %v5558_v23, 0.0  ;;  %v5559_v4 = vadd.f32 %v12625_v34, %v15677_v0  ;;  %v5393_v10 = vpop.f32.mrb[3].mxu0 }
 0x34e   : > { %v5588_v11 = vmax.f32 %v5556_v9, 0.0  ;;  %v5557_v44 = vadd.f32 %v15677_v0, %v5393_v10 }
 0x34f   : > { %v11995_v31 = vpack.c.bf16 %v5590_v2, %v5590_v2  ;;  %v5591_v58 = vmax.f32 %v5559_v4, 0.0 }
 0x350   : > { %v11993_v40 = vpack.c.bf16 %v5588_v11, %v5588_v11  ;;  %v5589_v25 = vmax.f32 %v5557_v44, 0.0  ;;  %v6060_v11 = vld [vmem:[#allocation3 + $0x30] sm:$0xf] }
 0x351   : > { %v5734_v47 = vshrl.u32 %v11995_v31, 16  ;;  %v11996_v57 = vpack.c.bf16 %v5591_v58, %v5591_v58  ;;  %v5737_v3 = vshll.u32 %v11995_v31, 16 }
 0x352   : > { %v5717_v20 = vshrl.u32 %v11993_v40, 16  ;;  %v5720_v26 = vshll.u32 %v11993_v40, 16  ;;  %v11994_v27 = vpack.c.bf16 %v5589_v25, %v5589_v25  ;;  %v12628_v32 = vpop.f32.mrb[4].mxu0 }
 0x353   : > { %v5736_v15 = vrot.slane %v5734_v47, 7  ;;  %v5742_v13 = vshrl.u32 %v11996_v57, 16  ;;  %v5745_v51 = vshll.u32 %v11996_v57, 16  ;;  %v5562_v48 = vadd.f32 %v12628_v32, %v15677_v0  ;;  %v5406_v59 = vpop.f32.mrb[5].mxu0  ;;  %v6053_v57 = vld [vmem:[#allocation3 + $0x24] sm:$0xf] }
 0x354   : > { %v5719_v36 = vrot.slane %v5717_v20, 7  ;;  %v5725_v7 = vshrl.u32 %v11994_v27, 16  ;;  %v5728_v46 = vshll.u32 %v11994_v27, 16  ;;  %v5560_v39 = vadd.f32 %v15677_v0, %v5406_v59  ;;  %v12629_v54 = vpop.f32.mrb[6].mxu0 }
 0x355   : > { %v5739_v56 = vor.u32 %v5737_v3, %v5736_v15  ;;  %v5740_v12 = vrot.slane %v5736_v15, 4  ;;  %v5744_v45 = vrot.slane %v5742_v13, 7  ;;  %v5594_v52 = vmax.f32 %v5562_v48, 0.0  ;;  %v5409_v42 = vpop.f32.mrb[7].mxu0 }
 0x356   : > { %v5722_v49 = vor.u32 %v5720_v26, %v5719_v36  ;;  %v5723_v62 = vrot.slane %v5719_v36, 4  ;;  %v5727_v35 = vrot.slane %v5725_v7, 7  ;;  %v5592_v6 = vmax.f32 %v5560_v39, 0.0 }
 0x357   : > { %v6047_v30 = vsel %vm15686_vm10, %v5739_v56, %v6046_v61  ;;  %v5747_v38 = vor.u32 %v5745_v51, %v5744_v45  ;;  %v5749_v53 = vrot.slane %v5744_v45, 4  ;;  %v11999_v29 = vpack.c.bf16 %v5594_v52, %v5594_v52  ;;  %v6064_v45 = vld [vmem:[#allocation3 + $0x38] sm:$0x1]  ;;  %v6057_v52 = vld [vmem:[#allocation3 + $0x2c] sm:$0x1] }
 0x358   : > { %6048 = vst [vmem:[#allocation3 + $0x18] sm:$0xf] %v6047_v30  ;;  %v6040_v28 = vsel %vm15686_vm10, %v5722_v49, %v6039_v55  ;;  %v5730_v5 = vor.u32 %v5728_v46, %v5727_v35  ;;  %v5732_v8 = vrot.slane %v5727_v35, 4  ;;  %v11997_v21 = vpack.c.bf16 %v5592_v6, %v5592_v6 }
 0x359   : > { %6041 = vst [vmem:[#allocation3 + $0xc] sm:$0xf] %v6040_v28  ;;  %v5748_v16 = vsel %vm13912_vm11, %v5740_v12, %v5747_v38  ;;  %v6051_v41 = vsel %vm15349_vm6, %v5749_v53, %v6050_v60  ;;  %v5768_v22 = vshrl.u32 %v11999_v29, 16  ;;  %v5771_v63 = vshll.u32 %v11999_v29, 16  ;;  %v6074_v28 = vld [vmem:[#allocation3 + $0x48] sm:$0xf] }
 0x35a   : > { %6049 = vst.msk [vmem:[#allocation3 + $0x1c] sm:$0xf] %vm402_vm5, %v5748_v16  ;;  %6052 = vst [vmem:[#allocation3 + $0x20] sm:$0x1] %v6051_v41  ;;  %v5731_v14 = vsel %vm13912_vm11, %v5723_v62, %v5730_v5  ;;  %v6044_v18 = vsel %vm15349_vm6, %v5732_v8, %v6043_v24  ;;  %v5751_v23 = vshrl.u32 %v11997_v21, 16  ;;  %v12632_v19 = vpop.f32.mrb[8].mxu0  ;;  %v5563_v34 = vadd.f32 %v12629_v54, %v15677_v0 }
 0x35b   : > { %6042 = vst.msk [vmem:[#allocation3 + $0x10] sm:$0xf] %vm402_vm5, %v5731_v14  ;;  %6045 = vst [vmem:[#allocation3 + $0x14] sm:$0x1] %v6044_v18  ;;  %v15705_v9 = vrot.slane %v5768_v22, 7  ;;  %v5561_v2 = vadd.f32 %v15677_v0, %v5409_v42  ;;  %v5566_v4 = vadd.f32 %v12632_v19, %v15677_v0  ;;  %v5422_v10 = vpop.f32.mrb[9].mxu0 }
 0x35c   : > { %v5753_v44 = vrot.slane %v5751_v23, 7  ;;  %v5754_v31 = vshll.u32 %v11997_v21, 16  ;;  %v5564_v58 = vadd.f32 %v15677_v0, %v5422_v10  ;;  %v12633_v40 = vpop.f32.mrb[10].mxu0  ;;  %v5595_v3 = vmax.f32 %v5563_v34, 0.0 }
 0x35d   : > { %v5773_v25 = vor.u32 %v5771_v63, %v15705_v9  ;;  %v5774_v47 = vrot.slane %v15705_v9, 4  ;;  %v5593_v20 = vmax.f32 %v5561_v2, 0.0  ;;  %v5425_v26 = vpop.f32.mrb[11].mxu0  ;;  %v5598_v15 = vmax.f32 %v5566_v4, 0.0  ;;  %v6067_v63 = vld [vmem:[#allocation3 + $0x3c] sm:$0xf] }
 0x35e   : > { %v5756_v27 = vor.u32 %v5754_v31, %v5753_v44  ;;  %v5757_v32 = vrot.slane %v5753_v44, 4  ;;  %v5596_v13 = vmax.f32 %v5564_v58, 0.0  ;;  %v12000_v48 = vpack.c.bf16 %v5595_v3, %v5595_v3 }
 0x35f   : > { %v6061_v51 = vsel %vm15686_vm10, %v5773_v25, %v6060_v11  ;;  %v11998_v59 = vpack.c.bf16 %v5593_v20, %v5593_v20  ;;  %v5567_v61 = vadd.f32 %v12633_v40, %v15677_v0  ;;  %v12003_v7 = vpack.c.bf16 %v5598_v15, %v5598_v15 }
 0x360   : > { %6062 = vst [vmem:[#allocation3 + $0x30] sm:$0xf] %v6061_v51  ;;  %v6054_v36 = vsel %vm15686_vm10, %v5756_v27, %v6053_v57  ;;  %v12001_v46 = vpack.c.bf16 %v5596_v13, %v5596_v13  ;;  %v5565_v39 = vadd.f32 %v15677_v0, %v5425_v26  ;;  %v5776_v54 = vshrl.u32 %v12000_v48, 16  ;;  %v6078_v51 = vld [vmem:[#allocation3 + $0x50] sm:$0x1] }
 0x361   : > { %6055 = vst [vmem:[#allocation3 + $0x24] sm:$0xf] %v6054_v36  ;;  %v5779_v56 = vshll.u32 %v12000_v48, 16  ;;  %v5759_v12 = vshrl.u32 %v11998_v59, 16  ;;  %v5762_v55 = vshll.u32 %v11998_v59, 16  ;;  %v5802_v42 = vshrl.u32 %v12003_v7, 16 }
 0x362   : > { %v5805_v49 = vshll.u32 %v12003_v7, 16  ;;  %v5785_v62 = vshrl.u32 %v12001_v46, 16  ;;  %v5788_v60 = vshll.u32 %v12001_v46, 16  ;;  %v12636_v35 = vpop.f32.mrb[12].mxu0  ;;  %v5778_v6 = vrot.slane %v5776_v54, 7 }
 0x363   : > { %v5761_v30 = vrot.slane %v5759_v12, 7  ;;  %v5599_v38 = vmax.f32 %v5567_v61, 0.0  ;;  %v5597_v53 = vmax.f32 %v5565_v39, 0.0  ;;  %v5438_v24 = vpop.f32.mrb[13].mxu0  ;;  %v15719_v29 = vrot.slane %v5802_v42, 7 }
 0x364   : > { %v15721_v5 = vrot.slane %v5785_v62, 7  ;;  %v5570_v8 = vadd.f32 %v12636_v35, %v15677_v0  ;;  %v5568_v21 = vadd.f32 %v15677_v0, %v5438_v24  ;;  %v12637_v16 = vpop.f32.mrb[14].mxu0  ;;  %v5781_v41 = vor.u32 %v5779_v56, %v5778_v6  ;;  %v6071_v54 = vld [vmem:[#allocation3 + $0x44] sm:$0x1] }
 0x365   : > { %v5783_v22 = vrot.slane %v5778_v6, 4  ;;  %v5764_v14 = vor.u32 %v5762_v55, %v5761_v30  ;;  %v5766_v18 = vrot.slane %v5761_v30, 4  ;;  %v5441_v23 = vpop.f32.mrb[15].mxu0  ;;  %v5807_v19 = vor.u32 %v5805_v49, %v15719_v29 }
 0x366   : > { %v5808_v9 = vrot.slane %v15719_v29, 4  ;;  %v5790_v34 = vor.u32 %v5788_v60, %v15721_v5  ;;  %v5791_v2 = vrot.slane %v15721_v5, 4  ;;  %v5782_v4 = vsel %vm13912_vm11, %v5774_v47, %v5781_v41  ;;  %v6081_v41 = vld [vmem:[#allocation3 + $0x54] sm:$0xf] }
 0x367   : > { %v6065_v10 = vsel %vm15349_vm6, %v5783_v22, %v6064_v45  ;;  %v5765_v11 = vsel %vm13912_vm11, %v5757_v32, %v5764_v14  ;;  %v6058_v44 = vsel %vm15349_vm6, %v5766_v18, %v6057_v52  ;;  %6063 = vst.msk [vmem:[#allocation3 + $0x34] sm:$0xf] %vm402_vm5, %v5782_v4  ;;  %v6075_v31 = vsel %vm15686_vm10, %v5807_v19, %v6074_v28 }
 0x368   : > { %6066 = vst [vmem:[#allocation3 + $0x38] sm:$0x1] %v6065_v10  ;;  %6056 = vst.msk [vmem:[#allocation3 + $0x28] sm:$0xf] %vm402_vm5, %v5765_v11  ;;  %v6068_v58 = vsel %vm15686_vm10, %v5790_v34, %v6067_v63  ;;  %v12004_v40 = vpack.c.bf16 %v5599_v38, %v5599_v38  ;;  %v12002_v25 = vpack.c.bf16 %v5597_v53, %v5597_v53  ;;  %v5602_v47 = vmax.f32 %v5570_v8, 0.0 }
 0x369   : > { %6059 = vst [vmem:[#allocation3 + $0x2c] sm:$0x1] %v6058_v44  ;;  %6076 = vst [vmem:[#allocation3 + $0x48] sm:$0xf] %v6075_v31  ;;  %v5600_v57 = vmax.f32 %v5568_v21, 0.0  ;;  %v5571_v3 = vadd.f32 %v12637_v16, %v15677_v0  ;;  %v5569_v20 = vadd.f32 %v15677_v0, %v5441_v23 }
 0x36a   : > { %6069 = vst [vmem:[#allocation3 + $0x3c] sm:$0xf] %v6068_v58  ;;  %v5810_v26 = vshrl.u32 %v12004_v40, 16  ;;  %v5813_v27 = vshll.u32 %v12004_v40, 16  ;;  %v5793_v32 = vshrl.u32 %v12002_v25, 16  ;;  %v5796_v15 = vshll.u32 %v12002_v25, 16 }
 0x36b   : > { %v12640_v13 = vpop.f32.mrb[16].mxu0  ;;  %v12007_v48 = vpack.c.bf16 %v5602_v47, %v5602_v47  ;;  %v12005_v59 = vpack.c.bf16 %v5600_v57, %v5600_v57  ;;  %v5603_v61 = vmax.f32 %v5571_v3, 0.0  ;;  %v5601_v36 = vmax.f32 %v5569_v20, 0.0  ;;  %v6088_v16 = vld [vmem:[#allocation3 + $0x60] sm:$0xf] }
 0x36c   : > { %v5454_v7 = vpop.f32.mrb[17].mxu0  ;;  %v5812_v46 = vrot.slane %v5810_v26, 7  ;;  %v5795_v39 = vrot.slane %v5793_v32, 7  ;;  %v5574_v56 = vadd.f32 %v12640_v13, %v15677_v0  ;;  %v6153_v23 = vld [vmem:[#allocation3 + $0xc] sm:$0xf] }
 0x36d   : > { %v5572_v12 = vadd.f32 %v15677_v0, %v5454_v7  ;;  %v12641_v55 = vpop.f32.mrb[18].mxu0  ;;  %v5836_v45 = vshrl.u32 %v12007_v48, 16  ;;  %v5839_v52 = vshll.u32 %v12007_v48, 16  ;;  %v5819_v42 = vshrl.u32 %v12005_v59, 16  ;;  %v6092_v44 = vld [vmem:[#allocation3 + $0x68] sm:$0x1] }
 0x36e   : > { %v5822_v49 = vshll.u32 %v12005_v59, 16  ;;  %v5457_v62 = vpop.f32.mrb[19].mxu0  ;;  %v5815_v60 = vor.u32 %v5813_v27, %v5812_v46  ;;  %v5817_v35 = vrot.slane %v5812_v46, 4  ;;  %v5798_v6 = vor.u32 %v5796_v15, %v5795_v39  ;;  %v6085_v31 = vld [vmem:[#allocation3 + $0x5c] sm:$0x1] }
 0x36f   : > { %v5800_v30 = vrot.slane %v5795_v39, 4  ;;  %v5838_v38 = vrot.slane %v5836_v45, 7  ;;  %v5821_v53 = vrot.slane %v5819_v42, 7  ;;  %v12008_v24 = vpack.c.bf16 %v5603_v61, %v5603_v61  ;;  %v6154_v15 = vld [vmem:[#allocation3 + $0x10] sm:$0xf] }
 0x370   : > { %v12006_v29 = vpack.c.bf16 %v5601_v36, %v5601_v36  ;;  %v5816_v28 = vsel %vm13912_vm11, %v5808_v9, %v5815_v60  ;;  %v6079_v5 = vsel %vm15349_vm6, %v5817_v35, %v6078_v51  ;;  %v5799_v8 = vsel %vm13912_vm11, %v5791_v2, %v5798_v6  ;;  %v6102_v42 = vld [vmem:[#allocation3 + $0x78] sm:$0xf] }
 0x371   : > { %v6072_v21 = vsel %vm15349_vm6, %v5800_v30, %v6071_v54  ;;  %6077 = vst.msk [vmem:[#allocation3 + $0x4c] sm:$0xf] %vm402_vm5, %v5816_v28  ;;  %6080 = vst [vmem:[#allocation3 + $0x50] sm:$0x1] %v6079_v5  ;;  %v5841_v22 = vor.u32 %v5839_v52, %v5838_v38  ;;  %v5842_v14 = vrot.slane %v5838_v38, 4  ;;  %v5824_v18 = vor.u32 %v5822_v49, %v5821_v53 }
 0x372   : > { %6070 = vst.msk [vmem:[#allocation3 + $0x40] sm:$0xf] %vm402_vm5, %v5799_v8  ;;  %6073 = vst [vmem:[#allocation3 + $0x44] sm:$0x1] %v6072_v21  ;;  %v5825_v63 = vrot.slane %v5821_v53, 4  ;;  %v5844_v19 = vshrl.u32 %v12008_v24, 16  ;;  %v5575_v3 = vadd.f32 %v12641_v55, %v15677_v0  ;;  %v5573_v20 = vadd.f32 %v15677_v0, %v5457_v62 }
 0x373   : > { %v5847_v9 = vshll.u32 %v12008_v24, 16  ;;  %v5827_v34 = vshrl.u32 %v12006_v29, 16  ;;  %v5830_v2 = vshll.u32 %v12006_v29, 16  ;;  %v15757_v4 = vpop.f32.mrb[20].mxu0  ;;  %v6089_v10 = vsel %vm15686_vm10, %v5841_v22, %v6088_v16  ;;  %v6095_v49 = vld [vmem:[#allocation3 + $0x6c] sm:$0xf] }
 0x374   : > { %v6082_v11 = vsel %vm15686_vm10, %v5824_v18, %v6081_v41  ;;  %v5606_v58 = vmax.f32 %v5574_v56, 0.0  ;;  %v5604_v40 = vmax.f32 %v5572_v12, 0.0  ;;  %v15763_v25 = vpop.f32.mrb[21].mxu0  ;;  %6090 = vst [vmem:[#allocation3 + $0x60] sm:$0xf] %v6089_v10  ;;  %v5846_v47 = vrot.slane %v5844_v19, 7 }
 0x375   : > { %6083 = vst [vmem:[#allocation3 + $0x54] sm:$0xf] %v6082_v11  ;;  %v5829_v57 = vrot.slane %v5827_v34, 7  ;;  %v15767_v26 = vpop.f32.mrb[22].mxu0  ;;  %v6225_v13 = vshrl.u32 %v6153_v23, 16  ;;  %v6228_v51 = vshll.u32 %v6153_v23, 16 }
 0x376   : > { %v12011_v27 = vpack.c.bf16 %v5606_v58, %v5606_v58  ;;  %v12009_v32 = vpack.c.bf16 %v5604_v40, %v5604_v40  ;;  %v15769_v48 = vpop.f32.mrb[23].mxu0  ;;  %v5849_v59 = vor.u32 %v5847_v9, %v5846_v47  ;;  %v5851_v61 = vrot.slane %v5846_v47, 4  ;;  %v6185_v30 = vld [vmem:[#allocation3 + $0x14] sm:$0x1]  ;;  %v6155_v23 = vld [vmem:[#allocation3 + $0x18] sm:$0xf] }
 0x377   : > { %v5832_v36 = vor.u32 %v5830_v2, %v5829_v57  ;;  %v5834_v7 = vrot.slane %v5829_v57, 4  ;;  %v5607_v35 = vmax.f32 %v5575_v3, 0.0  ;;  %v5605_v6 = vmax.f32 %v5573_v20, 0.0  ;;  %v6156_v11 = vld [vmem:[#allocation3 + $0x1c] sm:$0xf] }
 0x378   : > { %v5870_v46 = vshrl.u32 %v12011_v27, 16  ;;  %v5873_v39 = vshll.u32 %v12011_v27, 16  ;;  %v5853_v54 = vshrl.u32 %v12009_v32, 16  ;;  %v5856_v56 = vshll.u32 %v12009_v32, 16 }
 0x379   : > { %v5850_v12 = vsel %vm13912_vm11, %v5842_v14, %v5849_v59  ;;  %v6093_v55 = vsel %vm15349_vm6, %v5851_v61, %v6092_v44  ;;  %v5833_v45 = vsel %vm13912_vm11, %v5825_v63, %v5832_v36  ;;  %v6086_v52 = vsel %vm15349_vm6, %v5834_v7, %v6085_v31  ;;  %v6099_v61 = vld [vmem:[#allocation3 + $0x74] sm:$0x1] }
 0x37a   : > { %6091 = vst.msk [vmem:[#allocation3 + $0x64] sm:$0xf] %vm402_vm5, %v5850_v12  ;;  %6094 = vst [vmem:[#allocation3 + $0x68] sm:$0x1] %v6093_v55  ;;  %v5872_v62 = vrot.slane %v5870_v46, 7  ;;  %v5855_v60 = vrot.slane %v5853_v54, 7  ;;  %v12012_v22 = vpack.c.bf16 %v5607_v35, %v5607_v35  ;;  %v12010_v14 = vpack.c.bf16 %v5605_v6, %v5605_v6 }
 0x37b   : > { %6084 = vst.msk [vmem:[#allocation3 + $0x58] sm:$0xf] %vm402_vm5, %v5833_v45  ;;  %6087 = vst [vmem:[#allocation3 + $0x5c] sm:$0x1] %v6086_v52  ;;  %v6227_v38 = vrot.slane %v6225_v13, 4  ;;  %v6230_v53 = vrot.slane %v6228_v51, 5 }
 0x37c   : > { %v6234_v24 = vshll.u32 %v6154_v15, 16  ;;  %v6238_v29 = vshrl.u32 %v6154_v15, 16  ;;  %v15781_v28 = vpop.f32.mrb[24].mxu0  ;;  %v5875_v5 = vor.u32 %v5873_v39, %v5872_v62  ;;  %v5876_v8 = vrot.slane %v5872_v62, 4  ;;  %v6106_v15 = vld [vmem:[#allocation3 + $0x80] sm:$0x1] }
 0x37d   : > { %v5858_v21 = vor.u32 %v5856_v56, %v5855_v60  ;;  %v5859_v16 = vrot.slane %v5855_v60, 4  ;;  %v15783_v41 = vpop.f32.mrb[25].mxu0  ;;  %v6231_v18 = vor.u32 %v6230_v53, %v6227_v38  ;;  %v6244_v10 = vshll.u32 %v6185_v30, 16  ;;  %v6186_v45 = vld [vmem:[#allocation3 + $0x20] sm:$0x1] }
 0x37e   : > { %v6236_v63 = vrot.slane %v6234_v24, 5  ;;  %v15785_v19 = vpop.f32.mrb[26].mxu0  ;;  %v6103_v9 = vsel %vm15686_vm10, %v5875_v5, %v6102_v42  ;;  %v6240_v2 = vrot.slane %v6238_v29, 4  ;;  %v5878_v31 = vshrl.u32 %v12012_v22, 16  ;;  %v6157_v35 = vld [vmem:[#allocation3 + $0x24] sm:$0xf] }
 0x37f   : > { %v6096_v34 = vsel %vm15686_vm10, %v5858_v21, %v6095_v49  ;;  %v15791_v44 = vpop.f32.mrb[27].mxu0  ;;  %6104 = vst [vmem:[#allocation3 + $0x78] sm:$0xf] %v6103_v9  ;;  %v5881_v58 = vshll.u32 %v12012_v22, 16  ;;  %v5861_v40 = vshrl.u32 %v12010_v14, 16  ;;  %v5864_v47 = vshll.u32 %v12010_v14, 16 }
 0x380   : > { %6097 = vst [vmem:[#allocation3 + $0x6c] sm:$0xf] %v6096_v34  ;;  %v6232_v57 = vrot.slane %v6231_v18, 4  ;;  %v6241_v3 = vor.u32 %v6240_v2, %v6236_v63  ;;  %v6246_v20 = vrot.slane %v6244_v10, 5  ;;  %v6249_v27 = vshrl.u32 %v6155_v23, 16 }
 0x381   : > { %v5880_v32 = vrot.slane %v5878_v31, 7  ;;  %v5863_v13 = vrot.slane %v5861_v40, 7  ;;  %v6252_v51 = vshll.u32 %v6155_v23, 16  ;;  %v6258_v59 = vshll.u32 %v6156_v11, 16  ;;  %v15823_v9 = vld [vmem:[#allocation3 + $0x28] sm:$0xf] }
 0x382   : > { %v6237_v36 = vsel %vm13935_vm13, %v6232_v57, %v6236_v63  ;;  %v6242_v7 = vrot.slane %v6241_v3, 4  ;;  %v6251_v46 = vrot.slane %v6249_v27, 4  ;;  %v6262_v39 = vshrl.u32 %v6156_v11, 16  ;;  %v15795_v52 = vpop.f32.mrb[28].mxu0 }
 0x383   : > { %v5883_v54 = vor.u32 %v5881_v58, %v5880_v32  ;;  %v5885_v56 = vrot.slane %v5880_v32, 4  ;;  %v5866_v12 = vor.u32 %v5864_v47, %v5863_v13  ;;  %v5868_v55 = vrot.slane %v5863_v13, 4  ;;  %v15799_v6 = vpop.f32.mrb[29].mxu0 }
 0x384   : > { %v6247_v42 = vsel %vm13935_vm13, %v6242_v7, %v6246_v20  ;;  %v6254_v49 = vrot.slane %v6252_v51, 5  ;;  %v6260_v62 = vrot.slane %v6258_v59, 5  ;;  %v6264_v60 = vrot.slane %v6262_v39, 4  ;;  %v15809_v29 = vpop.f32.mrb[30].mxu0  ;;  %v6116_v39 = vld [vmem:[#allocation3 + $0x90] sm:$0xf] }
 0x385   : > { %v5884_v30 = vsel %vm13912_vm11, %v5876_v8, %v5883_v54  ;;  %v6107_v38 = vsel %vm15349_vm6, %v5885_v56, %v6106_v15  ;;  %v5867_v53 = vsel %vm13912_vm11, %v5859_v16, %v5866_v12  ;;  %v6100_v24 = vsel %vm15349_vm6, %v5868_v55, %v6099_v61  ;;  %v15813_v14 = vpop.f32.mrb[31].mxu0  ;;  %v6109_v54 = vld [vmem:[#allocation3 + $0x84] sm:$0xf] }
 0x386   : > { %6105 = vst.msk [vmem:[#allocation3 + $0x7c] sm:$0xf] %vm402_vm5, %v5884_v30  ;;  %6108 = vst [vmem:[#allocation3 + $0x80] sm:$0x1] %v6107_v38  ;;  %v11613_v5 = vcombine.low %v6237_v36, %v6247_v42  ;;  %v6255_v21 = vor.u32 %v6254_v49, %v6251_v46  ;;  %v6265_v8 = vor.u32 %v6264_v60, %v6260_v62  ;;  %v6268_v22 = vshll.u32 %v6186_v45, 16 }
 0x387   : > { %6098 = vst.msk [vmem:[#allocation3 + $0x70] sm:$0xf] %vm402_vm5, %v5867_v53  ;;  %6101 = vst [vmem:[#allocation3 + $0x74] sm:$0x1] %v6100_v24  ;;  %v5578_v16 = vadd.f32 %v15757_v4, %v15677_v0  ;;  %v5576_v18 = vadd.f32 %v15677_v0, %v15763_v25  ;;  %v5579_v63 = vadd.f32 %v15767_v26, %v15677_v0  ;;  %v6273_v11 = vshrl.u32 %v6157_v35, 16 }
 0x388   : > { %v5577_v23 = vadd.f32 %v15677_v0, %v15769_v48  ;;  %12657 = vmatmul.mubr.msk.bf16.vlgmr.msra.gmra.mrb[32].mxu0 %vm6634_vm9, %v11613_v5  ;;  %v6256_v34 = vrot.slane %v6255_v21, 4  ;;  %v6266_v2 = vrot.slane %v6265_v8, 4  ;;  %v6270_v10 = vrot.slane %v6268_v22, 5  ;;  %v6187_v46 = vld [vmem:[#allocation3 + $0x2c] sm:$0x1] }
 0x389   : > { %v5610_v31 = vmax.f32 %v5578_v16, 0.0  ;;  %v5608_v58 = vmax.f32 %v5576_v18, 0.0  ;;  %v5611_v4 = vmax.f32 %v5579_v63, 0.0  ;;  %v6275_v47 = vrot.slane %v6273_v11, 4  ;;  %v6113_v53 = vld [vmem:[#allocation3 + $0x8c] sm:$0x1] }
 0x38a   : > { %v5609_v40 = vmax.f32 %v5577_v23, 0.0  ;;  %v6261_v25 = vsel %vm13935_vm13, %v6256_v34, %v6260_v62  ;;  %v6271_v26 = vsel %vm13935_vm13, %v6266_v2, %v6270_v10  ;;  %v6276_v48 = vshll.u32 %v6157_v35, 16  ;;  %v6120_v62 = vld [vmem:[#allocation3 + $0x98] sm:$0x1]  ;;  %v15833_v2 = vld [vmem:[#allocation3 + $0x30] sm:$0xf] }
 0x38b   : > { %v11614_v57 = vcombine.low %v6261_v25, %v6271_v26  ;;  %v12015_v3 = vpack.c.bf16 %v5610_v31, %v5610_v31  ;;  %v12013_v20 = vpack.c.bf16 %v5608_v58, %v5608_v58  ;;  %v12016_v27 = vpack.c.bf16 %v5611_v4, %v5611_v4  ;;  %v15839_v4 = vld [vmem:[#allocation3 + $0x34] sm:$0xf] }
 0x38c   : > { %v12014_v32 = vpack.c.bf16 %v5609_v40, %v5609_v40  ;;  %v6278_v15 = vrot.slane %v6276_v48, 5  ;;  %v6282_v13 = vshll.u32 %v15823_v9, 16  ;;  %v6286_v51 = vshrl.u32 %v15823_v9, 16  ;;  %v6188_v40 = vld [vmem:[#allocation3 + $0x38] sm:$0x1] }
 0x38d   : > { %12660 = vmatprep.mubr.msk.bf16.mxu0 %vm6634_vm9, %v11614_v57  ;;  %v5904_v59 = vshrl.u32 %v12015_v3, 16  ;;  %v5907_v61 = vshll.u32 %v12015_v3, 16  ;;  %v5887_v36 = vshrl.u32 %v12013_v20, 16  ;;  %v5890_v7 = vshll.u32 %v12013_v20, 16 }
 0x38e   : > { %v5912_v56 = vshrl.u32 %v12016_v27, 16  ;;  %v5915_v12 = vshll.u32 %v12016_v27, 16  ;;  %v5895_v55 = vshrl.u32 %v12014_v32, 16  ;;  %v5898_v45 = vshll.u32 %v12014_v32, 16 }
 0x38f   : > { %v5906_v42 = vrot.slane %v5904_v59, 7  ;;  %v5889_v49 = vrot.slane %v5887_v36, 7  ;;  %v6279_v60 = vor.u32 %v6278_v15, %v6275_v47  ;;  %v6284_v35 = vrot.slane %v6282_v13, 5 }
 0x390   : > { %v5914_v30 = vrot.slane %v5912_v56, 7  ;;  %v5897_v38 = vrot.slane %v5895_v55, 7  ;;  %v6288_v24 = vrot.slane %v6286_v51, 4  ;;  %v6292_v5 = vshll.u32 %v6187_v46, 16  ;;  %v15863_v46 = vld [vmem:[#allocation3 + $0x3c] sm:$0xf] }
 0x391   : > { %v5909_v21 = vor.u32 %v5907_v61, %v5906_v42  ;;  %v5910_v8 = vrot.slane %v5906_v42, 4  ;;  %v5892_v22 = vor.u32 %v5890_v7, %v5889_v49  ;;  %v5893_v16 = vrot.slane %v5889_v49, 4 }
 0x392   : > { %v5917_v18 = vor.u32 %v5915_v12, %v5914_v30  ;;  %v5919_v63 = vrot.slane %v5914_v30, 4  ;;  %v5900_v23 = vor.u32 %v5898_v45, %v5897_v38  ;;  %v5902_v34 = vrot.slane %v5897_v38, 4 }
 0x393   : > { %v6117_v10 = vsel %vm15686_vm10, %v5909_v21, %v6116_v39  ;;  %v6110_v11 = vsel %vm15686_vm10, %v5892_v22, %v6109_v54  ;;  %v6280_v31 = vrot.slane %v6279_v60, 4  ;;  %v6289_v58 = vor.u32 %v6288_v24, %v6284_v35 }
 0x394   : > { %6118 = vst [vmem:[#allocation3 + $0x90] sm:$0xf] %v6117_v10  ;;  %6111 = vst [vmem:[#allocation3 + $0x84] sm:$0xf] %v6110_v11  ;;  %v5918_v25 = vsel %vm13912_vm11, %v5910_v8, %v5917_v18  ;;  %v6121_v26 = vsel %vm15349_vm6, %v5919_v63, %v6120_v62  ;;  %v5901_v47 = vsel %vm13912_vm11, %v5893_v16, %v5900_v23  ;;  %v6294_v20 = vrot.slane %v6292_v5, 5 }
 0x395   : > { %v6114_v48 = vsel %vm15349_vm6, %v5902_v34, %v6113_v53  ;;  %6119 = vst.msk [vmem:[#allocation3 + $0x94] sm:$0xf] %vm402_vm5, %v5918_v25  ;;  %6122 = vst [vmem:[#allocation3 + $0x98] sm:$0x1] %v6121_v26  ;;  %v6285_v57 = vsel %vm13935_vm13, %v6280_v31, %v6284_v35  ;;  %v6290_v3 = vrot.slane %v6289_v58, 4  ;;  %v6297_v27 = vshrl.u32 %v15833_v2, 16 }
 0x396   : > { %6112 = vst.msk [vmem:[#allocation3 + $0x88] sm:$0xf] %vm402_vm5, %v5901_v47  ;;  %6115 = vst [vmem:[#allocation3 + $0x8c] sm:$0x1] %v6114_v48  ;;  %v6300_v32 = vshll.u32 %v15833_v2, 16  ;;  %v6306_v15 = vshll.u32 %v15839_v4, 16  ;;  %v5582_v36 = vadd.f32 %v15781_v28, %v15677_v0  ;;  %v5580_v7 = vadd.f32 %v15677_v0, %v15783_v41 }
 0x397   : > { %v6310_v13 = vshrl.u32 %v15839_v4, 16  ;;  %v6316_v51 = vshll.u32 %v6188_v40, 16  ;;  %v6295_v59 = vsel %vm13935_vm13, %v6290_v3, %v6294_v20  ;;  %v6299_v61 = vrot.slane %v6297_v27, 4  ;;  %v6130_v23 = vld [vmem:[#allocation3 + $0xa8] sm:$0xf] }
 0x398   : > { %v11615_v39 = vcombine.low %v6285_v57, %v6295_v59  ;;  %v6302_v54 = vrot.slane %v6300_v32, 5  ;;  %v6308_v56 = vrot.slane %v6306_v15, 5  ;;  %v5614_v45 = vmax.f32 %v5582_v36, 0.0  ;;  %v6123_v34 = vld [vmem:[#allocation3 + $0x9c] sm:$0xf] }
 0x399   : > { %v6312_v12 = vrot.slane %v6310_v13, 4  ;;  %v6318_v55 = vrot.slane %v6316_v51, 5  ;;  %v5612_v42 = vmax.f32 %v5580_v7, 0.0  ;;  %v5583_v49 = vadd.f32 %v15785_v19, %v15677_v0  ;;  %v15876_v31 = vld [vmem:[#allocation3 + $0x40] sm:$0xf] }
 0x39a   : > { %12661 = vmatmul.mubr.msk.bf16.gmra.mrb[36].mxu0 %vm6634_vm9, %v11615_v39  ;;  %v6303_v62 = vor.u32 %v6302_v54, %v6299_v61  ;;  %v5581_v28 = vadd.f32 %v15677_v0, %v15791_v44  ;;  %v6321_v41 = vshrl.u32 %v15863_v46, 16  ;;  %v12019_v35 = vpack.c.bf16 %v5614_v45, %v5614_v45  ;;  %v15878_v26 = vld [vmem:[#allocation3 + $0x44] sm:$0x1]  ;;  %v6134_v59 = vld [vmem:[#allocation3 + $0xb0] sm:$0x1] }
 0x39b   : > { %v6313_v60 = vor.u32 %v6312_v12, %v6308_v56  ;;  %v12017_v30 = vpack.c.bf16 %v5612_v42, %v5612_v42  ;;  %v5615_v38 = vmax.f32 %v5583_v49, 0.0  ;;  %v6324_v53 = vshll.u32 %v15863_v46, 16 }
 0x39c   : > { %v6304_v24 = vrot.slane %v6303_v62, 4  ;;  %v5613_v21 = vmax.f32 %v5581_v28, 0.0  ;;  %v6323_v8 = vrot.slane %v6321_v41, 4  ;;  %v5938_v22 = vshrl.u32 %v12019_v35, 16  ;;  %v15890_v28 = vld [vmem:[#allocation3 + $0x4c] sm:$0xf] }
 0x39d   : > { %v6314_v5 = vrot.slane %v6313_v60, 4  ;;  %v5941_v19 = vshll.u32 %v12019_v35, 16  ;;  %v5921_v16 = vshrl.u32 %v12017_v30, 16  ;;  %v5924_v18 = vshll.u32 %v12017_v30, 16  ;;  %v15888_v60 = vld [vmem:[#allocation3 + $0x48] sm:$0xf] }
 0x39e   : > { %v6309_v63 = vsel %vm13935_vm13, %v6304_v24, %v6308_v56  ;;  %v12020_v10 = vpack.c.bf16 %v5615_v38, %v5615_v38  ;;  %v12018_v11 = vpack.c.bf16 %v5613_v21, %v5613_v21  ;;  %v5940_v40 = vrot.slane %v5938_v22, 7  ;;  %v6127_v56 = vld [vmem:[#allocation3 + $0xa4] sm:$0x1] }
 0x39f   : > { %v6319_v44 = vsel %vm13935_vm13, %v6314_v5, %v6318_v55  ;;  %v5923_v25 = vrot.slane %v5921_v16, 7  ;;  %v6326_v47 = vrot.slane %v6324_v53, 5  ;;  %v6330_v7 = vshll.u32 %v15876_v31, 16  ;;  %v15892_v53 = vld [vmem:[#allocation3 + $0x50] sm:$0x1] }
 0x3a0   : > { %v11616_v58 = vcombine.low %v6309_v63, %v6319_v44  ;;  %v5946_v48 = vshrl.u32 %v12020_v10, 16  ;;  %v5949_v57 = vshll.u32 %v12020_v10, 16  ;;  %v5929_v3 = vshrl.u32 %v12018_v11, 16 }
 0x3a1   : > { %v5932_v20 = vshll.u32 %v12018_v11, 16  ;;  %v5943_v27 = vor.u32 %v5941_v19, %v5940_v40  ;;  %v5944_v32 = vrot.slane %v5940_v40, 4  ;;  %v5926_v15 = vor.u32 %v5924_v18, %v5923_v25 }
 0x3a2   : > { %12664 = vmatprep.mubr.msk.bf16.mxu0 %vm6634_vm9, %v11616_v58  ;;  %v5927_v13 = vrot.slane %v5923_v25, 4  ;;  %v5948_v51 = vrot.slane %v5946_v48, 7  ;;  %v5931_v61 = vrot.slane %v5929_v3, 7  ;;  %v6327_v36 = vor.u32 %v6326_v47, %v6323_v8  ;;  %v15915_v3 = vld [vmem:[#allocation3 + $0x60] sm:$0xf] }
 0x3a3   : > { %v6131_v39 = vsel %vm15686_vm10, %v5943_v27, %v6130_v23  ;;  %v6124_v54 = vsel %vm15686_vm10, %v5926_v15, %v6123_v34  ;;  %v6334_v12 = vshrl.u32 %v15876_v31, 16  ;;  %v6340_v55 = vshll.u32 %v15878_v26, 16 }
 0x3a4   : > { %6132 = vst [vmem:[#allocation3 + $0xa8] sm:$0xf] %v6131_v39  ;;  %6125 = vst [vmem:[#allocation3 + $0x9c] sm:$0xf] %v6124_v54  ;;  %v5951_v45 = vor.u32 %v5949_v57, %v5948_v51  ;;  %v5953_v42 = vrot.slane %v5948_v51, 4  ;;  %v5934_v49 = vor.u32 %v5932_v20, %v5931_v61  ;;  %v5936_v62 = vrot.slane %v5931_v61, 4 }
 0x3a5   : > { %v6328_v41 = vrot.slane %v6327_v36, 4  ;;  %v6332_v35 = vrot.slane %v6330_v7, 5  ;;  %v6336_v30 = vrot.slane %v6334_v12, 4  ;;  %v6342_v38 = vrot.slane %v6340_v55, 5 }
 0x3a6   : > { %v5952_v24 = vsel %vm13912_vm11, %v5944_v32, %v5951_v45  ;;  %v6135_v5 = vsel %vm15349_vm6, %v5953_v42, %v6134_v59  ;;  %v5935_v21 = vsel %vm13912_vm11, %v5927_v13, %v5934_v49  ;;  %v6128_v8 = vsel %vm15349_vm6, %v5936_v62, %v6127_v56 }
 0x3a7   : > { %6133 = vst.msk [vmem:[#allocation3 + $0xac] sm:$0xf] %vm402_vm5, %v5952_v24  ;;  %6136 = vst [vmem:[#allocation3 + $0xb0] sm:$0x1] %v6135_v5  ;;  %v6333_v22 = vsel %vm13935_vm13, %v6328_v41, %v6332_v35  ;;  %v6337_v19 = vor.u32 %v6336_v30, %v6332_v35  ;;  %v6345_v16 = vshrl.u32 %v15888_v60, 16  ;;  %v6348_v18 = vshll.u32 %v15888_v60, 16 }
 0x3a8   : > { %6126 = vst.msk [vmem:[#allocation3 + $0xa0] sm:$0xf] %vm402_vm5, %v5935_v21  ;;  %6129 = vst [vmem:[#allocation3 + $0xa4] sm:$0x1] %v6128_v8  ;;  %v6354_v63 = vshll.u32 %v15890_v28, 16  ;;  %v6358_v44 = vshrl.u32 %v15890_v28, 16  ;;  %v5586_v34 = vadd.f32 %v15795_v52, %v15677_v0  ;;  %v5584_v40 = vadd.f32 %v15677_v0, %v15799_v6 }
 0x3a9   : > { %v6364_v23 = vshll.u32 %v15892_v53, 16  ;;  %v6338_v10 = vrot.slane %v6337_v19, 4  ;;  %v6347_v11 = vrot.slane %v6345_v16, 4  ;;  %v6350_v58 = vrot.slane %v6348_v18, 5  ;;  %v13750_v52 = vld [vmem:[%s17685_s2] ss:$0 sm:$0xff] }
 0x3aa   : > { %v6356_v25 = vrot.slane %v6354_v63, 5  ;;  %v6360_v47 = vrot.slane %v6358_v44, 4  ;;  %v5618_v57 = vmax.f32 %v5586_v34, 0.0  ;;  %v5616_v32 = vmax.f32 %v5584_v40, 0.0  ;;  %v15930_v35 = vld [vmem:[#allocation3 + $0x64] sm:$0xf] }
 0x3ab   : > { %v6366_v48 = vrot.slane %v6364_v23, 5  ;;  %v6343_v20 = vsel %vm13935_vm13, %v6338_v10, %v6342_v38  ;;  %v6351_v27 = vor.u32 %v6350_v58, %v6347_v11  ;;  %v5587_v15 = vadd.f32 %v13750_v52, %v15809_v29  ;;  %v6144_v29 = vld [vmem:[#allocation3 + $0xc0] sm:$0xf]  ;;  %v6137_v19 = vld [vmem:[#allocation3 + $0xb4] sm:$0xf] }
 0x3ac   : > { %v11617_v13 = vcombine.low %v6333_v22, %v6343_v20  ;;  %v6361_v51 = vor.u32 %v6360_v47, %v6356_v25  ;;  %v12023_v0 = vpack.c.bf16 %v5618_v57, %v5618_v57  ;;  %v5585_v6 = vadd.f32 %v13750_v52, %v15813_v14  ;;  %v6148_v34 = vld [vmem:[#allocation3 + $0xc8] sm:$0x1] }
 0x3ad   : > { %v6352_v59 = vrot.slane %v6351_v27, 4  ;;  %v12021_v61 = vpack.c.bf16 %v5616_v32, %v5616_v32  ;;  %v5619_v36 = vmax.f32 %v5587_v15, 0.0  ;;  %v6393_v7 = vshrl.u32 %v15915_v3, 16  ;;  %v15936_v40 = vld [vmem:[#allocation3 + $0x68] sm:$0x1] }
 0x3ae   : > { %12665 = vmatmul.mubr.msk.bf16.gmra.mrb[40].mxu0 %vm6634_vm9, %v11617_v13  ;;  %v6362_v39 = vrot.slane %v6361_v51, 4  ;;  %v5972_v54 = vshrl.u32 %v12023_v0, 16  ;;  %v5975_v56 = vshll.u32 %v12023_v0, 16  ;;  %v5617_v12 = vmax.f32 %v5585_v6, 0.0  ;;  %v6141_v27 = vld [vmem:[#allocation3 + $0xbc] sm:$0x1] }
 0x3af   : > { %v6357_v55 = vsel %vm13935_vm13, %v6352_v59, %v6356_v25  ;;  %v5955_v45 = vshrl.u32 %v12021_v61, 16  ;;  %v5958_v42 = vshll.u32 %v12021_v61, 16  ;;  %v12024_v49 = vpack.c.bf16 %v5619_v36, %v5619_v36  ;;  %v15942_v0 = vld [vmem:[#allocation3 + $0x54] sm:$0xf]  ;;  %v15949_v36 = vld [vmem:[#allocation3 + $0x58] sm:$0xf] }
 0x3b0   : > { %v6367_v14 = vsel %vm13935_vm13, %v6362_v39, %v6366_v48  ;;  %v5974_v62 = vrot.slane %v5972_v54, 7  ;;  %v12022_v41 = vpack.c.bf16 %v5617_v12, %v5617_v12  ;;  %v6395_v30 = vrot.slane %v6393_v7, 4  ;;  %v15951_v7 = vld [vmem:[#allocation3 + $0x5c] sm:$0x1]  ;;  %v15958_v12 = vld [vmem:[#allocation3 + $0x6c] sm:$0xf] }
 0x3b1   : > { %v11618_v38 = vcombine.low %v6357_v55, %v6367_v14  ;;  %v5957_v24 = vrot.slane %v5955_v45, 7  ;;  %v5980_v5 = vshrl.u32 %v12024_v49, 16  ;;  %v5983_v21 = vshll.u32 %v12024_v49, 16  ;;  %v13751_v55 = vld [vmem:[%s17686_s3] sm:$0xf] }
 0x3b2   : > { %v5977_v8 = vor.u32 %v5975_v56, %v5974_v62  ;;  %v5978_v22 = vrot.slane %v5974_v62, 4  ;;  %v5963_v16 = vshrl.u32 %v12022_v41, 16  ;;  %v5966_v18 = vshll.u32 %v12022_v41, 16  ;;  %v15969_v14 = vld [vmem:[#allocation3 + $0x70] sm:$0xf] }
 0x3b3   : > { %12668 = vmatprep.mubr.msk.bf16.mxu0 %vm6634_vm9, %v11618_v38  ;;  %v5960_v63 = vor.u32 %v5958_v42, %v5957_v24  ;;  %v5961_v44 = vrot.slane %v5957_v24, 4  ;;  %v5982_v23 = vrot.slane %v5980_v5, 7  ;;  %v6396_v10 = vshll.u32 %v15915_v3, 16  ;;  %v15971_v62 = vld [vmem:[#allocation3 + $0x74] sm:$0x1] }
 0x3b4   : > { %v6145_v11 = vsel %vm15686_vm10, %v5977_v8, %v6144_v29  ;;  %v5965_v58 = vrot.slane %v5963_v16, 7  ;;  %v6402_v25 = vshll.u32 %v15930_v35, 16  ;;  %v6406_v47 = vshrl.u32 %v15930_v35, 16  ;;  %v15976_v5 = vld [vmem:[#allocation3 + $0x78] sm:$0xf] }
 0x3b5   : > { %6146 = vst [vmem:[#allocation3 + $0xc0] sm:$0xf] %v6145_v11  ;;  %v6138_v48 = vsel %vm15686_vm10, %v5960_v63, %v6137_v19  ;;  %v5985_v57 = vor.u32 %v5983_v21, %v5982_v23  ;;  %v5987_v20 = vrot.slane %v5982_v23, 4  ;;  %v6398_v32 = vrot.slane %v6396_v10, 5 }
 0x3b6   : > { %6139 = vst [vmem:[#allocation3 + $0xb4] sm:$0xf] %v6138_v48  ;;  %v5968_v52 = vor.u32 %v5966_v18, %v5965_v58  ;;  %v5970_v15 = vrot.slane %v5965_v58, 4  ;;  %v6404_v13 = vrot.slane %v6402_v25, 5  ;;  %v6408_v51 = vrot.slane %v6406_v47, 4 }
 0x3b7   : > { %v5986_v6 = vsel %vm13912_vm11, %v5978_v22, %v5985_v57  ;;  %v6149_v59 = vsel %vm15349_vm6, %v5987_v20, %v6148_v34  ;;  %v6399_v61 = vor.u32 %v6398_v32, %v6395_v30  ;;  %v6412_v37 = vshll.u32 %v15936_v40, 16  ;;  %v15984_v58 = vld [vmem:[#allocation3 + $0x7c] sm:$0xf] }
 0x3b8   : > { %6147 = vst.msk [vmem:[#allocation3 + $0xc4] sm:$0xf] %vm402_vm5, %v5986_v6  ;;  %6150 = vst [vmem:[#allocation3 + $0xc8] sm:$0x1] %v6149_v59  ;;  %v5969_v39 = vsel %vm13912_vm11, %v5961_v44, %v5968_v52  ;;  %v6142_v54 = vsel %vm15349_vm6, %v5970_v15, %v6141_v27  ;;  %v6409_v56 = vor.u32 %v6408_v51, %v6404_v13  ;;  %v15964_v29 = vsel %vm6683_vm7, %v13751_v55, 0 }
 0x3b9   : > { %6140 = vst.msk [vmem:[#allocation3 + $0xb8] sm:$0xf] %vm402_vm5, %v5969_v39  ;;  %6143 = vst [vmem:[#allocation3 + $0xbc] sm:$0x1] %v6142_v54  ;;  %v6400_v45 = vrot.slane %v6399_v61, 4  ;;  %v6414_v42 = vrot.slane %v6412_v37, 5 }
 0x3ba   : > { %v6369_v33 = vshrl.u32 %v15942_v0, 16  ;;  %v6372_v49 = vshll.u32 %v15942_v0, 16  ;;  %v6410_v41 = vrot.slane %v6409_v56, 4  ;;  %v6378_v30 = vshll.u32 %v15949_v36, 16  ;;  %v15992_v59 = vld [vmem:[#allocation3 + $0x80] sm:$0x1] }
 0x3bb   : > { %v6382_v38 = vshrl.u32 %v15949_v36, 16  ;;  %v6388_v24 = vshll.u32 %v15951_v7, 16  ;;  %v6405_v21 = vsel %vm13935_vm13, %v6400_v45, %v6404_v13  ;;  %v6417_v19 = vshrl.u32 %v15958_v12, 16  ;;  %v15996_v56 = vld [vmem:[#allocation3 + $0x84] sm:$0xf] }
 0x3bc   : > { %v6371_v8 = vrot.slane %v6369_v33, 4  ;;  %v6374_v22 = vrot.slane %v6372_v49, 5  ;;  %v6415_v16 = vsel %vm13935_vm13, %v6410_v41, %v6414_v42  ;;  %v6380_v18 = vrot.slane %v6378_v30, 5 }
 0x3bd   : > { %v6384_v63 = vrot.slane %v6382_v38, 4  ;;  %v6390_v44 = vrot.slane %v6388_v24, 5  ;;  %v11620_v23 = vcombine.low %v6405_v21, %v6415_v16  ;;  %v6419_v10 = vrot.slane %v6417_v19, 4  ;;  %v16003_v24 = vld [vmem:[#allocation3 + $0x88] sm:$0xf] }
 0x3be   : > { %v6375_v34 = vor.u32 %v6374_v22, %v6371_v8  ;;  %v6420_v11 = vshll.u32 %v15958_v12, 16  ;;  %v6426_v47 = vshll.u32 %v15969_v14, 16  ;;  %v6430_v48 = vshrl.u32 %v15969_v14, 16  ;;  %v16006_v16 = vld [vmem:[#allocation3 + $0x90] sm:$0xf] }
 0x3bf   : > { %v6385_v25 = vor.u32 %v6384_v63, %v6380_v18  ;;  %v6436_v57 = vshll.u32 %v15971_v62, 16  ;;  %12672 = vmatprep.mubr.msk.bf16.mxu1 %vm6634_vm9, %v11620_v23  ;;  %v6441_v32 = vshrl.u32 %v15976_v5, 16  ;;  %v6444_v52 = vshll.u32 %v15976_v5, 16  ;;  %v16011_v23 = vld [vmem:[#allocation3 + $0x8c] sm:$0x1] }
 0x3c0   : > { %v6376_v20 = vrot.slane %v6375_v34, 4  ;;  %v6422_v27 = vrot.slane %v6420_v11, 5  ;;  %v6428_v13 = vrot.slane %v6426_v47, 5  ;;  %v6432_v51 = vrot.slane %v6430_v48, 4  ;;  %v16017_v48 = vld [vmem:[#allocation3 + $0x94] sm:$0xf] }
 0x3c1   : > { %v6386_v15 = vrot.slane %v6385_v25, 4  ;;  %v6438_v6 = vrot.slane %v6436_v57, 5  ;;  %v6443_v39 = vrot.slane %v6441_v32, 4  ;;  %v6446_v54 = vrot.slane %v6444_v52, 5  ;;  %v16022_v57 = vld [vmem:[%s17686_s3 + $0x8] sm:$0xf] }
 0x3c2   : > { %v6381_v61 = vsel %vm13935_vm13, %v6376_v20, %v6380_v18  ;;  %v6423_v37 = vor.u32 %v6422_v27, %v6419_v10  ;;  %v6433_v45 = vor.u32 %v6432_v51, %v6428_v13  ;;  %v6450_v42 = vshll.u32 %v15984_v58, 16 }
 0x3c3   : > { %v6391_v55 = vsel %vm13935_vm13, %v6386_v15, %v6390_v44  ;;  %v6454_v33 = vshrl.u32 %v15984_v58, 16  ;;  %v6447_v30 = vor.u32 %v6446_v54, %v6443_v39  ;;  %v6460_v38 = vshll.u32 %v15992_v59, 16  ;;  %v16027_v15 = vld [vmem:[#allocation3 + $0x98] sm:$0x1] }
 0x3c4   : > { %v11619_v49 = vcombine.low %v6381_v61, %v6391_v55  ;;  %v6424_v41 = vrot.slane %v6423_v37, 4  ;;  %v6434_v21 = vrot.slane %v6433_v45, 4  ;;  %v6452_v8 = vrot.slane %v6450_v42, 5  ;;  %v16031_v37 = vld [vmem:[#allocation3 + $0x9c] sm:$0xf] }
 0x3c5   : > { %v6456_v22 = vrot.slane %v6454_v33, 4  ;;  %v6465_v19 = vshrl.u32 %v15996_v56, 16  ;;  %v6448_v63 = vrot.slane %v6447_v30, 4  ;;  %v6462_v44 = vrot.slane %v6460_v38, 5  ;;  %v16036_v42 = vld [vmem:[#allocation3 + $0xa0] sm:$0xf] }
 0x3c6   : > { %12669 = vmatmul.mubr.msk.bf16.gmra.mrb[44].mxu0 %vm6634_vm9, %v11619_v49  ;;  %v6429_v18 = vsel %vm13935_vm13, %v6424_v41, %v6428_v13  ;;  %v6468_v34 = vshll.u32 %v15996_v56, 16  ;;  %v6439_v10 = vsel %vm13935_vm13, %v6434_v21, %v6438_v6  ;;  %v6474_v47 = vshll.u32 %v16003_v24, 16 }
 0x3c7   : > { %v6457_v11 = vor.u32 %v6456_v22, %v6452_v8  ;;  %v6467_v25 = vrot.slane %v6465_v19, 4  ;;  %v11621_v20 = vcombine.low %v6429_v18, %v6439_v10  ;;  %v6453_v27 = vsel %vm13935_vm13, %v6448_v63, %v6452_v8  ;;  %v16042_v19 = vld [vmem:[#allocation3 + $0xa4] sm:$0x1] }
 0x3c8   : > { %v6470_v32 = vrot.slane %v6468_v34, 5  ;;  %v6478_v52 = vshrl.u32 %v16003_v24, 16  ;;  %v6476_v51 = vrot.slane %v6474_v47, 5  ;;  %v6484_v6 = vshll.u32 %v16011_v23, 16 }
 0x3c9   : > { %v6458_v13 = vrot.slane %v6457_v11, 4  ;;  %v6489_v61 = vshrl.u32 %v16006_v16, 16  ;;  %12673 = vmatmul.mubr.msk.bf16.vlgmr.msra.gmra.mrb[0].mxu1 %vm6634_vm9, %v11621_v20  ;;  %v6492_v55 = vshll.u32 %v16006_v16, 16  ;;  %v6498_v45 = vshll.u32 %v16017_v48, 16 }
 0x3ca   : > { %v6471_v39 = vor.u32 %v6470_v32, %v6467_v25  ;;  %v6480_v54 = vrot.slane %v6478_v52, 4  ;;  %12689 = vmatpush3.bf16.msra.mxu1 %v15964_v29  ;;  %v6486_v49 = vrot.slane %v6484_v6, 5  ;;  %v6502_v30 = vshrl.u32 %v16017_v48, 16 }
 0x3cb   : > { %v6463_v33 = vsel %vm13935_vm13, %v6458_v13, %v6462_v44  ;;  %v6491_v41 = vrot.slane %v6489_v61, 4  ;;  %v6494_v22 = vrot.slane %v6492_v55, 5  ;;  %13616 = vmatprep.subr.msk.bf16.mxu1 %vm6683_vm7, %v16022_v57  ;;  %v6500_v18 = vrot.slane %v6498_v45, 5  ;;  %v16048_v44 = vld [vmem:[#allocation3 + $0xa8] sm:$0xf] }
 0x3cc   : > { %v11622_v38 = vcombine.low %v6453_v27, %v6463_v33  ;;  %v6472_v21 = vrot.slane %v6471_v39, 4  ;;  %v6481_v8 = vor.u32 %v6480_v54, %v6476_v51  ;;  %v6504_v63 = vrot.slane %v6502_v30, 4  ;;  %v16058_v54 = vld [vmem:[#allocation3 + $0xac] sm:$0xf] }
 0x3cd   : > { %v6508_v29 = vshll.u32 %v16027_v15, 16  ;;  %v6513_v34 = vshrl.u32 %v16031_v37, 16  ;;  %v6495_v25 = vor.u32 %v6494_v22, %v6491_v41  ;;  %v6516_v47 = vshll.u32 %v16031_v37, 16  ;;  %v16061_v41 = vld [vmem:[#allocation3 + $0xb0] sm:$0x1] }
 0x3ce   : > { %12676 = vmatprep.mubr.msk.bf16.mxu1 %vm6634_vm9, %v11622_v38  ;;  %v6477_v10 = vsel %vm13935_vm13, %v6472_v21, %v6476_v51  ;;  %v6482_v11 = vrot.slane %v6481_v8, 4  ;;  %v6505_v20 = vor.u32 %v6504_v63, %v6500_v18  ;;  %v6522_v52 = vshll.u32 %v16036_v42, 16  ;;  %v16064_v8 = vld [vmem:[#allocation3 + $0xb4] sm:$0xf] }
 0x3cf   : > { %v6510_v27 = vrot.slane %v6508_v29, 5  ;;  %v6515_v32 = vrot.slane %v6513_v34, 4  ;;  %v6496_v6 = vrot.slane %v6495_v25, 4  ;;  %v6518_v61 = vrot.slane %v6516_v47, 5  ;;  %v16073_v34 = vld [vmem:[#allocation3 + $0xb8] sm:$0xf] }
 0x3d0   : > { %v6487_v13 = vsel %vm13935_vm13, %v6482_v11, %v6486_v49  ;;  %v6526_v39 = vshrl.u32 %v16036_v42, 16  ;;  %v6506_v51 = vrot.slane %v6505_v20, 4  ;;  %v6524_v45 = vrot.slane %v6522_v52, 5 }
 0x3d1   : > { %v11623_v55 = vcombine.low %v6477_v10, %v6487_v13  ;;  %v6532_v33 = vshll.u32 %v16042_v19, 16  ;;  %v6519_v30 = vor.u32 %v6518_v61, %v6515_v32  ;;  %v6537_v21 = vshrl.u32 %v16048_v44, 16 }
 0x3d2   : > { %v6528_v38 = vrot.slane %v6526_v39, 4  ;;  %v6501_v49 = vsel %vm13935_vm13, %v6496_v6, %v6500_v18  ;;  %v6511_v22 = vsel %vm13935_vm13, %v6506_v51, %v6510_v27  ;;  %v6540_v63 = vshll.u32 %v16048_v44, 16 }
 0x3d3   : > { %12677 = vmatmul.mubr.msk.bf16.gmra.mrb[4].mxu1 %vm6634_vm9, %v11623_v55  ;;  %v6546_v29 = vshll.u32 %v16058_v54, 16  ;;  %v11624_v10 = vcombine.low %v6501_v49, %v6511_v22  ;;  %v6520_v11 = vrot.slane %v6519_v30, 4  ;;  %v6539_v47 = vrot.slane %v6537_v21, 4  ;;  %v16082_v30 = vld [vmem:[#allocation3 + $0xbc] sm:$0x1] }
 0x3d4   : > { %v6529_v25 = vor.u32 %v6528_v38, %v6524_v45  ;;  %v6534_v20 = vrot.slane %v6532_v33, 5  ;;  %v6542_v32 = vrot.slane %v6540_v63, 5  ;;  %v6550_v13 = vshrl.u32 %v16058_v54, 16 }
 0x3d5   : > { %v6548_v52 = vrot.slane %v6546_v29, 5  ;;  %12680 = vmatprep.mubr.msk.bf16.mxu1 %vm6634_vm9, %v11624_v10  ;;  %v6556_v27 = vshll.u32 %v16061_v41, 16  ;;  %v6561_v6 = vshrl.u32 %v16064_v8, 16  ;;  %v6564_v61 = vshll.u32 %v16064_v8, 16 }
 0x3d6   : > { %v6530_v18 = vrot.slane %v6529_v25, 4  ;;  %v6525_v39 = vsel %vm13935_vm13, %v6520_v11, %v6524_v45  ;;  %v6543_v55 = vor.u32 %v6542_v32, %v6539_v47  ;;  %v6552_v51 = vrot.slane %v6550_v13, 4 }
 0x3d7   : > { %v6570_v33 = vshll.u32 %v16073_v34, 16  ;;  %v6563_v21 = vrot.slane %v6561_v6, 4  ;;  %v6566_v49 = vrot.slane %v6564_v61, 5  ;;  %v6574_v22 = vshrl.u32 %v16073_v34, 16  ;;  %v13752_v6 = vld [vmem:[#allocation3] sm:$0xf] }
 0x3d8   : > { %v6535_v38 = vsel %vm13935_vm13, %v6530_v18, %v6534_v20  ;;  %v6544_v29 = vrot.slane %v6543_v55, 4  ;;  %v6553_v10 = vor.u32 %v6552_v51, %v6548_v52  ;;  %v6580_v45 = vshll.u32 %v16082_v30, 16  ;;  %v16094_v61 = vld [vmem:[#allocation3 + $0x4] sm:$0xf] }
 0x3d9   : > { %v11625_v63 = vcombine.low %v6525_v39, %v6535_v38  ;;  %v6572_v25 = vrot.slane %v6570_v33, 5  ;;  %v6567_v50 = vor.u32 %v6566_v49, %v6563_v21  ;;  %v6576_v1 = vrot.slane %v6574_v22, 4 }
 0x3da   : > { %v6554_v11 = vrot.slane %v6553_v10, 4  ;;  %v6558_v47 = vrot.slane %v6556_v27, 5  ;;  %v6549_v20 = vsel %vm13935_vm13, %v6544_v29, %v6548_v52  ;;  %v11644_v39 = vcombine.low %v13752_v6, %v16094_v61  ;;  %v16133_v6 = vld [vmem:[%s17686_s3 + $0xc] sm:$0xf]  ;;  %v7151_v10 = vld [vmem:[#allocation3 + $0x84] sm:$0xe] }
 0x3db   : > { %12681 = vmatmul.mubr.msk.bf16.gmra.mrb[8].mxu1 %vm6634_vm9, %v11625_v63  ;;  %v6568_v32 = vrot.slane %v6567_v50, 4  ;;  %v6577_v13 = vor.u32 %v6576_v1, %v6572_v25  ;;  %v6582_v38 = vrot.slane %v6580_v45, 5  ;;  %v11651_v1 = vcombine.low %v15942_v0, %v15949_v36  ;;  %v13754_v45 = vld [vmem:[#allocation3 + $0xc] sm:$0xf]  ;;  %v7140_v0 = vld [vmem:[#allocation3] sm:$0xe] }
 0x3dc   : > { %v6559_v18 = vsel %vm13935_vm13, %v6554_v11, %v6558_v47  ;;  %v11652_v50 = vcombine.low %v15915_v3, %v15930_v35  ;;  %v11653_v52 = vcombine.low %v15958_v12, %v15969_v14  ;;  %v11654_v27 = vcombine.low %v15976_v5, %v15984_v58  ;;  %v16122_v11 = vld [vmem:[#allocation3 + $0x10] sm:$0xf] }
 0x3dd   : > { %v11626_v55 = vcombine.low %v6549_v20, %v6559_v18  ;;  %v6573_v51 = vsel %vm13935_vm13, %v6568_v32, %v6572_v25  ;;  %v6578_v33 = vrot.slane %v6577_v13, 4  ;;  %v11655_v49 = vcombine.low %v15996_v56, %v16003_v24  ;;  %v13756_v13 = vld [vmem:[#allocation3 + $0x18] sm:$0xf]  ;;  %v16127_v20 = vld [vmem:[#allocation3 + $0x1c] sm:$0xf] }
 0x3de   : > { %v11645_v47 = vcombine.low %v13754_v45, %v16122_v11  ;;  %v7399_v32 = vsel %vm6683_vm7, %v16022_v57, 0  ;;  %v11646_v18 = vcombine.low %v13756_v13, %v16127_v20  ;;  %v7148_v57 = vld [vmem:[#allocation3 + $0x60] sm:$0xe]  ;;  %v13758_v45 = vld [vmem:[#allocation3 + $0x24] sm:$0xf]  ;;  %v11649_v13 = vcombine.low %v15863_v46, %v15876_v31 }
 0x3df   : > { %12684 = vmatprep.mubr.msk.bf16.mxu1 %vm6634_vm9, %v11626_v55  ;;  %v6583_v21 = vsel %vm13935_vm13, %v6578_v33, %v6582_v38  ;;  %v7239_v55 = vrot.slane %v15949_v36, 5  ;;  %v7150_v25 = vld [vmem:[#allocation3 + $0x78] sm:$0xe]  ;;  %v7256_v46 = vrot.slane %v15971_v62, 5  ;;  %v7263_v62 = vrot.slane %v15992_v59, 5 }
 0x3e0   : > { %v11627_v29 = vcombine.low %v6573_v51, %v6583_v21  ;;  %v7249_v51 = vrot.slane %v15936_v40, 5  ;;  %v7242_v21 = vrot.slane %v15951_v7, 5  ;;  %v7284_v22 = vrot.slane %v16042_v19, 5 }
 0x3e1   : > { %v7241_v38 = vrot.slane %v7239_v55, 4  ;;  %v17891_v3 = vcombine.low %v16006_v16, %v16017_v48  ;;  %v11676_v36 = vrot.slane %v7140_v0, 9  ;;  %v17892_v5 = vcombine.low %v16031_v37, %v16036_v42  ;;  %v16315_v0 = vld [vmem:[%s17686_s3 + $0x10] sm:$0xf] }
 0x3e2   : > { %v7197_v16 = vrot.slane %v16122_v11, 5  ;;  %v17894_v37 = vcombine.low %v16064_v8, %v16073_v34 }
 0x3e3   : > { %12685 = vmatmul.mubr.msk.bf16.gmra.mrb[12].mxu1 %vm6634_vm9, %v11627_v29  ;;  %v7149_v29 = vld [vmem:[#allocation3 + $0x6c] sm:$0xe]  ;;  %v16154_v7 = vsel %vm14308_vm8, %v7241_v38, %v7242_v21  ;;  %v7260_v38 = vrot.slane %v15984_v58, 5  ;;  %v17893_v58 = vcombine.low %v16048_v44, %v16058_v54 }
 0x3e4   : > { %12690 = vmatprep.mubr.msk.bf16.mxu1 %vm6634_vm9, %v11644_v39  ;;  %v7147_v39 = vld [vmem:[#allocation3 + $0x54] sm:$0xe] }
 0x3e5   : > { %v11683_v33 = vrot.slane %v7147_v39, 9  ;;  %v11684_v39 = vrot.slane %v7148_v57, 9 }
 0x3e7   : > { %v16150_v40 = vsel %vm14308_vm8, %v11683_v33, %v7239_v55  ;;  %v11686_v33 = vrot.slane %v7150_v25, 9 }
 0x3e9   : > { %v16190_v25 = vsel %vm14308_vm8, %v11686_v33, %v7260_v38  ;;  %v7281_v33 = vrot.slane %v16036_v42, 5  ;;  %v7141_v42 = vld [vmem:[#allocation3 + $0xc] sm:$0xe] }
 0x3eb   : > { %12691 = vmatmul.mubr.msk.bf16.vlgmr.msra.gmra.mrb[16].mxu1 %vm6634_vm9, %v11645_v47  ;;  %v11647_v47 = vcombine.low %v13758_v45, %v15823_v9  ;;  %v7253_v9 = vrot.slane %v15969_v14, 5  ;;  %v11685_v45 = vrot.slane %v7149_v29, 9  ;;  %v7267_v29 = vrot.slane %v16003_v24, 5  ;;  %v13759_v14 = vld [vmem:[#allocation3 + $0x8] sm:$0x1] }
 0x3ec   : > { %12723 = vmatpush3.bf16.msra.mxu1 %v7399_v32  ;;  %12694 = vmatprep.mubr.msk.bf16.mxu1 %vm6634_vm9, %v11646_v18  ;;  %v11648_v32 = vcombine.low %v15833_v2, %v15839_v4  ;;  %v7246_v18 = vrot.slane %v15930_v35, 5  ;;  %v7190_v35 = vrot.slane %v16094_v61, 5 }
 0x3ed   : > { %13617 = vmatprep.subr.msk.bf16.mxu1 %vm6683_vm7, %v16133_v6  ;;  %v7255_v55 = vrot.slane %v7253_v9, 4  ;;  %v16172_v21 = vsel %vm14308_vm8, %v11685_v45, %v7253_v9  ;;  %v11650_v9 = vcombine.low %v15888_v60, %v15890_v28  ;;  %v7270_v45 = vrot.slane %v16011_v23, 5 }
 0x3ee   : > { %v7248_v4 = vrot.slane %v7246_v18, 4  ;;  %v16162_v63 = vsel %vm14308_vm8, %v11684_v39, %v7246_v18  ;;  %v7262_v18 = vrot.slane %v7260_v38, 4  ;;  %v7152_v39 = vld [vmem:[#allocation3 + $0x90] sm:$0xe]  ;;  %v7274_v60 = vrot.slane %v16017_v48, 5 }
 0x3ef   : > { %v11688_v59 = vrot.slane %v7152_v39, 9  ;;  %v7154_v38 = vld [vmem:[#allocation3 + $0xa8] sm:$0xe]  ;;  %v7155_v39 = vld [vmem:[#allocation3 + $0xb4] sm:$0xe]  ;;  %v7192_v12 = vrot.slane %v7190_v35, 4  ;;  %v7191_v56 = vsel %vm14308_vm8, %v11676_v36, %v7190_v35 }
 0x3f0   : > { %v16168_v57 = vsel %vm14308_vm8, %v7248_v4, %v7249_v51  ;;  %v11687_v51 = vrot.slane %v7151_v10, 9  ;;  %v7269_v4 = vrot.slane %v7267_v29, 4  ;;  %v7204_v48 = vrot.slane %v16127_v20, 5  ;;  %v13762_v20 = vld [vmem:[#allocation3 + $0x28] sm:$0xf] }
 0x3f1   : > { %v16213_v2 = vsel %vm14308_vm8, %v11688_v59, %v7274_v60  ;;  %v7143_v36 = vld [vmem:[#allocation3 + $0x24] sm:$0xe] }
 0x3f2   : > { %v16198_v10 = vsel %vm14308_vm8, %v11687_v51, %v7267_v29  ;;  %v16205_v23 = vsel %vm14308_vm8, %v7269_v4, %v7270_v45  ;;  %v7277_v29 = vrot.slane %v16027_v15, 5  ;;  %v7288_v4 = vrot.slane %v16058_v54, 5  ;;  %v13760_v54 = vld [vmem:[#allocation3 + $0x14] sm:$0x1] }
 0x3f3   : > { %12695 = vmatmul.mubr.msk.bf16.gmra.mrb[20].mxu1 %vm6634_vm9, %v11647_v47  ;;  %v16181_v47 = vsel %vm14308_vm8, %v7255_v55, %v7256_v46  ;;  %v16194_v46 = vsel %vm14308_vm8, %v7262_v18, %v7263_v62  ;;  %v7276_v18 = vrot.slane %v7274_v60, 4  ;;  %v7283_v55 = vrot.slane %v7281_v33, 4 }
 0x3f4   : > { %12698 = vmatprep.mubr.msk.bf16.mxu1 %vm6634_vm9, %v11648_v32  ;;  %v7153_v32 = vld [vmem:[#allocation3 + $0x9c] sm:$0xe]  ;;  %v11690_v15 = vrot.slane %v7154_v38, 9  ;;  %v7290_v60 = vrot.slane %v7288_v4, 4  ;;  %v11691_v38 = vrot.slane %v7155_v39, 9  ;;  %v7206_v44 = vrot.slane %v7204_v48, 4 }
 0x3f5   : > { %v11689_v51 = vrot.slane %v7153_v32, 9  ;;  %v16219_v45 = vsel %vm14308_vm8, %v7276_v18, %v7277_v29  ;;  %v7295_v32 = vrot.slane %v16073_v34, 5  ;;  %v16231_v19 = vsel %vm14308_vm8, %v7283_v55, %v7284_v22  ;;  %v13763_v34 = vld [vmem:[#allocation3 + $0x34] sm:$0xf] }
 0x3f6   : > { %v11705_v59 = vcombine.low %v16213_v2, %v16219_v45  ;;  %v7291_v18 = vrot.slane %v16061_v41, 5  ;;  %v11677_v39 = vrot.slane %v7141_v42, 9 }
 0x3f7   : > { %v16223_v62 = vsel %vm14308_vm8, %v11689_v51, %v7281_v33  ;;  %v7297_v29 = vrot.slane %v7295_v32, 4  ;;  %v7298_v51 = vrot.slane %v16082_v30, 5  ;;  %v17911_v30 = vcombine.low %v16198_v10, %v16205_v23  ;;  %v16502_v23 = vld [vmem:[#allocation3 + $0xac] sm:$0xf]  ;;  %v16522_v33 = vld [vmem:[#allocation3 + $0xb8] sm:$0xf] }
 0x3f8   : > { %v16244_v22 = vsel %vm14308_vm8, %v7290_v60, %v7291_v18  ;;  %v7218_v60 = vrot.slane %v13763_v34, 5  ;;  %v7198_v18 = vsel %vm14308_vm8, %v11677_v39, %v7197_v16 }
 0x3f9   : > { %v16254_v55 = vsel %vm14308_vm8, %v7297_v29, %v7298_v51  ;;  %v7757_v29 = vsel %vm6683_vm7, %v16133_v6, 0  ;;  %v7144_v6 = vld [vmem:[#allocation3 + $0x30] sm:$0xe] }
 0x3fb   : > { %12699 = vmatmul.mubr.msk.bf16.gmra.mrb[24].mxu1 %vm6634_vm9, %v11649_v13  ;;  %v16240_v13 = vsel %vm14308_vm8, %v11690_v15, %v7288_v4  ;;  %v7211_v15 = vrot.slane %v13762_v20, 5 }
 0x3fc   : > { %12702 = vmatprep.mubr.msk.bf16.mxu1 %vm6634_vm9, %v11650_v9  ;;  %v16250_v9 = vsel %vm14308_vm8, %v11691_v38, %v7295_v32 }
 0x3fd   : > { %v7213_v35 = vrot.slane %v7211_v15, 4 }
 0x403   : > { %12703 = vmatmul.mubr.msk.bf16.gmra.mrb[28].mxu1 %vm6634_vm9, %v11651_v1  ;;  %v7193_v1 = vrot.slane %v13759_v14, 5  ;;  %v13764_v14 = vld [vmem:[#allocation3 + $0x2c] sm:$0x1] }
 0x404   : > { %12706 = vmatprep.mubr.msk.bf16.mxu1 %vm6634_vm9, %v11652_v50  ;;  %v7199_v50 = vrot.slane %v7197_v16, 4  ;;  %v7225_v16 = vrot.slane %v15876_v31, 5  ;;  %v7228_v31 = vrot.slane %v15878_v26, 5  ;;  %v16345_v26 = vld [vmem:[#allocation3 + $0x28] sm:$0xf] }
 0x405   : > { %v7194_v24 = vsel %vm14308_vm8, %v7192_v12, %v7193_v1  ;;  %v7220_v12 = vrot.slane %v7218_v60, 4  ;;  %v7214_v1 = vrot.slane %v13764_v14, 5 }
 0x406   : > { %v11693_v61 = vcombine.low %v7191_v56, %v7194_v24  ;;  %v11679_v56 = vrot.slane %v7143_v36, 9  ;;  %v16361_v36 = vld [vmem:[#allocation3 + $0x40] sm:$0xf] }
 0x407   : > { %v7215_v24 = vsel %vm14308_vm8, %v7213_v35, %v7214_v1  ;;  %v8681_v35 = vld [vmem:[#allocation3 + $0x30] sm:$0xe]  ;;  %v16367_v1 = vld [vmem:[#allocation3 + $0x4c] sm:$0xf] }
 0x40b   : > { %12707 = vmatmul.mubr.msk.bf16.gmra.mrb[0].mxu1 %vm6634_vm9, %v11653_v52  ;;  %v7200_v52 = vrot.slane %v13760_v54, 5 }
 0x40c   : > { %12710 = vmatprep.mubr.msk.bf16.mxu1 %vm6634_vm9, %v11654_v27  ;;  %v7142_v27 = vld [vmem:[#allocation3 + $0x18] sm:$0xe] }
 0x40d   : > { %v7201_v11 = vsel %vm14308_vm8, %v7199_v50, %v7200_v52  ;;  %v11678_v32 = vrot.slane %v7142_v27, 9  ;;  %v7232_v50 = vrot.slane %v15890_v28, 5  ;;  %v7227_v52 = vrot.slane %v7225_v16, 4  ;;  %v7145_v27 = vld [vmem:[#allocation3 + $0x3c] sm:$0xe] }
 0x40e   : > { %v11694_v38 = vcombine.low %v7198_v18, %v7201_v11  ;;  %v7235_v28 = vrot.slane %v15892_v53, 5  ;;  %v11681_v39 = vrot.slane %v7145_v27, 9  ;;  %v16347_v53 = vld [vmem:[#allocation3 + $0x34] sm:$0xf]  ;;  %v17895_v18 = vcombine.low %v16150_v40, %v16154_v7  ;;  %v8682_v40 = vld [vmem:[#allocation3 + $0x3c] sm:$0xe] }
 0x40f   : > { %v7205_v51 = vsel %vm14308_vm8, %v11678_v32, %v7204_v48  ;;  %v11680_v48 = vrot.slane %v7144_v6, 9  ;;  %v7229_v11 = vsel %vm14308_vm8, %v7227_v52, %v7228_v31  ;;  %v8765_v14 = vrot.slane %v16347_v53, 5  ;;  %v16365_v7 = vld [vmem:[#allocation3 + $0x44] sm:$0x1]  ;;  %v8684_v27 = vld [vmem:[#allocation3 + $0x54] sm:$0xe] }
 0x410   : > { %v7226_v32 = vsel %vm14308_vm8, %v11681_v39, %v7225_v16  ;;  %v8779_v52 = vrot.slane %v16367_v1, 5  ;;  %v16392_v31 = vld [vmem:[#allocation3 + $0x64] sm:$0xf] }
 0x413   : > { %12711 = vmatmul.mubr.msk.bf16.gmra.mrb[4].mxu1 %vm6634_vm9, %v11655_v49  ;;  %v13761_v49 = vld [vmem:[#allocation3 + $0x20] sm:$0x1] }
 0x414   : > { %12714 = vmatprep.mubr.msk.bf16.mxu1 %vm6634_vm9, %v17891_v3  ;;  %v7207_v4 = vrot.slane %v13761_v49, 5  ;;  %v7234_v49 = vrot.slane %v7232_v50, 4 }
 0x416   : > { %v7208_v8 = vsel %vm14308_vm8, %v7206_v44, %v7207_v4  ;;  %v7219_v44 = vsel %vm14308_vm8, %v11680_v48, %v7218_v60  ;;  %v7146_v4 = vld [vmem:[#allocation3 + $0x48] sm:$0xe]  ;;  %v8767_v48 = vrot.slane %v8765_v14, 4 }
 0x417   : > { %v11695_v3 = vcombine.low %v7205_v51, %v7208_v8  ;;  %v11682_v20 = vrot.slane %v7146_v4, 9  ;;  %v11698_v8 = vcombine.low %v7226_v32, %v7229_v11  ;;  %v16357_v51 = vld [vmem:[#allocation3 + $0x2c] sm:$0x1]  ;;  %v8689_v4 = vld [vmem:[#allocation3 + $0x90] sm:$0xe] }
 0x419   : > { %v7233_v34 = vsel %vm14308_vm8, %v11682_v20, %v7232_v50  ;;  %v8772_v50 = vrot.slane %v16361_v36, 5  ;;  %v17901_v20 = vcombine.low %v16172_v21, %v16181_v47  ;;  %v16417_v21 = vld [vmem:[#allocation3 + $0x70] sm:$0xf] }
 0x41b   : > { %12715 = vmatmul.mubr.msk.bf16.gmra.mrb[8].mxu1 %vm6634_vm9, %v17892_v5  ;;  %v13765_v5 = vld [vmem:[#allocation3 + $0x38] sm:$0x1]  ;;  %v8774_v39 = vrot.slane %v8772_v50, 4 }
 0x41c   : > { %12718 = vmatprep.mubr.msk.bf16.mxu1 %vm6634_vm9, %v17893_v58  ;;  %v7221_v58 = vrot.slane %v13765_v5, 5  ;;  %v11794_v5 = vrot.slane %v8681_v35, 9  ;;  %v11797_v35 = vrot.slane %v8684_v27, 9 }
 0x423   : > { %12719 = vmatmul.mubr.msk.bf16.gmra.mrb[12].mxu1 %vm6634_vm9, %v17894_v37  ;;  %v7212_v37 = vsel %vm14308_vm8, %v11679_v56, %v7211_v15  ;;  %v7236_v15 = vsel %vm14308_vm8, %v7234_v49, %v7235_v28  ;;  %v8683_v56 = vld [vmem:[#allocation3 + $0x48] sm:$0xe]  ;;  %v16390_v49 = vld [vmem:[#allocation3 + $0x5c] sm:$0x1] }
 0x424   : > { %12724 = vmatprep.mubr.msk.bf16.mxu1 %vm6634_vm9, %v11693_v61  ;;  %v7222_v61 = vsel %vm14308_vm8, %v7220_v12, %v7221_v58  ;;  %v11696_v42 = vcombine.low %v7212_v37, %v7215_v24  ;;  %v11699_v60 = vcombine.low %v7233_v34, %v7236_v15  ;;  %v8758_v12 = vrot.slane %v16345_v26, 5  ;;  %v16371_v24 = vld [vmem:[#allocation3 + $0x50] sm:$0x1]  ;;  %v16378_v37 = vld [vmem:[#allocation3 + $0x58] sm:$0xf] }
 0x425   : > { %v11697_v54 = vcombine.low %v7219_v44, %v7222_v61  ;;  %v11795_v61 = vrot.slane %v8682_v40, 9  ;;  %v16386_v44 = vsel %vm14308_vm8, %v11794_v5, %v8765_v14  ;;  %v11796_v11 = vrot.slane %v8683_v56, 9  ;;  %v16404_v15 = vld [vmem:[#allocation3 + $0x68] sm:$0x1]  ;;  %v8686_v14 = vld [vmem:[#allocation3 + $0x6c] sm:$0xe] }
 0x426   : > { %17899 = vst [vmem:[#allocation19_spill] sm:$0xff] %v16386_v44  ;;  %v8781_v34 = vrot.slane %v8779_v52, 4  ;;  %v16428_v40 = vld [vmem:[#allocation3 + $0x74] sm:$0x1]  ;;  %v11799_v27 = vrot.slane %v8686_v14, 9  ;;  %v13683_v44 = vld [vmem:[#allocation3 + $0x6c] sm:$0xff]  }
 0x42b   : > { %12725 = vmatmul.mubr.msk.bf16.vlgmr.msra.gmra.mrb[16].mxu1 %vm6634_vm9, %v11694_v38  ;;  %v8680_v38 = vld [vmem:[#allocation3 + $0x24] sm:$0xe] }
 0x42c   : > { %12757 = vmatpush3.bf16.msra.mxu1 %v7757_v29  ;;  %12728 = vmatprep.mubr.msk.bf16.mxu1 %vm6634_vm9, %v11695_v3  ;;  %v17896_v29 = vcombine.low %v16162_v63, %v16168_v57  ;;  %v16359_v3 = vld [vmem:[#allocation3 + $0x38] sm:$0x1]  ;;  %v11793_v6 = vrot.slane %v8680_v38, 9  ;;  %v8760_v63 = vrot.slane %v8758_v12, 4  ;;  %v8761_v57 = vrot.slane %v16357_v51, 5 }
 0x42d   : > { %13618 = vmatprep.subr.msk.bf16.mxu1 %vm6683_vm7, %v16315_v0  ;;  %v8768_v58 = vrot.slane %v16359_v3, 5  ;;  %v17903_v38 = vcombine.low %v16190_v25, %v16194_v46  ;;  %v16472_v25 = vld [vmem:[#allocation3 + $0x98] sm:$0x1] }
 0x42e   : > { %v16375_v16 = vsel %vm14308_vm8, %v11793_v6, %v8758_v12  ;;  %v8786_v12 = vrot.slane %v16378_v37, 5  ;;  %v16430_v6 = vld [vmem:[#allocation3 + $0x7c] sm:$0xf] }
 0x42f   : > { %17897 = vst [vmem:[#allocation16_spill] sm:$0xff] %v16375_v16  ;;  %v16398_v28 = vsel %vm14308_vm8, %v8767_v48, %v8768_v58  ;;  %v8796_v48 = vrot.slane %v16404_v15, 5 }
 0x430   : > { %17900 = vst [vmem:[#allocation20_spill] sm:$0xff] %v16398_v28  ;;  %v8788_v58 = vrot.slane %v8786_v12, 4  ;;  %v16657_v28 = vld [vmem:[#allocation3 + $0x20] sm:$0x1] }
 0x431   : > { %17939 = vst [vmem:[#allocation42_spill] sm:$0xff] %v16657_v28 }
 0x433   : > { %12729 = vmatmul.mubr.msk.bf16.gmra.mrb[20].mxu1 %vm6634_vm9, %v11696_v42  ;;  %v16382_v42 = vsel %vm14308_vm8, %v8760_v63, %v8761_v57  ;;  %v8789_v63 = vrot.slane %v16390_v49, 5  ;;  %v8793_v57 = vrot.slane %v16392_v31, 5 }
 0x434   : > { %12732 = vmatprep.mubr.msk.bf16.mxu1 %vm6634_vm9, %v11697_v54  ;;  %17898 = vst [vmem:[#allocation17_spill] sm:$0xff] %v16382_v42  ;;  %v8775_v54 = vrot.slane %v16365_v7, 5 }
 0x436   : > { %v16421_v47 = vsel %vm14308_vm8, %v8774_v39, %v8775_v54  ;;  %v16447_v54 = vsel %vm14308_vm8, %v11797_v35, %v8786_v12  ;;  %v8800_v39 = vrot.slane %v16417_v21, 5  ;;  %v16464_v35 = vld [vmem:[#allocation3 + $0x94] sm:$0xf]  ;;  %v16481_v12 = vld [vmem:[#allocation3 + $0xa0] sm:$0xf] }
 0x437   : > { %17904 = vst [vmem:[#allocation21_spill] sm:$0xff] %v16421_v47  ;;  %17907 = vst [vmem:[#allocation7_spill] sm:$0xff] %v16447_v54  ;;  %v7961_v47 = vld [vmem:[#allocation3 + $0x30] sm:$0xf] }
 0x438   : > { %v8802_v5 = vrot.slane %v8800_v39, 4 }
 0x43b   : > { %12733 = vmatmul.mubr.msk.bf16.gmra.mrb[24].mxu1 %vm6634_vm9, %v11698_v8  ;;  %v16410_v8 = vsel %vm14308_vm8, %v11795_v61, %v8772_v50  ;;  %v8687_v61 = vld [vmem:[#allocation3 + $0x78] sm:$0xe]  ;;  %v16443_v50 = vld [vmem:[#allocation3 + $0x80] sm:$0x1] }
 0x43c   : > { %12736 = vmatprep.mubr.msk.bf16.mxu1 %vm6634_vm9, %v11699_v60  ;;  %17902 = vst [vmem:[#allocation4_spill] sm:$0xff] %v16410_v8  ;;  %v8782_v60 = vrot.slane %v16371_v24, 5  ;;  %v8810_v32 = vrot.slane %v16443_v50, 5 }
 0x43e   : > { %v16436_v46 = vsel %vm14308_vm8, %v8781_v34, %v8782_v60  ;;  %v16456_v34 = vsel %vm14308_vm8, %v8788_v58, %v8789_v63  ;;  %v11800_v63 = vrot.slane %v8687_v61, 9  ;;  %v8688_v58 = vld [vmem:[#allocation3 + $0x84] sm:$0xe]  ;;  %v16487_v61 = vsel %vm14308_vm8, %v11799_v27, %v8800_v39 }
 0x43f   : > { %17906 = vst [vmem:[#allocation6_spill] sm:$0xff] %v16436_v46  ;;  %17908 = vst [vmem:[#allocation8_spill] sm:$0xff] %v16456_v34  ;;  %v11801_v27 = vrot.slane %v8688_v58, 9  ;;  %v8821_v39 = vrot.slane %v16464_v35, 5  ;;  %v8828_v58 = vrot.slane %v16481_v12, 5 }
 0x440   : > { %17912 = vst [vmem:[#allocation11_spill] sm:$0xff] %v16487_v61  ;;  %v16547_v34 = vld [vmem:[#allocation3 + $0xc8] sm:$0x1] }
 0x441   : > { %v8823_v41 = vrot.slane %v8821_v39, 4 }
 0x443   : > { %12737 = vmatmul.mubr.msk.bf16.gmra.mrb[28].mxu1 %vm6634_vm9, %v17895_v18  ;;  %v8685_v18 = vld [vmem:[#allocation3 + $0x60] sm:$0xe] }
 0x444   : > { %12740 = vmatprep.mubr.msk.bf16.mxu1 %vm6634_vm9, %v17896_v29  ;;  %v16425_v29 = vsel %vm14308_vm8, %v11796_v11, %v8779_v52  ;;  %v11798_v56 = vrot.slane %v8685_v18, 9  ;;  %v8795_v52 = vrot.slane %v8793_v57, 4  ;;  %v16450_v11 = vld [vmem:[#allocation3 + $0x88] sm:$0xf]  ;;  %v8803_v18 = vrot.slane %v16428_v40, 5 }
 0x445   : > { %17905 = vst [vmem:[#allocation18_spill] sm:$0xff] %v16425_v29  ;;  %v8814_v10 = vrot.slane %v16450_v11, 5 }
 0x446   : > { %v16460_v60 = vsel %vm14308_vm8, %v11798_v56, %v8793_v57  ;;  %v16470_v14 = vsel %vm14308_vm8, %v8795_v52, %v8796_v48  ;;  %v16483_v48 = vld [vmem:[#allocation3 + $0xa4] sm:$0x1]  ;;  %v16491_v52 = vsel %vm14308_vm8, %v8802_v5, %v8803_v18  ;;  %v8690_v18 = vld [vmem:[#allocation3 + $0x9c] sm:$0xe] }
 0x447   : > { %17909 = vst [vmem:[#allocation9_spill] sm:$0xff] %v16460_v60  ;;  %17910 = vst [vmem:[#allocation10_spill] sm:$0xff] %v16470_v14  ;;  %v8816_v45 = vrot.slane %v8814_v10, 4  ;;  %v8692_v60 = vld [vmem:[#allocation3 + $0xb4] sm:$0xe] }
 0x448   : > { %17913 = vst [vmem:[#allocation12_spill] sm:$0xff] %v16491_v52 }
 0x44b   : > { %12741 = vmatmul.mubr.msk.bf16.gmra.mrb[0].mxu1 %vm6634_vm9, %v17901_v20  ;;  %v16452_v20 = vld [vmem:[#allocation3 + $0x8c] sm:$0x1] }
 0x44c   : > { %12744 = vmatprep.mubr.msk.bf16.mxu1 %vm6634_vm9, %v17903_v38  ;;  %v8807_v38 = vrot.slane %v16430_v6, 5 }
 0x44e   : > { %v8809_v56 = vrot.slane %v8807_v38, 4  ;;  %v16495_v57 = vsel %vm14308_vm8, %v11800_v63, %v8807_v38  ;;  %v16511_v38 = vld [vmem:[#allocation3 + $0xb0] sm:$0x1]  ;;  %v11802_v63 = vrot.slane %v8689_v4, 9  ;;  %v11803_v4 = vrot.slane %v8690_v18, 9 }
 0x44f   : > { %17914 = vst [vmem:[#allocation13_spill] sm:$0xff] %v16495_v57  ;;  %v8838_v14 = vrot.slane %v16511_v38, 5 }
 0x450   : > { %v16508_v5 = vsel %vm14308_vm8, %v8809_v56, %v8810_v32  ;;  %v8824_v32 = vrot.slane %v16472_v25, 5  ;;  %v8691_v56 = vld [vmem:[#allocation3 + $0xa8] sm:$0xe]  ;;  %v16530_v2 = vsel %vm14308_vm8, %v11802_v63, %v8821_v39  ;;  %v16551_v57 = vsel %vm14308_vm8, %v11803_v4, %v8828_v58 }
 0x451   : > { %17915 = vst [vmem:[#allocation5_spill] sm:$0xff] %v16508_v5  ;;  %17918 = vst [vmem:[#allocation24_spill] sm:$0xff] %v16530_v2  ;;  %v16535_v5 = vld [vmem:[#allocation3 + $0xc4] sm:$0xf]  ;;  %v11804_v18 = vrot.slane %v8691_v56, 9  ;;  %v17922_v56 = vcombine.low %v16223_v62, %v16231_v19  ;;  %v8852_v39 = vrot.slane %v16547_v34, 5 }
 0x452   : > { %v16541_v61 = vsel %vm14308_vm8, %v8823_v41, %v8824_v32  ;;  %17920 = vst [vmem:[#allocation26_spill] sm:$0xff] %v16551_v57  ;;  %v8842_v32 = vrot.slane %v16522_v33, 5  ;;  %v8849_v4 = vrot.slane %v16535_v5, 5 }
 0x453   : > { %12745 = vmatmul.mubr.msk.bf16.gmra.mrb[4].mxu1 %vm6634_vm9, %v17911_v30  ;;  %v16518_v30 = vsel %vm14308_vm8, %v11801_v27, %v8814_v10  ;;  %v8835_v10 = vrot.slane %v16502_v23, 5  ;;  %v16533_v27 = vld [vmem:[#allocation3 + $0xbc] sm:$0x1]  ;;  %17919 = vst [vmem:[#allocation25_spill] sm:$0xff] %v16541_v61 }
 0x454   : > { %12748 = vmatprep.mubr.msk.bf16.mxu1 %vm6634_vm9, %v11705_v59  ;;  %v8817_v59 = vrot.slane %v16452_v20, 5  ;;  %17916 = vst [vmem:[#allocation22_spill] sm:$0xff] %v16518_v30 }
 0x455   : > { %v8837_v63 = vrot.slane %v8835_v10, 4  ;;  %v16566_v61 = vsel %vm14308_vm8, %v11804_v18, %v8835_v10  ;;  %v8845_v10 = vrot.slane %v16533_v27, 5 }
 0x456   : > { %v16526_v52 = vsel %vm14308_vm8, %v8816_v45, %v8817_v59  ;;  %v8830_v45 = vrot.slane %v8828_v58, 4  ;;  %v8831_v59 = vrot.slane %v16483_v48, 5  ;;  %17923 = vst [vmem:[#allocation28_spill] sm:$0xff] %v16566_v61 }
 0x457   : > { %17917 = vst [vmem:[#allocation23_spill] sm:$0xff] %v16526_v52  ;;  %v8693_v52 = vld [vmem:[#allocation3 + $0xc0] sm:$0xe]  ;;  %v16570_v58 = vsel %vm14308_vm8, %v8837_v63, %v8838_v14  ;;  %v8851_v63 = vrot.slane %v8849_v4, 4 }
 0x458   : > { %v16555_v41 = vsel %vm14308_vm8, %v8830_v45, %v8831_v59  ;;  %17924 = vst [vmem:[#allocation29_spill] sm:$0xff] %v16570_v58  ;;  %v17925_v45 = vcombine.low %v16240_v13, %v16244_v22  ;;  %v11805_v59 = vrot.slane %v8692_v60, 9  ;;  %v11806_v14 = vrot.slane %v8693_v52, 9 }
 0x459   : > { %17921 = vst [vmem:[#allocation27_spill] sm:$0xff] %v16555_v41  ;;  %v16605_v19 = vsel %vm14308_vm8, %v8851_v63, %v8852_v39  ;;  %v16619_v39 = vld [vmem:[%s17686_s3 + $0x14] sm:$0xf]  ;;  %v8062_v58 = vshrl.u32 %v16345_v26, 16 }
 0x45a   : > { %v16589_v13 = vsel %vm14308_vm8, %v11805_v59, %v8842_v32  ;;  %v16601_v52 = vsel %vm14308_vm8, %v11806_v14, %v8849_v4  ;;  %17933 = vst [vmem:[#allocation37_spill] sm:$0xff] %v16605_v19  ;;  %v13675_v59 = vld [vmem:[#allocation3 + $0xc] sm:$0xff]   ;;  %v8483_v4 = vsel %vm6683_vm7, %v16315_v0, 0  ;;  %v13677_v14 = vld [vmem:[#allocation3 + $0x24] sm:$0xff]   ;;  %v13681_v19 = vld [vmem:[#allocation3 + $0x54] sm:$0xff]  }
 0x45b   : > { %12749 = vmatmul.mubr.msk.bf16.gmra.mrb[8].mxu1 %vm6634_vm9, %v17922_v56  ;;  %v16577_v62 = vpop.f32.mrb[32].mxu0  ;;  %v8844_v56 = vrot.slane %v8842_v32, 4  ;;  %17929 = vst [vmem:[#allocation33_spill] sm:$0xff] %v16589_v13  ;;  %17932 = vst [vmem:[#allocation36_spill] sm:$0xff] %v16601_v52  ;;  %v13678_v0 = vld [vmem:[#allocation3 + $0x30] sm:$0xff]   ;;  %v8058_v13 = vshll.u32 %v16345_v26, 16 }
 0x45c   : > { %12752 = vmatprep.mubr.msk.bf16.mxu1 %vm6634_vm9, %v17925_v45  ;;  %17926 = vst [vmem:[#allocation30_spill] sm:$0xff] %v16577_v62  ;;  %v16582_v18 = vpop.f32.mrb[33].mxu0  ;;  %v16633_v32 = vld [vmem:[#allocation3 + $0x10] sm:$0xf]  ;;  %v7955_v45 = vld [vmem:[#allocation3 + $0x18] sm:$0xf] }
 0x45d   : > { %17927 = vst [vmem:[#allocation31_spill] sm:$0xff] %v16582_v18  ;;  %v16585_v41 = vpop.f32.mrb[34].mxu0  ;;  %v16593_v22 = vsel %vm14308_vm8, %v8844_v56, %v8845_v10  ;;  %v17934_v56 = vcombine.low %v16250_v9, %v16254_v55  ;;  %v13676_v10 = vld [vmem:[#allocation3 + $0x18] sm:$0xff]   ;;  %v16655_v46 = vrot.slane %v8058_v13, 5  ;;  %v8064_v29 = vrot.slane %v8062_v58, 4  ;;  %v13682_v26 = vld [vmem:[#allocation3 + $0x60] sm:$0xff]  }
 0x45e   : > { %17928 = vst [vmem:[#allocation32_spill] sm:$0xff] %v16585_v41  ;;  %17930 = vst [vmem:[#allocation34_spill] sm:$0xff] %v16593_v22  ;;  %v16595_v60 = vpop.f32.mrb[35].mxu0  ;;  %v8025_v41 = vshrl.u32 %v7955_v45, 16  ;;  %v7958_v22 = vld [vmem:[#allocation3 + $0x24] sm:$0xf] }
 0x45f   : > { %17931 = vst [vmem:[#allocation35_spill] sm:$0xff] %v16595_v60  ;;  %v8049_v54 = vshrl.u32 %v7958_v22, 16  ;;  %v8065_v58 = vor.u32 %v8064_v29, %v16655_v46  ;;  %v7964_v29 = vld [vmem:[#allocation3 + $0x3c] sm:$0xf] }
 0x460   : > { %v8027_v61 = vrot.slane %v8025_v41, 4  ;;  %v8097_v16 = vshrl.u32 %v7964_v29, 16 }
 0x463   : > { %12753 = vmatmul.mubr.msk.bf16.gmra.mrb[12].mxu1 %vm6634_vm9, %v17934_v56  ;;  %v13679_v56 = vld [vmem:[#allocation3 + $0x3c] sm:$0xff]  }
 0x464   : > { %12758 = vmatprep.mubr.msk.bf16.mxu1 %vm6634_vm9, %v13675_v59 }
 0x46b   : > { %12759 = vmatmul.mubr.msk.bf16.vlgmr.msra.gmra.mrb[16].mxu1 %vm6634_vm9, %v13676_v10  ;;  %v7952_v10 = vld [vmem:[#allocation3 + $0xc] sm:$0xf] }
 0x46c   : > { %12791 = vmatpush3.bf16.msra.mxu1 %v8483_v4  ;;  %12762 = vmatprep.mubr.msk.bf16.mxu1 %vm6634_vm9, %v13677_v14  ;;  %v8010_v4 = vshll.u32 %v16633_v32, 16  ;;  %v8014_v14 = vshrl.u32 %v16633_v32, 16  ;;  %v8004_v18 = vshll.u32 %v7952_v10, 16 }
 0x46d   : > { %13619 = vmatprep.subr.msk.bf16.mxu1 %vm6683_vm7, %v16619_v39  ;;  %v16625_v9 = vpop.f32.mrb[36].mxu0 }
 0x46e   : > { %17935 = vst [vmem:[#allocation38_spill] sm:$0xff] %v16625_v9  ;;  %v16627_v55 = vpop.f32.mrb[37].mxu0  ;;  %v16639_v9 = vld [vmem:[#allocation3 + $0x1c] sm:$0xf]  ;;  %v16643_v62 = vrot.slane %v8010_v4, 5  ;;  %v8016_v60 = vrot.slane %v8014_v14, 4 }
 0x46f   : > { %17936 = vst [vmem:[#allocation39_spill] sm:$0xff] %v16627_v55  ;;  %v16629_v63 = vpop.f32.mrb[38].mxu0  ;;  %v16641_v55 = vld [vmem:[#allocation3 + $0x14] sm:$0x1]  ;;  %v8038_v52 = vshrl.u32 %v16639_v9, 16  ;;  %v8006_v14 = vrot.slane %v8004_v18, 5 }
 0x470   : > { %17937 = vst [vmem:[#allocation40_spill] sm:$0xff] %v16629_v63  ;;  %v16631_v59 = vpop.f32.mrb[39].mxu0  ;;  %v8001_v63 = vshrl.u32 %v7952_v10, 16  ;;  %v8020_v4 = vshll.u32 %v16641_v55, 16 }
 0x471   : > { %17938 = vst [vmem:[#allocation41_spill] sm:$0xff] %v16631_v59  ;;  %v13680_v59 = vld [vmem:[#allocation3 + $0x48] sm:$0xff]   ;;  %v8040_v30 = vrot.slane %v8038_v52, 4 }
 0x472   : > { %v8003_v10 = vrot.slane %v8001_v63, 4  ;;  %v8022_v63 = vrot.slane %v8020_v4, 5  ;;  %v8086_v4 = vshrl.u32 %v16347_v53, 16 }
 0x473   : > { %12763 = vmatmul.mubr.msk.bf16.gmra.mrb[20].mxu1 %vm6634_vm9, %v13678_v0  ;;  %v8028_v0 = vshll.u32 %v7955_v45, 16  ;;  %v8017_v45 = vor.u32 %v8016_v60, %v16643_v62 }
 0x474   : > { %12766 = vmatprep.mubr.msk.bf16.mxu1 %vm6634_vm9, %v13679_v56  ;;  %v8034_v56 = vshll.u32 %v16639_v9, 16  ;;  %v8007_v8 = vor.u32 %v8006_v14, %v8003_v10  ;;  %v8082_v10 = vshll.u32 %v16347_v53, 16  ;;  %v8066_v53 = vrot.slane %v8065_v58, 4 }
 0x475   : > { %v8030_v57 = vrot.slane %v8028_v0, 5  ;;  %v8051_v0 = vrot.slane %v8049_v54, 4 }
 0x476   : > { %v16653_v2 = vrot.slane %v8034_v56, 5  ;;  %v8073_v56 = vshrl.u32 %v7961_v47, 16 }
 0x477   : > { %v8031_v18 = vor.u32 %v8030_v57, %v8027_v61  ;;  %v8044_v61 = vshll.u32 %v16657_v28, 16  ;;  %v8100_v28 = vshll.u32 %v7964_v29, 16 }
 0x478   : > { %v8041_v41 = vor.u32 %v8040_v30, %v16653_v2  ;;  %v8008_v30 = vrot.slane %v8007_v8, 4 }
 0x479   : > { %v8046_v42 = vrot.slane %v8044_v61, 5  ;;  %v8102_v61 = vrot.slane %v8100_v28, 5 }
 0x47a   : > { %v8013_v8 = vsel %vm13935_vm13, %v8008_v30, %v16643_v62 }
 0x47b   : > { %12767 = vmatmul.mubr.msk.bf16.gmra.mrb[24].mxu1 %vm6634_vm9, %v13680_v59  ;;  %v8052_v59 = vshll.u32 %v7958_v22, 16  ;;  %v8076_v22 = vshll.u32 %v7961_v47, 16  ;;  %v8032_v47 = vrot.slane %v8031_v18, 4  ;;  %v7967_v18 = vld [vmem:[#allocation3 + $0x48] sm:$0xf] }
 0x47c   : > { %12770 = vmatprep.mubr.msk.bf16.mxu1 %vm6634_vm9, %v13681_v19  ;;  %v8018_v19 = vrot.slane %v8017_v45, 4  ;;  %v8068_v45 = vshll.u32 %v16357_v51, 16  ;;  %v8106_v51 = vshll.u32 %v16361_v36, 16  ;;  %v8121_v30 = vshrl.u32 %v7967_v18, 16 }
 0x47d   : > { %v8054_v52 = vrot.slane %v8052_v59, 5  ;;  %v8042_v59 = vrot.slane %v8041_v41, 4  ;;  %v13685_v41 = vld [vmem:[#allocation3 + $0x84] sm:$0xff]  }
 0x47e   : > { %v8023_v14 = vsel %vm13935_vm13, %v8018_v19, %v8022_v63  ;;  %v8070_v19 = vrot.slane %v8068_v45, 5  ;;  %v8110_v63 = vshrl.u32 %v16361_v36, 16  ;;  %v8130_v45 = vshll.u32 %v16367_v1, 16 }
 0x480   : > { %v8071_v62 = vsel %vm13935_vm13, %v8066_v53, %v8070_v19 }
 0x481   : > { %v16659_v60 = vpop.f32.mrb[40].mxu0 }
 0x482   : > { %17940 = vst [vmem:[#allocation43_spill] sm:$0xff] %v16659_v60  ;;  %v16663_v13 = vpop.f32.mrb[41].mxu0  ;;  %v8078_v60 = vrot.slane %v8076_v22, 5 }
 0x483   : > { %12771 = vmatmul.mubr.msk.bf16.gmra.mrb[28].mxu1 %vm6634_vm9, %v13682_v26  ;;  %17941 = vst [vmem:[#allocation44_spill] sm:$0xff] %v16663_v13  ;;  %v16669_v57 = vpop.f32.mrb[42].mxu0  ;;  %v8055_v26 = vor.u32 %v8054_v52, %v8051_v0  ;;  %v8075_v13 = vrot.slane %v8073_v56, 4  ;;  %v16684_v0 = vcombine.low %v8013_v8, %v8023_v14  ;;  %v8037_v52 = vsel %vm13935_vm13, %v8032_v47, %v16653_v2 }
 0x484   : > { %12774 = vmatprep.mubr.msk.bf16.mxu1 %vm6634_vm9, %v13683_v44  ;;  %17942 = vst [vmem:[#allocation45_spill] sm:$0xff] %v16669_v57  ;;  %v16672_v54 = vpop.f32.mrb[43].mxu0  ;;  %v16677_v44 = vrot.slane %v8082_v10, 5  ;;  %v8088_v57 = vrot.slane %v8086_v4, 4  ;;  %v8047_v56 = vsel %vm13935_vm13, %v8042_v59, %v8046_v42  ;;  %v8092_v10 = vshll.u32 %v16359_v3, 16 }
 0x485   : > { %17943 = vst [vmem:[#allocation46_spill] sm:$0xff] %v16672_v54  ;;  %v13684_v54 = vld [vmem:[#allocation3 + $0x78] sm:$0xff]   ;;  %v8056_v58 = vrot.slane %v8055_v26, 4  ;;  %v8079_v22 = vor.u32 %v8078_v60, %v8075_v13  ;;  %v8099_v4 = vrot.slane %v8097_v16, 4  ;;  %v8124_v2 = vshll.u32 %v7967_v18, 16 }
 0x486   : > { %v8089_v36 = vor.u32 %v8088_v57, %v16677_v44  ;;  %v16697_v14 = vrot.slane %v8106_v51, 5  ;;  %v8112_v42 = vrot.slane %v8110_v63, 4  ;;  %v16701_v29 = vcombine.low %v8037_v52, %v8047_v56  ;;  %v7970_v3 = vld [vmem:[#allocation3 + $0x54] sm:$0xf]  ;;  %v7973_v26 = vld [vmem:[#allocation3 + $0x60] sm:$0xf] }
 0x487   : > { %v8061_v60 = vsel %vm13935_vm13, %v8056_v58, %v16655_v46  ;;  %v8154_v13 = vshll.u32 %v16378_v37, 16  ;;  %v8158_v16 = vshrl.u32 %v16378_v37, 16  ;;  %v8080_v57 = vrot.slane %v8079_v22, 4  ;;  %v13686_v51 = vld [vmem:[#allocation3 + $0x90] sm:$0xff]   ;;  %v7976_v52 = vld [vmem:[#allocation3 + $0x6c] sm:$0xf] }
 0x488   : > { %v16708_v28 = vcombine.low %v8061_v60, %v8071_v62  ;;  %v8094_v47 = vrot.slane %v8092_v10, 5  ;;  %v8116_v59 = vshll.u32 %v16365_v7, 16  ;;  %v8090_v53 = vrot.slane %v8089_v36, 4  ;;  %v13687_v37 = vld [vmem:[#allocation3 + $0x9c] sm:$0xff]  }
 0x489   : > { %v8123_v8 = vrot.slane %v8121_v30, 4  ;;  %v8126_v19 = vrot.slane %v8124_v2, 5  ;;  %v8113_v63 = vor.u32 %v8112_v42, %v16697_v14  ;;  %v16712_v46 = vrot.slane %v8130_v45, 5 }
 0x48a   : > { %v8148_v56 = vshll.u32 %v7970_v3, 16  ;;  %v16714_v58 = vrot.slane %v8154_v13, 5  ;;  %v8160_v62 = vrot.slane %v8158_v16, 4  ;;  %v8169_v22 = vshrl.u32 %v7973_v26, 16 }
 0x48b   : > { %12775 = vmatmul.mubr.msk.bf16.gmra.mrb[0].mxu1 %vm6634_vm9, %v13684_v54  ;;  %v8134_v54 = vshrl.u32 %v16367_v1, 16  ;;  %v8103_v1 = vor.u32 %v8102_v61, %v8099_v4  ;;  %v8085_v7 = vsel %vm13935_vm13, %v8080_v57, %v16677_v44  ;;  %v8172_v36 = vshll.u32 %v7973_v26, 16 }
 0x48c   : > { %12778 = vmatprep.mubr.msk.bf16.mxu1 %vm6634_vm9, %v13685_v41  ;;  %v8145_v41 = vshrl.u32 %v7970_v3, 16  ;;  %v8178_v10 = vshll.u32 %v16392_v31, 16  ;;  %v8182_v4 = vshrl.u32 %v16392_v31, 16  ;;  %v8095_v61 = vsel %vm13935_vm13, %v8090_v53, %v8094_v47 }
 0x48d   : > { %v8136_v18 = vrot.slane %v8134_v54, 4  ;;  %v8104_v30 = vrot.slane %v8103_v1, 4  ;;  %v8193_v2 = vshrl.u32 %v7976_v52, 16  ;;  %v8196_v42 = vshll.u32 %v7976_v52, 16 }
 0x48e   : > { %v8114_v45 = vrot.slane %v8113_v63, 4  ;;  %v8127_v54 = vor.u32 %v8126_v19, %v8123_v8  ;;  %v8140_v60 = vshll.u32 %v16371_v24, 16  ;;  %v8147_v3 = vrot.slane %v8145_v41, 4  ;;  %v13688_v24 = vld [vmem:[#allocation3 + $0xa8] sm:$0xff]  }
 0x48f   : > { %v8137_v44 = vor.u32 %v8136_v18, %v16712_v46  ;;  %v8150_v13 = vrot.slane %v8148_v56, 5  ;;  %v8161_v16 = vor.u32 %v8160_v62, %v16714_v58  ;;  %v8171_v57 = vrot.slane %v8169_v22, 4  ;;  %v7979_v56 = vld [vmem:[#allocation3 + $0x78] sm:$0xf] }
 0x490   : > { %v8174_v31 = vrot.slane %v8172_v36, 5  ;;  %v16728_v26 = vrot.slane %v8178_v10, 5  ;;  %v8202_v47 = vshll.u32 %v16417_v21, 16  ;;  %v8118_v53 = vrot.slane %v8116_v59, 5  ;;  %v13689_v59 = vld [vmem:[#allocation3 + $0xb4] sm:$0xff]  }
 0x491   : > { %v8195_v1 = vrot.slane %v8193_v2, 4  ;;  %v8198_v52 = vrot.slane %v8196_v42, 5  ;;  %v8206_v8 = vshrl.u32 %v16417_v21, 16  ;;  %v16734_v63 = vcombine.low %v8085_v7, %v8095_v61 }
 0x492   : > { %v8109_v18 = vsel %vm13935_vm13, %v8104_v30, %v16697_v14  ;;  %v8128_v41 = vrot.slane %v8127_v54, 4  ;;  %v8119_v22 = vsel %vm13935_vm13, %v8114_v45, %v8118_v53  ;;  %v8138_v21 = vrot.slane %v8137_v44, 4 }
 0x493   : > { %12779 = vmatmul.mubr.msk.bf16.gmra.mrb[4].mxu1 %vm6634_vm9, %v13686_v51  ;;  %v8184_v51 = vrot.slane %v8182_v4, 4  ;;  %v8142_v36 = vrot.slane %v8140_v60, 5  ;;  %v8151_v10 = vor.u32 %v8150_v13, %v8147_v3  ;;  %v8162_v7 = vrot.slane %v8161_v16, 4 }
 0x494   : > { %12782 = vmatprep.mubr.msk.bf16.mxu1 %vm6634_vm9, %v13687_v37  ;;  %v8164_v37 = vshll.u32 %v16390_v49, 16  ;;  %v8175_v61 = vor.u32 %v8174_v31, %v8171_v57  ;;  %v16748_v30 = vrot.slane %v8202_v47, 5  ;;  %v8199_v2 = vor.u32 %v8198_v52, %v8195_v1  ;;  %v7982_v47 = vld [vmem:[#allocation3 + $0x84] sm:$0xf] }
 0x495   : > { %v8185_v14 = vor.u32 %v8184_v51, %v16728_v26  ;;  %v8208_v42 = vrot.slane %v8206_v8, 4  ;;  %v8217_v45 = vshrl.u32 %v7979_v56, 16  ;;  %v8220_v54 = vshll.u32 %v7979_v56, 16 }
 0x496   : > { %v16753_v60 = vcombine.low %v8109_v18, %v8119_v22  ;;  %v8133_v3 = vsel %vm13935_vm13, %v8128_v41, %v16712_v46  ;;  %v8166_v44 = vrot.slane %v8164_v37, 5  ;;  %v8188_v13 = vshll.u32 %v16404_v15, 16  ;;  %v16777_v41 = vld [vmem:[#allocation3 + $0x34] sm:$0xf] }
 0x497   : > { %v8143_v16 = vsel %vm13935_vm13, %v8138_v21, %v8142_v36  ;;  %v8152_v57 = vrot.slane %v8151_v10, 4  ;;  %v8226_v31 = vshll.u32 %v16430_v6, 16  ;;  %v8230_v51 = vshrl.u32 %v16430_v6, 16  ;;  %v13690_v6 = vld [vmem:[#allocation3 + $0xc0] sm:$0xff]   ;;  %v16784_v21 = vld [vmem:[#allocation3 + $0x38] sm:$0x1] }
 0x498   : > { %v8167_v53 = vsel %vm13935_vm13, %v8162_v7, %v8166_v44  ;;  %v16765_v1 = vrot.slane %v8175_v61, 4  ;;  %v16767_v52 = vrot.slane %v8185_v14, 4  ;;  %v8212_v46 = vshll.u32 %v16428_v40, 16  ;;  %17948 = vst [vmem:[#allocation51_spill] sm:$0xff] %v16784_v21  ;;  %v10235_v61 = vld [vmem:[#allocation3 + $0x30] sm:$0xe] }
 0x499   : > { %v16732_v19 = vpop.f32.mrb[44].mxu0  ;;  %v16770_v8 = vrot.slane %v8199_v2, 4  ;;  %v8209_v15 = vor.u32 %v8208_v42, %v16748_v30  ;;  %v16775_v18 = vrot.slane %v8220_v54, 5  ;;  %v16779_v37 = vcombine.low %v8133_v3, %v8143_v16  ;;  %v16806_v42 = vld [vmem:[#allocation3 + $0x40] sm:$0xf] }
 0x49a   : > { %17944 = vst [vmem:[#allocation47_spill] sm:$0xff] %v16732_v19  ;;  %v16740_v62 = vpop.f32.mrb[45].mxu0  ;;  %v16781_v56 = vrot.slane %v8188_v13, 5  ;;  %v8241_v22 = vshrl.u32 %v7982_v47, 16  ;;  %v8157_v40 = vsel %vm13935_vm13, %v8152_v57, %v16714_v58  ;;  %v16789_v36 = vrot.slane %v8226_v31, 5  ;;  %17949 = vst [vmem:[#allocation52_spill] sm:$0xff] %v16806_v42 }
 0x49b   : > { %17945 = vst [vmem:[#allocation48_spill] sm:$0xff] %v16740_v62  ;;  %v16744_v4 = vpop.f32.mrb[46].mxu0  ;;  %12783 = vmatmul.mubr.msk.bf16.gmra.mrb[8].mxu1 %vm6634_vm9, %v13688_v24  ;;  %v16773_v24 = vrot.slane %v8217_v45, 4  ;;  %v16791_v10 = vrot.slane %v8230_v51, 4  ;;  %v8244_v7 = vshll.u32 %v7982_v47, 16  ;;  %v16794_v14 = vcombine.low %v8157_v40, %v8167_v53 }
 0x49c   : > { %17946 = vst [vmem:[#allocation49_spill] sm:$0xff] %v16744_v4  ;;  %v16750_v49 = vpop.f32.mrb[47].mxu0  ;;  %12786 = vmatprep.mubr.msk.bf16.mxu1 %vm6634_vm9, %v13689_v59  ;;  %v8236_v59 = vshll.u32 %v16443_v50, 16  ;;  %v16804_v2 = vrot.slane %v8212_v46, 5  ;;  %v16808_v45 = vld [vmem:[#allocation3 + $0x44] sm:$0x1] }
 0x49d   : > { %17947 = vst [vmem:[#allocation50_spill] sm:$0xff] %v16750_v49  ;;  %17950 = vst [vmem:[#allocation53_spill] sm:$0xff] %v16808_v45  ;;  %v16810_v54 = vld [vmem:[#allocation3 + $0x4c] sm:$0xf]  ;;  %v16818_v44 = vrot.slane %v8209_v15, 4  ;;  %v10313_v31 = vrot.slane %v16777_v41, 5 }
 0x49e   : > { %v16822_v16 = vld [vmem:[#allocation3 + $0x50] sm:$0x1]  ;;  %v16824_v57 = vld [vmem:[#allocation3 + $0x58] sm:$0xf]  ;;  %v10236_v51 = vld [vmem:[#allocation3 + $0x3c] sm:$0xe] }
 0x49f   : > { %17951 = vst [vmem:[#allocation54_spill] sm:$0xff] %v16822_v16  ;;  %17952 = vst [vmem:[#allocation55_spill] sm:$0xff] %v16824_v57  ;;  %v16827_v47 = vrot.slane %v8236_v59, 5  ;;  %v11908_v46 = vrot.slane %v10235_v61, 9  ;;  %v16834_v40 = vrot.slane %v8244_v7, 5  ;;  %v10315_v3 = vrot.slane %v10313_v31, 4 }
 0x4a0   : > { %v16836_v13 = vld [vmem:[#allocation3 + $0x5c] sm:$0x1]  ;;  %v10316_v50 = vrot.slane %v16784_v21, 5  ;;  %v8953_v59 = vsel %vm6683_vm7, %v16619_v39, 0  ;;  %v16841_v58 = vld [vmem:[#allocation3 + $0x64] sm:$0xf] }
 0x4a1   : > { %17953 = vst [vmem:[#allocation56_spill] sm:$0xff] %v16836_v13  ;;  %17954 = vst [vmem:[#allocation57_spill] sm:$0xff] %v16841_v58  ;;  %v11909_v61 = vrot.slane %v10236_v51, 9  ;;  %v10320_v53 = vrot.slane %v16806_v42, 5  ;;  %v10238_v15 = vld [vmem:[#allocation3 + $0x54] sm:$0xe] }
 0x4a2   : > { %v16850_v7 = vsel %vm14308_vm8, %v10315_v3, %v10316_v50  ;;  %v10323_v49 = vrot.slane %v16808_v45, 5  ;;  %v10327_v62 = vrot.slane %v16810_v54, 5  ;;  %v10239_v39 = vld [vmem:[#allocation3 + $0x60] sm:$0xe]  ;;  %v16854_v19 = vld [vmem:[#allocation3 + $0x68] sm:$0x1] }
 0x4a3   : > { %12787 = vmatmul.mubr.msk.bf16.gmra.mrb[12].mxu1 %vm6634_vm9, %v13690_v6  ;;  %v10237_v6 = vld [vmem:[#allocation3 + $0x48] sm:$0xe]  ;;  %17956 = vst [vmem:[#allocation59_spill] sm:$0xff] %v16850_v7  ;;  %17957 = vst [vmem:[#allocation60_spill] sm:$0xff] %v16854_v19  ;;  %v16856_v21 = vld [vmem:[#allocation3 + $0x70] sm:$0xf]  ;;  %v16869_v3 = vsel %vm14308_vm8, %v11909_v61, %v10320_v53 }
 0x4a4   : > { %12792 = vmatprep.mubr.msk.bf16.mxu1 %vm6634_vm9, %v16684_v0  ;;  %v16829_v0 = vrot.slane %v8241_v22, 4  ;;  %v16845_v22 = vsel %vm14308_vm8, %v11908_v46, %v10313_v31  ;;  %v11910_v4 = vrot.slane %v10237_v6, 9  ;;  %17958 = vst [vmem:[#allocation61_spill] sm:$0xff] %v16856_v21  ;;  %v10322_v51 = vrot.slane %v10320_v53, 4  ;;  %v16865_v50 = vld [vmem:[%s17686_s3 + $0x18] sm:$0xf] }
 0x4a5   : > { %17955 = vst [vmem:[#allocation58_spill] sm:$0xff] %v16845_v22  ;;  %v10330_v46 = vrot.slane %v16822_v16, 5  ;;  %v10334_v42 = vrot.slane %v16824_v57, 5  ;;  %17959 = vst [vmem:[#allocation62_spill] sm:$0xff] %v16869_v3  ;;  %v10329_v45 = vrot.slane %v10327_v62, 4  ;;  %v11911_v31 = vrot.slane %v10238_v15, 9 }
 0x4a6   : > { %v16873_v6 = vsel %vm14308_vm8, %v11910_v4, %v10327_v62  ;;  %v10240_v7 = vld [vmem:[#allocation3 + $0x6c] sm:$0xe]  ;;  %v16877_v22 = vld [vmem:[#allocation3 + $0x7c] sm:$0xf]  ;;  %v16881_v16 = vsel %vm14308_vm8, %v10322_v51, %v10323_v49  ;;  %v10337_v53 = vrot.slane %v16836_v13, 5  ;;  %v11912_v61 = vrot.slane %v10239_v39, 9 }
 0x4a7   : > { %17960 = vst [vmem:[#allocation63_spill] sm:$0xff] %v16873_v6  ;;  %17961 = vst [vmem:[#allocation64_spill] sm:$0xff] %v16877_v22  ;;  %v10336_v57 = vrot.slane %v10334_v42, 4  ;;  %v16886_v62 = vld [vmem:[#allocation3 + $0x74] sm:$0x1]  ;;  %v16894_v15 = vsel %vm14308_vm8, %v10329_v45, %v10330_v46  ;;  %v16898_v49 = vsel %vm14308_vm8, %v11911_v31, %v10334_v42  ;;  %v11913_v45 = vrot.slane %v10240_v7, 9 }
 0x4a8   : > { %17962 = vst [vmem:[#allocation65_spill] sm:$0xff] %v16881_v16  ;;  %17963 = vst [vmem:[#allocation66_spill] sm:$0xff] %v16886_v62  ;;  %v16888_v4 = vld [vmem:[#allocation3 + $0x80] sm:$0x1]  ;;  %v10348_v46 = vrot.slane %v16856_v21, 5  ;;  %v10344_v39 = vrot.slane %v16854_v19, 5 }
 0x4a9   : > { %17964 = vst [vmem:[#allocation67_spill] sm:$0xff] %v16888_v4  ;;  %17965 = vst [vmem:[#allocation68_spill] sm:$0xff] %v16894_v15  ;;  %v16909_v51 = vsel %vm14308_vm8, %v10336_v57, %v10337_v53  ;;  %v16912_v42 = vld [vmem:[#allocation3 + $0x94] sm:$0xf]  ;;  %v10242_v15 = vld [vmem:[#allocation3 + $0x84] sm:$0xe] }
 0x4aa   : > { %17966 = vst [vmem:[#allocation69_spill] sm:$0xff] %v16898_v49  ;;  %17968 = vst [vmem:[#allocation71_spill] sm:$0xff] %v16909_v51  ;;  %v16921_v6 = vld [vmem:[#allocation3 + $0x8c] sm:$0x1]  ;;  %v16925_v57 = vsel %vm14308_vm8, %v11913_v45, %v10348_v46  ;;  %v10350_v7 = vrot.slane %v10348_v46, 4  ;;  %v10351_v53 = vrot.slane %v16886_v62, 5 }
 0x4ab   : > { %12793 = vmatmul.mubr.msk.bf16.vlgmr.msra.gmra.mrb[16].mxu1 %vm6634_vm9, %v16701_v29  ;;  %v10241_v29 = vld [vmem:[#allocation3 + $0x78] sm:$0xe]  ;;  %17970 = vst [vmem:[#allocation73_spill] sm:$0xff] %v16921_v6  ;;  %17971 = vst [vmem:[#allocation74_spill] sm:$0xff] %v16925_v57  ;;  %v10355_v21 = vrot.slane %v16877_v22, 5  ;;  %v10358_v51 = vrot.slane %v16888_v4, 5 }
 0x4ac   : > { %12825 = vmatpush3.bf16.msra.mxu1 %v8953_v59  ;;  %12796 = vmatprep.mubr.msk.bf16.mxu1 %vm6634_vm9, %v16708_v28  ;;  %v10341_v59 = vrot.slane %v16841_v58, 5  ;;  %v16903_v28 = vld [vmem:[#allocation3 + $0x88] sm:$0xf]  ;;  %v16929_v31 = vld [vmem:[#allocation3 + $0x98] sm:$0x1]  ;;  %v16945_v62 = vsel %vm14308_vm8, %v10350_v7, %v10351_v53  ;;  %v11915_v13 = vrot.slane %v10242_v15, 9 }
 0x4ad   : > { %13620 = vmatprep.subr.msk.bf16.mxu1 %vm6683_vm7, %v16865_v50  ;;  %17967 = vst [vmem:[#allocation70_spill] sm:$0xff] %v16903_v28  ;;  %17972 = vst [vmem:[#allocation75_spill] sm:$0xff] %v16929_v31  ;;  %v10362_v49 = vrot.slane %v16903_v28, 5  ;;  %v16937_v19 = vld [vmem:[#allocation3 + $0xa0] sm:$0xf]  ;;  %v10357_v22 = vrot.slane %v10355_v21, 4 }
 0x4ae   : > { %v16918_v16 = vsel %vm14308_vm8, %v11912_v61, %v10341_v59  ;;  %v10343_v3 = vrot.slane %v10341_v59, 4  ;;  %v11914_v59 = vrot.slane %v10241_v29, 9  ;;  %17974 = vst [vmem:[#allocation77_spill] sm:$0xff] %v16937_v19  ;;  %v16939_v45 = vld [vmem:[#allocation3 + $0xac] sm:$0xf]  ;;  %17976 = vst [vmem:[#allocation79_spill] sm:$0xff] %v16945_v62 }
 0x4af   : > { %17969 = vst [vmem:[#allocation72_spill] sm:$0xff] %v16918_v16  ;;  %17975 = vst [vmem:[#allocation78_spill] sm:$0xff] %v16939_v45  ;;  %v8254_v29 = vshrl.u32 %v16450_v11, 16  ;;  %v10364_v4 = vrot.slane %v10362_v49, 4  ;;  %v10365_v28 = vrot.slane %v16921_v6, 5  ;;  %v16963_v7 = vsel %vm14308_vm8, %v10357_v22, %v10358_v51  ;;  %v18059_v43 = vld [vmem:[#allocation63_spill] sm:$0xff] }
 0x4b0   : > { %v16933_v61 = vsel %vm14308_vm8, %v10343_v3, %v10344_v39  ;;  %v10243_v3 = vld [vmem:[#allocation3 + $0x90] sm:$0xe]  ;;  %v10244_v58 = vld [vmem:[#allocation3 + $0x9c] sm:$0xe]  ;;  %v16953_v46 = vld [vmem:[#allocation3 + $0xa4] sm:$0x1]  ;;  %v16959_v15 = vsel %vm14308_vm8, %v11914_v59, %v10355_v21  ;;  %v16967_v53 = vsel %vm14308_vm8, %v11915_v13, %v10362_v49 }
 0x4b1   : > { %17973 = vst [vmem:[#allocation76_spill] sm:$0xff] %v16933_v61  ;;  %17977 = vst [vmem:[#allocation80_spill] sm:$0xff] %v16953_v46  ;;  %v16955_v61 = vld [vmem:[#allocation3 + $0xb0] sm:$0x1]  ;;  %v10369_v39 = vrot.slane %v16912_v42, 5  ;;  %v16978_v21 = vsel %vm14308_vm8, %v10364_v4, %v10365_v28  ;;  %v11916_v22 = vrot.slane %v10243_v3, 9 }
 0x4b2   : > { %17978 = vst [vmem:[#allocation81_spill] sm:$0xff] %v16959_v15  ;;  %17979 = vst [vmem:[#allocation82_spill] sm:$0xff] %v16963_v7  ;;  %v10376_v51 = vrot.slane %v16937_v19, 5  ;;  %v10245_v59 = vld [vmem:[#allocation3 + $0xa8] sm:$0xe]  ;;  %v11917_v16 = vrot.slane %v10244_v58, 9 }
 0x4b3   : > { %12797 = vmatmul.mubr.msk.bf16.gmra.mrb[20].mxu1 %vm6634_vm9, %v16734_v63  ;;  %17980 = vst [vmem:[#allocation83_spill] sm:$0xff] %v16967_v53  ;;  %v16972_v63 = vld [vmem:[#allocation3 + $0xb8] sm:$0xf]  ;;  %17982 = vst [vmem:[#allocation85_spill] sm:$0xff] %v16978_v21  ;;  %v9548_v13 = vld [vmem:[#allocation3 + $0xbc] sm:$0x1]  ;;  %v16986_v6 = vsel %vm14308_vm8, %v11916_v22, %v10369_v39 }
 0x4b4   : > { %12800 = vmatprep.mubr.msk.bf16.mxu1 %vm6634_vm9, %v16753_v60  ;;  %17981 = vst [vmem:[#allocation84_spill] sm:$0xff] %v16972_v63  ;;  %v10371_v57 = vrot.slane %v10369_v39, 4  ;;  %v10372_v60 = vrot.slane %v16929_v31, 5  ;;  %v10378_v62 = vrot.slane %v10376_v51, 4  ;;  %v10379_v4 = vrot.slane %v16953_v46, 5 }
 0x4b5   : > { %v10383_v28 = vrot.slane %v16939_v45, 5  ;;  %v10246_v3 = vld [vmem:[#allocation3 + $0xb4] sm:$0xe]  ;;  %v16990_v7 = vld [vmem:[#allocation3 + $0xc4] sm:$0xf]  ;;  %v16998_v49 = vsel %vm14308_vm8, %v11917_v16, %v10376_v51  ;;  %v11918_v58 = vrot.slane %v10245_v59, 9 }
 0x4b6   : > { %v16994_v15 = vsel %vm14308_vm8, %v10371_v57, %v10372_v60  ;;  %v10390_v39 = vrot.slane %v16972_v63, 5  ;;  %v9551_v22 = vld [vmem:[#allocation3 + $0xc8] sm:$0x1]  ;;  %v17005_v53 = vsel %vm14308_vm8, %v10378_v62, %v10379_v4  ;;  %v10386_v45 = vrot.slane %v16955_v61, 5  ;;  %v10247_v59 = vld [vmem:[#allocation3 + $0xc0] sm:$0xe] }
 0x4b7   : > { %v10385_v46 = vrot.slane %v10383_v28, 4  ;;  %v11934_v57 = vcombine.low %v16998_v49, %v17005_v53  ;;  %v11919_v60 = vrot.slane %v10246_v3, 9  ;;  %v10393_v51 = vrot.slane %v9548_v13, 5  ;;  %v7985_v19 = vld [vmem:[#allocation3 + $0x90] sm:$0xf]  ;;  %v13710_v49 = vld [vmem:[%s13887_s10 + $0x18] sm:$0xff]  }
 0x4b8   : > { %v10392_v16 = vrot.slane %v10390_v39, 4  ;;  %v17983_v63 = vshll.u32 %v16450_v11, 16  ;;  %v17016_v21 = vsel %vm14308_vm8, %v11918_v58, %v10383_v28  ;;  %v10397_v4 = vrot.slane %v16990_v7, 5  ;;  %v7988_v11 = vld [vmem:[#allocation3 + $0x9c] sm:$0xf]  ;;  %v13708_v53 = vld [vmem:[%s13887_s10 + $0x8] sm:$0xff]  }
 0x4b9   : > { %v17020_v62 = vsel %vm14308_vm8, %v10385_v46, %v10386_v45  ;;  %v8256_v13 = vrot.slane %v8254_v29, 4  ;;  %v11920_v46 = vrot.slane %v10247_v59, 9  ;;  %v10400_v29 = vrot.slane %v9551_v22, 5 }
 0x4ba   : > { %v17012_v31 = vrot.slane %v17983_v63, 5  ;;  %v17029_v63 = vsel %vm14308_vm8, %v11919_v60, %v10390_v39  ;;  %v17033_v28 = vsel %vm14308_vm8, %v10392_v16, %v10393_v51  ;;  %v8215_v3 = vsel %vm13935_vm13, %v16818_v44, %v16804_v2 }
 0x4bb   : > { %12801 = vmatmul.mubr.msk.bf16.gmra.mrb[24].mxu1 %vm6634_vm9, %v16779_v37  ;;  %v11936_v45 = vcombine.low %v17029_v63, %v17033_v28  ;;  %v10399_v37 = vrot.slane %v10397_v4, 4  ;;  %v17984_v58 = vor.u32 %v16791_v10, %v16789_v36  ;;  %v8265_v60 = vshrl.u32 %v7985_v19, 16  ;;  %v13713_v63 = vld [vmem:[%s13887_s10 + $0x30] sm:$0xff]   ;;  %v13714_v28 = vld [vmem:[%s13887_s10 + $0x38] sm:$0xff]  }
 0x4bc   : > { %12804 = vmatprep.mubr.msk.bf16.mxu1 %vm6634_vm9, %v16794_v14  ;;  %v8268_v16 = vshll.u32 %v7985_v19, 16  ;;  %v8274_v51 = vshll.u32 %v16464_v35, 16  ;;  %v8278_v14 = vshrl.u32 %v16464_v35, 16  ;;  %v17050_v59 = vsel %vm14308_vm8, %v11920_v46, %v10397_v4 }
 0x4bd   : > { %v8234_v39 = vrot.slane %v17984_v58, 4  ;;  %v17054_v22 = vsel %vm14308_vm8, %v10399_v37, %v10400_v29  ;;  %v8257_v2 = vor.u32 %v8256_v13, %v17012_v31  ;;  %v8298_v10 = vshll.u32 %v16481_v12, 16 }
 0x4be   : > { %v8302_v44 = vshrl.u32 %v16481_v12, 16  ;;  %v17985_v35 = vsel %vm13935_vm13, %v16767_v52, %v16781_v56  ;;  %v17986_v4 = vsel %vm13935_vm13, %v16765_v1, %v16728_v26  ;;  %v17987_v13 = vsel %vm13935_vm13, %v16770_v8, %v16748_v30 }
 0x4bf   : > { %v11766_v46 = vcombine.low %v17986_v4, %v17985_v35  ;;  %v11767_v12 = vcombine.low %v17987_v13, %v8215_v3  ;;  %v17988_v37 = vor.u32 %v16775_v18, %v16773_v24  ;;  %v8247_v58 = vor.u32 %v16834_v40, %v16829_v0 }
 0x4c0   : > { %v8239_v52 = vsel %vm13935_vm13, %v8234_v39, %v16827_v47  ;;  %v8260_v26 = vshll.u32 %v16452_v20, 16  ;;  %v8289_v1 = vshrl.u32 %v7988_v11, 16  ;;  %v8292_v56 = vshll.u32 %v7988_v11, 16  ;;  %v7991_v39 = vld [vmem:[#allocation3 + $0xa8] sm:$0xf] }
 0x4c1   : > { %v8224_v29 = vrot.slane %v17988_v37, 4  ;;  %v8267_v35 = vrot.slane %v8265_v60, 4  ;;  %v8270_v4 = vrot.slane %v8268_v16, 5  ;;  %v8276_v19 = vrot.slane %v8274_v51, 5 }
 0x4c2   : > { %v8280_v30 = vrot.slane %v8278_v14, 4  ;;  %v8258_v8 = vrot.slane %v8257_v2, 4  ;;  %v8300_v24 = vrot.slane %v8298_v10, 5  ;;  %v8304_v18 = vrot.slane %v8302_v44, 4  ;;  %v7994_v2 = vld [vmem:[#allocation3 + $0xb4] sm:$0xf] }
 0x4c3   : > { %12805 = vmatmul.mubr.msk.bf16.gmra.mrb[28].mxu1 %vm6634_vm9, %v11766_v46  ;;  %v8229_v0 = vsel %vm13935_vm13, %v8224_v29, %v16789_v36  ;;  %v8248_v47 = vrot.slane %v8247_v58, 4  ;;  %v8262_v20 = vrot.slane %v8260_v26, 5  ;;  %v8291_v3 = vrot.slane %v8289_v1, 4 }
 0x4c4   : > { %12808 = vmatprep.mubr.msk.bf16.mxu1 %vm6634_vm9, %v11767_v12  ;;  %v11768_v40 = vcombine.low %v8229_v0, %v8239_v52  ;;  %v8294_v11 = vrot.slane %v8292_v56, 5  ;;  %v8271_v60 = vor.u32 %v8270_v4, %v8267_v35  ;;  %v8281_v16 = vor.u32 %v8280_v30, %v8276_v19 }
 0x4c5   : > { %v8322_v51 = vshll.u32 %v16502_v23, 16  ;;  %v8326_v14 = vshrl.u32 %v16502_v23, 16  ;;  %v8263_v10 = vsel %vm13935_vm13, %v8258_v8, %v8262_v20  ;;  %v8305_v44 = vor.u32 %v8304_v18, %v8300_v24 }
 0x4c6   : > { %v8346_v46 = vshll.u32 %v16522_v33, 16  ;;  %v8350_v36 = vshrl.u32 %v16522_v33, 16  ;;  %v8253_v13 = vsel %vm13935_vm13, %v8248_v47, %v17012_v31  ;;  %v8284_v12 = vshll.u32 %v16472_v25, 16 }
 0x4c7   : > { %v8313_v37 = vshrl.u32 %v7991_v39, 16  ;;  %v8316_v29 = vshll.u32 %v7991_v39, 16  ;;  %v8295_v58 = vor.u32 %v8294_v11, %v8291_v3  ;;  %v8308_v23 = vshll.u32 %v16483_v48, 16  ;;  %v7997_v11 = vld [vmem:[#allocation3 + $0xc0] sm:$0xf] }
 0x4c8   : > { %v8337_v52 = vshrl.u32 %v7994_v2, 16  ;;  %v8340_v26 = vshll.u32 %v7994_v2, 16  ;;  %v11769_v1 = vcombine.low %v8253_v13, %v8263_v10  ;;  %v8282_v56 = vrot.slane %v8281_v16, 4 }
 0x4c9   : > { %v8324_v35 = vrot.slane %v8322_v51, 5  ;;  %v8328_v4 = vrot.slane %v8326_v14, 4  ;;  %v8272_v33 = vrot.slane %v8271_v60, 4  ;;  %v8306_v30 = vrot.slane %v8305_v44, 4 }
 0x4ca   : > { %v8348_v8 = vrot.slane %v8346_v46, 5  ;;  %v8352_v18 = vrot.slane %v8350_v36, 4  ;;  %v8286_v25 = vrot.slane %v8284_v12, 5  ;;  %v8315_v31 = vrot.slane %v8313_v37, 4 }
 0x4cb   : > { %12809 = vmatmul.mubr.msk.bf16.gmra.mrb[0].mxu1 %vm6634_vm9, %v11768_v40  ;;  %v8318_v0 = vrot.slane %v8316_v29, 5  ;;  %v8296_v47 = vrot.slane %v8295_v58, 4  ;;  %v8310_v20 = vrot.slane %v8308_v23, 5  ;;  %v8339_v48 = vrot.slane %v8337_v52, 4 }
 0x4cc   : > { %12812 = vmatprep.mubr.msk.bf16.mxu1 %vm6634_vm9, %v11769_v1  ;;  %v8342_v3 = vrot.slane %v8340_v26, 5  ;;  %v8287_v39 = vsel %vm13935_vm13, %v8282_v56, %v8286_v25  ;;  %v8329_v16 = vor.u32 %v8328_v4, %v8324_v35  ;;  %v8370_v40 = vshll.u32 %v16535_v5, 16 }
 0x4cd   : > { %v8374_v60 = vshrl.u32 %v16535_v5, 16  ;;  %v8277_v51 = vsel %vm13935_vm13, %v8272_v33, %v8276_v19  ;;  %v8311_v14 = vsel %vm13935_vm13, %v8306_v30, %v8310_v20  ;;  %v8353_v2 = vor.u32 %v8352_v18, %v8348_v8 }
 0x4ce   : > { %v8319_v10 = vor.u32 %v8318_v0, %v8315_v31  ;;  %v8332_v44 = vshll.u32 %v16511_v38, 16  ;;  %v8361_v46 = vshrl.u32 %v7997_v11, 16  ;;  %v8364_v36 = vshll.u32 %v7997_v11, 16 }
 0x4cf   : > { %v11770_v13 = vcombine.low %v8277_v51, %v8287_v39  ;;  %v8301_v12 = vsel %vm13935_vm13, %v8296_v47, %v8300_v24  ;;  %v8343_v37 = vor.u32 %v8342_v3, %v8339_v48  ;;  %v8356_v29 = vshll.u32 %v16533_v27, 16 }
 0x4d0   : > { %v11771_v5 = vcombine.low %v8301_v12, %v8311_v14  ;;  %v8330_v58 = vrot.slane %v8329_v16, 4  ;;  %v8372_v23 = vrot.slane %v8370_v40, 5  ;;  %v8376_v19 = vrot.slane %v8374_v60, 4  ;;  %v464_v40 = vld [vmem:[#allocation3 + $0xcc] sm:$0x1]  ;;  %v18016_v60 = vld [vmem:[#allocation23_spill] sm:$0xff] }
 0x4d1   : > { %v8354_v52 = vrot.slane %v8353_v2, 4  ;;  %v8320_v26 = vrot.slane %v8319_v10, 4  ;;  %v8334_v38 = vrot.slane %v8332_v44, 5  ;;  %v8363_v1 = vrot.slane %v8361_v46, 4 }
 0x4d2   : > { %v8366_v56 = vrot.slane %v8364_v36, 5  ;;  %v8344_v4 = vrot.slane %v8343_v37, 4  ;;  %v8358_v33 = vrot.slane %v8356_v29, 5  ;;  %v8377_v30 = vor.u32 %v8376_v19, %v8372_v23  ;;  %v11873_v19 = vld [vmem:[%s17686_s3 + $0x1c] sm:$0xf] }
 0x4d3   : > { %12813 = vmatmul.mubr.msk.bf16.gmra.mrb[4].mxu1 %vm6634_vm9, %v11770_v13  ;;  %v8335_v24 = vsel %vm13935_vm13, %v8330_v58, %v8334_v38  ;;  %v8744_v18 = vrot.slane %v16633_v32, 5  ;;  %v8325_v25 = vsel %vm13935_vm13, %v8320_v26, %v8324_v35  ;;  %v8380_v0 = vshll.u32 %v16547_v34, 16  ;;  %v8678_v32 = vld [vmem:[#allocation3 + $0xc] sm:$0xe]  ;;  %v8679_v13 = vld [vmem:[#allocation3 + $0x18] sm:$0xe] }
 0x4d4   : > { %12816 = vmatprep.mubr.msk.bf16.mxu1 %vm6634_vm9, %v11771_v5  ;;  %v8359_v27 = vsel %vm13935_vm13, %v8354_v52, %v8358_v33  ;;  %v8367_v31 = vor.u32 %v8366_v56, %v8363_v1  ;;  %v11772_v47 = vcombine.low %v8325_v25, %v8335_v24  ;;  %v8349_v20 = vsel %vm13935_vm13, %v8344_v4, %v8348_v8  ;;  %v17991_v52 = vld [vmem:[#allocation16_spill] sm:$0xff]  ;;  %v17992_v26 = vld [vmem:[#allocation17_spill] sm:$0xff]  ;;  %v17994_v1 = vld [vmem:[#allocation19_spill] sm:$0xff] }
 0x4d5   : > { %v11773_v48 = vcombine.low %v8349_v20, %v8359_v27  ;;  %v8378_v3 = vrot.slane %v8377_v30, 4  ;;  %v8746_v11 = vrot.slane %v8744_v18, 4  ;;  %v8382_v16 = vrot.slane %v8380_v0, 5  ;;  %v17995_v56 = vld [vmem:[#allocation20_spill] sm:$0xff]  ;;  %v17998_v33 = vld [vmem:[#allocation21_spill] sm:$0xff]  ;;  %v18000_v30 = vld [vmem:[#allocation18_spill] sm:$0xff] }
 0x4d6   : > { %v8368_v39 = vrot.slane %v8367_v31, 4  ;;  %v8747_v35 = vrot.slane %v16641_v55, 5  ;;  %v465_v34 = vsel %vm15349_vm6, 0, %v464_v40  ;;  %v8751_v8 = vrot.slane %v16639_v9, 5  ;;  %v17990_v9 = vld [vmem:[#allocation42_spill] sm:$0xff]  ;;  %v18003_v25 = vld [vmem:[#allocation7_spill] sm:$0xff] }
 0x4d7   : > { %v8383_v51 = vsel %vm13935_vm13, %v8378_v3, %v8382_v16  ;;  %466 = vst [vmem:[#allocation3 + $0xcc] sm:$0x1] %v465_v34  ;;  %v11791_v14 = vrot.slane %v8678_v32, 9  ;;  %v8754_v12 = vrot.slane %v17990_v9, 5  ;;  %v11792_v37 = vrot.slane %v8679_v13, 9  ;;  %v18001_v27 = vld [vmem:[#allocation6_spill] sm:$0xff] }
 0x4d8   : > { %v8748_v2 = vsel %vm14308_vm8, %v8746_v11, %v8747_v35  ;;  %v8373_v10 = vsel %vm13935_vm13, %v8368_v39, %v8372_v23  ;;  %v8753_v36 = vrot.slane %v8751_v8, 4  ;;  %v9312_v23 = vsel %vm6683_vm7, %v16865_v50, 0  ;;  %v17997_v50 = vld [vmem:[#allocation4_spill] sm:$0xff]  ;;  %v18007_v20 = vld [vmem:[#allocation10_spill] sm:$0xff]  ;;  %v18009_v3 = vld [vmem:[#allocation11_spill] sm:$0xff] }
 0x4d9   : > { %v11774_v44 = vcombine.low %v8373_v10, %v8383_v51  ;;  %v8745_v55 = vsel %vm14308_vm8, %v11791_v14, %v8744_v18  ;;  %v8752_v5 = vsel %vm14308_vm8, %v11792_v37, %v8751_v8  ;;  %v17993_v38 = vcombine.low %v17991_v52, %v17992_v26  ;;  %v18004_v31 = vld [vmem:[#allocation8_spill] sm:$0xff]  ;;  %v18012_v16 = vld [vmem:[#allocation13_spill] sm:$0xff]  ;;  %v18015_v35 = vld [vmem:[#allocation22_spill] sm:$0xff] }
 0x4da   : > { %v11808_v46 = vcombine.low %v8745_v55, %v8748_v2  ;;  %v8755_v29 = vsel %vm14308_vm8, %v8753_v36, %v8754_v12  ;;  %v17996_v4 = vcombine.low %v17994_v1, %v17995_v56  ;;  %v17999_v24 = vcombine.low %v17997_v50, %v17998_v33  ;;  %v18010_v11 = vld [vmem:[#allocation12_spill] sm:$0xff]  ;;  %v18013_v32 = vld [vmem:[#allocation5_spill] sm:$0xff]  ;;  %v18021_v2 = vld [vmem:[#allocation26_spill] sm:$0xff] }
 0x4db   : > { %12817 = vmatmul.mubr.msk.bf16.gmra.mrb[8].mxu1 %vm6634_vm9, %v11772_v47  ;;  %v11809_v58 = vcombine.low %v8752_v5, %v8755_v29  ;;  %v18002_v18 = vcombine.low %v18000_v30, %v18001_v27  ;;  %v18005_v0 = vcombine.low %v18003_v25, %v18004_v31  ;;  %v18006_v47 = vld [vmem:[#allocation9_spill] sm:$0xff]  ;;  %v18011_v39 = vcombine.low %v18009_v3, %v18010_v11  ;;  %v18018_v51 = vld [vmem:[#allocation24_spill] sm:$0xff]  ;;  %v18022_v10 = vld [vmem:[#allocation27_spill] sm:$0xff] }
 0x4dc   : > { %12820 = vmatprep.mubr.msk.bf16.mxu1 %vm6634_vm9, %v11773_v48  ;;  %v18008_v48 = vcombine.low %v18006_v47, %v18007_v20  ;;  %v18014_v40 = vcombine.low %v18012_v16, %v18013_v32  ;;  %v18017_v34 = vcombine.low %v18015_v35, %v18016_v60  ;;  %v18019_v8 = vld [vmem:[#allocation25_spill] sm:$0xff]  ;;  %v18024_v55 = vld [vmem:[#allocation28_spill] sm:$0xff]  ;;  %v18028_v9 = vld [vmem:[#allocation34_spill] sm:$0xff]  ;;  %v10038_v1 = vsel %vm6683_vm7, %v11873_v19, 0 }
 0x4dd   : > { %v18020_v14 = vcombine.low %v18018_v51, %v18019_v8  ;;  %v18027_v13 = vld [vmem:[#allocation33_spill] sm:$0xff]  ;;  %v519_v37 = vld [vmem:[#allocation3 + $0xd4] sm:$0x1]  ;;  %v13695_v33 = vld [vmem:[#allocation3 + $0x48] sm:$0xff]  }
 0x4de   : > { %v18029_v12 = vcombine.low %v18027_v13, %v18028_v9  ;;  %v520_v5 = vsel %vm15591_vm3, 0, %v519_v37  ;;  %v18032_v52 = vld [vmem:[#allocation37_spill] sm:$0xff]  ;;  %v13693_v56 = vld [vmem:[#allocation3 + $0x30] sm:$0xff]   ;;  %v13699_v27 = vld [vmem:[#allocation3 + $0x78] sm:$0xff]  }
 0x4df   : > { %521 = vst [vmem:[#allocation3 + $0xd4] sm:$0x1] %v520_v5  ;;  %v13694_v50 = vld [vmem:[#allocation3 + $0x3c] sm:$0xff]   ;;  %v13698_v30 = vld [vmem:[#allocation3 + $0x6c] sm:$0xff]   ;;  %v9507_v25 = vld [vmem:[#allocation3 + $0x18] sm:$0xf] }
 0x4e0   : > { %v13700_v47 = vld [vmem:[#allocation3 + $0x84] sm:$0xff]   ;;  %v9556_v20 = vshrl.u32 %v9507_v25, 16  ;;  %v13701_v3 = vld [vmem:[#allocation3 + $0x90] sm:$0xff]   ;;  %v17245_v29 = vld [vmem:[#allocation3 + $0x2c] sm:$0x1] }
 0x4e1   : > { %v9510_v11 = vld [vmem:[#allocation3 + $0x24] sm:$0xf]  ;;  %v10309_v17 = vrot.slane %v17245_v29, 5 }
 0x4e2   : > { %v9580_v60 = vshrl.u32 %v9510_v11, 16 }
 0x4e3   : > { %12821 = vmatmul.mubr.msk.bf16.gmra.mrb[12].mxu1 %vm6634_vm9, %v11774_v44  ;;  %v18023_v44 = vcombine.low %v18021_v2, %v18022_v10  ;;  %v9513_v10 = vld [vmem:[#allocation3 + $0x30] sm:$0xf] }
 0x4e4   : > { %12826 = vmatprep.mubr.msk.bf16.mxu1 %vm6634_vm9, %v11808_v46  ;;  %v18025_v46 = vld [vmem:[#allocation29_spill] sm:$0xff]  ;;  %v9582_v13 = vrot.slane %v9580_v60, 4  ;;  %v18034_v60 = vld [vmem:[#allocation51_spill] sm:$0xff] }
 0x4e5   : > { %v18026_v36 = vcombine.low %v18024_v55, %v18025_v46  ;;  %v9617_v55 = vshrl.u32 %v16777_v41, 16  ;;  %v13702_v46 = vld [vmem:[#allocation3 + $0x9c] sm:$0xff]  }
 0x4eb   : > { %12827 = vmatmul.mubr.msk.bf16.vlgmr.msra.gmra.mrb[16].mxu1 %vm6634_vm9, %v11809_v58  ;;  %v13691_v58 = vld [vmem:[#allocation3 + $0x18] sm:$0xff]  }
 0x4ec   : > { %12859 = vmatpush3.bf16.msra.mxu1 %v9312_v23  ;;  %12830 = vmatprep.mubr.msk.bf16.mxu1 %vm6634_vm9, %v17993_v38  ;;  %v18031_v23 = vld [vmem:[#allocation36_spill] sm:$0xff]  ;;  %v13692_v38 = vld [vmem:[#allocation3 + $0x24] sm:$0xff]  }
 0x4ed   : > { %13621 = vmatprep.subr.msk.bf16.mxu1 %vm6683_vm7, %v11873_v19  ;;  %v18033_v26 = vcombine.low %v18031_v23, %v18032_v52  ;;  %v13696_v19 = vld [vmem:[#allocation3 + $0x54] sm:$0xff]   ;;  %v9604_v23 = vshrl.u32 %v9513_v10, 16  ;;  %v9607_v52 = vshll.u32 %v9513_v10, 16 }
 0x4f3   : > { %12831 = vmatmul.mubr.msk.bf16.gmra.mrb[20].mxu1 %vm6634_vm9, %v17996_v4  ;;  %v17218_v4 = vld [vmem:[%s17686_s3 + $0x20] sm:$0xf] }
 0x4f4   : > { %12834 = vmatprep.mubr.msk.bf16.mxu1 %vm6634_vm9, %v17999_v24  ;;  %v13697_v24 = vld [vmem:[#allocation3 + $0x60] sm:$0xff]  }
 0x4fb   : > { %12835 = vmatmul.mubr.msk.bf16.gmra.mrb[24].mxu1 %vm6634_vm9, %v18002_v18  ;;  %v17230_v18 = vld [vmem:[#allocation3 + $0x1c] sm:$0xf] }
 0x4fc   : > { %12838 = vmatprep.mubr.msk.bf16.mxu1 %vm6634_vm9, %v18005_v0  ;;  %v9565_v31 = vshll.u32 %v17230_v18, 16  ;;  %v9569_v0 = vshrl.u32 %v17230_v18, 16 }
 0x4fe   : > { %v9567_v16 = vrot.slane %v9565_v31, 5  ;;  %v9571_v32 = vrot.slane %v9569_v0, 4 }
 0x500   : > { %v9572_v2 = vor.u32 %v9571_v32, %v9567_v16  ;;  %v9519_v32 = vld [vmem:[#allocation3 + $0x48] sm:$0xf] }
 0x503   : > { %12839 = vmatmul.mubr.msk.bf16.gmra.mrb[28].mxu1 %vm6634_vm9, %v18008_v48  ;;  %v9559_v48 = vshll.u32 %v9507_v25, 16 }
 0x504   : > { %12842 = vmatprep.mubr.msk.bf16.mxu1 %vm6634_vm9, %v18011_v39  ;;  %v17235_v39 = vld [vmem:[#allocation3 + $0x28] sm:$0xf] }
 0x505   : > { %v9561_v35 = vrot.slane %v9559_v48, 5  ;;  %v9589_v51 = vshll.u32 %v17235_v39, 16  ;;  %v9593_v8 = vshrl.u32 %v17235_v39, 16 }
 0x507   : > { %v17247_v5 = vrot.slane %v9589_v51, 5  ;;  %v18035_v51 = vld [vmem:[#allocation52_spill] sm:$0xff] }
 0x50b   : > { %12843 = vmatmul.mubr.msk.bf16.gmra.mrb[0].mxu1 %vm6634_vm9, %v18014_v40  ;;  %v9558_v40 = vrot.slane %v9556_v20, 4 }
 0x50c   : > { %12846 = vmatprep.mubr.msk.bf16.mxu1 %vm6634_vm9, %v18017_v34  ;;  %v9583_v34 = vshll.u32 %v9510_v11, 16 }
 0x50e   : > { %v9585_v9 = vrot.slane %v9583_v34, 5  ;;  %v9623_v34 = vshll.u32 %v18034_v60, 16 }
 0x513   : > { %12847 = vmatmul.mubr.msk.bf16.gmra.mrb[4].mxu1 %vm6634_vm9, %v18020_v14  ;;  %v17240_v14 = vld [vmem:[#allocation3 + $0x20] sm:$0x1] }
 0x514   : > { %12850 = vmatprep.mubr.msk.bf16.mxu1 %vm6634_vm9, %v18023_v44  ;;  %v9613_v44 = vshll.u32 %v16777_v41, 16  ;;  %v9575_v37 = vshll.u32 %v17240_v14, 16 }
 0x516   : > { %v17251_v41 = vrot.slane %v9613_v44, 5 }
 0x51b   : > { %12851 = vmatmul.mubr.msk.bf16.gmra.mrb[8].mxu1 %vm6634_vm9, %v18026_v36  ;;  %v9562_v36 = vor.u32 %v9561_v35, %v9558_v40  ;;  %v13705_v40 = vld [vmem:[#allocation3 + $0xc0] sm:$0xff]  }
 0x51c   : > { %12854 = vmatprep.mubr.msk.bf16.mxu1 %vm6634_vm9, %v18029_v12  ;;  %v13703_v12 = vld [vmem:[#allocation3 + $0xa8] sm:$0xff]  }
 0x523   : > { %12855 = vmatmul.mubr.msk.bf16.gmra.mrb[12].mxu1 %vm6634_vm9, %v18033_v26  ;;  %v9573_v26 = vrot.slane %v9572_v2, 4  ;;  %v9641_v2 = vshrl.u32 %v18035_v51, 16 }
 0x524   : > { %12860 = vmatprep.mubr.msk.bf16.mxu1 %vm6634_vm9, %v13691_v58  ;;  %v9595_v58 = vrot.slane %v9593_v8, 4  ;;  %v9637_v8 = vshll.u32 %v18035_v51, 16 }
 0x52b   : > { %12861 = vmatmul.mubr.msk.bf16.vlgmr.msra.gmra.mrb[16].mxu1 %vm6634_vm9, %v13692_v38  ;;  %v9619_v38 = vrot.slane %v9617_v55, 4  ;;  %v9665_v55 = vshrl.u32 %v16810_v54, 16 }
 0x52c   : > { %12893 = vmatpush3.bf16.msra.mxu1 %v10038_v1  ;;  %12864 = vmatprep.mubr.msk.bf16.mxu1 %vm6634_vm9, %v13693_v56  ;;  %v9563_v1 = vrot.slane %v9562_v36, 4  ;;  %v9586_v56 = vor.u32 %v9585_v9, %v9582_v13  ;;  %v17272_v36 = vld [vmem:[#allocation3 + $0xd4] sm:$0x1] }
 0x52d   : > { %13622 = vmatprep.subr.msk.bf16.mxu1 %vm6683_vm7, %v17218_v4  ;;  %v9620_v31 = vor.u32 %v9619_v38, %v17251_v41 }
 0x52e   : > { %v9568_v20 = vsel %vm13935_vm13, %v9563_v1, %v9567_v16  ;;  %v17260_v48 = vrot.slane %v9586_v56, 4  ;;  %v9661_v16 = vshll.u32 %v16810_v54, 16  ;;  %v17279_v56 = vrot.slane %v9637_v8, 5  ;;  %v9525_v8 = vld [vmem:[#allocation3 + $0x60] sm:$0xf] }
 0x52f   : > { %v9621_v13 = vrot.slane %v9620_v31, 4 }
 0x533   : > { %12865 = vmatmul.mubr.msk.bf16.gmra.mrb[20].mxu1 %vm6634_vm9, %v13694_v50  ;;  %v9599_v50 = vshll.u32 %v17245_v29, 16  ;;  %v18056_v29 = vld [vmem:[#allocation62_spill] sm:$0xff] }
 0x534   : > { %12868 = vmatprep.mubr.msk.bf16.mxu1 %vm6634_vm9, %v13695_v33  ;;  %v9516_v33 = vld [vmem:[#allocation3 + $0x3c] sm:$0xf] }
 0x535   : > { %v9628_v0 = vshrl.u32 %v9516_v33, 16  ;;  %v9631_v11 = vshll.u32 %v9516_v33, 16  ;;  %v9652_v33 = vshrl.u32 %v9519_v32, 16 }
 0x537   : > { %v9630_v9 = vrot.slane %v9628_v0, 4  ;;  %v9625_v0 = vrot.slane %v9623_v34, 5 }
 0x53b   : > { %12869 = vmatmul.mubr.msk.bf16.gmra.mrb[24].mxu1 %vm6634_vm9, %v13696_v19  ;;  %v9577_v19 = vrot.slane %v9575_v37, 5 }
 0x53c   : > { %12872 = vmatprep.mubr.msk.bf16.mxu1 %vm6634_vm9, %v13697_v24  ;;  %v9596_v24 = vor.u32 %v9595_v58, %v17247_v5  ;;  %v10407_v58 = vrot.slane %v17272_v36, 5 }
 0x53d   : > { %v9578_v25 = vsel %vm13935_vm13, %v9573_v26, %v9577_v19  ;;  %v18036_v26 = vld [vmem:[#allocation55_spill] sm:$0xff] }
 0x53e   : > { %v9597_v35 = vrot.slane %v9596_v24, 4  ;;  %v11874_v10 = vcombine.low %v9568_v20, %v9578_v25  ;;  %v9685_v38 = vshll.u32 %v18036_v26, 16  ;;  %v9689_v1 = vshrl.u32 %v18036_v26, 16  ;;  %v13706_v24 = vld [vmem:[#allocation3 + $0xcc] sm:$0xff]  }
 0x53f   : > { %v9667_v25 = vrot.slane %v9665_v55, 4  ;;  %v9703_v26 = vshll.u32 %v9525_v8, 16 }
 0x540   : > { %v17291_v60 = vrot.slane %v9685_v38, 5  ;;  %v9691_v51 = vrot.slane %v9689_v1, 4 }
 0x543   : > { %12873 = vmatmul.mubr.msk.bf16.gmra.mrb[28].mxu1 %vm6634_vm9, %v13698_v30  ;;  %v9606_v30 = vrot.slane %v9604_v23, 4  ;;  %v9633_v23 = vrot.slane %v9631_v11, 5 }
 0x544   : > { %12876 = vmatprep.mubr.msk.bf16.mxu1 %vm6634_vm9, %v13699_v27  ;;  %v9609_v27 = vrot.slane %v9607_v52, 5  ;;  %v9522_v52 = vld [vmem:[#allocation3 + $0x54] sm:$0xf] }
 0x545   : > { %v9679_v20 = vshll.u32 %v9522_v52, 16 }
 0x546   : > { %v9610_v44 = vor.u32 %v9609_v27, %v9606_v30  ;;  %v9655_v30 = vshll.u32 %v9519_v32, 16  ;;  %v17281_v27 = vrot.slane %v9661_v16, 5  ;;  %v9626_v16 = vsel %vm13935_vm13, %v9621_v13, %v9625_v0  ;;  %v18037_v13 = vld [vmem:[#allocation57_spill] sm:$0xff] }
 0x54b   : > { %12877 = vmatmul.mubr.msk.bf16.gmra.mrb[0].mxu1 %vm6634_vm9, %v13700_v47  ;;  %v13704_v47 = vld [vmem:[#allocation3 + $0xb4] sm:$0xff]  }
 0x54c   : > { %12880 = vmatprep.mubr.msk.bf16.mxu1 %vm6634_vm9, %v13701_v3  ;;  %v17262_v3 = vrot.slane %v9599_v50, 5  ;;  %v9643_v50 = vrot.slane %v9641_v2, 4  ;;  %v9592_v2 = vsel %vm13935_vm13, %v17260_v48, %v17247_v5  ;;  %v9681_v5 = vrot.slane %v9679_v20, 5 }
 0x54d   : > { %v9700_v48 = vshrl.u32 %v9525_v8, 16  ;;  %v10508_v8 = vsel %vm6683_vm7, %v17218_v4, 0 }
 0x54e   : > { %v9602_v34 = vsel %vm13935_vm13, %v9597_v35, %v17262_v3  ;;  %v9644_v55 = vor.u32 %v9643_v50, %v17279_v56  ;;  %v9692_v35 = vor.u32 %v9691_v51, %v17291_v60  ;;  %v9705_v51 = vrot.slane %v9703_v26, 5 }
 0x54f   : > { %v11875_v38 = vcombine.low %v9592_v2, %v9602_v34 }
 0x553   : > { %12881 = vmatmul.mubr.msk.bf16.gmra.mrb[4].mxu1 %vm6634_vm9, %v13702_v46  ;;  %v17270_v46 = vld [vmem:[#allocation3 + $0xd0] sm:$0xf] }
 0x554   : > { %12884 = vmatprep.mubr.msk.bf16.mxu1 %vm6634_vm9, %v13703_v12  ;;  %v10248_v12 = vld [vmem:[#allocation3 + $0xcc] sm:$0xe]  ;;  %v10404_v37 = vrot.slane %v17270_v46, 5 }
 0x555   : > { %v11921_v54 = vrot.slane %v10248_v12, 9  ;;  %v9654_v12 = vrot.slane %v9652_v33, 4  ;;  %v18039_v33 = vld [vmem:[#allocation54_spill] sm:$0xff] }
 0x556   : > { %v10406_v19 = vrot.slane %v10404_v37, 4 }
 0x557   : > { %v17285_v31 = vsel %vm14308_vm8, %v11921_v54, %v10404_v37  ;;  %v9657_v37 = vrot.slane %v9655_v30, 5  ;;  %v18038_v54 = vld [vmem:[#allocation53_spill] sm:$0xff] }
 0x558   : > { %v17289_v11 = vsel %vm14308_vm8, %v10406_v19, %v10407_v58  ;;  %v9668_v58 = vor.u32 %v9667_v25, %v17281_v27  ;;  %v9647_v50 = vshll.u32 %v18038_v54, 16  ;;  %v18040_v25 = vld [vmem:[#allocation56_spill] sm:$0xff] }
 0x559   : > { %v11938_v32 = vcombine.low %v17285_v31, %v17289_v11  ;;  %v9658_v30 = vor.u32 %v9657_v37, %v9654_v12  ;;  %v9695_v0 = vshll.u32 %v18040_v25, 16  ;;  %v18041_v37 = vld [vmem:[#allocation61_spill] sm:$0xff]  ;;  %v13719_v11 = vld [vmem:[%s13887_s10 + $0x60] sm:$0xff]  }
 0x55a   : > { %v9669_v20 = vrot.slane %v9668_v58, 4  ;;  %v9733_v58 = vshll.u32 %v18041_v37, 16  ;;  %v13718_v31 = vld [vmem:[%s13887_s10 + $0x58] sm:$0xff]  }
 0x55b   : > { %12885 = vmatmul.mubr.msk.bf16.gmra.mrb[8].mxu1 %vm6634_vm9, %v13704_v47  ;;  %v9676_v47 = vshrl.u32 %v9522_v52, 16  ;;  %v9697_v4 = vrot.slane %v9695_v0, 5  ;;  %v9659_v26 = vrot.slane %v9658_v30, 4  ;;  %v18043_v0 = vld [vmem:[#allocation64_spill] sm:$0xff] }
 0x55c   : > { %12888 = vmatprep.mubr.msk.bf16.mxu1 %vm6634_vm9, %v13705_v40  ;;  %v9611_v40 = vrot.slane %v9610_v44, 4  ;;  %v9634_v44 = vor.u32 %v9633_v23, %v9630_v9  ;;  %v9709_v9 = vshll.u32 %v18037_v13, 16  ;;  %v9713_v23 = vshrl.u32 %v18037_v13, 16 }
 0x55d   : > { %v9678_v52 = vrot.slane %v9676_v47, 4  ;;  %v9528_v47 = vld [vmem:[#allocation3 + $0x6c] sm:$0xf]  ;;  %v9693_v13 = vrot.slane %v9692_v35, 4  ;;  %v17343_v30 = vrot.slane %v9733_v58, 5 }
 0x55e   : > { %v9616_v3 = vsel %vm13935_vm13, %v9611_v40, %v17251_v41  ;;  %v9635_v19 = vrot.slane %v9634_v44, 4  ;;  %v9702_v40 = vrot.slane %v9700_v48, 4  ;;  %v17319_v2 = vrot.slane %v9709_v9, 5 }
 0x55f   : > { %v11876_v1 = vcombine.low %v9616_v3, %v9626_v16  ;;  %v9682_v41 = vor.u32 %v9681_v5, %v9678_v52  ;;  %v9715_v34 = vrot.slane %v9713_v23, 4  ;;  %v9649_v16 = vrot.slane %v9647_v50, 5  ;;  %v9531_v5 = vld [vmem:[#allocation3 + $0x78] sm:$0xf] }
 0x560   : > { %v9724_v54 = vshrl.u32 %v9528_v47, 16  ;;  %v9727_v44 = vshll.u32 %v9528_v47, 16  ;;  %v9640_v12 = vsel %vm13935_vm13, %v9635_v19, %v17279_v56  ;;  %v9737_v52 = vshrl.u32 %v18041_v37, 16  ;;  %v18042_v50 = vld [vmem:[#allocation60_spill] sm:$0xff] }
 0x561   : > { %v9683_v9 = vrot.slane %v9682_v41, 4  ;;  %v9698_v56 = vsel %vm13935_vm13, %v9693_v13, %v9697_v4  ;;  %v9706_v23 = vor.u32 %v9705_v51, %v9702_v40  ;;  %v9748_v19 = vshrl.u32 %v9531_v5, 16 }
 0x562   : > { %v9739_v25 = vrot.slane %v9737_v52, 4  ;;  %v9757_v47 = vshll.u32 %v18043_v0, 16  ;;  %v9664_v40 = vsel %vm13935_vm13, %v9659_v26, %v17281_v27  ;;  %v9537_v52 = vld [vmem:[#allocation3 + $0x90] sm:$0xf] }
 0x563   : > { %12889 = vmatmul.mubr.msk.bf16.gmra.mrb[12].mxu1 %vm6634_vm9, %v13706_v24  ;;  %v9645_v24 = vrot.slane %v9644_v55, 4  ;;  %v17324_v55 = vld [vmem:[%s17688_s5] sm:$0x3]  ;;  %v9688_v51 = vsel %vm13935_vm13, %v9683_v9, %v17291_v60  ;;  %v9750_v37 = vrot.slane %v9748_v19, 4 }
 0x564   : > { %12894 = vmatprep.mubr.msk.bf16.mxu1 %vm6634_vm9, %v11874_v10  ;;  %v9671_v10 = vshll.u32 %v18039_v33, 16  ;;  %v9719_v33 = vshll.u32 %v18042_v50, 16  ;;  %v11879_v13 = vcombine.low %v9688_v51, %v9698_v56  ;;  %v9740_v27 = vor.u32 %v9739_v25, %v17343_v30 }
 0x565   : > { %v9650_v48 = vsel %vm13935_vm13, %v9645_v24, %v9649_v16  ;;  %v9751_v24 = vshll.u32 %v9531_v5, 16  ;;  %v9759_v5 = vrot.slane %v9757_v47, 5  ;;  %v9805_v50 = vshll.u32 %v16912_v42, 16 }
 0x566   : > { %v9673_v3 = vrot.slane %v9671_v10, 5  ;;  %v9729_v10 = vrot.slane %v9727_v44, 5  ;;  %v11877_v41 = vcombine.low %v9640_v12, %v9650_v48  ;;  %v9721_v16 = vrot.slane %v9719_v33, 5  ;;  %v18044_v44 = vld [vmem:[#allocation66_spill] sm:$0xff] }
 0x567   : > { %v9743_v4 = vshll.u32 %v18044_v44, 16  ;;  %v9753_v58 = vrot.slane %v9751_v24, 5  ;;  %v9809_v33 = vshrl.u32 %v16912_v42, 16 }
 0x568   : > { %v9674_v35 = vsel %vm13935_vm13, %v9669_v20, %v9673_v3  ;;  %v9761_v20 = vshrl.u32 %v18043_v0, 16  ;;  %v9534_v3 = vld [vmem:[#allocation3 + $0x84] sm:$0xf]  ;;  %v9741_v0 = vrot.slane %v9740_v27, 4 }
 0x569   : > { %v9772_v60 = vshrl.u32 %v9534_v3, 16  ;;  %v9775_v26 = vshll.u32 %v9534_v3, 16  ;;  %v9745_v19 = vrot.slane %v9743_v4, 5  ;;  %v9754_v24 = vor.u32 %v9753_v58, %v9750_v37 }
 0x56a   : > { %v9763_v48 = vrot.slane %v9761_v20, 4  ;;  %v18046_v20 = vld [vmem:[#allocation67_spill] sm:$0xff] }
 0x56b   : > { %12895 = vmatmul.mubr.msk.bf16.vlgmr.msra.gmra.mrb[16].mxu1 %vm6634_vm9, %v11875_v38  ;;  %v9716_v38 = vor.u32 %v9715_v34, %v17319_v2  ;;  %v9707_v34 = vrot.slane %v9706_v23, 4  ;;  %v9796_v23 = vshrl.u32 %v9537_v52, 16  ;;  %v9777_v51 = vrot.slane %v9775_v26, 5  ;;  %v18047_v26 = vld [vmem:[#allocation73_spill] sm:$0xff] }
 0x56c   : > { %12927 = vmatpush3.bf16.msra.mxu1 %v10508_v8  ;;  %12898 = vmatprep.mubr.msk.bf16.mxu1 %vm6634_vm9, %v11876_v1  ;;  %v9726_v1 = vrot.slane %v9724_v54, 4  ;;  %v11878_v8 = vcombine.low %v9664_v40, %v9674_v35  ;;  %v18045_v35 = vld [vmem:[#allocation70_spill] sm:$0xff]  ;;  %v9764_v47 = vor.u32 %v9763_v48, %v9759_v5  ;;  %v9774_v40 = vrot.slane %v9772_v60, 4 }
 0x56d   : > { %13623 = vmatprep.subr.msk.bf16.mxu1 %vm1526_vm0, %v17324_v55  ;;  %v9717_v54 = vrot.slane %v9716_v38, 4  ;;  %v9781_v9 = vshll.u32 %v18045_v35, 16  ;;  %v9785_v56 = vshrl.u32 %v18045_v35, 16  ;;  %v9799_v38 = vshll.u32 %v9537_v52, 16 }
 0x56e   : > { %v9730_v12 = vor.u32 %v9729_v10, %v9726_v1  ;;  %v9712_v1 = vsel %vm13935_vm13, %v9707_v34, %v17319_v2  ;;  %v9798_v42 = vrot.slane %v9796_v23, 4  ;;  %v17369_v52 = vrot.slane %v9805_v50, 5  ;;  %v9540_v34 = vld [vmem:[#allocation3 + $0x9c] sm:$0xf] }
 0x56f   : > { %v9722_v10 = vsel %vm13935_vm13, %v9717_v54, %v9721_v16  ;;  %v9787_v3 = vrot.slane %v9785_v56, 4  ;;  %v9801_v44 = vrot.slane %v9799_v38, 5  ;;  %v9811_v2 = vrot.slane %v9809_v33, 4  ;;  %v18048_v38 = vld [vmem:[#allocation77_spill] sm:$0xff] }
 0x570   : > { %v9731_v25 = vrot.slane %v9730_v12, 4  ;;  %v11880_v35 = vcombine.low %v9712_v1, %v9722_v10  ;;  %v9755_v16 = vrot.slane %v9754_v24, 4  ;;  %v9746_v4 = vsel %vm13935_vm13, %v9741_v0, %v9745_v19  ;;  %v9543_v1 = vld [vmem:[#allocation3 + $0xa8] sm:$0xf]  ;;  %v18049_v19 = vld [vmem:[#allocation75_spill] sm:$0xff] }
 0x571   : > { %v9765_v37 = vrot.slane %v9764_v47, 4  ;;  %v9778_v58 = vor.u32 %v9777_v51, %v9774_v40  ;;  %v9820_v27 = vshrl.u32 %v9540_v34, 16  ;;  %v9823_v48 = vshll.u32 %v9540_v34, 16 }
 0x572   : > { %v9736_v54 = vsel %vm13935_vm13, %v9731_v25, %v17343_v30  ;;  %v9802_v56 = vor.u32 %v9801_v44, %v9798_v42  ;;  %v9760_v30 = vsel %vm13935_vm13, %v9755_v16, %v9759_v5  ;;  %v9829_v50 = vshll.u32 %v18048_v38, 16  ;;  %v18050_v25 = vld [vmem:[#allocation78_spill] sm:$0xff] }
 0x573   : > { %12899 = vmatmul.mubr.msk.bf16.gmra.mrb[20].mxu1 %vm6634_vm9, %v11877_v41  ;;  %v9767_v41 = vshll.u32 %v18046_v20, 16  ;;  %v11881_v23 = vcombine.low %v9736_v54, %v9746_v4  ;;  %v9833_v33 = vshrl.u32 %v18048_v38, 16  ;;  %v9815_v24 = vshll.u32 %v18049_v19, 16 }
 0x574   : > { %12902 = vmatprep.mubr.msk.bf16.mxu1 %vm6634_vm9, %v11878_v8  ;;  %v17367_v8 = vrot.slane %v9781_v9, 5  ;;  %v9791_v9 = vshll.u32 %v18047_v26, 16  ;;  %v9853_v0 = vshll.u32 %v18050_v25, 16  ;;  %v9857_v47 = vshrl.u32 %v18050_v25, 16 }
 0x575   : > { %v9769_v60 = vrot.slane %v9767_v41, 5  ;;  %v9779_v20 = vrot.slane %v9778_v58, 4  ;;  %v9822_v40 = vrot.slane %v9820_v27, 4  ;;  %v9825_v51 = vrot.slane %v9823_v48, 5  ;;  %v18051_v48 = vld [vmem:[#allocation80_spill] sm:$0xff] }
 0x576   : > { %v9788_v12 = vor.u32 %v9787_v3, %v17367_v8  ;;  %v9803_v3 = vrot.slane %v9802_v56, 4  ;;  %v9844_v42 = vshrl.u32 %v9543_v1, 16  ;;  %v9847_v44 = vshll.u32 %v9543_v1, 16  ;;  %v9549_v1 = vld [vmem:[#allocation3 + $0xc0] sm:$0xf] }
 0x577   : > { %v9770_v10 = vsel %vm13935_vm13, %v9765_v37, %v9769_v60  ;;  %v9793_v34 = vrot.slane %v9791_v9, 5  ;;  %v9835_v16 = vrot.slane %v9833_v33, 4  ;;  %v9817_v54 = vrot.slane %v9815_v24, 5  ;;  %v9546_v60 = vld [vmem:[#allocation3 + $0xb4] sm:$0xf] }
 0x578   : > { %v9789_v41 = vrot.slane %v9788_v12, 4  ;;  %v17393_v4 = vrot.slane %v9853_v0, 5  ;;  %v9859_v37 = vrot.slane %v9857_v47, 4  ;;  %v9784_v58 = vsel %vm13935_vm13, %v9779_v20, %v17367_v8 }
 0x579   : > { %v9826_v27 = vor.u32 %v9825_v51, %v9822_v40  ;;  %v9839_v26 = vshll.u32 %v18051_v48, 16  ;;  %v9808_v9 = vsel %vm13935_vm13, %v9803_v3, %v17369_v52  ;;  %v9868_v38 = vshrl.u32 %v9546_v60, 16 }
 0x57a   : > { %v9794_v12 = vsel %vm13935_vm13, %v9789_v41, %v9793_v34  ;;  %v9871_v19 = vshll.u32 %v9546_v60, 16  ;;  %v9901_v24 = vshll.u32 %v16990_v7, 16  ;;  %v9863_v40 = vshll.u32 %v16955_v61, 16 }
 0x57b   : > { %12903 = vmatmul.mubr.msk.bf16.gmra.mrb[24].mxu1 %vm6634_vm9, %v11879_v13  ;;  %v9812_v13 = vor.u32 %v9811_v2, %v17369_v52  ;;  %v11882_v2 = vcombine.low %v9760_v30, %v9770_v10  ;;  %v9860_v10 = vor.u32 %v9859_v37, %v17393_v4  ;;  %v9905_v52 = vshrl.u32 %v16990_v7, 16 }
 0x57c   : > { %12906 = vmatprep.mubr.msk.bf16.mxu1 %vm6634_vm9, %v11880_v35  ;;  %v17390_v35 = vrot.slane %v9829_v50, 5  ;;  %v18052_v50 = vld [vmem:[#allocation84_spill] sm:$0xff]  ;;  %v11883_v25 = vcombine.low %v9784_v58, %v9794_v12  ;;  %v9827_v47 = vrot.slane %v9826_v27, 4  ;;  %v9841_v20 = vrot.slane %v9839_v26, 5 }
 0x57d   : > { %v9813_v5 = vrot.slane %v9812_v13, 4  ;;  %v9846_v13 = vrot.slane %v9844_v42, 4  ;;  %v9877_v8 = vshll.u32 %v18052_v50, 16  ;;  %v9881_v33 = vshrl.u32 %v18052_v50, 16  ;;  %v13766_v50 = vld [vmem:[#allocation3 + $0xbc] sm:$0x1] }
 0x57e   : > { %v9836_v30 = vor.u32 %v9835_v16, %v17390_v35  ;;  %v9892_v51 = vshrl.u32 %v9549_v1, 16  ;;  %v9895_v3 = vshll.u32 %v9549_v1, 16  ;;  %v9861_v16 = vrot.slane %v9860_v10, 4 }
 0x57f   : > { %v9818_v56 = vsel %vm13935_vm13, %v9813_v5, %v9817_v54  ;;  %v9552_v5 = vld [vmem:[#allocation3 + $0xcc] sm:$0xf]  ;;  %v9883_v34 = vrot.slane %v9881_v33, 4  ;;  %v9873_v54 = vrot.slane %v9871_v19, 5  ;;  %v9903_v37 = vrot.slane %v9901_v24, 5 }
 0x580   : > { %v11884_v0 = vcombine.low %v9808_v9, %v9818_v56  ;;  %v9837_v42 = vrot.slane %v9836_v30, 4  ;;  %v9907_v7 = vrot.slane %v9905_v52, 4  ;;  %v9916_v60 = vshrl.u32 %v9552_v5, 16 }
 0x581   : > { %v9919_v58 = vshll.u32 %v9552_v5, 16  ;;  %v9925_v12 = vshll.u32 %v17270_v46, 16  ;;  %v9929_v61 = vshrl.u32 %v17270_v46, 16  ;;  %v9865_v48 = vrot.slane %v9863_v40, 5 }
 0x582   : > { %v9894_v26 = vrot.slane %v9892_v51, 4  ;;  %v9897_v9 = vrot.slane %v9895_v3, 5  ;;  %v9832_v56 = vsel %vm13935_vm13, %v9827_v47, %v17390_v35  ;;  %v9908_v33 = vor.u32 %v9907_v7, %v9903_v37 }
 0x583   : > { %12907 = vmatmul.mubr.msk.bf16.gmra.mrb[28].mxu1 %vm6634_vm9, %v11881_v23  ;;  %v9849_v23 = vrot.slane %v9847_v44, 5  ;;  %v9870_v44 = vrot.slane %v9868_v38, 4  ;;  %v9866_v30 = vsel %vm13935_vm13, %v9861_v16, %v9865_v48  ;;  %v9918_v46 = vrot.slane %v9916_v60, 4 }
 0x584   : > { %12910 = vmatprep.mubr.msk.bf16.mxu1 %vm6634_vm9, %v11882_v2  ;;  %v9879_v2 = vrot.slane %v9877_v8, 5  ;;  %v9887_v8 = vshll.u32 %v13766_v50, 16  ;;  %v9921_v1 = vrot.slane %v9919_v58, 5  ;;  %v9927_v10 = vrot.slane %v9925_v12, 5 }
 0x585   : > { %v9850_v41 = vor.u32 %v9849_v23, %v9846_v13  ;;  %v9842_v13 = vsel %vm13935_vm13, %v9837_v42, %v9841_v20  ;;  %v9874_v38 = vor.u32 %v9873_v54, %v9870_v44  ;;  %v9931_v19 = vrot.slane %v9929_v61, 4 }
 0x586   : > { %v9884_v23 = vor.u32 %v9883_v34, %v9879_v2  ;;  %v11885_v24 = vcombine.low %v9832_v56, %v9842_v13  ;;  %v9898_v52 = vor.u32 %v9897_v9, %v9894_v26  ;;  %v9909_v40 = vrot.slane %v9908_v33, 4 }
 0x587   : > { %v9851_v27 = vrot.slane %v9850_v41, 4  ;;  %v9889_v41 = vrot.slane %v9887_v8, 5  ;;  %v9875_v51 = vrot.slane %v9874_v38, 4  ;;  %v9922_v3 = vor.u32 %v9921_v1, %v9918_v46  ;;  %v10234_v8 = vld [vmem:[#allocation3 + $0x24] sm:$0xe] }
 0x588   : > { %v9885_v20 = vrot.slane %v9884_v23, 4  ;;  %v9932_v5 = vor.u32 %v9931_v19, %v9927_v10  ;;  %v9935_v42 = vshll.u32 %v17272_v36, 16  ;;  %v9899_v44 = vrot.slane %v9898_v52, 4  ;;  %v18054_v19 = vld [vmem:[#allocation59_spill] sm:$0xff] }
 0x589   : > { %v9856_v35 = vsel %vm13935_vm13, %v9851_v27, %v17393_v4  ;;  %v10299_v54 = vrot.slane %v17230_v18, 5  ;;  %v9880_v7 = vsel %vm13935_vm13, %v9875_v51, %v9879_v2  ;;  %v9923_v60 = vrot.slane %v9922_v3, 4  ;;  %v10233_v2 = vld [vmem:[#allocation3 + $0x18] sm:$0xe]  ;;  %v18068_v3 = vld [vmem:[#allocation74_spill] sm:$0xff] }
 0x58a   : > { %v11886_v47 = vcombine.low %v9856_v35, %v9866_v30  ;;  %v9890_v4 = vsel %vm13935_vm13, %v9885_v20, %v9889_v41  ;;  %v9933_v58 = vrot.slane %v9932_v5, 4  ;;  %v9937_v12 = vrot.slane %v9935_v42, 5  ;;  %v18057_v35 = vld [vmem:[#allocation65_spill] sm:$0xff]  ;;  %v18065_v41 = vld [vmem:[#allocation72_spill] sm:$0xff]  ;;  %v18069_v5 = vld [vmem:[#allocation79_spill] sm:$0xff] }
 0x58b   : > { %12911 = vmatmul.mubr.msk.bf16.gmra.mrb[0].mxu1 %vm6634_vm9, %v11883_v25  ;;  %v13767_v25 = vld [vmem:[#allocation3 + $0xc8] sm:$0x1]  ;;  %v11887_v61 = vcombine.low %v9880_v7, %v9890_v4  ;;  %v9904_v36 = vsel %vm13935_vm13, %v9899_v44, %v9903_v37  ;;  %v10301_v48 = vrot.slane %v10299_v54, 4  ;;  %v9928_v26 = vsel %vm13935_vm13, %v9923_v60, %v9927_v10  ;;  %v18071_v44 = vld [vmem:[#allocation81_spill] sm:$0xff] }
 0x58c   : > { %12914 = vmatprep.mubr.msk.bf16.mxu1 %vm6634_vm9, %v11884_v0  ;;  %v9911_v0 = vshll.u32 %v13767_v25, 16  ;;  %v9938_v18 = vsel %vm13935_vm13, %v9933_v58, %v9937_v12  ;;  %v10302_v9 = vrot.slane %v17240_v14, 5  ;;  %v10306_v56 = vrot.slane %v17235_v39, 5  ;;  %v18053_v10 = vld [vmem:[#allocation58_spill] sm:$0xff]  ;;  %v18060_v25 = vld [vmem:[#allocation68_spill] sm:$0xff] }
 0x58d   : > { %v11889_v13 = vcombine.low %v9928_v26, %v9938_v18  ;;  %v11906_v23 = vrot.slane %v10233_v2, 9  ;;  %v11907_v14 = vrot.slane %v10234_v8, 9  ;;  %v10911_v1 = vsel %vm1526_vm0, %v17324_v55, 0  ;;  %v18062_v55 = vld [vmem:[#allocation69_spill] sm:$0xff]  ;;  %v13721_v12 = vld [vmem:[%s13887_s10 + $0x70] sm:$0xff]   ;;  %v18081_v26 = vld [vmem:[#allocation35_spill] sm:$0xff] }
 0x58e   : > { %v9913_v34 = vrot.slane %v9911_v0, 5  ;;  %v10303_v37 = vsel %vm14308_vm8, %v10301_v48, %v10302_v9  ;;  %v10308_v50 = vrot.slane %v10306_v56, 4  ;;  %v18058_v52 = vcombine.low %v18056_v29, %v18057_v35  ;;  %v17562_v2 = vld [vmem:[%s17689_s6] ss:$0 sm:$0xff] }
 0x58f   : > { %v10300_v30 = vsel %vm14308_vm8, %v11906_v23, %v10299_v54  ;;  %v10307_v33 = vsel %vm14308_vm8, %v11907_v14, %v10306_v56  ;;  %v18061_v0 = vcombine.low %v18059_v43, %v18060_v25  ;;  %v18070_v42 = vcombine.low %v18068_v3, %v18069_v5  ;;  %v18075_v54 = vld [vmem:[#allocation85_spill] sm:$0xff]  ;;  %v18082_v9 = vld [vmem:[#allocation30_spill] sm:$0xff] }
 0x590   : > { %v9914_v16 = vsel %vm13935_vm13, %v9909_v40, %v9913_v34  ;;  %v11923_v38 = vcombine.low %v10300_v30, %v10303_v37  ;;  %v10310_v39 = vsel %vm14308_vm8, %v10308_v50, %v10309_v17  ;;  %v18066_v40 = vld [vmem:[#allocation76_spill] sm:$0xff]  ;;  %v18072_v34 = vld [vmem:[#allocation82_spill] sm:$0xff]  ;;  %v18077_v60 = vcombine.low %v16986_v6, %v16994_v15 }
 0x591   : > { %v11888_v27 = vcombine.low %v9904_v36, %v9914_v16  ;;  %v11924_v46 = vcombine.low %v10307_v33, %v10310_v39  ;;  %v18067_v51 = vcombine.low %v18065_v41, %v18066_v40  ;;  %v18073_v4 = vcombine.low %v18071_v44, %v18072_v34  ;;  %v18074_v16 = vld [vmem:[#allocation83_spill] sm:$0xff]  ;;  %v13707_v15 = vld [vmem:[%s13887_s10] sm:$0xff]  }
 0x592   : > { %v18076_v7 = vcombine.low %v18074_v16, %v18075_v54  ;;  %v18078_v58 = vcombine.low %v17016_v21, %v17020_v62  ;;  %v18079_v6 = vcombine.low %v17050_v59, %v17054_v22  ;;  %v13709_v21 = vld [vmem:[%s13887_s10 + $0x10] sm:$0xff]   ;;  %v13712_v62 = vld [vmem:[%s13887_s10 + $0x28] sm:$0xff]   ;;  %v17553_v36 = vld [vmem:[%s17687_s4] ss:$0 sm:$0xff] }
 0x593   : > { %12915 = vmatmul.mubr.msk.bf16.gmra.mrb[4].mxu1 %vm6634_vm9, %v11885_v24  ;;  %v18055_v24 = vcombine.low %v18053_v10, %v18054_v19  ;;  %v13716_v59 = vld [vmem:[%s13887_s10 + $0x48] sm:$0xff]   ;;  %v13717_v22 = vld [vmem:[%s13887_s10 + $0x50] sm:$0xff]   ;;  %v13005_v18 = vadd.f32 %v17553_v36, %v18081_v26  ;;  %v12996_v56 = vadd.f32 %v18082_v9, %v17553_v36  ;;  %v18084_v39 = vld [vmem:[#allocation38_spill] sm:$0xff] }
 0x594   : > { %12918 = vmatprep.mubr.msk.bf16.mxu1 %vm6634_vm9, %v11886_v47  ;;  %v18063_v47 = vld [vmem:[#allocation71_spill] sm:$0xff]  ;;  %v13008_v33 = vadd.f32 %v18084_v39, %v17553_v36  ;;  %v18095_v39 = vld [vmem:[#allocation50_spill] sm:$0xff] }
 0x595   : > { %v18064_v20 = vcombine.low %v18062_v55, %v18063_v47  ;;  %v13006_v14 = vadd.f32 %v13005_v18, %v17562_v2  ;;  %v18085_v19 = vld [vmem:[#allocation39_spill] sm:$0xff]  ;;  %v18087_v55 = vld [vmem:[#allocation41_spill] sm:$0xff] }
 0x596   : > { %v13017_v47 = vadd.f32 %v17553_v36, %v18087_v55  ;;  %v13009_v40 = vadd.f32 %v13008_v33, %v17562_v2  ;;  %v18088_v54 = vld [vmem:[#allocation43_spill] sm:$0xff]  ;;  %v13041_v33 = vadd.f32 %v17553_v36, %v18095_v39 }
 0x597   : > { %v18092_v18 = vld [vmem:[#allocation47_spill] sm:$0xff] }
 0x598   : > { %v13018_v16 = vadd.f32 %v13017_v47, %v17562_v2  ;;  %v13032_v9 = vadd.f32 %v18092_v18, %v17553_v36 }
 0x59b   : > { %12919 = vmatmul.mubr.msk.bf16.gmra.mrb[8].mxu1 %vm6634_vm9, %v11887_v61  ;;  %v13722_v61 = vld [vmem:[%s13887_s10 + $0x78] sm:$0xff]  }
 0x59c   : > { %12922 = vmatprep.mubr.msk.bf16.mxu1 %vm6634_vm9, %v11888_v27  ;;  %v18080_v27 = vld [vmem:[#allocation32_spill] sm:$0xff] }
 0x59d   : > { %v13002_v48 = vadd.f32 %v18080_v27, %v17553_v36 }
 0x59f   : > { %v13003_v50 = vadd.f32 %v13002_v48, %v17562_v2 }
 0x5a3   : > { %12923 = vmatmul.mubr.msk.bf16.gmra.mrb[12].mxu1 %vm6634_vm9, %v11889_v13  ;;  %v18083_v13 = vld [vmem:[#allocation31_spill] sm:$0xff] }
 0x5a4   : > { %12928 = vmatprep.mubr.msk.bf16.mxu1 %vm6634_vm9, %v11923_v38  ;;  %v12999_v23 = vadd.f32 %v17553_v36, %v18083_v13 }
 0x5ab   : > { %12929 = vmatmul.mubr.msk.bf16.vlgmr.msra.gmra.mrb[16].mxu1 %vm6634_vm9, %v11924_v46 }
 0x5ac   : > { %12961 = vmatpush3.bf16.msra.mxu1 %v10911_v1  ;;  %12932 = vmatprep.mubr.msk.bf16.mxu1 %vm6634_vm9, %v18055_v24  ;;  %v13011_v24 = vadd.f32 %v17553_v36, %v18085_v19 }
 0x5ae   : > { %v13012_v3 = vadd.f32 %v13011_v24, %v17562_v2 }
 0x5b3   : > { %12933 = vmatmul.mubr.msk.bf16.gmra.mrb[20].mxu1 %vm6634_vm9, %v18058_v52  ;;  %v18086_v52 = vld [vmem:[#allocation40_spill] sm:$0xff] }
 0x5b4   : > { %12936 = vmatprep.mubr.msk.bf16.mxu1 %vm6634_vm9, %v18061_v0  ;;  %v13014_v43 = vadd.f32 %v18086_v52, %v17553_v36 }
 0x5b6   : > { %v13015_v44 = vadd.f32 %v13014_v43, %v17562_v2 }
 0x5bb   : > { %12937 = vmatmul.mubr.msk.bf16.gmra.mrb[24].mxu1 %vm6634_vm9, %v18064_v20 }
 0x5bc   : > { %12940 = vmatprep.mubr.msk.bf16.mxu1 %vm6634_vm9, %v18067_v51 }
 0x5c3   : > { %12941 = vmatmul.mubr.msk.bf16.gmra.mrb[28].mxu1 %vm6634_vm9, %v18070_v42 }
 0x5c4   : > { %12944 = vmatprep.mubr.msk.bf16.mxu1 %vm6634_vm9, %v18073_v4 }
 0x5cb   : > { %12945 = vmatmul.mubr.msk.bf16.gmra.mrb[0].mxu1 %vm6634_vm9, %v18076_v7  ;;  %v13020_v7 = vadd.f32 %v18088_v54, %v17553_v36 }
 0x5cc   : > { %12948 = vmatprep.mubr.msk.bf16.mxu1 %vm6634_vm9, %v18077_v60 }
 0x5d3   : > { %12949 = vmatmul.mubr.msk.bf16.gmra.mrb[4].mxu1 %vm6634_vm9, %v11934_v57  ;;  %v13711_v57 = vld [vmem:[%s13887_s10 + $0x20] sm:$0xff]  }
 0x5d4   : > { %12952 = vmatprep.mubr.msk.bf16.mxu1 %vm6634_vm9, %v18078_v58 }
 0x5db   : > { %12953 = vmatmul.mubr.msk.bf16.gmra.mrb[8].mxu1 %vm6634_vm9, %v11936_v45  ;;  %v13715_v45 = vld [vmem:[%s13887_s10 + $0x40] sm:$0xff]  }
 0x5dc   : > { %12956 = vmatprep.mubr.msk.bf16.mxu1 %vm6634_vm9, %v18079_v6 }
 0x5e3   : > { %12957 = vmatmul.mubr.msk.bf16.gmra.mrb[12].mxu1 %vm6634_vm9, %v11938_v32  ;;  %v13720_v32 = vld [vmem:[%s13887_s10 + $0x68] sm:$0xff]   ;;  %s11992_s10 = sshll.u32 %s18097_s25, 8 }
 0x5e4   : > { %12962 = vmatprep.mubr.msk.bf16.mxu1 %vm1477_vm14, %v13707_v15  ;;  %s17579_s16 = scalar_lea.vmem %s17690_s7, %s11992_s10  ;;  %v18089_v15 = vld [vmem:[#allocation44_spill] sm:$0xff] }
 0x5eb   : > { %12963 = vmatmul.mubr.msk.bf16.vlgmr.msra.gmra.mrb[16].mxu1 %vm1477_vm14, %v13708_v53  ;;  %v13023_v53 = vadd.f32 %v17553_v36, %v18089_v15 }
 0x5ec   : > { %12966 = vmatprep.mubr.msk.bf16.mxu1 %vm1477_vm14, %v13709_v21 }
 0x5f3   : > { %12967 = vmatmul.mubr.msk.bf16.gmra.mrb[20].mxu1 %vm1477_vm14, %v13710_v49 }
 0x5f4   : > { %12970 = vmatprep.mubr.msk.bf16.mxu1 %vm1477_vm14, %v13711_v57  ;;  %v18090_v57 = vld [vmem:[#allocation45_spill] sm:$0xff] }
 0x5fb   : > { %12971 = vmatmul.mubr.msk.bf16.gmra.mrb[24].mxu1 %vm1477_vm14, %v13712_v62  ;;  %v13026_v62 = vadd.f32 %v18090_v57, %v17553_v36 }
 0x5fc   : > { %12974 = vmatprep.mubr.msk.bf16.mxu1 %vm1477_vm14, %v13713_v63 }
 0x603   : > { %12975 = vmatmul.mubr.msk.bf16.gmra.mrb[28].mxu1 %vm1477_vm14, %v13714_v28  ;;  %v18091_v28 = vld [vmem:[#allocation46_spill] sm:$0xff] }
 0x604   : > { %12978 = vmatprep.mubr.msk.bf16.mxu1 %vm1477_vm14, %v13715_v45  ;;  %v13029_v45 = vadd.f32 %v17553_v36, %v18091_v28 }
 0x606   : > { %v13030_v26 = vadd.f32 %v13029_v45, %v17562_v2 }
 0x60b   : > { %12979 = vmatmul.mubr.msk.bf16.gmra.mrb[0].mxu1 %vm1477_vm14, %v13716_v59 }
 0x60c   : > { %12982 = vmatprep.mubr.msk.bf16.mxu1 %vm1477_vm14, %v13717_v22  ;;  %v13021_v22 = vadd.f32 %v13020_v7, %v17562_v2 }
 0x613   : > { %12983 = vmatmul.mubr.msk.bf16.gmra.mrb[4].mxu1 %vm1477_vm14, %v13718_v31 }
 0x614   : > { %12986 = vmatprep.mubr.msk.bf16.mxu1 %vm1477_vm14, %v13719_v11  ;;  %v13024_v11 = vadd.f32 %v13023_v53, %v17562_v2 }
 0x61b   : > { %12987 = vmatmul.mubr.msk.bf16.gmra.mrb[8].mxu1 %vm1477_vm14, %v13720_v32 }
 0x61c   : > { %12990 = vmatprep.mubr.msk.bf16.mxu1 %vm1477_vm14, %v13721_v12 }
 0x623   : > { %12991 = vmatmul.mubr.msk.bf16.gmra.mrb[12].mxu1 %vm1477_vm14, %v13722_v61  ;;  %v13027_v61 = vadd.f32 %v13026_v62, %v17562_v2 }
 0x6be   : > { %v12964_v37 = vpop.f32.mrb[16].mxu1 }
 0x6bf   : > { %v12997_v30 = vadd.f32 %v12996_v56, %v12964_v37  ;;  %v10947_v38 = vpop.f32.mrb[17].mxu1  ;;  %v18093_v37 = vld [vmem:[#allocation48_spill] sm:$0xff] }
 0x6c0   : > { %v13000_v8 = vadd.f32 %v12999_v23, %v10947_v38  ;;  %v12965_v17 = vpop.f32.mrb[18].mxu1 }
 0x6c1   : > { %v12998_v46 = vadd.f32 %v12997_v30, %v17562_v2  ;;  %v13004_v1 = vadd.f32 %v13003_v50, %v12965_v17  ;;  %v10950_v10 = vpop.f32.mrb[19].mxu1  ;;  %v13035_v30 = vadd.f32 %v17553_v36, %v18093_v37 }
 0x6c2   : > { %v13001_v29 = vadd.f32 %v13000_v8, %v17562_v2  ;;  %v13007_v35 = vadd.f32 %v13006_v14, %v10950_v10  ;;  %v18094_v8 = vld [vmem:[#allocation49_spill] sm:$0xff] }
 0x6c3   : > { %v11108_v25 = vmax.f32 %v12998_v46, 0.0  ;;  %v11109_v0 = vmax.f32 %v13004_v1, 0.0  ;;  %v13038_v17 = vadd.f32 %v18094_v8, %v17553_v36  ;;  %v13033_v1 = vadd.f32 %v13032_v9, %v17562_v2 }
 0x6c4   : > { %v11106_v20 = vmax.f32 %v13001_v29, 0.0  ;;  %v11107_v41 = vmax.f32 %v13007_v35, 0.0  ;;  %v13036_v19 = vadd.f32 %v13035_v30, %v17562_v2 }
 0x6c5   : > { %11140 = vst.msk [vmem:[%s17579_s16 + $0x10] sm:$0xff] %vm6634_vm9, %v11108_v25  ;;  %11141 = vst.msk [vmem:[%s17579_s16 + $0x18] sm:$0xff] %vm6634_vm9, %v11109_v0  ;;  %v13039_v35 = vadd.f32 %v13038_v17, %v17562_v2  ;;  %v13042_v25 = vadd.f32 %v13041_v33, %v17562_v2 }
 0x6c6   : > { %11138 = vst.msk [vmem:[%s17579_s16] sm:$0xff] %vm6634_vm9, %v11106_v20  ;;  %11139 = vst.msk [vmem:[%s17579_s16 + $0x8] sm:$0xff] %vm6634_vm9, %v11107_v41  ;;  %v12968_v51 = vpop.f32.mrb[20].mxu1 }
 0x6c7   : > { %v13010_v5 = vadd.f32 %v13009_v40, %v12968_v51  ;;  %v10963_v42 = vpop.f32.mrb[21].mxu1  ;;  %v13046_v51 = vadd.f32 %v17562_v2, %v17553_v36 }
 0x6c8   : > { %v13013_v34 = vadd.f32 %v13012_v3, %v10963_v42  ;;  %v12969_v4 = vpop.f32.mrb[22].mxu1 }
 0x6c9   : > { %v11112_v60 = vmax.f32 %v13010_v5, 0.0  ;;  %v13016_v58 = vadd.f32 %v13015_v44, %v12969_v4  ;;  %v10966_v6 = vpop.f32.mrb[23].mxu1 }
 0x6ca   : > { %v11110_v21 = vmax.f32 %v13013_v34, 0.0  ;;  %v13019_v49 = vadd.f32 %v13018_v16, %v10966_v6 }
 0x6cb   : > { %11144 = vst.msk [vmem:[%s17579_s16 + $0x30] sm:$0xff] %vm6634_vm9, %v11112_v60  ;;  %v11113_v63 = vmax.f32 %v13016_v58, 0.0 }
 0x6cc   : > { %11142 = vst.msk [vmem:[%s17579_s16 + $0x20] sm:$0xff] %vm6634_vm9, %v11110_v21  ;;  %v11111_v59 = vmax.f32 %v13019_v49, 0.0 }
 0x6cd   : > { %11145 = vst.msk [vmem:[%s17579_s16 + $0x38] sm:$0xff] %vm6634_vm9, %v11113_v63 }
 0x6ce   : > { %11143 = vst.msk [vmem:[%s17579_s16 + $0x28] sm:$0xff] %vm6634_vm9, %v11111_v59  ;;  %v12972_v31 = vpop.f32.mrb[24].mxu1 }
 0x6cf   : > { %v13022_v32 = vadd.f32 %v13021_v22, %v12972_v31  ;;  %v10979_v12 = vpop.f32.mrb[25].mxu1 }
 0x6d0   : > { %v13025_v27 = vadd.f32 %v13024_v11, %v10979_v12  ;;  %v12973_v48 = vpop.f32.mrb[26].mxu1 }
 0x6d1   : > { %v11116_v56 = vmax.f32 %v13022_v32, 0.0  ;;  %v13028_v13 = vadd.f32 %v13027_v61, %v12973_v48  ;;  %v10982_v23 = vpop.f32.mrb[27].mxu1 }
 0x6d2   : > { %v11114_v38 = vmax.f32 %v13025_v27, 0.0  ;;  %v13031_v50 = vadd.f32 %v13030_v26, %v10982_v23 }
 0x6d3   : > { %11148 = vst.msk [vmem:[%s17579_s16 + $0x50] sm:$0xff] %vm6634_vm9, %v11116_v56  ;;  %v11117_v14 = vmax.f32 %v13028_v13, 0.0 }
 0x6d4   : > { %11146 = vst.msk [vmem:[%s17579_s16 + $0x40] sm:$0xff] %vm6634_vm9, %v11114_v38  ;;  %v11115_v46 = vmax.f32 %v13031_v50, 0.0 }
 0x6d5   : > { %11149 = vst.msk [vmem:[%s17579_s16 + $0x58] sm:$0xff] %vm6634_vm9, %v11117_v14 }
 0x6d6   : > { %11147 = vst.msk [vmem:[%s17579_s16 + $0x48] sm:$0xff] %vm6634_vm9, %v11115_v46  ;;  %v12976_v10 = vpop.f32.mrb[28].mxu1 }
 0x6d7   : > { %v13034_v24 = vadd.f32 %v13033_v1, %v12976_v10  ;;  %v10995_v29 = vpop.f32.mrb[29].mxu1 }
 0x6d8   : > { %v13037_v52 = vadd.f32 %v13036_v19, %v10995_v29  ;;  %v12977_v43 = vpop.f32.mrb[30].mxu1 }
 0x6d9   : > { %v11120_v0 = vmax.f32 %v13034_v24, 0.0  ;;  %v13040_v55 = vadd.f32 %v13039_v35, %v12977_v43  ;;  %v10998_v47 = vpop.f32.mrb[31].mxu1 }
 0x6da   : > { %v11118_v20 = vmax.f32 %v13037_v52, 0.0  ;;  %v13043_v41 = vadd.f32 %v13042_v25, %v10998_v47 }
 0x6db   : > { %11152 = vst.msk [vmem:[%s17579_s16 + $0x70] sm:$0xff] %vm6634_vm9, %v11120_v0  ;;  %v11121_v40 = vmax.f32 %v13040_v55, 0.0 }
 0x6dc   : > { %11150 = vst.msk [vmem:[%s17579_s16 + $0x60] sm:$0xff] %vm6634_vm9, %v11118_v20  ;;  %v11119_v3 = vmax.f32 %v13043_v41, 0.0 }
 0x6dd   : > { %11153 = vst.msk [vmem:[%s17579_s16 + $0x78] sm:$0xff] %vm6634_vm9, %v11121_v40 }
 0x6de   : > { %11151 = vst.msk [vmem:[%s17579_s16 + $0x68] sm:$0xff] %vm6634_vm9, %v11119_v3  ;;  %v12980_v5 = vpop.f32.mrb[0].mxu1 }
 0x6df   : > { %v13045_v42 = vadd.f32 %v13046_v51, %v12980_v5  ;;  %v11011_v44 = vpop.f32.mrb[1].mxu1 }
 0x6e0   : > { %v13047_v34 = vadd.f32 %v13046_v51, %v11011_v44  ;;  %v12981_v4 = vpop.f32.mrb[2].mxu1 }
 0x6e1   : > { %v11124_v16 = vmax.f32 %v13045_v42, 0.0  ;;  %v13049_v54 = vadd.f32 %v13046_v51, %v12981_v4  ;;  %v11014_v7 = vpop.f32.mrb[3].mxu1 }
 0x6e2   : > { %v11122_v60 = vmax.f32 %v13047_v34, 0.0  ;;  %v13051_v36 = vadd.f32 %v13046_v51, %v11014_v7 }
 0x6e3   : > { %11156 = vst.msk [vmem:[%s17579_s16 + $0x90] sm:$0xff] %vm6634_vm9, %v11124_v16  ;;  %v11125_v2 = vmax.f32 %v13049_v54, 0.0 }
 0x6e4   : > { %11154 = vst.msk [vmem:[%s17579_s16 + $0x80] sm:$0xff] %vm6634_vm9, %v11122_v60  ;;  %v11123_v58 = vmax.f32 %v13051_v36, 0.0 }
 0x6e5   : > { %11157 = vst.msk [vmem:[%s17579_s16 + $0x98] sm:$0xff] %vm6634_vm9, %v11125_v2 }
 0x6e6   : > { %11155 = vst.msk [vmem:[%s17579_s16 + $0x88] sm:$0xff] %vm6634_vm9, %v11123_v58  ;;  %v12984_v6 = vpop.f32.mrb[4].mxu1 }
 0x6e7   : > { %v13053_v15 = vadd.f32 %v13046_v51, %v12984_v6  ;;  %v11027_v53 = vpop.f32.mrb[5].mxu1 }
 0x6e8   : > { %v13055_v21 = vadd.f32 %v13046_v51, %v11027_v53  ;;  %v12985_v49 = vpop.f32.mrb[6].mxu1 }
 0x6e9   : > { %v11128_v57 = vmax.f32 %v13053_v15, 0.0  ;;  %v13057_v62 = vadd.f32 %v13046_v51, %v12985_v49  ;;  %v11030_v63 = vpop.f32.mrb[7].mxu1 }
 0x6ea   : > { %v11126_v28 = vmax.f32 %v13055_v21, 0.0  ;;  %v13059_v45 = vadd.f32 %v13046_v51, %v11030_v63 }
 0x6eb   : > { %11160 = vst.msk [vmem:[%s17579_s16 + $0xb0] sm:$0xff] %vm6634_vm9, %v11128_v57  ;;  %v11129_v59 = vmax.f32 %v13057_v62, 0.0 }
 0x6ec   : > { %11158 = vst.msk [vmem:[%s17579_s16 + $0xa0] sm:$0xff] %vm6634_vm9, %v11126_v28  ;;  %v11127_v22 = vmax.f32 %v13059_v45, 0.0 }
 0x6ed   : > { %11161 = vst.msk [vmem:[%s17579_s16 + $0xb8] sm:$0xff] %vm6634_vm9, %v11129_v59 }
 0x6ee   : > { %11159 = vst.msk [vmem:[%s17579_s16 + $0xa8] sm:$0xff] %vm6634_vm9, %v11127_v22  ;;  %v12988_v31 = vpop.f32.mrb[8].mxu1 }
 0x6ef   : > { %v13061_v11 = vadd.f32 %v13046_v51, %v12988_v31  ;;  %v11043_v32 = vpop.f32.mrb[9].mxu1 }
 0x6f0   : > { %v13063_v12 = vadd.f32 %v13046_v51, %v11043_v32  ;;  %v12989_v61 = vpop.f32.mrb[10].mxu1 }
 0x6f1   : > { %v11132_v27 = vmax.f32 %v13061_v11, 0.0  ;;  %v13065_v48 = vadd.f32 %v13046_v51, %v12989_v61  ;;  %v11046_v26 = vpop.f32.mrb[11].mxu1 }
 0x6f2   : > { %v11130_v18 = vmax.f32 %v13063_v12, 0.0  ;;  %v13067_v9 = vadd.f32 %v13046_v51, %v11046_v26 }
 0x6f3   : > { %11164 = vst.msk [vmem:[%s17579_s16 + $0xd0] sm:$0xff] %vm6634_vm9, %v11132_v27  ;;  %v11133_v56 = vmax.f32 %v13065_v48, 0.0 }
 0x6f4   : > { %11162 = vst.msk [vmem:[%s17579_s16 + $0xc0] sm:$0xff] %vm6634_vm9, %v11130_v18  ;;  %v11131_v13 = vmax.f32 %v13067_v9, 0.0 }
 0x6f5   : > { %11165 = vst.msk [vmem:[%s17579_s16 + $0xd8] sm:$0xff] %vm6634_vm9, %v11133_v56 }
 0x6f6   : > { %11163 = vst.msk [vmem:[%s17579_s16 + $0xc8] sm:$0xff] %vm6634_vm9, %v11131_v13  ;;  %v12992_v23 = vpop.f32.mrb[12].mxu1 }
 0x6f7   : > { %v13069_v37 = vadd.f32 %v13046_v51, %v12992_v23  ;;  %v11059_v30 = vpop.f32.mrb[13].mxu1 }
 0x6f8   : > { %v13071_v38 = vadd.f32 %v13046_v51, %v11059_v30  ;;  %v12993_v50 = vpop.f32.mrb[14].mxu1 }
 0x6f9   : > { %v11136_v8 = vmax.f32 %v13069_v37, 0.0  ;;  %v13073_v17 = vadd.f32 %v13046_v51, %v12993_v50  ;;  %v11062_v14 = vpop.f32.mrb[15].mxu1 }
 0x6fa   : > { %v11134_v39 = vmax.f32 %v13071_v38, 0.0  ;;  %v13075_v33 = vadd.f32 %v13046_v51, %v11062_v14 }
 0x6fb   : > { %11168 = vst.msk [vmem:[%s17579_s16 + $0xf0] sm:$0xff] %vm6634_vm9, %v11136_v8  ;;  %v11137_v46 = vmax.f32 %v13073_v17, 0.0 }
 0x6fc   : > { %11166 = vst.msk [vmem:[%s17579_s16 + $0xe0] sm:$0xff] %vm6634_vm9, %v11134_v39  ;;  %v11135_v1 = vmax.f32 %v13075_v33, 0.0 }
 0x6fd   : > { %11169 = vst.msk [vmem:[%s17579_s16 + $0xf8] sm:$0xff] %vm6634_vm9, %v11137_v46 }
 0x6fe   : > { %11167 = vst.msk [vmem:[%s17579_s16 + $0xe8] sm:$0xff] %vm6634_vm9, %v11135_v1 }
 0x6ff PF: > { %s17_s24 = sadd.s32 1, %s13774_s24  }
 0x700   : > { %p14_p4 = scmp.ge.s32.totalorder %s17_s24, 4  }
 0x702   :  { %16 = sbr.rel (!%p14_p4) target bundleno = 1 (0x1), region = 100 }

</bundles_post_ra>
